<compile_context>
chip_gen: v7x
topology: tpu7x:2x2x1
jax: 0.10.0
libtpu: 0.0.40
codegen_flags: <defaults>
</compile_context>

<pallas_src>
import math
import jax
import jax.numpy as jnp
from jax.experimental import pallas as pl
from jax.experimental.pallas import tpu as pltpu

PAD_VALUE = 1.69117943

# Bilinear(490, 62, 482, bias=False) geometry (fixed by the module spec).
BIL_IN1, BIL_IN2, BIL_OUT = 490, 62, 482
BIL_TM = 8
BIL_TK = 3072          # K = 490*62 = 30380 -> Kp = 30720 = 10 * 3072 (exact)


def _detect_bilinear_n_tiling():
    """Generation-dependent N tiling for the bilinear GEMV.

    v7x (2 TensorCores/chip): two 256-wide N blocks, each a contiguous weight
    slab, so both cores stream half the weight each.
    v5e/v6e (1 TC): a single 512-wide N block -> fewest grid steps.
    bf16 B double-buffers are 3-6 MB, inside every generation's scoped VMEM.
    """
    try:
        kind = jax.devices()[0].device_kind.lower()
    except Exception:  # pragma: no cover - defensive
        kind = ""
    if ("v7" in kind) or ("tpu7" in kind):
        return 256, 2
    return 512, 1


BIL_TN, BIL_NJ = _detect_bilinear_n_tiling()


def _round_up(x, m):
    return (x + m - 1) // m * m


def _pick_tm(m):
    mp = _round_up(m, 8)
    return mp if mp <= 256 else 256


# ---------------------------------------------------------------------------
# Pallas kernel: tiled matmul + bias with optional fused ReLU (used by convs).
# Output block index is k-invariant, so it stays resident in VMEM and is the
# accumulator (no scratch, no final copy).
# ---------------------------------------------------------------------------
def _make_matmul_bias_kernel(activation):
    def kernel(a_ref, b_ref, bias_ref, o_ref):
        @pl.when(pl.program_id(2) == 0)
        def _():
            o_ref[...] = jnp.zeros_like(o_ref)

        o_ref[...] += jnp.dot(a_ref[...], b_ref[...],
                              preferred_element_type=jnp.float32)

        @pl.when(pl.program_id(2) == pl.num_programs(2) - 1)
        def _():
            r = o_ref[...] + bias_ref[...]
            if activation == "relu":
                r = jnp.maximum(r, 0.0)
            o_ref[...] = r

    return kernel


# Bilinear kernel: bf16 inputs, f32 accumulation, no bias, fused exact GELU.
def _bilinear_gelu_kernel(a_ref, b_ref, o_ref):
    @pl.when(pl.program_id(2) == 0)
    def _():
        o_ref[...] = jnp.zeros_like(o_ref)

    o_ref[...] += jnp.dot(a_ref[...], b_ref[...],
                          preferred_element_type=jnp.float32)

    @pl.when(pl.program_id(2) == pl.num_programs(2) - 1)
    def _():
        r = o_ref[...]
        # exact (erf) GELU, matching torch.nn.GELU(approximate='none')
        o_ref[...] = 0.5 * r * (1.0 + jax.lax.erf(r * 0.7071067811865476))


# ---------------------------------------------------------------------------
# Conv matmul wrapper (single K step, single N block for these shapes).
# ---------------------------------------------------------------------------
def pallas_matmul_bias(a, b, bias, *, out_m, out_n, activation=None):
    M, K = a.shape
    Kb, N = b.shape
    nbias = bias.shape[-1]

    tm = _pick_tm(M)
    tk = min(_round_up(max(K, Kb), 128), 2048)        # K=2025 / 1512 -> 1 step
    tn = min(_round_up(max(N, nbias), 128), 512)

    Mp = _round_up(M, tm)
    Kp = _round_up(max(K, Kb), tk)
    Np = _round_up(max(N, nbias), tn)

    if (Mp, Kp) != (M, K):
        a = jnp.pad(a, ((0, Mp - M), (0, Kp - K)))
    if (Kp, Np) != (Kb, N):
        b = jnp.pad(b, ((0, Kp - Kb), (0, Np - N)))
    bias = bias.reshape(1, nbias)
    if Np != nbias:
        bias = jnp.pad(bias, ((0, 0), (0, Np - nbias)))

    out = pl.pallas_call(
        _make_matmul_bias_kernel(activation),
        out_shape=jax.ShapeDtypeStruct((Mp, Np), jnp.float32),
        grid=(Mp // tm, Np // tn, Kp // tk),
        in_specs=[
            pl.BlockSpec((tm, tk), lambda i, j, k: (i, k)),
            pl.BlockSpec((tk, tn), lambda i, j, k: (k, j)),
            pl.BlockSpec((1, tn), lambda i, j, k: (0, j)),
        ],
        out_specs=pl.BlockSpec((tm, tn), lambda i, j, k: (i, j)),
        compiler_params=pltpu.CompilerParams(
            dimension_semantics=("parallel", "parallel", "arbitrary")),
    )(a, b, bias)
    return out[:out_m, :out_n]


# ---------------------------------------------------------------------------
# Conv2d = im2col via separable static strided slices (kh + kw slices, no
# gather lowering) + Pallas matmul (optionally with fused ReLU).
# ---------------------------------------------------------------------------
def conv2d_nchw(x, w, b, *, stride, padding, activation=None):
    N, C, H, W = x.shape
    O, Cw, kh, kw = w.shape
    assert C == Cw
    xp = jnp.pad(x, ((0, 0), (0, 0), (padding, padding), (padding, padding)))
    Hp, Wp = H + 2 * padding, W + 2 * padding
    oh = (Hp - kh) // stride + 1
    ow = (Wp - kw) // stride + 1

    # H windows: kh static strided slices
    rows = [xp[:, :, dh:dh + (oh - 1) * stride + 1:stride, :] for dh in range(kh)]
    xh = jnp.stack(rows, axis=3)                                 # (N,C,oh,kh,Wp)
    # W windows: kw static strided slices
    cols = [xh[..., dw:dw + (ow - 1) * stride + 1:stride] for dw in range(kw)]
    patches = jnp.stack(cols, axis=5)                            # (N,C,oh,kh,ow,kw)
    patches = jnp.transpose(patches, (0, 2, 4, 1, 3, 5))         # (N,oh,ow,C,kh,kw)
    a = patches.reshape(N * oh * ow, C * kh * kw)

    w2d = w.reshape(O, C * kh * kw).T                            # small, per-call OK
    y = pallas_matmul_bias(a, w2d, b, out_m=N * oh * ow, out_n=O,
                           activation=activation)                # (N*oh*ow, O)
    y = y.reshape(N, oh, ow, O)
    return jnp.transpose(y, (0, 3, 1, 2))                        # NCHW


# ---------------------------------------------------------------------------
# Bilinear (490,62,482, no bias) as an M-padded GEMV over the flattened outer
# product, streaming the bf16 weight slabs; GELU fused in the epilogue.
# ---------------------------------------------------------------------------
def bilinear_gelu(flat0, flat1, w_slabs):
    n = flat0.shape[0]
    K = BIL_IN1 * BIL_IN2
    Kp = w_slabs.shape[1]
    Mp = _round_up(n, BIL_TM)

    outer = (flat0[:, :, None] * flat1[:, None, :]).reshape(n, K)
    a = outer.astype(jnp.bfloat16)
    a = jnp.pad(a, ((0, Mp - n), (0, Kp - K)))

    out = pl.pallas_call(
        _bilinear_gelu_kernel,
        out_shape=jax.ShapeDtypeStruct((Mp, BIL_NJ * BIL_TN), jnp.float32),
        grid=(Mp // BIL_TM, BIL_NJ, Kp // BIL_TK),
        in_specs=[
            pl.BlockSpec((BIL_TM, BIL_TK), lambda i, j, k: (i, k)),
            # weight slab j is contiguous in HBM -> clean streaming DMA per TC
            pl.BlockSpec((None, BIL_TK, BIL_TN), lambda i, j, k: (j, k, 0)),
        ],
        out_specs=pl.BlockSpec((BIL_TM, BIL_TN), lambda i, j, k: (i, j)),
        compiler_params=pltpu.CompilerParams(
            dimension_semantics=("parallel", "parallel", "arbitrary")),
    )(a, w_slabs)
    return out[:n, :BIL_OUT]


# ---------------------------------------------------------------------------
# One-time parameter layout prep (run OUTSIDE the jitted forward)
# ---------------------------------------------------------------------------
def prepare_params(params):
    """Lay out the bilinear weight once: (482,490,62) -> padded bf16
    (BIL_NJ, Kp, BIL_TN) slabs, so the hot path never transposes, pads or
    re-casts the ~60 MB operand (now ~30 MB in bf16)."""
    w3 = params["w3"]                                   # (482, 490, 62) f32
    n_out, n_in1, n_in2 = w3.shape
    K, N = n_in1 * n_in2, n_out
    Kp = _round_up(K, BIL_TK)
    Np = BIL_NJ * BIL_TN
    assert Np >= N
    w = jnp.pad(w3.reshape(n_out, K).T, ((0, Kp - K), (0, Np - N)))
    w = w.astype(jnp.bfloat16)
    w_slabs = jnp.transpose(w.reshape(Kp, BIL_NJ, BIL_TN), (1, 0, 2))
    prepped = {k: v for k, v in params.items() if k != "w3"}
    prepped["w3_slabs"] = w_slabs                       # (NJ, 30720, TN) bf16
    return prepped


# ---------------------------------------------------------------------------
# Full forward pass
# ---------------------------------------------------------------------------
def model_forward(x1, params):
    n = x1.shape[0]

    # features: Conv2d(1,168,45,35,46) -> Conv2d(168,107,3,21,8)
    h = conv2d_nchw(x1, params["w1"], params["b1"],
                    stride=35, padding=46)                          # (1,168,24,8)
    # clamp(.,0) + ReLU == max(.,0), fused into conv2's matmul epilogue.
    # Since PAD_VALUE > 0, relu(pad(x,v)) == pad(relu(x),v) — exact.
    h = conv2d_nchw(h, params["w2"], params["b2"],
                    stride=21, padding=8, activation="relu")        # (1,107,2,2)

    # ConstantPad3d((0,160,100,50), 1.69117943).
    # TODO(synk): the original torch.split(x2,[1,1,1,1],dim=1) is ill-formed
    # (dim 1 has 107 channels, sizes sum to 4) and Sequential(Bilinear) cannot
    # consume a tuple; best-effort interpretation (unchanged): flatten the
    # first two 1-channel slices and truncate to the Bilinear feature sizes
    # 490 / 62.  Only channels 0 and 1 are consumed downstream, so pad just
    # those two — values are identical to slicing the full padded tensor.
    h01 = jnp.pad(h[:, :2], ((0, 0), (0, 0), (100, 50), (0, 160)),
                  constant_values=PAD_VALUE)                        # (1,2,152,162)
    flat0 = h01[:, 0].reshape(n, -1)[:, :BIL_IN1]                   # (1,490)
    flat1 = h01[:, 1].reshape(n, -1)[:, :BIL_IN2]                   # (1,62)

    # Bilinear(490,62,482,bias=False): out[b,o] = sum_{i,j} W[o,i,j] x1[b,i] x2[b,j]
    # = flatten(outer(x1,x2)) @ W_flat, GELU fused into the final-K epilogue
    # (gelu(y.T) == gelu(y).T, so transposing afterwards is exact).
    y = bilinear_gelu(flat0, flat1, params["w3_slabs"])             # (1,482)
    y = y.T                                                         # (482,1)
    return (y, y)


if __name__ == "__main__":
    key = jax.random.PRNGKey(0)
    k_x, k_w1, k_b1, k_w2, k_b2, k_w3 = jax.random.split(key, 6)

    # shapes are fixed by the module's conv / bilinear geometry
    x1 = jax.random.normal(k_x, (1, 1, 789, 215), dtype=jnp.float32)

    fan1 = 1 * 45 * 45
    fan2 = 168 * 3 * 3
    fan3 = 490
    params = {
        "w1": jax.random.normal(k_w1, (168, 1, 45, 45), jnp.float32) / math.sqrt(fan1),
        "b1": jax.random.normal(k_b1, (168,), jnp.float32) / math.sqrt(fan1),
        "w2": jax.random.normal(k_w2, (107, 168, 3, 3), jnp.float32) / math.sqrt(fan2),
        "b2": jax.random.normal(k_b2, (107,), jnp.float32) / math.sqrt(fan2),
        "w3": jax.random.normal(k_w3, (482, 490, 62), jnp.float32) / math.sqrt(fan3),
    }

    prepped = prepare_params(params)     # one-time weight layout prep (outside jit)

    fwd = jax.jit(model_forward)
    y1, y2 = fwd(x1, prepped)
    jax.block_until_ready(y1)
    assert y1.shape == (482, 1) and y2.shape == (482, 1)
    print("KERNEL_OK")
</pallas_src>

<mosaic_0001>
module attributes {stable_mosaic.version = 11 : i64} {
  func.func @kernel(%arg0: i32, %arg1: i32, %arg2: i32, %arg3: memref<192x2048xf32, #tpu.memory_space<vmem>>, %arg4: memref<2048x256xf32, #tpu.memory_space<vmem>>, %arg5: memref<1x256xf32, #tpu.memory_space<vmem>>, %arg6: memref<192x256xf32, #tpu.memory_space<vmem>>) attributes {dimension_semantics = [#tpu.dimension_semantics<parallel>, #tpu.dimension_semantics<parallel>, #tpu.dimension_semantics<arbitrary>], iteration_bounds = array<i64: 1, 1, 1>, scalar_prefetch = 0 : i64, scratch_operands = 0 : i64, tpu.core_type = #tpu.core_type<tc>, window_params = [{transform_indices = @transform_0, window_bounds = array<i64: 192, 2048>}, {transform_indices = @transform_1, window_bounds = array<i64: 2048, 256>}, {transform_indices = @transform_2, window_bounds = array<i64: 1, 256>}, {transform_indices = @transform_3, window_bounds = array<i64: 192, 256>}]} {
    %c0_i32 = arith.constant 0 : i32
    %0 = arith.cmpi eq, %arg2, %c0_i32 : i32
    %1 = arith.extui %0 : i1 to i32
    %c0_i32_0 = arith.constant 0 : i32
    %2 = arith.cmpi ne, %1, %c0_i32_0 : i32
    scf.if %2 {
      %cst_10 = arith.constant 0.000000e+00 : f32
      %12 = vector.broadcast %cst_10 : f32 to vector<192x256xf32>
      %c0_11 = arith.constant 0 : index
      %c0_12 = arith.constant 0 : index
      %13 = vector.load %arg6[%c0_11, %c0_12] : memref<192x256xf32, #tpu.memory_space<vmem>>, vector<192x256xf32>
      tpu.vector_store %arg6[%c0_11, %c0_12], %12 {strides = array<i32>} : memref<192x256xf32, #tpu.memory_space<vmem>>, vector<192x256xf32>,
    } else {
    }
    %c0 = arith.constant 0 : index
    %c0_1 = arith.constant 0 : index
    %3 = vector.load %arg6[%c0, %c0_1] : memref<192x256xf32, #tpu.memory_space<vmem>>, vector<192x256xf32>
    %c0_2 = arith.constant 0 : index
    %c0_3 = arith.constant 0 : index
    %4 = vector.load %arg3[%c0_2, %c0_3] : memref<192x2048xf32, #tpu.memory_space<vmem>>, vector<192x2048xf32>
    %c0_4 = arith.constant 0 : index
    %c0_5 = arith.constant 0 : index
    %5 = vector.load %arg4[%c0_4, %c0_5] : memref<2048x256xf32, #tpu.memory_space<vmem>>, vector<2048x256xf32>
    %cst = arith.constant dense<0.000000e+00> : vector<192x256xf32>
    %6 = tpu.matmul %4, %5, %cst {dimension_numbers = #tpu.dot_dimension_numbers<[1], [0], [0], [1], [0, 0, 1, 1], [], []>} : vector<192x2048xf32>, vector<2048x256xf32>, vector<192x256xf32> -> vector<192x256xf32>
    %7 = arith.addf %3, %6 : vector<192x256xf32>
    %c0_6 = arith.constant 0 : index
    %c0_7 = arith.constant 0 : index
    %8 = vector.load %arg6[%c0_6, %c0_7] : memref<192x256xf32, #tpu.memory_space<vmem>>, vector<192x256xf32>
    tpu.vector_store %arg6[%c0_6, %c0_7], %7 {strides = array<i32>} : memref<192x256xf32, #tpu.memory_space<vmem>>, vector<192x256xf32>,
    %c0_i32_8 = arith.constant 0 : i32
    %9 = arith.cmpi eq, %arg2, %c0_i32_8 : i32
    %10 = arith.extui %9 : i1 to i32
    %c0_i32_9 = arith.constant 0 : i32
    %11 = arith.cmpi ne, %10, %c0_i32_9 : i32
    scf.if %11 {
      %c0_10 = arith.constant 0 : index
      %c0_11 = arith.constant 0 : index
      %12 = vector.load %arg6[%c0_10, %c0_11] : memref<192x256xf32, #tpu.memory_space<vmem>>, vector<192x256xf32>
      %c0_12 = arith.constant 0 : index
      %c0_13 = arith.constant 0 : index
      %13 = vector.load %arg5[%c0_12, %c0_13] : memref<1x256xf32, #tpu.memory_space<vmem>>, vector<1x256xf32>
      %14 = vector.broadcast %13 : vector<1x256xf32> to vector<192x256xf32>
      %15 = arith.addf %12, %14 : vector<192x256xf32>
      %c0_14 = arith.constant 0 : index
      %c0_15 = arith.constant 0 : index
      %16 = vector.load %arg6[%c0_14, %c0_15] : memref<192x256xf32, #tpu.memory_space<vmem>>, vector<192x256xf32>
      tpu.vector_store %arg6[%c0_14, %c0_15], %15 {strides = array<i32>} : memref<192x256xf32, #tpu.memory_space<vmem>>, vector<192x256xf32>,
    } else {
    }
    return
  }
  func.func @transform_0(%arg0: i32, %arg1: i32, %arg2: i32) -> (i32, i32) {
    %c0_i32 = arith.constant 0 : i32
    return %arg0, %arg2 : i32, i32
  }
  func.func @transform_1(%arg0: i32, %arg1: i32, %arg2: i32) -> (i32, i32) {
    %c0_i32 = arith.constant 0 : i32
    return %arg2, %arg1 : i32, i32
  }
  func.func @transform_2(%arg0: i32, %arg1: i32, %arg2: i32) -> (i32, i32) {
    %c0_i32 = arith.constant 0 : i32
    %c0_i32_0 = arith.constant 0 : i32
    return %c0_i32, %arg1 : i32, i32
  }
  func.func @transform_3(%arg0: i32, %arg1: i32, %arg2: i32) -> (i32, i32) {
    %c0_i32 = arith.constant 0 : i32
    return %arg0, %arg1 : i32, i32
  }
}

module attributes {stable_mosaic.version = 11 : i64} {
  func.func @kernel(%arg0: i32, %arg1: i32, %arg2: i32, %arg3: memref<8x1536xf32, #tpu.memory_space<vmem>>, %arg4: memref<1536x128xf32, #tpu.memory_space<vmem>>, %arg5: memref<1x128xf32, #tpu.memory_space<vmem>>, %arg6: memref<8x128xf32, #tpu.memory_space<vmem>>) attributes {dimension_semantics = [#tpu.dimension_semantics<parallel>, #tpu.dimension_semantics<parallel>, #tpu.dimension_semantics<arbitrary>], iteration_bounds = array<i64: 1, 1, 1>, scalar_prefetch = 0 : i64, scratch_operands = 0 : i64, tpu.core_type = #tpu.core_type<tc>, window_params = [{transform_indices = @transform_0, window_bounds = array<i64: 8, 1536>}, {transform_indices = @transform_1, window_bounds = array<i64: 1536, 128>}, {transform_indices = @transform_2, window_bounds = array<i64: 1, 128>}, {transform_indices = @transform_3, window_bounds = array<i64: 8, 128>}]} {
    %c0_i32 = arith.constant 0 : i32
    %0 = arith.cmpi eq, %arg2, %c0_i32 : i32
    %1 = arith.extui %0 : i1 to i32
    %c0_i32_0 = arith.constant 0 : i32
    %2 = arith.cmpi ne, %1, %c0_i32_0 : i32
    scf.if %2 {
      %cst_10 = arith.constant 0.000000e+00 : f32
      %12 = vector.broadcast %cst_10 : f32 to vector<8x128xf32>
      %c0_11 = arith.constant 0 : index
      %c0_12 = arith.constant 0 : index
      %13 = vector.load %arg6[%c0_11, %c0_12] : memref<8x128xf32, #tpu.memory_space<vmem>>, vector<8x128xf32>
      tpu.vector_store %arg6[%c0_11, %c0_12], %12 {strides = array<i32>} : memref<8x128xf32, #tpu.memory_space<vmem>>, vector<8x128xf32>,
    } else {
    }
    %c0 = arith.constant 0 : index
    %c0_1 = arith.constant 0 : index
    %3 = vector.load %arg6[%c0, %c0_1] : memref<8x128xf32, #tpu.memory_space<vmem>>, vector<8x128xf32>
    %c0_2 = arith.constant 0 : index
    %c0_3 = arith.constant 0 : index
    %4 = vector.load %arg3[%c0_2, %c0_3] : memref<8x1536xf32, #tpu.memory_space<vmem>>, vector<8x1536xf32>
    %c0_4 = arith.constant 0 : index
    %c0_5 = arith.constant 0 : index
    %5 = vector.load %arg4[%c0_4, %c0_5] : memref<1536x128xf32, #tpu.memory_space<vmem>>, vector<1536x128xf32>
    %cst = arith.constant dense<0.000000e+00> : vector<8x128xf32>
    %6 = tpu.matmul %4, %5, %cst {dimension_numbers = #tpu.dot_dimension_numbers<[1], [0], [0], [1], [0, 0, 1, 1], [], []>} : vector<8x1536xf32>, vector<1536x128xf32>, vector<8x128xf32> -> vector<8x128xf32>
    %7 = arith.addf %3, %6 : vector<8x128xf32>
    %c0_6 = arith.constant 0 : index
    %c0_7 = arith.constant 0 : index
    %8 = vector.load %arg6[%c0_6, %c0_7] : memref<8x128xf32, #tpu.memory_space<vmem>>, vector<8x128xf32>
    tpu.vector_store %arg6[%c0_6, %c0_7], %7 {strides = array<i32>} : memref<8x128xf32, #tpu.memory_space<vmem>>, vector<8x128xf32>,
    %c0_i32_8 = arith.constant 0 : i32
    %9 = arith.cmpi eq, %arg2, %c0_i32_8 : i32
    %10 = arith.extui %9 : i1 to i32
    %c0_i32_9 = arith.constant 0 : i32
    %11 = arith.cmpi ne, %10, %c0_i32_9 : i32
    scf.if %11 {
      %c0_10 = arith.constant 0 : index
      %c0_11 = arith.constant 0 : index
      %12 = vector.load %arg6[%c0_10, %c0_11] : memref<8x128xf32, #tpu.memory_space<vmem>>, vector<8x128xf32>
      %c0_12 = arith.constant 0 : index
      %c0_13 = arith.constant 0 : index
      %13 = vector.load %arg5[%c0_12, %c0_13] : memref<1x128xf32, #tpu.memory_space<vmem>>, vector<1x128xf32>
      %14 = vector.broadcast %13 : vector<1x128xf32> to vector<8x128xf32>
      %15 = arith.addf %12, %14 : vector<8x128xf32>
      %cst_14 = arith.constant 0.000000e+00 : f32
      %16 = vector.broadcast %cst_14 : f32 to vector<8x128xf32>
      %17 = arith.maximumf %15, %16 : vector<8x128xf32>
      %c0_15 = arith.constant 0 : index
      %c0_16 = arith.constant 0 : index
      %18 = vector.load %arg6[%c0_15, %c0_16] : memref<8x128xf32, #tpu.memory_space<vmem>>, vector<8x128xf32>
      tpu.vector_store %arg6[%c0_15, %c0_16], %17 {strides = array<i32>} : memref<8x128xf32, #tpu.memory_space<vmem>>, vector<8x128xf32>,
    } else {
    }
    return
  }
  func.func @transform_0(%arg0: i32, %arg1: i32, %arg2: i32) -> (i32, i32) {
    %c0_i32 = arith.constant 0 : i32
    return %arg0, %arg2 : i32, i32
  }
  func.func @transform_1(%arg0: i32, %arg1: i32, %arg2: i32) -> (i32, i32) {
    %c0_i32 = arith.constant 0 : i32
    return %arg2, %arg1 : i32, i32
  }
  func.func @transform_2(%arg0: i32, %arg1: i32, %arg2: i32) -> (i32, i32) {
    %c0_i32 = arith.constant 0 : i32
    %c0_i32_0 = arith.constant 0 : i32
    return %c0_i32, %arg1 : i32, i32
  }
  func.func @transform_3(%arg0: i32, %arg1: i32, %arg2: i32) -> (i32, i32) {
    %c0_i32 = arith.constant 0 : i32
    return %arg0, %arg1 : i32, i32
  }
}

module attributes {stable_mosaic.version = 11 : i64} {
  func.func @_bilinear_gelu_kernel(%arg0: i32, %arg1: i32, %arg2: i32, %arg3: memref<8x3072xbf16, #tpu.memory_space<vmem>>, %arg4: memref<1x3072x512xbf16, #tpu.memory_space<vmem>>, %arg5: memref<8x512xf32, #tpu.memory_space<vmem>>) attributes {dimension_semantics = [#tpu.dimension_semantics<parallel>, #tpu.dimension_semantics<parallel>, #tpu.dimension_semantics<arbitrary>], iteration_bounds = array<i64: 1, 1, 10>, scalar_prefetch = 0 : i64, scratch_operands = 0 : i64, tpu.core_type = #tpu.core_type<tc>, window_params = [{transform_indices = @transform_0, window_bounds = array<i64: 8, 3072>}, {transform_indices = @transform_1, window_bounds = array<i64: 1, 3072, 512>}, {transform_indices = @transform_2, window_bounds = array<i64: 8, 512>}]} {
    %c0_i32 = arith.constant 0 : i32
    %0 = arith.cmpi eq, %arg2, %c0_i32 : i32
    %1 = arith.extui %0 : i1 to i32
    %c0_i32_0 = arith.constant 0 : i32
    %2 = arith.cmpi ne, %1, %c0_i32_0 : i32
    scf.if %2 {
      %cst_10 = arith.constant 0.000000e+00 : f32
      %13 = vector.broadcast %cst_10 : f32 to vector<8x512xf32>
      %c0_11 = arith.constant 0 : index
      %c0_12 = arith.constant 0 : index
      %14 = vector.load %arg5[%c0_11, %c0_12] : memref<8x512xf32, #tpu.memory_space<vmem>>, vector<8x512xf32>
      tpu.vector_store %arg5[%c0_11, %c0_12], %13 {strides = array<i32>} : memref<8x512xf32, #tpu.memory_space<vmem>>, vector<8x512xf32>,
    } else {
    }
    %c0 = arith.constant 0 : index
    %c0_1 = arith.constant 0 : index
    %3 = vector.load %arg5[%c0, %c0_1] : memref<8x512xf32, #tpu.memory_space<vmem>>, vector<8x512xf32>
    %c0_2 = arith.constant 0 : index
    %c0_3 = arith.constant 0 : index
    %4 = vector.load %arg3[%c0_2, %c0_3] : memref<8x3072xbf16, #tpu.memory_space<vmem>>, vector<8x3072xbf16>
    %c0_4 = arith.constant 0 : index
    %c0_5 = arith.constant 0 : index
    %c0_6 = arith.constant 0 : index
    %5 = vector.load %arg4[%c0_4, %c0_5, %c0_6] : memref<1x3072x512xbf16, #tpu.memory_space<vmem>>, vector<1x3072x512xbf16>
    %6 = vector.shape_cast %5 : vector<1x3072x512xbf16> to vector<3072x512xbf16>
    %cst = arith.constant dense<0.000000e+00> : vector<8x512xf32>
    %7 = tpu.matmul %4, %6, %cst {dimension_numbers = #tpu.dot_dimension_numbers<[1], [0], [0], [1], [0, 0, 1, 1], [], []>} : vector<8x3072xbf16>, vector<3072x512xbf16>, vector<8x512xf32> -> vector<8x512xf32>
    %8 = arith.addf %3, %7 : vector<8x512xf32>
    %c0_7 = arith.constant 0 : index
    %c0_8 = arith.constant 0 : index
    %9 = vector.load %arg5[%c0_7, %c0_8] : memref<8x512xf32, #tpu.memory_space<vmem>>, vector<8x512xf32>
    tpu.vector_store %arg5[%c0_7, %c0_8], %8 {strides = array<i32>} : memref<8x512xf32, #tpu.memory_space<vmem>>, vector<8x512xf32>,
    %c9_i32 = arith.constant 9 : i32
    %10 = arith.cmpi eq, %arg2, %c9_i32 : i32
    %11 = arith.extui %10 : i1 to i32
    %c0_i32_9 = arith.constant 0 : i32
    %12 = arith.cmpi ne, %11, %c0_i32_9 : i32
    scf.if %12 {
      %c0_10 = arith.constant 0 : index
      %c0_11 = arith.constant 0 : index
      %13 = vector.load %arg5[%c0_10, %c0_11] : memref<8x512xf32, #tpu.memory_space<vmem>>, vector<8x512xf32>
      %cst_12 = arith.constant 5.000000e-01 : f32
      %14 = vector.broadcast %cst_12 : f32 to vector<8x512xf32>
      %15 = arith.mulf %14, %13 : vector<8x512xf32>
      %cst_13 = arith.constant 0.707106769 : f32
      %16 = vector.broadcast %cst_13 : f32 to vector<8x512xf32>
      %17 = arith.mulf %13, %16 : vector<8x512xf32>
      %18 = math.erf %17 : vector<8x512xf32>
      %cst_14 = arith.constant 1.000000e+00 : f32
      %19 = vector.broadcast %cst_14 : f32 to vector<8x512xf32>
      %20 = arith.addf %19, %18 : vector<8x512xf32>
      %21 = arith.mulf %15, %20 : vector<8x512xf32>
      %c0_15 = arith.constant 0 : index
      %c0_16 = arith.constant 0 : index
      %22 = vector.load %arg5[%c0_15, %c0_16] : memref<8x512xf32, #tpu.memory_space<vmem>>, vector<8x512xf32>
      tpu.vector_store %arg5[%c0_15, %c0_16], %21 {strides = array<i32>} : memref<8x512xf32, #tpu.memory_space<vmem>>, vector<8x512xf32>,
    } else {
    }
    return
  }
  func.func @transform_0(%arg0: i32, %arg1: i32, %arg2: i32) -> (i32, i32) {
    %c0_i32 = arith.constant 0 : i32
    return %arg0, %arg2 : i32, i32
  }
  func.func @transform_1(%arg0: i32, %arg1: i32, %arg2: i32) -> (i32, i32, i32) {
    %c0_i32 = arith.constant 0 : i32
    %c0_i32_0 = arith.constant 0 : i32
    return %arg1, %arg2, %c0_i32 : i32, i32, i32
  }
  func.func @transform_2(%arg0: i32, %arg1: i32, %arg2: i32) -> (i32, i32) {
    %c0_i32 = arith.constant 0 : i32
    return %arg0, %arg1 : i32, i32
  }
}

</mosaic_0001>

<bundles_post_ra>
// kernel: model_forward.3
= control target key start
LH: loop header
LB: loop body
LE: loop exit
PB: predicated region body
PF: predicated region fallthrough
CT: control target
= control target key end

     0   :  { %8 = vsyncpa [#allocation3], 0  ;;  %s3832_s12 = smov [#allocation2]   ;;  %s5218_s0 = inlined_call_operand.vmem [shape: f32[192,2048], index: 0, kind: input, shape index: {}]   ;;  %s5219_s1 = inlined_call_operand.hbm [shape: f32[2048,256], index: 1, kind: input, shape index: {}]   ;;  %s5220_s2 = inlined_call_operand.vmem [shape: f32[1,256], index: 2, kind: input, shape index: {}]   ;;  %s5221_s3 = inlined_call_operand.vmem [shape: f32[192,256], index: 3, kind: output, shape index: {}]  }
   0x1   :  { %s16_s13 = sshll.u32 %s3832_s12, 4  ;;  %s3808_s16 = scalar_lea.hbm %s5219_s1, 65536  ;;  %s17_s13 = int_to_ptr.vmem [resolvable:$true] %s16_s13 }
   0x2   :  { %p3809_p0 = scmp.ne.s32.totalorder %s5219_s1, %s3808_s16  ;;  %p3812_p1 = scmp.lt.u32.totalorder %s3808_s16, %s5219_s1 }
   0x4   :  { %p3814_p2 = pnand %p3812_p1, %p3809_p0 }
   0x6   :  { %3817 = shalt.err (!%p3814_p2)
}
   0x7   :  { %s3818_s21 = scalar_lea.vmem %s17_s13, 65536  ;;  %p3823_p4 = scmp.lt.s32.totalorder %s17_s13, %s17_s13 }
   0x8   :  { %p3819_p3 = scmp.ne.s32.totalorder %s17_s13, %s3818_s21  ;;  %p3824_p5 = scmp.lt.s32.totalorder %s3818_s21, %s3818_s21 }
   0xa   :  { %p3825_p6 = por %p3824_p5, %p3823_p4 }
   0xc   :  { %p3826_p7 = pnand %p3825_p6, %p3819_p3 }
   0xe   :  { %3829 = shalt.err (!%p3826_p7)
}
   0xf   :  { %s3833_s22 = smov 256   ;;  %s3834_s23 = smov 16  }
  0x10   :  { %22 = dma.hbm_to_vmem [thread:$0]  %s5219_s1, 65536, %s17_s13, [#allocation3], %s3833_s22, %s3833_s22, %s3834_s23  }
  0x11   :  { %3830 = dma.done.wait [#allocation3], 65536  }
  0x12   :  { %3831 = vsyncadd [#allocation3], 4294901760  ;;  %v513_v0 = vld [vmem:[#allocation2 + $0x8] sm:$0xff]  ;;  %v515_v1 = vld [vmem:[#allocation2 + $0x18] sm:$0xff] }
  0x13   :  { %v769_v2 = vld [vmem:[#allocation2 + $0x808] sm:$0xff]  ;;  %v2956_v3 = vpack.c.bf16 %v515_v1, %v513_v0  ;;  %v771_v4 = vld [vmem:[#allocation2 + $0x818] sm:$0xff]  ;;  %v512_v5 = vld [vmem:[#allocation2] sm:$0xff] }
  0x14   :  { %v514_v6 = vld [vmem:[#allocation2 + $0x10] sm:$0xff]  ;;  %v3212_v7 = vpack.c.bf16 %v771_v4, %v769_v2  ;;  %v768_v9 = vld [vmem:[#allocation2 + $0x800] sm:$0xff]  ;;  %v517_v11 = vld [vmem:[#allocation2 + $0x28] sm:$0xff] }
  0x15   :  { %v2958_v8 = vpack.c.bf16 %v514_v6, %v512_v5  ;;  %v770_v10 = vld [vmem:[#allocation2 + $0x810] sm:$0xff]  ;;  %2957 = vmatprep.subr.bf16.mxu1 %v2956_v3  ;;  %v519_v13 = vld [vmem:[#allocation2 + $0x38] sm:$0xff]  ;;  %v773_v14 = vld [vmem:[#allocation2 + $0x828] sm:$0xff] }
  0x16   :  { %v3214_v12 = vpack.c.bf16 %v770_v10, %v768_v9  ;;  %v775_v15 = vld [vmem:[#allocation2 + $0x838] sm:$0xff]  ;;  %3213 = vmatprep.subr.bf16.mxu0 %v3212_v7  ;;  %v2960_v16 = vpack.c.bf16 %v519_v13, %v517_v11  ;;  %v516_v18 = vld [vmem:[#allocation2 + $0x20] sm:$0xff]  ;;  %v518_v19 = vld [vmem:[#allocation2 + $0x30] sm:$0xff] }
  0x17   :  { %2959 = vmatpush1.bf16.msra.mxu1 %v2958_v8  ;;  %v3216_v17 = vpack.c.bf16 %v775_v15, %v773_v14  ;;  %v772_v20 = vld [vmem:[#allocation2 + $0x820] sm:$0xff]  ;;  %v2962_v21 = vpack.c.bf16 %v518_v19, %v516_v18  ;;  %v774_v22 = vld [vmem:[#allocation2 + $0x830] sm:$0xff]  ;;  %v521_v23 = vld [vmem:[#allocation2 + $0x48] sm:$0xff] }
  0x18   :  { %3215 = vmatpush1.bf16.msra.mxu0 %v3214_v12  ;;  %v523_v24 = vld [vmem:[#allocation2 + $0x58] sm:$0xff]  ;;  %2961 = vmatprep.subr.bf16.mxu1 %v2960_v16  ;;  %v3218_v25 = vpack.c.bf16 %v774_v22, %v772_v20  ;;  %v777_v27 = vld [vmem:[#allocation2 + $0x848] sm:$0xff]  ;;  %v520_v29 = vld [vmem:[#allocation2 + $0x40] sm:$0xff] }
  0x19   :  { %3217 = vmatprep.subr.bf16.mxu0 %v3216_v17  ;;  %v2964_v26 = vpack.c.bf16 %v523_v24, %v521_v23  ;;  %v779_v28 = vld [vmem:[#allocation2 + $0x858] sm:$0xff]  ;;  %v522_v31 = vld [vmem:[#allocation2 + $0x50] sm:$0xff]  ;;  %v776_v32 = vld [vmem:[#allocation2 + $0x840] sm:$0xff] }
  0x1a   :  { %v3220_v30 = vpack.c.bf16 %v779_v28, %v777_v27  ;;  %v778_v33 = vld [vmem:[#allocation2 + $0x850] sm:$0xff]  ;;  %v2966_v34 = vpack.c.bf16 %v522_v31, %v520_v29  ;;  %v525_v35 = vld [vmem:[#allocation2 + $0x68] sm:$0xff]  ;;  %v527_v36 = vld [vmem:[#allocation2 + $0x78] sm:$0xff] }
  0x1b   :  { %2963 = vmatpush1.bf16.msra.mxu1 %v2962_v21  ;;  %v781_v37 = vld [vmem:[#allocation2 + $0x868] sm:$0xff]  ;;  %v3222_v38 = vpack.c.bf16 %v778_v33, %v776_v32  ;;  %v2968_v39 = vpack.c.bf16 %v527_v36, %v525_v35  ;;  %v783_v40 = vld [vmem:[#allocation2 + $0x878] sm:$0xff]  ;;  %v524_v41 = vld [vmem:[#allocation2 + $0x60] sm:$0xff] }
  0x1c   :  { %3219 = vmatpush1.bf16.msra.mxu0 %v3218_v25  ;;  %2965 = vmatprep.subr.bf16.mxu1 %v2964_v26  ;;  %v526_v42 = vld [vmem:[#allocation2 + $0x70] sm:$0xff]  ;;  %v3224_v43 = vpack.c.bf16 %v783_v40, %v781_v37  ;;  %v780_v44 = vld [vmem:[#allocation2 + $0x860] sm:$0xff]  ;;  %v529_v46 = vld [vmem:[#allocation2 + $0x88] sm:$0xff] }
  0x1d   :  { %3221 = vmatprep.subr.bf16.mxu0 %v3220_v30  ;;  %v782_v45 = vld [vmem:[#allocation2 + $0x870] sm:$0xff]  ;;  %v531_v47 = vld [vmem:[#allocation2 + $0x98] sm:$0xff]  ;;  %v785_v48 = vld [vmem:[#allocation2 + $0x888] sm:$0xff]  ;;  %v2970_v50 = vpack.c.bf16 %v526_v42, %v524_v41 }
  0x1e   :  { %v787_v49 = vld [vmem:[#allocation2 + $0x898] sm:$0xff]  ;;  %v3226_v51 = vpack.c.bf16 %v782_v45, %v780_v44  ;;  %v2972_v52 = vpack.c.bf16 %v531_v47, %v529_v46  ;;  %v528_v53 = vld [vmem:[#allocation2 + $0x80] sm:$0xff]  ;;  %v530_v54 = vld [vmem:[#allocation2 + $0x90] sm:$0xff] }
  0x1f   :  { %2967 = vmatpush1.bf16.msra.mxu1 %v2966_v34  ;;  %v784_v55 = vld [vmem:[#allocation2 + $0x880] sm:$0xff]  ;;  %v3228_v56 = vpack.c.bf16 %v787_v49, %v785_v48  ;;  %v786_v57 = vld [vmem:[#allocation2 + $0x890] sm:$0xff]  ;;  %v533_v58 = vld [vmem:[#allocation2 + $0xa8] sm:$0xff]  ;;  %v2974_v62 = vpack.c.bf16 %v530_v54, %v528_v53 }
  0x20   :  { %3223 = vmatpush1.bf16.msra.mxu0 %v3222_v38  ;;  %2969 = vmatprep.subr.bf16.mxu1 %v2968_v39  ;;  %v535_v59 = vld [vmem:[#allocation2 + $0xb8] sm:$0xff]  ;;  %v789_v60 = vld [vmem:[#allocation2 + $0x8a8] sm:$0xff]  ;;  %v3230_v63 = vpack.c.bf16 %v786_v57, %v784_v55  ;;  %v532_v1 = vld [vmem:[#allocation2 + $0xa0] sm:$0xff] }
  0x21   :  { %3225 = vmatprep.subr.bf16.mxu0 %v3224_v43  ;;  %v791_v61 = vld [vmem:[#allocation2 + $0x8b8] sm:$0xff]  ;;  %v2976_v0 = vpack.c.bf16 %v535_v59, %v533_v58  ;;  %v534_v2 = vld [vmem:[#allocation2 + $0xb0] sm:$0xff]  ;;  %v788_v3 = vld [vmem:[#allocation2 + $0x8a0] sm:$0xff] }
  0x22   :  { %v3232_v4 = vpack.c.bf16 %v791_v61, %v789_v60  ;;  %v790_v5 = vld [vmem:[#allocation2 + $0x8b0] sm:$0xff]  ;;  %v537_v6 = vld [vmem:[#allocation2 + $0xc8] sm:$0xff]  ;;  %v539_v7 = vld [vmem:[#allocation2 + $0xd8] sm:$0xff]  ;;  %v2978_v10 = vpack.c.bf16 %v534_v2, %v532_v1 }
  0x23   :  { %2971 = vmatpush1.bf16.msra.mxu1 %v2970_v50  ;;  %v793_v8 = vld [vmem:[#allocation2 + $0x8c8] sm:$0xff]  ;;  %v795_v9 = vld [vmem:[#allocation2 + $0x8d8] sm:$0xff]  ;;  %v3234_v11 = vpack.c.bf16 %v790_v5, %v788_v3  ;;  %v2980_v12 = vpack.c.bf16 %v539_v7, %v537_v6  ;;  %v536_v13 = vld [vmem:[#allocation2 + $0xc0] sm:$0xff] }
  0x24   :  { %3227 = vmatpush1.bf16.msra.mxu0 %v3226_v51  ;;  %2973 = vmatprep.subr.bf16.mxu1 %v2972_v52  ;;  %v538_v14 = vld [vmem:[#allocation2 + $0xd0] sm:$0xff]  ;;  %v792_v15 = vld [vmem:[#allocation2 + $0x8c0] sm:$0xff]  ;;  %v3236_v16 = vpack.c.bf16 %v795_v9, %v793_v8  ;;  %v541_v18 = vld [vmem:[#allocation2 + $0xe8] sm:$0xff] }
  0x25   :  { %3229 = vmatprep.subr.bf16.mxu0 %v3228_v56  ;;  %v794_v17 = vld [vmem:[#allocation2 + $0x8d0] sm:$0xff]  ;;  %v543_v19 = vld [vmem:[#allocation2 + $0xf8] sm:$0xff]  ;;  %v797_v20 = vld [vmem:[#allocation2 + $0x8e8] sm:$0xff]  ;;  %v2982_v22 = vpack.c.bf16 %v538_v14, %v536_v13 }
  0x26   :  { %v799_v21 = vld [vmem:[#allocation2 + $0x8f8] sm:$0xff]  ;;  %v3238_v23 = vpack.c.bf16 %v794_v17, %v792_v15  ;;  %v2984_v24 = vpack.c.bf16 %v543_v19, %v541_v18  ;;  %v540_v25 = vld [vmem:[#allocation2 + $0xe0] sm:$0xff]  ;;  %v542_v26 = vld [vmem:[#allocation2 + $0xf0] sm:$0xff] }
  0x27   :  { %2975 = vmatpush1.bf16.msra.mxu1 %v2974_v62  ;;  %v796_v27 = vld [vmem:[#allocation2 + $0x8e0] sm:$0xff]  ;;  %v3240_v28 = vpack.c.bf16 %v799_v21, %v797_v20  ;;  %v798_v29 = vld [vmem:[#allocation2 + $0x8f0] sm:$0xff]  ;;  %v545_v30 = vld [vmem:[#allocation2 + $0x108] sm:$0xff]  ;;  %v2986_v34 = vpack.c.bf16 %v542_v26, %v540_v25 }
  0x28   :  { %3231 = vmatpush1.bf16.msra.mxu0 %v3230_v63  ;;  %2977 = vmatprep.subr.bf16.mxu1 %v2976_v0  ;;  %v547_v31 = vld [vmem:[#allocation2 + $0x118] sm:$0xff]  ;;  %v801_v32 = vld [vmem:[#allocation2 + $0x908] sm:$0xff]  ;;  %v3242_v35 = vpack.c.bf16 %v798_v29, %v796_v27  ;;  %v544_v37 = vld [vmem:[#allocation2 + $0x100] sm:$0xff] }
  0x29   :  { %3233 = vmatprep.subr.bf16.mxu0 %v3232_v4  ;;  %v803_v33 = vld [vmem:[#allocation2 + $0x918] sm:$0xff]  ;;  %v2988_v36 = vpack.c.bf16 %v547_v31, %v545_v30  ;;  %v546_v38 = vld [vmem:[#allocation2 + $0x110] sm:$0xff]  ;;  %v800_v39 = vld [vmem:[#allocation2 + $0x900] sm:$0xff] }
  0x2a   :  { %v3244_v40 = vpack.c.bf16 %v803_v33, %v801_v32  ;;  %v802_v41 = vld [vmem:[#allocation2 + $0x910] sm:$0xff]  ;;  %v549_v42 = vld [vmem:[#allocation2 + $0x128] sm:$0xff]  ;;  %v551_v43 = vld [vmem:[#allocation2 + $0x138] sm:$0xff]  ;;  %v2990_v46 = vpack.c.bf16 %v546_v38, %v544_v37 }
  0x2b   :  { %2979 = vmatpush1.bf16.msra.mxu1 %v2978_v10  ;;  %v805_v44 = vld [vmem:[#allocation2 + $0x928] sm:$0xff]  ;;  %v807_v45 = vld [vmem:[#allocation2 + $0x938] sm:$0xff]  ;;  %v3246_v47 = vpack.c.bf16 %v802_v41, %v800_v39  ;;  %v2992_v48 = vpack.c.bf16 %v551_v43, %v549_v42  ;;  %v548_v49 = vld [vmem:[#allocation2 + $0x120] sm:$0xff] }
  0x2c   :  { %3235 = vmatpush1.bf16.msra.mxu0 %v3234_v11  ;;  %2981 = vmatprep.subr.bf16.mxu1 %v2980_v12  ;;  %v550_v50 = vld [vmem:[#allocation2 + $0x130] sm:$0xff]  ;;  %v804_v51 = vld [vmem:[#allocation2 + $0x920] sm:$0xff]  ;;  %v3248_v52 = vpack.c.bf16 %v807_v45, %v805_v44  ;;  %v553_v54 = vld [vmem:[#allocation2 + $0x148] sm:$0xff] }
  0x2d   :  { %3237 = vmatprep.subr.bf16.mxu0 %v3236_v16  ;;  %v806_v53 = vld [vmem:[#allocation2 + $0x930] sm:$0xff]  ;;  %v555_v55 = vld [vmem:[#allocation2 + $0x158] sm:$0xff]  ;;  %v809_v56 = vld [vmem:[#allocation2 + $0x948] sm:$0xff]  ;;  %v2994_v58 = vpack.c.bf16 %v550_v50, %v548_v49 }
  0x2e   :  { %v811_v57 = vld [vmem:[#allocation2 + $0x958] sm:$0xff]  ;;  %v3250_v59 = vpack.c.bf16 %v806_v53, %v804_v51  ;;  %v2996_v60 = vpack.c.bf16 %v555_v55, %v553_v54  ;;  %v552_v61 = vld [vmem:[#allocation2 + $0x140] sm:$0xff]  ;;  %v554_v62 = vld [vmem:[#allocation2 + $0x150] sm:$0xff] }
  0x2f   :  { %2983 = vmatpush1.bf16.msra.mxu1 %v2982_v22  ;;  %v808_v63 = vld [vmem:[#allocation2 + $0x940] sm:$0xff]  ;;  %v3252_v0 = vpack.c.bf16 %v811_v57, %v809_v56  ;;  %v810_v1 = vld [vmem:[#allocation2 + $0x950] sm:$0xff]  ;;  %v557_v2 = vld [vmem:[#allocation2 + $0x168] sm:$0xff]  ;;  %v2998_v6 = vpack.c.bf16 %v554_v62, %v552_v61 }
  0x30   :  { %3239 = vmatpush1.bf16.msra.mxu0 %v3238_v23  ;;  %2985 = vmatprep.subr.bf16.mxu1 %v2984_v24  ;;  %v559_v3 = vld [vmem:[#allocation2 + $0x178] sm:$0xff]  ;;  %v813_v4 = vld [vmem:[#allocation2 + $0x968] sm:$0xff]  ;;  %v556_v7 = vld [vmem:[#allocation2 + $0x160] sm:$0xff]  ;;  %v3254_v8 = vpack.c.bf16 %v810_v1, %v808_v63 }
  0x31   :  { %3241 = vmatprep.subr.bf16.mxu0 %v3240_v28  ;;  %v815_v5 = vld [vmem:[#allocation2 + $0x978] sm:$0xff]  ;;  %v3000_v9 = vpack.c.bf16 %v559_v3, %v557_v2  ;;  %v558_v10 = vld [vmem:[#allocation2 + $0x170] sm:$0xff]  ;;  %v812_v11 = vld [vmem:[#allocation2 + $0x960] sm:$0xff] }
  0x32   :  { %v814_v12 = vld [vmem:[#allocation2 + $0x970] sm:$0xff]  ;;  %v3256_v13 = vpack.c.bf16 %v815_v5, %v813_v4  ;;  %v561_v14 = vld [vmem:[#allocation2 + $0x188] sm:$0xff]  ;;  %v563_v15 = vld [vmem:[#allocation2 + $0x198] sm:$0xff]  ;;  %v3002_v20 = vpack.c.bf16 %v558_v10, %v556_v7 }
  0x33   :  { %2987 = vmatpush1.bf16.msra.mxu1 %v2986_v34  ;;  %v129_v16 = vld [vmem:[%s5218_s0 + $0x8] sm:$0xff]  ;;  %v817_v17 = vld [vmem:[#allocation2 + $0x988] sm:$0xff]  ;;  %v819_v18 = vld [vmem:[#allocation2 + $0x998] sm:$0xff]  ;;  %v3258_v21 = vpack.c.bf16 %v814_v12, %v812_v11  ;;  %v3004_v22 = vpack.c.bf16 %v563_v15, %v561_v14 }
  0x34   :  { %3243 = vmatpush1.bf16.msra.mxu0 %v3242_v35  ;;  %2989 = vmatprep.subr.bf16.mxu1 %v2988_v36  ;;  %v137_v19 = vld [vmem:[%s5218_s0 + $0x48] sm:$0xff]  ;;  %v562_v24 = vld [vmem:[#allocation2 + $0x190] sm:$0xff]  ;;  %v3260_v26 = vpack.c.bf16 %v819_v18, %v817_v17  ;;  %v565_v28 = vld [vmem:[#allocation2 + $0x1a8] sm:$0xff] }
  0x35   :  { %3245 = vmatprep.subr.bf16.mxu0 %v3244_v40  ;;  %1088 = vmatprep.mubr.f32.mxu1 %v129_v16  ;;  %v560_v23 = vld [vmem:[#allocation2 + $0x180] sm:$0xff]  ;;  %v818_v27 = vld [vmem:[#allocation2 + $0x990] sm:$0xff]  ;;  %v567_v29 = vld [vmem:[#allocation2 + $0x1b8] sm:$0xff] }
  0x36   :  { %1924 = vmatprep.mubr.f32.mxu0 %v137_v19  ;;  %v816_v25 = vld [vmem:[#allocation2 + $0x980] sm:$0xff]  ;;  %v821_v30 = vld [vmem:[#allocation2 + $0x9a8] sm:$0xff]  ;;  %v823_v31 = vld [vmem:[#allocation2 + $0x9b8] sm:$0xff]  ;;  %v3006_v32 = vpack.c.bf16 %v562_v24, %v560_v23  ;;  %v3008_v34 = vpack.c.bf16 %v567_v29, %v565_v28 }
  0x37   :  { %2991 = vmatpush1.bf16.msra.mxu1 %v2990_v46  ;;  %v3262_v33 = vpack.c.bf16 %v818_v27, %v816_v25  ;;  %v564_v35 = vld [vmem:[#allocation2 + $0x1a0] sm:$0xff]  ;;  %v566_v36 = vld [vmem:[#allocation2 + $0x1b0] sm:$0xff]  ;;  %v3264_v38 = vpack.c.bf16 %v823_v31, %v821_v30  ;;  %v569_v40 = vld [vmem:[#allocation2 + $0x1c8] sm:$0xff] }
  0x38   :  { %3247 = vmatpush1.bf16.msra.mxu0 %v3246_v47  ;;  %2993 = vmatprep.subr.bf16.mxu1 %v2992_v48  ;;  %v820_v37 = vld [vmem:[#allocation2 + $0x9a0] sm:$0xff]  ;;  %v822_v39 = vld [vmem:[#allocation2 + $0x9b0] sm:$0xff]  ;;  %v571_v41 = vld [vmem:[#allocation2 + $0x1d8] sm:$0xff]  ;;  %v3010_v44 = vpack.c.bf16 %v566_v36, %v564_v35 }
  0x39   :  { %3249 = vmatprep.subr.bf16.mxu0 %v3248_v52  ;;  %v825_v42 = vld [vmem:[#allocation2 + $0x9c8] sm:$0xff]  ;;  %v827_v43 = vld [vmem:[#allocation2 + $0x9d8] sm:$0xff]  ;;  %v3266_v45 = vpack.c.bf16 %v822_v39, %v820_v37  ;;  %v3012_v46 = vpack.c.bf16 %v571_v41, %v569_v40  ;;  %v568_v47 = vld [vmem:[#allocation2 + $0x1c0] sm:$0xff] }
  0x3a   :  { %v570_v48 = vld [vmem:[#allocation2 + $0x1d0] sm:$0xff]  ;;  %v824_v49 = vld [vmem:[#allocation2 + $0x9c0] sm:$0xff]  ;;  %v3268_v50 = vpack.c.bf16 %v827_v43, %v825_v42  ;;  %v573_v52 = vld [vmem:[#allocation2 + $0x1e8] sm:$0xff] }
  0x3b   :  { %2995 = vmatpush1.bf16.msra.mxu1 %v2994_v58  ;;  %v826_v51 = vld [vmem:[#allocation2 + $0x9d0] sm:$0xff]  ;;  %v575_v53 = vld [vmem:[#allocation2 + $0x1f8] sm:$0xff]  ;;  %v829_v54 = vld [vmem:[#allocation2 + $0x9e8] sm:$0xff]  ;;  %v3014_v56 = vpack.c.bf16 %v570_v48, %v568_v47 }
  0x3c   :  { %3251 = vmatpush1.bf16.msra.mxu0 %v3250_v59  ;;  %2997 = vmatprep.subr.bf16.mxu1 %v2996_v60  ;;  %v831_v55 = vld [vmem:[#allocation2 + $0x9f8] sm:$0xff]  ;;  %v3270_v57 = vpack.c.bf16 %v826_v51, %v824_v49  ;;  %v3016_v58 = vpack.c.bf16 %v575_v53, %v573_v52  ;;  %v572_v59 = vld [vmem:[#allocation2 + $0x1e0] sm:$0xff]  ;;  %v574_v60 = vld [vmem:[#allocation2 + $0x1f0] sm:$0xff] }
  0x3d   :  { %3253 = vmatprep.subr.bf16.mxu0 %v3252_v0  ;;  %v828_v61 = vld [vmem:[#allocation2 + $0x9e0] sm:$0xff]  ;;  %v3272_v62 = vpack.c.bf16 %v831_v55, %v829_v54  ;;  %v830_v63 = vld [vmem:[#allocation2 + $0x9f0] sm:$0xff]  ;;  %v577_v0 = vld [vmem:[#allocation2 + $0x208] sm:$0xff]  ;;  %v3018_v4 = vpack.c.bf16 %v574_v60, %v572_v59 }
  0x3e   :  { %v579_v1 = vld [vmem:[#allocation2 + $0x218] sm:$0xff]  ;;  %v833_v2 = vld [vmem:[#allocation2 + $0xa08] sm:$0xff]  ;;  %v3274_v5 = vpack.c.bf16 %v830_v63, %v828_v61  ;;  %v576_v7 = vld [vmem:[#allocation2 + $0x200] sm:$0xff] }
  0x3f   :  { %2999 = vmatpush1.bf16.msra.mxu1 %v2998_v6  ;;  %v835_v3 = vld [vmem:[#allocation2 + $0xa18] sm:$0xff]  ;;  %v3020_v6 = vpack.c.bf16 %v579_v1, %v577_v0  ;;  %v832_v10 = vld [vmem:[#allocation2 + $0xa00] sm:$0xff]  ;;  %v834_v11 = vld [vmem:[#allocation2 + $0xa10] sm:$0xff] }
  0x40   :  { %3255 = vmatpush1.bf16.msra.mxu0 %v3254_v8  ;;  %3001 = vmatprep.subr.bf16.mxu1 %v3000_v9  ;;  %v578_v8 = vld [vmem:[#allocation2 + $0x210] sm:$0xff]  ;;  %v3276_v9 = vpack.c.bf16 %v835_v3, %v833_v2  ;;  %v581_v12 = vld [vmem:[#allocation2 + $0x228] sm:$0xff]  ;;  %v128_v14 = vld [vmem:[%s5218_s0] sm:$0xff]  ;;  %v3278_v19 = vpack.c.bf16 %v834_v11, %v832_v10 }
  0x41   :  { %3257 = vmatprep.subr.bf16.mxu0 %v3256_v13  ;;  %v583_v13 = vld [vmem:[#allocation2 + $0x238] sm:$0xff]  ;;  %v3022_v15 = vpack.c.bf16 %v578_v8, %v576_v7  ;;  %v837_v16 = vld [vmem:[#allocation2 + $0xa28] sm:$0xff]  ;;  %v580_v23 = vld [vmem:[#allocation2 + $0x220] sm:$0xff] }
  0x42   :  { %v839_v17 = vld [vmem:[#allocation2 + $0xa38] sm:$0xff]  ;;  %v582_v24 = vld [vmem:[#allocation2 + $0x230] sm:$0xff]  ;;  %v836_v25 = vld [vmem:[#allocation2 + $0xa20] sm:$0xff] }
  0x43   :  { %3003 = vmatpush1.bf16.msra.mxu1 %v3002_v20  ;;  %v136_v18 = vld [vmem:[%s5218_s0 + $0x40] sm:$0xff]  ;;  %v145_v20 = vld [vmem:[%s5218_s0 + $0x88] sm:$0xff]  ;;  %v838_v27 = vld [vmem:[#allocation2 + $0xa30] sm:$0xff]  ;;  %v3026_v35 = vpack.c.bf16 %v582_v24, %v580_v23 }
  0x44   :  { %3259 = vmatpush1.bf16.msra.mxu0 %v3258_v21  ;;  %3005 = vmatprep.subr.bf16.mxu1 %v3004_v22  ;;  %v153_v21 = vld [vmem:[%s5218_s0 + $0xc8] sm:$0xff]  ;;  %v3024_v22 = vpack.c.bf16 %v583_v13, %v581_v12  ;;  %v585_v28 = vld [vmem:[#allocation2 + $0x248] sm:$0xff]  ;;  %v587_v29 = vld [vmem:[#allocation2 + $0x258] sm:$0xff]  ;;  %v3282_v37 = vpack.c.bf16 %v838_v27, %v836_v25 }
  0x45   :  { %3261 = vmatprep.subr.bf16.mxu0 %v3260_v26  ;;  %v3280_v26 = vpack.c.bf16 %v839_v17, %v837_v16  ;;  %v144_v30 = vld [vmem:[%s5218_s0 + $0x80] sm:$0xff]  ;;  %v841_v31 = vld [vmem:[#allocation2 + $0xa48] sm:$0xff]  ;;  %v169_v36 = vld [vmem:[%s5218_s0 + $0x148] sm:$0xff] }
  0x46   :  { %v584_v39 = vld [vmem:[#allocation2 + $0x240] sm:$0xff]  ;;  %v586_v40 = vld [vmem:[#allocation2 + $0x250] sm:$0xff]  ;;  %v845_v47 = vld [vmem:[#allocation2 + $0xa68] sm:$0xff] }
  0x47   :  { %3007 = vmatpush1.bf16.msra.mxu1 %v3006_v32  ;;  %v843_v32 = vld [vmem:[#allocation2 + $0xa58] sm:$0xff]  ;;  %v840_v41 = vld [vmem:[#allocation2 + $0xa40] sm:$0xff]  ;;  %v842_v43 = vld [vmem:[#allocation2 + $0xa50] sm:$0xff]  ;;  %v3030_v52 = vpack.c.bf16 %v586_v40, %v584_v39 }
  0x48   :  { %3263 = vmatpush1.bf16.msra.mxu0 %v3262_v33  ;;  %3009 = vmatprep.subr.bf16.mxu1 %v3008_v34  ;;  %v152_v33 = vld [vmem:[%s5218_s0 + $0xc0] sm:$0xff]  ;;  %v161_v34 = vld [vmem:[%s5218_s0 + $0x108] sm:$0xff]  ;;  %v3284_v42 = vpack.c.bf16 %v843_v32, %v841_v31  ;;  %v3286_v53 = vpack.c.bf16 %v842_v43, %v840_v41  ;;  %v846_v59 = vld [vmem:[#allocation2 + $0xa70] sm:$0xff] }
  0x49   :  { %3265 = vmatprep.subr.bf16.mxu0 %v3264_v38  ;;  %v3028_v38 = vpack.c.bf16 %v587_v29, %v585_v28  ;;  %v847_v48 = vld [vmem:[#allocation2 + $0xa78] sm:$0xff]  ;;  %v185_v51 = vld [vmem:[%s5218_s0 + $0x1c8] sm:$0xff]  ;;  %v593_v60 = vld [vmem:[#allocation2 + $0x288] sm:$0xff] }
  0x4a   :  { %v168_v49 = vld [vmem:[%s5218_s0 + $0x140] sm:$0xff]  ;;  %v588_v55 = vld [vmem:[#allocation2 + $0x260] sm:$0xff]  ;;  %v849_v63 = vld [vmem:[#allocation2 + $0xa88] sm:$0xff] }
  0x4b   :  { %3011 = vmatpush1.bf16.msra.mxu1 %v3010_v44  ;;  %v589_v44 = vld [vmem:[#allocation2 + $0x268] sm:$0xff]  ;;  %v595_v61 = vld [vmem:[#allocation2 + $0x298] sm:$0xff]  ;;  %v193_v2 = vld [vmem:[%s5218_s0 + $0x208] sm:$0xff] }
  0x4c   :  { %3267 = vmatpush1.bf16.msra.mxu0 %v3266_v45  ;;  %3013 = vmatprep.subr.bf16.mxu1 %v3012_v46  ;;  %v591_v45 = vld [vmem:[#allocation2 + $0x278] sm:$0xff]  ;;  %v201_v3 = vld [vmem:[%s5218_s0 + $0x248] sm:$0xff]  ;;  %v594_v8 = vld [vmem:[#allocation2 + $0x290] sm:$0xff] }
  0x4d   :  { %3269 = vmatprep.subr.bf16.mxu0 %v3268_v50  ;;  %v160_v46 = vld [vmem:[%s5218_s0 + $0x100] sm:$0xff]  ;;  %v177_v50 = vld [vmem:[%s5218_s0 + $0x188] sm:$0xff]  ;;  %v3032_v54 = vpack.c.bf16 %v591_v45, %v589_v44  ;;  %v850_v11 = vld [vmem:[#allocation2 + $0xa90] sm:$0xff] }
  0x4e   :  { %v851_v0 = vld [vmem:[#allocation2 + $0xa98] sm:$0xff]  ;;  %v592_v7 = vld [vmem:[#allocation2 + $0x280] sm:$0xff]  ;;  %v597_v12 = vld [vmem:[#allocation2 + $0x2a8] sm:$0xff] }
  0x4f   :  { %3015 = vmatpush1.bf16.msra.mxu1 %v3014_v56  ;;  %v590_v56 = vld [vmem:[#allocation2 + $0x270] sm:$0xff]  ;;  %v184_v1 = vld [vmem:[%s5218_s0 + $0x1c0] sm:$0xff]  ;;  %v3292_v10 = vpack.c.bf16 %v851_v0, %v849_v63  ;;  %v596_v23 = vld [vmem:[#allocation2 + $0x2a0] sm:$0xff] }
  0x50   :  { %3271 = vmatpush1.bf16.msra.mxu0 %v3270_v57  ;;  %3017 = vmatprep.subr.bf16.mxu1 %v3016_v58  ;;  %v844_v57 = vld [vmem:[#allocation2 + $0xa60] sm:$0xff]  ;;  %v3288_v58 = vpack.c.bf16 %v847_v48, %v845_v47  ;;  %v599_v13 = vld [vmem:[#allocation2 + $0x2b8] sm:$0xff]  ;;  %v598_v24 = vld [vmem:[#allocation2 + $0x2b0] sm:$0xff] }
  0x51   :  { %3273 = vmatprep.subr.bf16.mxu0 %v3272_v62  ;;  %v176_v62 = vld [vmem:[%s5218_s0 + $0x180] sm:$0xff]  ;;  %v852_v25 = vld [vmem:[#allocation2 + $0xaa0] sm:$0xff]  ;;  %v854_v27 = vld [vmem:[#allocation2 + $0xab0] sm:$0xff] }
  0x52   :  { %v855_v16 = vld [vmem:[#allocation2 + $0xab8] sm:$0xff]  ;;  %v601_v28 = vld [vmem:[#allocation2 + $0x2c8] sm:$0xff]  ;;  %v600_v39 = vld [vmem:[#allocation2 + $0x2c0] sm:$0xff] }
  0x53   :  { %3019 = vmatpush1.bf16.msra.mxu1 %v3018_v4  ;;  %v3034_v4 = vpack.c.bf16 %v590_v56, %v588_v55  ;;  %v200_v17 = vld [vmem:[%s5218_s0 + $0x240] sm:$0xff]  ;;  %v857_v31 = vld [vmem:[#allocation2 + $0xac8] sm:$0xff]  ;;  %v602_v40 = vld [vmem:[#allocation2 + $0x2d0] sm:$0xff] }
  0x54   :  { %3275 = vmatpush1.bf16.msra.mxu0 %v3274_v5  ;;  %3021 = vmatprep.subr.bf16.mxu1 %v3020_v6  ;;  %v3290_v5 = vpack.c.bf16 %v846_v59, %v844_v57  ;;  %v3036_v6 = vpack.c.bf16 %v595_v61, %v593_v60  ;;  %v603_v29 = vld [vmem:[#allocation2 + $0x2d8] sm:$0xff]  ;;  %v856_v41 = vld [vmem:[#allocation2 + $0xac0] sm:$0xff]  ;;  %v858_v43 = vld [vmem:[#allocation2 + $0xad0] sm:$0xff] }
  0x55   :  { %3277 = vmatprep.subr.bf16.mxu0 %v3276_v9  ;;  %v848_v9 = vld [vmem:[#allocation2 + $0xa80] sm:$0xff]  ;;  %v859_v32 = vld [vmem:[#allocation2 + $0xad8] sm:$0xff]  ;;  %v605_v44 = vld [vmem:[#allocation2 + $0x2e8] sm:$0xff] }
  0x56   :  { %1089 = vmatmul.mubr.f32.vlgmr.msra.gmra.mrb[0].mxu1 %v128_v14  ;;  %v192_v14 = vld [vmem:[%s5218_s0 + $0x200] sm:$0xff]  ;;  %v861_v47 = vld [vmem:[#allocation2 + $0xae8] sm:$0xff]  ;;  %v604_v55 = vld [vmem:[#allocation2 + $0x2e0] sm:$0xff] }
  0x57   :  { %1925 = vmatmul.mubr.f32.vlgmr.msra.gmra.mrb[0].mxu0 %v136_v18  ;;  %3023 = vmatpush1.bf16.msra.mxu1 %v3022_v15  ;;  %v853_v15 = vld [vmem:[#allocation2 + $0xaa8] sm:$0xff]  ;;  %v209_v18 = vld [vmem:[%s5218_s0 + $0x288] sm:$0xff]  ;;  %v607_v45 = vld [vmem:[#allocation2 + $0x2f8] sm:$0xff] }
  0x58   :  { %3279 = vmatpush1.bf16.msra.mxu0 %v3278_v19  ;;  %1094 = vmatprep.mubr.f32.mxu1 %v145_v20  ;;  %v217_v19 = vld [vmem:[%s5218_s0 + $0x2c8] sm:$0xff]  ;;  %v3038_v20 = vpack.c.bf16 %v594_v8, %v592_v7  ;;  %v863_v48 = vld [vmem:[#allocation2 + $0xaf8] sm:$0xff]  ;;  %v606_v56 = vld [vmem:[#allocation2 + $0x2f0] sm:$0xff] }
  0x59   :  { %1930 = vmatprep.mubr.f32.mxu0 %v153_v21  ;;  %3025 = vmatprep.subr.bf16.mxu1 %v3024_v22  ;;  %v3294_v21 = vpack.c.bf16 %v850_v11, %v848_v9  ;;  %v3040_v22 = vpack.c.bf16 %v599_v13, %v597_v12  ;;  %v860_v57 = vld [vmem:[#allocation2 + $0xae0] sm:$0xff]  ;;  %v862_v59 = vld [vmem:[#allocation2 + $0xaf0] sm:$0xff]  ;;  %v609_v60 = vld [vmem:[#allocation2 + $0x308] sm:$0xff] }
  0x5a   :  { %1095 = vmatmul.mubr.f32.gmra.mrb[2].mxu1 %v144_v30  ;;  %3281 = vmatprep.subr.bf16.mxu0 %v3280_v26  ;;  %v3296_v26 = vpack.c.bf16 %v855_v16, %v853_v15  ;;  %v208_v30 = vld [vmem:[%s5218_s0 + $0x280] sm:$0xff]  ;;  %v865_v63 = vld [vmem:[#allocation2 + $0xb08] sm:$0xff]  ;;  %v608_v7 = vld [vmem:[#allocation2 + $0x300] sm:$0xff] }
  0x5b   :  { %1931 = vmatmul.mubr.f32.gmra.mrb[2].mxu0 %v152_v33  ;;  %1100 = vmatprep.mubr.f32.mxu1 %v161_v34  ;;  %v216_v33 = vld [vmem:[%s5218_s0 + $0x2c0] sm:$0xff]  ;;  %v225_v34 = vld [vmem:[%s5218_s0 + $0x308] sm:$0xff]  ;;  %v610_v8 = vld [vmem:[#allocation2 + $0x310] sm:$0xff] }
  0x5c   :  { %3027 = vmatpush1.bf16.msra.mxu1 %v3026_v35  ;;  %1936 = vmatprep.mubr.f32.mxu0 %v169_v36  ;;  %v233_v35 = vld [vmem:[%s5218_s0 + $0x348] sm:$0xff]  ;;  %v3042_v36 = vpack.c.bf16 %v598_v24, %v596_v23  ;;  %v611_v61 = vld [vmem:[#allocation2 + $0x318] sm:$0xff]  ;;  %v866_v11 = vld [vmem:[#allocation2 + $0xb10] sm:$0xff] }
  0x5d   :  { %3283 = vmatpush1.bf16.msra.mxu0 %v3282_v37  ;;  %3029 = vmatprep.subr.bf16.mxu1 %v3028_v38  ;;  %v3298_v37 = vpack.c.bf16 %v854_v27, %v852_v25  ;;  %v3044_v38 = vpack.c.bf16 %v603_v29, %v601_v28  ;;  %v867_v0 = vld [vmem:[#allocation2 + $0xb18] sm:$0xff]  ;;  %v864_v9 = vld [vmem:[#allocation2 + $0xb00] sm:$0xff]  ;;  %v613_v12 = vld [vmem:[#allocation2 + $0x328] sm:$0xff] }
  0x5e   :  { %1101 = vmatmul.mubr.f32.gmra.mrb[4].mxu1 %v160_v46  ;;  %3285 = vmatprep.subr.bf16.mxu0 %v3284_v42  ;;  %v3300_v42 = vpack.c.bf16 %v859_v32, %v857_v31  ;;  %v224_v46 = vld [vmem:[%s5218_s0 + $0x300] sm:$0xff]  ;;  %v869_v15 = vld [vmem:[#allocation2 + $0xb28] sm:$0xff]  ;;  %v612_v23 = vld [vmem:[#allocation2 + $0x320] sm:$0xff] }
  0x5f   :  { %1937 = vmatmul.mubr.f32.gmra.mrb[4].mxu0 %v168_v49  ;;  %1106 = vmatprep.mubr.f32.mxu1 %v177_v50  ;;  %v232_v49 = vld [vmem:[%s5218_s0 + $0x340] sm:$0xff]  ;;  %v241_v50 = vld [vmem:[%s5218_s0 + $0x388] sm:$0xff]  ;;  %v614_v24 = vld [vmem:[#allocation2 + $0x330] sm:$0xff] }
  0x60   :  { %1942 = vmatprep.mubr.f32.mxu0 %v185_v51  ;;  %3031 = vmatpush1.bf16.msra.mxu1 %v3030_v52  ;;  %v249_v51 = vld [vmem:[%s5218_s0 + $0x3c8] sm:$0xff]  ;;  %v3046_v52 = vpack.c.bf16 %v602_v40, %v600_v39  ;;  %v615_v13 = vld [vmem:[#allocation2 + $0x338] sm:$0xff]  ;;  %v870_v27 = vld [vmem:[#allocation2 + $0xb30] sm:$0xff] }
  0x61   :  { %3287 = vmatpush1.bf16.msra.mxu0 %v3286_v53  ;;  %3033 = vmatprep.subr.bf16.mxu1 %v3032_v54  ;;  %v3302_v53 = vpack.c.bf16 %v858_v43, %v856_v41  ;;  %v3048_v54 = vpack.c.bf16 %v607_v45, %v605_v44  ;;  %v871_v16 = vld [vmem:[#allocation2 + $0xb38] sm:$0xff]  ;;  %v868_v25 = vld [vmem:[#allocation2 + $0xb20] sm:$0xff]  ;;  %v617_v28 = vld [vmem:[#allocation2 + $0x348] sm:$0xff] }
  0x62   :  { %1107 = vmatmul.mubr.f32.gmra.mrb[6].mxu1 %v176_v62  ;;  %3289 = vmatprep.subr.bf16.mxu0 %v3288_v58  ;;  %v3304_v58 = vpack.c.bf16 %v863_v48, %v861_v47  ;;  %v240_v62 = vld [vmem:[%s5218_s0 + $0x380] sm:$0xff]  ;;  %v873_v31 = vld [vmem:[#allocation2 + $0xb48] sm:$0xff]  ;;  %v616_v39 = vld [vmem:[#allocation2 + $0x340] sm:$0xff] }
  0x63   :  { %1943 = vmatmul.mubr.f32.gmra.mrb[6].mxu0 %v184_v1  ;;  %1112 = vmatprep.mubr.f32.mxu1 %v193_v2  ;;  %v248_v1 = vld [vmem:[%s5218_s0 + $0x3c0] sm:$0xff]  ;;  %v257_v2 = vld [vmem:[%s5218_s0 + $0x408] sm:$0xff]  ;;  %v618_v40 = vld [vmem:[#allocation2 + $0x350] sm:$0xff] }
  0x64   :  { %1948 = vmatprep.mubr.f32.mxu0 %v201_v3  ;;  %3035 = vmatpush1.bf16.msra.mxu1 %v3034_v4  ;;  %v265_v3 = vld [vmem:[%s5218_s0 + $0x448] sm:$0xff]  ;;  %v3050_v4 = vpack.c.bf16 %v606_v56, %v604_v55  ;;  %v619_v29 = vld [vmem:[#allocation2 + $0x358] sm:$0xff]  ;;  %v874_v43 = vld [vmem:[#allocation2 + $0xb50] sm:$0xff] }
  0x65   :  { %3291 = vmatpush1.bf16.msra.mxu0 %v3290_v5  ;;  %3037 = vmatprep.subr.bf16.mxu1 %v3036_v6  ;;  %v3306_v5 = vpack.c.bf16 %v862_v59, %v860_v57  ;;  %v3052_v6 = vpack.c.bf16 %v611_v61, %v609_v60  ;;  %v875_v32 = vld [vmem:[#allocation2 + $0xb58] sm:$0xff]  ;;  %v872_v41 = vld [vmem:[#allocation2 + $0xb40] sm:$0xff]  ;;  %v621_v44 = vld [vmem:[#allocation2 + $0x368] sm:$0xff] }
  0x66   :  { %1113 = vmatmul.mubr.f32.gmra.mrb[8].mxu1 %v192_v14  ;;  %3293 = vmatprep.subr.bf16.mxu0 %v3292_v10  ;;  %v3308_v10 = vpack.c.bf16 %v867_v0, %v865_v63  ;;  %v256_v14 = vld [vmem:[%s5218_s0 + $0x400] sm:$0xff]  ;;  %v877_v47 = vld [vmem:[#allocation2 + $0xb68] sm:$0xff]  ;;  %v620_v55 = vld [vmem:[#allocation2 + $0x360] sm:$0xff] }
  0x67   :  { %1949 = vmatmul.mubr.f32.gmra.mrb[8].mxu0 %v200_v17  ;;  %1118 = vmatprep.mubr.f32.mxu1 %v209_v18  ;;  %v264_v17 = vld [vmem:[%s5218_s0 + $0x440] sm:$0xff]  ;;  %v273_v18 = vld [vmem:[%s5218_s0 + $0x488] sm:$0xff]  ;;  %v622_v56 = vld [vmem:[#allocation2 + $0x370] sm:$0xff] }
  0x68   :  { %1954 = vmatprep.mubr.f32.mxu0 %v217_v19  ;;  %3039 = vmatpush1.bf16.msra.mxu1 %v3038_v20  ;;  %v281_v19 = vld [vmem:[%s5218_s0 + $0x4c8] sm:$0xff]  ;;  %v3054_v20 = vpack.c.bf16 %v610_v8, %v608_v7  ;;  %v623_v45 = vld [vmem:[#allocation2 + $0x378] sm:$0xff]  ;;  %v878_v59 = vld [vmem:[#allocation2 + $0xb70] sm:$0xff] }
  0x69   :  { %3295 = vmatpush1.bf16.msra.mxu0 %v3294_v21  ;;  %3041 = vmatprep.subr.bf16.mxu1 %v3040_v22  ;;  %v3310_v21 = vpack.c.bf16 %v866_v11, %v864_v9  ;;  %v3056_v22 = vpack.c.bf16 %v615_v13, %v613_v12  ;;  %v879_v48 = vld [vmem:[#allocation2 + $0xb78] sm:$0xff]  ;;  %v876_v57 = vld [vmem:[#allocation2 + $0xb60] sm:$0xff]  ;;  %v625_v60 = vld [vmem:[#allocation2 + $0x388] sm:$0xff] }
  0x6a   :  { %1119 = vmatmul.mubr.f32.gmra.mrb[10].mxu1 %v208_v30  ;;  %3297 = vmatprep.subr.bf16.mxu0 %v3296_v26  ;;  %v3312_v26 = vpack.c.bf16 %v871_v16, %v869_v15  ;;  %v272_v30 = vld [vmem:[%s5218_s0 + $0x480] sm:$0xff]  ;;  %v881_v63 = vld [vmem:[#allocation2 + $0xb88] sm:$0xff]  ;;  %v624_v7 = vld [vmem:[#allocation2 + $0x380] sm:$0xff] }
  0x6b   :  { %1955 = vmatmul.mubr.f32.gmra.mrb[10].mxu0 %v216_v33  ;;  %1124 = vmatprep.mubr.f32.mxu1 %v225_v34  ;;  %v280_v33 = vld [vmem:[%s5218_s0 + $0x4c0] sm:$0xff]  ;;  %v289_v34 = vld [vmem:[%s5218_s0 + $0x508] sm:$0xff]  ;;  %v626_v8 = vld [vmem:[#allocation2 + $0x390] sm:$0xff] }
  0x6c   :  { %1960 = vmatprep.mubr.f32.mxu0 %v233_v35  ;;  %3043 = vmatpush1.bf16.msra.mxu1 %v3042_v36  ;;  %v297_v35 = vld [vmem:[%s5218_s0 + $0x548] sm:$0xff]  ;;  %v3058_v36 = vpack.c.bf16 %v614_v24, %v612_v23  ;;  %v627_v61 = vld [vmem:[#allocation2 + $0x398] sm:$0xff]  ;;  %v882_v11 = vld [vmem:[#allocation2 + $0xb90] sm:$0xff] }
  0x6d   :  { %3299 = vmatpush1.bf16.msra.mxu0 %v3298_v37  ;;  %3045 = vmatprep.subr.bf16.mxu1 %v3044_v38  ;;  %v3314_v37 = vpack.c.bf16 %v870_v27, %v868_v25  ;;  %v3060_v38 = vpack.c.bf16 %v619_v29, %v617_v28  ;;  %v883_v0 = vld [vmem:[#allocation2 + $0xb98] sm:$0xff]  ;;  %v880_v9 = vld [vmem:[#allocation2 + $0xb80] sm:$0xff]  ;;  %v629_v12 = vld [vmem:[#allocation2 + $0x3a8] sm:$0xff] }
  0x6e   :  { %1125 = vmatmul.mubr.f32.gmra.mrb[12].mxu1 %v224_v46  ;;  %3301 = vmatprep.subr.bf16.mxu0 %v3300_v42  ;;  %v3316_v42 = vpack.c.bf16 %v875_v32, %v873_v31  ;;  %v288_v46 = vld [vmem:[%s5218_s0 + $0x500] sm:$0xff]  ;;  %v885_v15 = vld [vmem:[#allocation2 + $0xba8] sm:$0xff]  ;;  %v628_v23 = vld [vmem:[#allocation2 + $0x3a0] sm:$0xff] }
  0x6f   :  { %1961 = vmatmul.mubr.f32.gmra.mrb[12].mxu0 %v232_v49  ;;  %1130 = vmatprep.mubr.f32.mxu1 %v241_v50  ;;  %v296_v49 = vld [vmem:[%s5218_s0 + $0x540] sm:$0xff]  ;;  %v305_v50 = vld [vmem:[%s5218_s0 + $0x588] sm:$0xff]  ;;  %v630_v24 = vld [vmem:[#allocation2 + $0x3b0] sm:$0xff] }
  0x70   :  { %1966 = vmatprep.mubr.f32.mxu0 %v249_v51  ;;  %3047 = vmatpush1.bf16.msra.mxu1 %v3046_v52  ;;  %v313_v51 = vld [vmem:[%s5218_s0 + $0x5c8] sm:$0xff]  ;;  %v3062_v52 = vpack.c.bf16 %v618_v40, %v616_v39  ;;  %v631_v13 = vld [vmem:[#allocation2 + $0x3b8] sm:$0xff]  ;;  %v886_v27 = vld [vmem:[#allocation2 + $0xbb0] sm:$0xff] }
  0x71   :  { %3303 = vmatpush1.bf16.msra.mxu0 %v3302_v53  ;;  %3049 = vmatprep.subr.bf16.mxu1 %v3048_v54  ;;  %v3318_v53 = vpack.c.bf16 %v874_v43, %v872_v41  ;;  %v3064_v54 = vpack.c.bf16 %v623_v45, %v621_v44  ;;  %v887_v16 = vld [vmem:[#allocation2 + $0xbb8] sm:$0xff]  ;;  %v884_v25 = vld [vmem:[#allocation2 + $0xba0] sm:$0xff]  ;;  %v633_v28 = vld [vmem:[#allocation2 + $0x3c8] sm:$0xff] }
  0x72   :  { %1131 = vmatmul.mubr.f32.gmra.mrb[14].mxu1 %v240_v62  ;;  %3305 = vmatprep.subr.bf16.mxu0 %v3304_v58  ;;  %v3320_v58 = vpack.c.bf16 %v879_v48, %v877_v47  ;;  %v304_v62 = vld [vmem:[%s5218_s0 + $0x580] sm:$0xff]  ;;  %v889_v31 = vld [vmem:[#allocation2 + $0xbc8] sm:$0xff]  ;;  %v632_v39 = vld [vmem:[#allocation2 + $0x3c0] sm:$0xff] }
  0x73   :  { %1967 = vmatmul.mubr.f32.gmra.mrb[14].mxu0 %v248_v1  ;;  %1136 = vmatprep.mubr.f32.mxu1 %v257_v2  ;;  %v312_v1 = vld [vmem:[%s5218_s0 + $0x5c0] sm:$0xff]  ;;  %v321_v2 = vld [vmem:[%s5218_s0 + $0x608] sm:$0xff]  ;;  %v634_v40 = vld [vmem:[#allocation2 + $0x3d0] sm:$0xff] }
  0x74   :  { %1972 = vmatprep.mubr.f32.mxu0 %v265_v3  ;;  %3051 = vmatpush1.bf16.msra.mxu1 %v3050_v4  ;;  %v329_v3 = vld [vmem:[%s5218_s0 + $0x648] sm:$0xff]  ;;  %v3066_v4 = vpack.c.bf16 %v622_v56, %v620_v55  ;;  %v635_v29 = vld [vmem:[#allocation2 + $0x3d8] sm:$0xff]  ;;  %v890_v43 = vld [vmem:[#allocation2 + $0xbd0] sm:$0xff] }
  0x75   :  { %3307 = vmatpush1.bf16.msra.mxu0 %v3306_v5  ;;  %3053 = vmatprep.subr.bf16.mxu1 %v3052_v6  ;;  %v3322_v5 = vpack.c.bf16 %v878_v59, %v876_v57  ;;  %v3068_v6 = vpack.c.bf16 %v627_v61, %v625_v60  ;;  %v891_v32 = vld [vmem:[#allocation2 + $0xbd8] sm:$0xff]  ;;  %v888_v41 = vld [vmem:[#allocation2 + $0xbc0] sm:$0xff]  ;;  %v637_v44 = vld [vmem:[#allocation2 + $0x3e8] sm:$0xff] }
  0x76   :  { %1137 = vmatmul.mubr.f32.gmra.mrb[16].mxu1 %v256_v14  ;;  %3309 = vmatprep.subr.bf16.mxu0 %v3308_v10  ;;  %v3324_v10 = vpack.c.bf16 %v883_v0, %v881_v63  ;;  %v320_v14 = vld [vmem:[%s5218_s0 + $0x600] sm:$0xff]  ;;  %v893_v47 = vld [vmem:[#allocation2 + $0xbe8] sm:$0xff]  ;;  %v636_v55 = vld [vmem:[#allocation2 + $0x3e0] sm:$0xff] }
  0x77   :  { %1973 = vmatmul.mubr.f32.gmra.mrb[16].mxu0 %v264_v17  ;;  %1142 = vmatprep.mubr.f32.mxu1 %v273_v18  ;;  %v328_v17 = vld [vmem:[%s5218_s0 + $0x640] sm:$0xff]  ;;  %v337_v18 = vld [vmem:[%s5218_s0 + $0x688] sm:$0xff]  ;;  %v638_v56 = vld [vmem:[#allocation2 + $0x3f0] sm:$0xff] }
  0x78   :  { %1978 = vmatprep.mubr.f32.mxu0 %v281_v19  ;;  %3055 = vmatpush1.bf16.msra.mxu1 %v3054_v20  ;;  %v345_v19 = vld [vmem:[%s5218_s0 + $0x6c8] sm:$0xff]  ;;  %v3070_v20 = vpack.c.bf16 %v626_v8, %v624_v7  ;;  %v639_v45 = vld [vmem:[#allocation2 + $0x3f8] sm:$0xff]  ;;  %v894_v59 = vld [vmem:[#allocation2 + $0xbf0] sm:$0xff] }
  0x79   :  { %3311 = vmatpush1.bf16.msra.mxu0 %v3310_v21  ;;  %3057 = vmatprep.subr.bf16.mxu1 %v3056_v22  ;;  %v3326_v21 = vpack.c.bf16 %v882_v11, %v880_v9  ;;  %v3072_v22 = vpack.c.bf16 %v631_v13, %v629_v12  ;;  %v895_v48 = vld [vmem:[#allocation2 + $0xbf8] sm:$0xff]  ;;  %v892_v57 = vld [vmem:[#allocation2 + $0xbe0] sm:$0xff]  ;;  %v641_v60 = vld [vmem:[#allocation2 + $0x408] sm:$0xff] }
  0x7a   :  { %1143 = vmatmul.mubr.f32.gmra.mrb[18].mxu1 %v272_v30  ;;  %3313 = vmatprep.subr.bf16.mxu0 %v3312_v26  ;;  %v3328_v26 = vpack.c.bf16 %v887_v16, %v885_v15  ;;  %v336_v30 = vld [vmem:[%s5218_s0 + $0x680] sm:$0xff]  ;;  %v897_v63 = vld [vmem:[#allocation2 + $0xc08] sm:$0xff]  ;;  %v409_v11 = vld [vmem:[%s5218_s0 + $0x8c8] sm:$0xff] }
  0x7b   :  { %1979 = vmatmul.mubr.f32.gmra.mrb[18].mxu0 %v280_v33  ;;  %1148 = vmatprep.mubr.f32.mxu1 %v289_v34  ;;  %v344_v33 = vld [vmem:[%s5218_s0 + $0x6c0] sm:$0xff]  ;;  %v353_v34 = vld [vmem:[%s5218_s0 + $0x708] sm:$0xff] }
  0x7c   :  { %1984 = vmatprep.mubr.f32.mxu0 %v297_v35  ;;  %3059 = vmatpush1.bf16.msra.mxu1 %v3058_v36  ;;  %v361_v35 = vld [vmem:[%s5218_s0 + $0x748] sm:$0xff]  ;;  %v3074_v36 = vpack.c.bf16 %v630_v24, %v628_v23  ;;  %v643_v61 = vld [vmem:[#allocation2 + $0x418] sm:$0xff] }
  0x7d   :  { %3315 = vmatpush1.bf16.msra.mxu0 %v3314_v37  ;;  %3061 = vmatprep.subr.bf16.mxu1 %v3060_v38  ;;  %v3330_v37 = vpack.c.bf16 %v886_v27, %v884_v25  ;;  %v3076_v38 = vpack.c.bf16 %v635_v29, %v633_v28  ;;  %v899_v0 = vld [vmem:[#allocation2 + $0xc18] sm:$0xff]  ;;  %v425_v15 = vld [vmem:[%s5218_s0 + $0x948] sm:$0xff] }
  0x7e   :  { %1149 = vmatmul.mubr.f32.gmra.mrb[20].mxu1 %v288_v46  ;;  %3317 = vmatprep.subr.bf16.mxu0 %v3316_v42  ;;  %v3332_v42 = vpack.c.bf16 %v891_v32, %v889_v31  ;;  %v352_v46 = vld [vmem:[%s5218_s0 + $0x700] sm:$0xff]  ;;  %v3340_v7 = vpack.c.bf16 %v899_v0, %v897_v63  ;;  %v457_v23 = vld [vmem:[%s5218_s0 + $0xa48] sm:$0xff]  ;;  %v905_v63 = vld [vmem:[#allocation2 + $0xc48] sm:$0xff] }
  0x7f   :  { %1985 = vmatmul.mubr.f32.gmra.mrb[20].mxu0 %v296_v49  ;;  %1154 = vmatprep.mubr.f32.mxu1 %v305_v50  ;;  %v360_v49 = vld [vmem:[%s5218_s0 + $0x740] sm:$0xff]  ;;  %v369_v50 = vld [vmem:[%s5218_s0 + $0x788] sm:$0xff] }
  0x80   :  { %1990 = vmatprep.mubr.f32.mxu0 %v313_v51  ;;  %3063 = vmatpush1.bf16.msra.mxu1 %v3062_v52  ;;  %v377_v51 = vld [vmem:[%s5218_s0 + $0x7c8] sm:$0xff]  ;;  %v3078_v52 = vpack.c.bf16 %v634_v40, %v632_v39  ;;  %v384_v8 = vld [vmem:[%s5218_s0 + $0x800] sm:$0xff]  ;;  %v642_v40 = vld [vmem:[#allocation2 + $0x410] sm:$0xff] }
  0x81   :  { %3319 = vmatpush1.bf16.msra.mxu0 %v3318_v53  ;;  %3065 = vmatprep.subr.bf16.mxu1 %v3064_v54  ;;  %v3334_v53 = vpack.c.bf16 %v890_v43, %v888_v41  ;;  %v3080_v54 = vpack.c.bf16 %v639_v45, %v637_v44  ;;  %v392_v9 = vld [vmem:[%s5218_s0 + $0x840] sm:$0xff]  ;;  %v473_v27 = vld [vmem:[%s5218_s0 + $0xac8] sm:$0xff]  ;;  %v139_v41 = vld [vmem:[%s5218_s0 + $0x58] sm:$0xff] }
  0x82   :  { %1155 = vmatmul.mubr.f32.gmra.mrb[22].mxu1 %v304_v62  ;;  %3321 = vmatprep.subr.bf16.mxu0 %v3320_v58  ;;  %v3336_v58 = vpack.c.bf16 %v895_v48, %v893_v47  ;;  %v368_v62 = vld [vmem:[%s5218_s0 + $0x780] sm:$0xff]  ;;  %v489_v31 = vld [vmem:[%s5218_s0 + $0xb48] sm:$0xff]  ;;  %v898_v43 = vld [vmem:[#allocation2 + $0xc10] sm:$0xff] }
  0x83   :  { %1991 = vmatmul.mubr.f32.gmra.mrb[22].mxu0 %v312_v1  ;;  %1160 = vmatprep.mubr.f32.mxu1 %v321_v2  ;;  %v376_v1 = vld [vmem:[%s5218_s0 + $0x7c0] sm:$0xff]  ;;  %v385_v2 = vld [vmem:[%s5218_s0 + $0x808] sm:$0xff]  ;;  %v645_v44 = vld [vmem:[#allocation2 + $0x428] sm:$0xff] }
  0x84   :  { %1996 = vmatprep.mubr.f32.mxu0 %v329_v3  ;;  %3067 = vmatpush1.bf16.msra.mxu1 %v3066_v4  ;;  %v3082_v3 = vpack.c.bf16 %v638_v56, %v636_v55  ;;  %v393_v4 = vld [vmem:[%s5218_s0 + $0x848] sm:$0xff]  ;;  %v400_v12 = vld [vmem:[%s5218_s0 + $0x880] sm:$0xff]  ;;  %v901_v48 = vld [vmem:[#allocation2 + $0xc28] sm:$0xff] }
  0x85   :  { %3323 = vmatpush1.bf16.msra.mxu0 %v3322_v5  ;;  %3069 = vmatprep.subr.bf16.mxu1 %v3068_v6  ;;  %v3338_v5 = vpack.c.bf16 %v894_v59, %v892_v57  ;;  %v3084_v6 = vpack.c.bf16 %v643_v61, %v641_v60  ;;  %v408_v13 = vld [vmem:[%s5218_s0 + $0x8c0] sm:$0xff]  ;;  %v640_v39 = vld [vmem:[#allocation2 + $0x400] sm:$0xff]  ;;  %v646_v56 = vld [vmem:[#allocation2 + $0x430] sm:$0xff] }
  0x86   :  { %1161 = vmatmul.mubr.f32.gmra.mrb[24].mxu1 %v320_v14  ;;  %3325 = vmatprep.subr.bf16.mxu0 %v3324_v10  ;;  %v401_v10 = vld [vmem:[%s5218_s0 + $0x888] sm:$0xff]  ;;  %v416_v16 = vld [vmem:[%s5218_s0 + $0x900] sm:$0xff]  ;;  %v3086_v47 = vpack.c.bf16 %v642_v40, %v640_v39  ;;  %v902_v59 = vld [vmem:[#allocation2 + $0xc30] sm:$0xff] }
  0x87   :  { %1997 = vmatmul.mubr.f32.gmra.mrb[24].mxu0 %v328_v17  ;;  %1166 = vmatprep.mubr.f32.mxu1 %v337_v18  ;;  %v417_v14 = vld [vmem:[%s5218_s0 + $0x908] sm:$0xff]  ;;  %v424_v17 = vld [vmem:[%s5218_s0 + $0x940] sm:$0xff]  ;;  %v649_v60 = vld [vmem:[#allocation2 + $0x448] sm:$0xff] }
  0x88   :  { %2002 = vmatprep.mubr.f32.mxu0 %v345_v19  ;;  %3071 = vmatpush1.bf16.msra.mxu1 %v3070_v20  ;;  %v433_v18 = vld [vmem:[%s5218_s0 + $0x988] sm:$0xff]  ;;  %v432_v20 = vld [vmem:[%s5218_s0 + $0x980] sm:$0xff]  ;;  %v658_v40 = vld [vmem:[#allocation2 + $0x490] sm:$0xff] }
  0x89   :  { %3327 = vmatpush1.bf16.msra.mxu0 %v3326_v21  ;;  %3073 = vmatprep.subr.bf16.mxu1 %v3072_v22  ;;  %v441_v19 = vld [vmem:[%s5218_s0 + $0x9c8] sm:$0xff]  ;;  %v440_v21 = vld [vmem:[%s5218_s0 + $0x9c0] sm:$0xff] }
  0x8a   :  { %1167 = vmatmul.mubr.f32.gmra.mrb[26].mxu1 %v336_v30  ;;  %3329 = vmatprep.subr.bf16.mxu0 %v3328_v26  ;;  %v449_v22 = vld [vmem:[%s5218_s0 + $0xa08] sm:$0xff]  ;;  %v448_v24 = vld [vmem:[%s5218_s0 + $0xa00] sm:$0xff] }
  0x8b   :  { %2003 = vmatmul.mubr.f32.gmra.mrb[26].mxu0 %v344_v33  ;;  %1172 = vmatprep.mubr.f32.mxu1 %v353_v34  ;;  %v456_v25 = vld [vmem:[%s5218_s0 + $0xa40] sm:$0xff]  ;;  %v465_v26 = vld [vmem:[%s5218_s0 + $0xa88] sm:$0xff] }
  0x8c   :  { %2008 = vmatprep.mubr.f32.mxu0 %v361_v35  ;;  %3075 = vmatpush1.bf16.msra.mxu1 %v3074_v36  ;;  %v464_v28 = vld [vmem:[%s5218_s0 + $0xa80] sm:$0xff]  ;;  %v481_v30 = vld [vmem:[%s5218_s0 + $0xb08] sm:$0xff] }
  0x8d   :  { %3331 = vmatpush1.bf16.msra.mxu0 %v3330_v37  ;;  %3077 = vmatprep.subr.bf16.mxu1 %v3076_v38  ;;  %v472_v29 = vld [vmem:[%s5218_s0 + $0xac0] sm:$0xff]  ;;  %v497_v34 = vld [vmem:[%s5218_s0 + $0xb88] sm:$0xff]  ;;  %v131_v38 = vld [vmem:[%s5218_s0 + $0x18] sm:$0xff] }
  0x8e   :  { %1173 = vmatmul.mubr.f32.gmra.mrb[28].mxu1 %v352_v46  ;;  %3333 = vmatprep.subr.bf16.mxu0 %v3332_v42  ;;  %v480_v32 = vld [vmem:[%s5218_s0 + $0xb00] sm:$0xff]  ;;  %v505_v35 = vld [vmem:[%s5218_s0 + $0xbc8] sm:$0xff]  ;;  %v130_v46 = vld [vmem:[%s5218_s0 + $0x10] sm:$0xff] }
  0x8f   :  { %2009 = vmatmul.mubr.f32.gmra.mrb[28].mxu0 %v360_v49  ;;  %1178 = vmatprep.mubr.f32.mxu1 %v369_v50  ;;  %v488_v33 = vld [vmem:[%s5218_s0 + $0xb40] sm:$0xff]  ;;  %v896_v42 = vld [vmem:[#allocation2 + $0xc00] sm:$0xff]  ;;  %v138_v50 = vld [vmem:[%s5218_s0 + $0x50] sm:$0xff] }
  0x90   :  { %2014 = vmatprep.mubr.f32.mxu0 %v377_v51  ;;  %3079 = vmatpush1.bf16.msra.mxu1 %v3078_v52  ;;  %v496_v36 = vld [vmem:[%s5218_s0 + $0xb80] sm:$0xff]  ;;  %v3342_v51 = vpack.c.bf16 %v898_v43, %v896_v42  ;;  %v147_v52 = vld [vmem:[%s5218_s0 + $0x98] sm:$0xff]  ;;  %v644_v55 = vld [vmem:[#allocation2 + $0x420] sm:$0xff] }
  0x91   :  { %3335 = vmatpush1.bf16.msra.mxu0 %v3334_v53  ;;  %3081 = vmatprep.subr.bf16.mxu1 %v3080_v54  ;;  %v504_v37 = vld [vmem:[%s5218_s0 + $0xbc0] sm:$0xff]  ;;  %v155_v53 = vld [vmem:[%s5218_s0 + $0xd8] sm:$0xff]  ;;  %v900_v57 = vld [vmem:[#allocation2 + $0xc20] sm:$0xff] }
  0x92   :  { %1179 = vmatmul.mubr.f32.gmra.mrb[30].mxu1 %v368_v62  ;;  %3337 = vmatprep.subr.bf16.mxu0 %v3336_v58  ;;  %v647_v45 = vld [vmem:[#allocation2 + $0x438] sm:$0xff]  ;;  %v146_v62 = vld [vmem:[%s5218_s0 + $0x90] sm:$0xff]  ;;  %v656_v39 = vld [vmem:[#allocation2 + $0x480] sm:$0xff] }
  0x93   :  { %2015 = vmatmul.mubr.f32.gmra.mrb[30].mxu0 %v376_v1  ;;  %1184 = vmatprep.mubr.f32.mxu1 %v385_v2  ;;  %v903_v49 = vld [vmem:[#allocation2 + $0xc38] sm:$0xff]  ;;  %v3088_v54 = vpack.c.bf16 %v647_v45, %v645_v44  ;;  %v154_v1 = vld [vmem:[%s5218_s0 + $0xd0] sm:$0xff]  ;;  %v163_v2 = vld [vmem:[%s5218_s0 + $0x118] sm:$0xff] }
  0x94   :  { %2020 = vmatprep.mubr.f32.mxu0 %v393_v4  ;;  %3083 = vmatpush1.bf16.msra.mxu1 %v3082_v3  ;;  %v3344_v58 = vpack.c.bf16 %v903_v49, %v901_v48  ;;  %v651_v61 = vld [vmem:[#allocation2 + $0x458] sm:$0xff]  ;;  %v3090_v3 = vpack.c.bf16 %v646_v56, %v644_v55  ;;  %v171_v4 = vld [vmem:[%s5218_s0 + $0x158] sm:$0xff]  ;;  %v661_v44 = vld [vmem:[#allocation2 + $0x4a8] sm:$0xff] }
  0x95   :  { %3339 = vmatpush1.bf16.msra.mxu0 %v3338_v5  ;;  %3085 = vmatprep.subr.bf16.mxu1 %v3084_v6  ;;  %v907_v0 = vld [vmem:[#allocation2 + $0xc58] sm:$0xff]  ;;  %v3346_v5 = vpack.c.bf16 %v902_v59, %v900_v57  ;;  %v3092_v6 = vpack.c.bf16 %v651_v61, %v649_v60  ;;  %v914_v43 = vld [vmem:[#allocation2 + $0xc90] sm:$0xff]  ;;  %v202_v49 = vld [vmem:[%s5218_s0 + $0x250] sm:$0xff] }
  0x96   :  { %1185 = vmatmul.mubr.f32.gmra.mrb[32].mxu1 %v384_v8  ;;  %3341 = vmatprep.subr.bf16.mxu0 %v3340_v7  ;;  %v648_v7 = vld [vmem:[#allocation2 + $0x440] sm:$0xff]  ;;  %v650_v8 = vld [vmem:[#allocation2 + $0x450] sm:$0xff]  ;;  %v663_v45 = vld [vmem:[#allocation2 + $0x4b8] sm:$0xff] }
  0x97   :  { %2021 = vmatmul.mubr.f32.gmra.mrb[32].mxu0 %v392_v9  ;;  %1190 = vmatprep.mubr.f32.mxu1 %v401_v10  ;;  %v904_v9 = vld [vmem:[#allocation2 + $0xc40] sm:$0xff]  ;;  %v3348_v10 = vpack.c.bf16 %v907_v0, %v905_v63  ;;  %v919_v48 = vld [vmem:[#allocation2 + $0xcb8] sm:$0xff]  ;;  %v662_v56 = vld [vmem:[#allocation2 + $0x4b0] sm:$0xff] }
  0x98   :  { %2026 = vmatprep.mubr.f32.mxu0 %v409_v11  ;;  %v906_v11 = vld [vmem:[#allocation2 + $0xc50] sm:$0xff]  ;;  %v660_v55 = vld [vmem:[#allocation2 + $0x4a0] sm:$0xff]  ;;  %v665_v60 = vld [vmem:[#allocation2 + $0x4c8] sm:$0xff] }
  0x99   :  { %v916_v57 = vld [vmem:[#allocation2 + $0xca0] sm:$0xff]  ;;  %v918_v59 = vld [vmem:[#allocation2 + $0xcb0] sm:$0xff]  ;;  %v667_v61 = vld [vmem:[#allocation2 + $0x4d8] sm:$0xff] }
  0x9a   :  { %1191 = vmatmul.mubr.f32.gmra.mrb[34].mxu1 %v400_v12  ;;  %v653_v12 = vld [vmem:[#allocation2 + $0x468] sm:$0xff]  ;;  %v923_v0 = vld [vmem:[#allocation2 + $0xcd8] sm:$0xff] }
  0x9b   :  { %2027 = vmatmul.mubr.f32.gmra.mrb[34].mxu0 %v408_v13  ;;  %1196 = vmatprep.mubr.f32.mxu1 %v417_v14  ;;  %v655_v13 = vld [vmem:[#allocation2 + $0x478] sm:$0xff]  ;;  %v162_v14 = vld [vmem:[%s5218_s0 + $0x110] sm:$0xff] }
  0x9c   :  { %2032 = vmatprep.mubr.f32.mxu0 %v425_v15  ;;  %v909_v15 = vld [vmem:[#allocation2 + $0xc68] sm:$0xff] }
  0x9d   :  { %v921_v63 = vld [vmem:[#allocation2 + $0xcc8] sm:$0xff] }
  0x9e   :  { %1197 = vmatmul.mubr.f32.gmra.mrb[36].mxu1 %v416_v16  ;;  %v911_v16 = vld [vmem:[#allocation2 + $0xc78] sm:$0xff] }
  0x9f   :  { %2033 = vmatmul.mubr.f32.gmra.mrb[36].mxu0 %v424_v17  ;;  %1202 = vmatprep.mubr.f32.mxu1 %v433_v18  ;;  %v170_v17 = vld [vmem:[%s5218_s0 + $0x150] sm:$0xff]  ;;  %v179_v18 = vld [vmem:[%s5218_s0 + $0x198] sm:$0xff] }
  0xa0   :  { %2038 = vmatprep.mubr.f32.mxu0 %v441_v19  ;;  %v187_v19 = vld [vmem:[%s5218_s0 + $0x1d8] sm:$0xff] }
  0xa2   :  { %1203 = vmatmul.mubr.f32.gmra.mrb[38].mxu1 %v432_v20  ;;  %v3094_v20 = vpack.c.bf16 %v650_v8, %v648_v7  ;;  %v664_v7 = vld [vmem:[#allocation2 + $0x4c0] sm:$0xff]  ;;  %v666_v8 = vld [vmem:[#allocation2 + $0x4d0] sm:$0xff] }
  0xa3   :  { %2039 = vmatmul.mubr.f32.gmra.mrb[38].mxu0 %v440_v21  ;;  %1208 = vmatprep.mubr.f32.mxu1 %v449_v22  ;;  %v3350_v21 = vpack.c.bf16 %v906_v11, %v904_v9  ;;  %v3096_v22 = vpack.c.bf16 %v655_v13, %v653_v12  ;;  %v920_v9 = vld [vmem:[#allocation2 + $0xcc0] sm:$0xff]  ;;  %v922_v11 = vld [vmem:[#allocation2 + $0xcd0] sm:$0xff]  ;;  %v669_v12 = vld [vmem:[#allocation2 + $0x4e8] sm:$0xff] }
  0xa4   :  { %2044 = vmatprep.mubr.f32.mxu0 %v457_v23  ;;  %v652_v23 = vld [vmem:[#allocation2 + $0x460] sm:$0xff]  ;;  %v671_v13 = vld [vmem:[#allocation2 + $0x4f8] sm:$0xff] }
  0xa6   :  { %1209 = vmatmul.mubr.f32.gmra.mrb[40].mxu1 %v448_v24  ;;  %v654_v24 = vld [vmem:[#allocation2 + $0x470] sm:$0xff] }
  0xa7   :  { %2045 = vmatmul.mubr.f32.gmra.mrb[40].mxu0 %v456_v25  ;;  %1214 = vmatprep.mubr.f32.mxu1 %v465_v26  ;;  %v908_v25 = vld [vmem:[#allocation2 + $0xc60] sm:$0xff]  ;;  %v3352_v26 = vpack.c.bf16 %v911_v16, %v909_v15  ;;  %v925_v15 = vld [vmem:[#allocation2 + $0xce8] sm:$0xff]  ;;  %v927_v16 = vld [vmem:[#allocation2 + $0xcf8] sm:$0xff] }
  0xa8   :  { %2050 = vmatprep.mubr.f32.mxu0 %v473_v27  ;;  %v910_v27 = vld [vmem:[#allocation2 + $0xc70] sm:$0xff] }
  0xaa   :  { %1215 = vmatmul.mubr.f32.gmra.mrb[42].mxu1 %v464_v28  ;;  %v657_v28 = vld [vmem:[#allocation2 + $0x488] sm:$0xff] }
  0xab   :  { %2051 = vmatmul.mubr.f32.gmra.mrb[42].mxu0 %v472_v29  ;;  %1220 = vmatprep.mubr.f32.mxu1 %v481_v30  ;;  %v659_v29 = vld [vmem:[#allocation2 + $0x498] sm:$0xff]  ;;  %v178_v30 = vld [vmem:[%s5218_s0 + $0x190] sm:$0xff] }
  0xac   :  { %2056 = vmatprep.mubr.f32.mxu0 %v489_v31  ;;  %v913_v31 = vld [vmem:[#allocation2 + $0xc88] sm:$0xff] }
  0xae   :  { %1221 = vmatmul.mubr.f32.gmra.mrb[44].mxu1 %v480_v32  ;;  %v915_v32 = vld [vmem:[#allocation2 + $0xc98] sm:$0xff] }
  0xaf   :  { %2057 = vmatmul.mubr.f32.gmra.mrb[44].mxu0 %v488_v33  ;;  %1226 = vmatprep.mubr.f32.mxu1 %v497_v34  ;;  %v186_v33 = vld [vmem:[%s5218_s0 + $0x1d0] sm:$0xff]  ;;  %v195_v34 = vld [vmem:[%s5218_s0 + $0x218] sm:$0xff]  ;;  %v3356_v42 = vpack.c.bf16 %v915_v32, %v913_v31  ;;  %v931_v32 = vld [vmem:[#allocation2 + $0xd18] sm:$0xff] }
  0xb0   :  { %2062 = vmatprep.mubr.f32.mxu0 %v505_v35  ;;  %v203_v35 = vld [vmem:[%s5218_s0 + $0x258] sm:$0xff]  ;;  %v929_v31 = vld [vmem:[#allocation2 + $0xd08] sm:$0xff] }
  0xb2   :  { %1227 = vmatmul.mubr.f32.gmra.mrb[46].mxu1 %v496_v36  ;;  %v3098_v36 = vpack.c.bf16 %v654_v24, %v652_v23  ;;  %v668_v23 = vld [vmem:[#allocation2 + $0x4e0] sm:$0xff]  ;;  %v670_v24 = vld [vmem:[#allocation2 + $0x4f0] sm:$0xff] }
  0xb3   :  { %2063 = vmatmul.mubr.f32.gmra.mrb[46].mxu0 %v504_v37  ;;  %1297 = vmatprep.mubr.f32.mxu1 %v131_v38  ;;  %v3354_v37 = vpack.c.bf16 %v910_v27, %v908_v25  ;;  %v3100_v38 = vpack.c.bf16 %v659_v29, %v657_v28  ;;  %v924_v25 = vld [vmem:[#allocation2 + $0xce0] sm:$0xff]  ;;  %v926_v27 = vld [vmem:[#allocation2 + $0xcf0] sm:$0xff]  ;;  %v673_v28 = vld [vmem:[#allocation2 + $0x508] sm:$0xff] }
  0xb4   :  { %2133 = vmatprep.mubr.f32.mxu0 %v139_v41  ;;  %v912_v41 = vld [vmem:[#allocation2 + $0xc80] sm:$0xff]  ;;  %v675_v29 = vld [vmem:[#allocation2 + $0x518] sm:$0xff] }
  0xb6   :  { %1298 = vmatmul.mubr.f32.vlgmr.msra.gmra.mrb[0].mxu1 %v130_v46  ;;  %v194_v46 = vld [vmem:[%s5218_s0 + $0x210] sm:$0xff] }
  0xb7   :  { %2134 = vmatmul.mubr.f32.vlgmr.msra.gmra.mrb[0].mxu0 %v138_v50  ;;  %3087 = vmatpush1.bf16.msra.mxu1 %v3086_v47  ;;  %v917_v47 = vld [vmem:[#allocation2 + $0xca8] sm:$0xff]  ;;  %v211_v50 = vld [vmem:[%s5218_s0 + $0x298] sm:$0xff] }
  0xb8   :  { %3343 = vmatpush1.bf16.msra.mxu0 %v3342_v51  ;;  %1303 = vmatprep.mubr.f32.mxu1 %v147_v52  ;;  %v219_v51 = vld [vmem:[%s5218_s0 + $0x2d8] sm:$0xff]  ;;  %v3102_v52 = vpack.c.bf16 %v658_v40, %v656_v39  ;;  %v672_v39 = vld [vmem:[#allocation2 + $0x500] sm:$0xff] }
  0xb9   :  { %2139 = vmatprep.mubr.f32.mxu0 %v155_v53  ;;  %3089 = vmatprep.subr.bf16.mxu1 %v3088_v54  ;;  %v3358_v53 = vpack.c.bf16 %v914_v43, %v912_v41  ;;  %v3104_v54 = vpack.c.bf16 %v663_v45, %v661_v44  ;;  %v674_v40 = vld [vmem:[#allocation2 + $0x510] sm:$0xff]  ;;  %v928_v41 = vld [vmem:[#allocation2 + $0xd00] sm:$0xff]  ;;  %v677_v44 = vld [vmem:[#allocation2 + $0x528] sm:$0xff] }
  0xba   :  { %1304 = vmatmul.mubr.f32.gmra.mrb[2].mxu1 %v146_v62  ;;  %3345 = vmatprep.subr.bf16.mxu0 %v3344_v58  ;;  %v3360_v58 = vpack.c.bf16 %v919_v48, %v917_v47  ;;  %v210_v62 = vld [vmem:[%s5218_s0 + $0x290] sm:$0xff]  ;;  %v930_v43 = vld [vmem:[#allocation2 + $0xd10] sm:$0xff]  ;;  %v679_v45 = vld [vmem:[#allocation2 + $0x538] sm:$0xff] }
  0xbb   :  { %2140 = vmatmul.mubr.f32.gmra.mrb[2].mxu0 %v154_v1  ;;  %1309 = vmatprep.mubr.f32.mxu1 %v163_v2  ;;  %v218_v1 = vld [vmem:[%s5218_s0 + $0x2d0] sm:$0xff]  ;;  %v227_v2 = vld [vmem:[%s5218_s0 + $0x318] sm:$0xff]  ;;  %v935_v48 = vld [vmem:[#allocation2 + $0xd38] sm:$0xff] }
  0xbc   :  { %3091 = vmatpush1.bf16.msra.mxu1 %v3090_v3  ;;  %2145 = vmatprep.mubr.f32.mxu0 %v171_v4  ;;  %v235_v3 = vld [vmem:[%s5218_s0 + $0x358] sm:$0xff]  ;;  %v3106_v4 = vpack.c.bf16 %v662_v56, %v660_v55  ;;  %v933_v47 = vld [vmem:[#allocation2 + $0xd28] sm:$0xff]  ;;  %v676_v55 = vld [vmem:[#allocation2 + $0x520] sm:$0xff] }
  0xbd   :  { %3347 = vmatpush1.bf16.msra.mxu0 %v3346_v5  ;;  %3093 = vmatprep.subr.bf16.mxu1 %v3092_v6  ;;  %v3362_v5 = vpack.c.bf16 %v918_v59, %v916_v57  ;;  %v3108_v6 = vpack.c.bf16 %v667_v61, %v665_v60  ;;  %v678_v56 = vld [vmem:[#allocation2 + $0x530] sm:$0xff]  ;;  %v932_v57 = vld [vmem:[#allocation2 + $0xd20] sm:$0xff]  ;;  %v681_v60 = vld [vmem:[#allocation2 + $0x548] sm:$0xff] }
  0xbe   :  { %1310 = vmatmul.mubr.f32.gmra.mrb[4].mxu1 %v162_v14  ;;  %3349 = vmatprep.subr.bf16.mxu0 %v3348_v10  ;;  %v3364_v10 = vpack.c.bf16 %v923_v0, %v921_v63  ;;  %v226_v14 = vld [vmem:[%s5218_s0 + $0x310] sm:$0xff]  ;;  %v934_v59 = vld [vmem:[#allocation2 + $0xd30] sm:$0xff]  ;;  %v683_v61 = vld [vmem:[#allocation2 + $0x558] sm:$0xff] }
  0xbf   :  { %2146 = vmatmul.mubr.f32.gmra.mrb[4].mxu0 %v170_v17  ;;  %1315 = vmatprep.mubr.f32.mxu1 %v179_v18  ;;  %v234_v17 = vld [vmem:[%s5218_s0 + $0x350] sm:$0xff]  ;;  %v243_v18 = vld [vmem:[%s5218_s0 + $0x398] sm:$0xff]  ;;  %v939_v0 = vld [vmem:[#allocation2 + $0xd58] sm:$0xff] }
  0xc0   :  { %2151 = vmatprep.mubr.f32.mxu0 %v187_v19  ;;  %3095 = vmatpush1.bf16.msra.mxu1 %v3094_v20  ;;  %v251_v19 = vld [vmem:[%s5218_s0 + $0x3d8] sm:$0xff]  ;;  %v3110_v20 = vpack.c.bf16 %v666_v8, %v664_v7  ;;  %v937_v63 = vld [vmem:[#allocation2 + $0xd48] sm:$0xff]  ;;  %v680_v7 = vld [vmem:[#allocation2 + $0x540] sm:$0xff] }
  0xc1   :  { %3351 = vmatpush1.bf16.msra.mxu0 %v3350_v21  ;;  %3097 = vmatprep.subr.bf16.mxu1 %v3096_v22  ;;  %v3366_v21 = vpack.c.bf16 %v922_v11, %v920_v9  ;;  %v3112_v22 = vpack.c.bf16 %v671_v13, %v669_v12  ;;  %v682_v8 = vld [vmem:[#allocation2 + $0x550] sm:$0xff]  ;;  %v936_v9 = vld [vmem:[#allocation2 + $0xd40] sm:$0xff]  ;;  %v685_v12 = vld [vmem:[#allocation2 + $0x568] sm:$0xff] }
  0xc2   :  { %1316 = vmatmul.mubr.f32.gmra.mrb[6].mxu1 %v178_v30  ;;  %3353 = vmatprep.subr.bf16.mxu0 %v3352_v26  ;;  %v3368_v26 = vpack.c.bf16 %v927_v16, %v925_v15  ;;  %v242_v30 = vld [vmem:[%s5218_s0 + $0x390] sm:$0xff]  ;;  %v938_v11 = vld [vmem:[#allocation2 + $0xd50] sm:$0xff]  ;;  %v687_v13 = vld [vmem:[#allocation2 + $0x578] sm:$0xff] }
  0xc3   :  { %2152 = vmatmul.mubr.f32.gmra.mrb[6].mxu0 %v186_v33  ;;  %1321 = vmatprep.mubr.f32.mxu1 %v195_v34  ;;  %v250_v33 = vld [vmem:[%s5218_s0 + $0x3d0] sm:$0xff]  ;;  %v259_v34 = vld [vmem:[%s5218_s0 + $0x418] sm:$0xff]  ;;  %v943_v16 = vld [vmem:[#allocation2 + $0xd78] sm:$0xff] }
  0xc4   :  { %2157 = vmatprep.mubr.f32.mxu0 %v203_v35  ;;  %3099 = vmatpush1.bf16.msra.mxu1 %v3098_v36  ;;  %v267_v35 = vld [vmem:[%s5218_s0 + $0x458] sm:$0xff]  ;;  %v3114_v36 = vpack.c.bf16 %v670_v24, %v668_v23  ;;  %v941_v15 = vld [vmem:[#allocation2 + $0xd68] sm:$0xff]  ;;  %v684_v23 = vld [vmem:[#allocation2 + $0x560] sm:$0xff] }
  0xc5   :  { %3355 = vmatpush1.bf16.msra.mxu0 %v3354_v37  ;;  %3101 = vmatprep.subr.bf16.mxu1 %v3100_v38  ;;  %v3370_v37 = vpack.c.bf16 %v926_v27, %v924_v25  ;;  %v3116_v38 = vpack.c.bf16 %v675_v29, %v673_v28  ;;  %v686_v24 = vld [vmem:[#allocation2 + $0x570] sm:$0xff]  ;;  %v940_v25 = vld [vmem:[#allocation2 + $0xd60] sm:$0xff]  ;;  %v689_v28 = vld [vmem:[#allocation2 + $0x588] sm:$0xff] }
  0xc6   :  { %1322 = vmatmul.mubr.f32.gmra.mrb[8].mxu1 %v194_v46  ;;  %3357 = vmatprep.subr.bf16.mxu0 %v3356_v42  ;;  %v3372_v42 = vpack.c.bf16 %v931_v32, %v929_v31  ;;  %v258_v46 = vld [vmem:[%s5218_s0 + $0x410] sm:$0xff]  ;;  %v942_v27 = vld [vmem:[#allocation2 + $0xd70] sm:$0xff]  ;;  %v691_v29 = vld [vmem:[#allocation2 + $0x598] sm:$0xff] }
  0xc7   :  { %2158 = vmatmul.mubr.f32.gmra.mrb[8].mxu0 %v202_v49  ;;  %1327 = vmatprep.mubr.f32.mxu1 %v211_v50  ;;  %v266_v49 = vld [vmem:[%s5218_s0 + $0x450] sm:$0xff]  ;;  %v275_v50 = vld [vmem:[%s5218_s0 + $0x498] sm:$0xff]  ;;  %v947_v32 = vld [vmem:[#allocation2 + $0xd98] sm:$0xff] }
  0xc8   :  { %2163 = vmatprep.mubr.f32.mxu0 %v219_v51  ;;  %3103 = vmatpush1.bf16.msra.mxu1 %v3102_v52  ;;  %v283_v51 = vld [vmem:[%s5218_s0 + $0x4d8] sm:$0xff]  ;;  %v3118_v52 = vpack.c.bf16 %v674_v40, %v672_v39  ;;  %v945_v31 = vld [vmem:[#allocation2 + $0xd88] sm:$0xff]  ;;  %v688_v39 = vld [vmem:[#allocation2 + $0x580] sm:$0xff] }
  0xc9   :  { %3359 = vmatpush1.bf16.msra.mxu0 %v3358_v53  ;;  %3105 = vmatprep.subr.bf16.mxu1 %v3104_v54  ;;  %v3374_v53 = vpack.c.bf16 %v930_v43, %v928_v41  ;;  %v3120_v54 = vpack.c.bf16 %v679_v45, %v677_v44  ;;  %v690_v40 = vld [vmem:[#allocation2 + $0x590] sm:$0xff]  ;;  %v944_v41 = vld [vmem:[#allocation2 + $0xd80] sm:$0xff]  ;;  %v693_v44 = vld [vmem:[#allocation2 + $0x5a8] sm:$0xff] }
  0xca   :  { %1328 = vmatmul.mubr.f32.gmra.mrb[10].mxu1 %v210_v62  ;;  %3361 = vmatprep.subr.bf16.mxu0 %v3360_v58  ;;  %v3376_v58 = vpack.c.bf16 %v935_v48, %v933_v47  ;;  %v274_v62 = vld [vmem:[%s5218_s0 + $0x490] sm:$0xff]  ;;  %v946_v43 = vld [vmem:[#allocation2 + $0xd90] sm:$0xff]  ;;  %v695_v45 = vld [vmem:[#allocation2 + $0x5b8] sm:$0xff] }
  0xcb   :  { %2164 = vmatmul.mubr.f32.gmra.mrb[10].mxu0 %v218_v1  ;;  %1333 = vmatprep.mubr.f32.mxu1 %v227_v2  ;;  %v282_v1 = vld [vmem:[%s5218_s0 + $0x4d0] sm:$0xff]  ;;  %v291_v2 = vld [vmem:[%s5218_s0 + $0x518] sm:$0xff]  ;;  %v951_v48 = vld [vmem:[#allocation2 + $0xdb8] sm:$0xff] }
  0xcc   :  { %2169 = vmatprep.mubr.f32.mxu0 %v235_v3  ;;  %3107 = vmatpush1.bf16.msra.mxu1 %v3106_v4  ;;  %v299_v3 = vld [vmem:[%s5218_s0 + $0x558] sm:$0xff]  ;;  %v3122_v4 = vpack.c.bf16 %v678_v56, %v676_v55  ;;  %v949_v47 = vld [vmem:[#allocation2 + $0xda8] sm:$0xff]  ;;  %v692_v55 = vld [vmem:[#allocation2 + $0x5a0] sm:$0xff] }
  0xcd   :  { %3363 = vmatpush1.bf16.msra.mxu0 %v3362_v5  ;;  %3109 = vmatprep.subr.bf16.mxu1 %v3108_v6  ;;  %v3378_v5 = vpack.c.bf16 %v934_v59, %v932_v57  ;;  %v3124_v6 = vpack.c.bf16 %v683_v61, %v681_v60  ;;  %v694_v56 = vld [vmem:[#allocation2 + $0x5b0] sm:$0xff]  ;;  %v948_v57 = vld [vmem:[#allocation2 + $0xda0] sm:$0xff]  ;;  %v697_v60 = vld [vmem:[#allocation2 + $0x5c8] sm:$0xff] }
  0xce   :  { %1334 = vmatmul.mubr.f32.gmra.mrb[12].mxu1 %v226_v14  ;;  %3365 = vmatprep.subr.bf16.mxu0 %v3364_v10  ;;  %v3380_v10 = vpack.c.bf16 %v939_v0, %v937_v63  ;;  %v290_v14 = vld [vmem:[%s5218_s0 + $0x510] sm:$0xff]  ;;  %v950_v59 = vld [vmem:[#allocation2 + $0xdb0] sm:$0xff]  ;;  %v699_v61 = vld [vmem:[#allocation2 + $0x5d8] sm:$0xff] }
  0xcf   :  { %2170 = vmatmul.mubr.f32.gmra.mrb[12].mxu0 %v234_v17  ;;  %1339 = vmatprep.mubr.f32.mxu1 %v243_v18  ;;  %v298_v17 = vld [vmem:[%s5218_s0 + $0x550] sm:$0xff]  ;;  %v307_v18 = vld [vmem:[%s5218_s0 + $0x598] sm:$0xff]  ;;  %v955_v0 = vld [vmem:[#allocation2 + $0xdd8] sm:$0xff] }
  0xd0   :  { %2175 = vmatprep.mubr.f32.mxu0 %v251_v19  ;;  %3111 = vmatpush1.bf16.msra.mxu1 %v3110_v20  ;;  %v315_v19 = vld [vmem:[%s5218_s0 + $0x5d8] sm:$0xff]  ;;  %v3126_v20 = vpack.c.bf16 %v682_v8, %v680_v7  ;;  %v953_v63 = vld [vmem:[#allocation2 + $0xdc8] sm:$0xff]  ;;  %v696_v7 = vld [vmem:[#allocation2 + $0x5c0] sm:$0xff] }
  0xd1   :  { %3367 = vmatpush1.bf16.msra.mxu0 %v3366_v21  ;;  %3113 = vmatprep.subr.bf16.mxu1 %v3112_v22  ;;  %v3382_v21 = vpack.c.bf16 %v938_v11, %v936_v9  ;;  %v3128_v22 = vpack.c.bf16 %v687_v13, %v685_v12  ;;  %v698_v8 = vld [vmem:[#allocation2 + $0x5d0] sm:$0xff]  ;;  %v952_v9 = vld [vmem:[#allocation2 + $0xdc0] sm:$0xff]  ;;  %v701_v12 = vld [vmem:[#allocation2 + $0x5e8] sm:$0xff] }
  0xd2   :  { %1340 = vmatmul.mubr.f32.gmra.mrb[14].mxu1 %v242_v30  ;;  %3369 = vmatprep.subr.bf16.mxu0 %v3368_v26  ;;  %v3384_v26 = vpack.c.bf16 %v943_v16, %v941_v15  ;;  %v306_v30 = vld [vmem:[%s5218_s0 + $0x590] sm:$0xff]  ;;  %v954_v11 = vld [vmem:[#allocation2 + $0xdd0] sm:$0xff]  ;;  %v703_v13 = vld [vmem:[#allocation2 + $0x5f8] sm:$0xff] }
  0xd3   :  { %2176 = vmatmul.mubr.f32.gmra.mrb[14].mxu0 %v250_v33  ;;  %1345 = vmatprep.mubr.f32.mxu1 %v259_v34  ;;  %v314_v33 = vld [vmem:[%s5218_s0 + $0x5d0] sm:$0xff]  ;;  %v323_v34 = vld [vmem:[%s5218_s0 + $0x618] sm:$0xff]  ;;  %v959_v16 = vld [vmem:[#allocation2 + $0xdf8] sm:$0xff] }
  0xd4   :  { %2181 = vmatprep.mubr.f32.mxu0 %v267_v35  ;;  %3115 = vmatpush1.bf16.msra.mxu1 %v3114_v36  ;;  %v331_v35 = vld [vmem:[%s5218_s0 + $0x658] sm:$0xff]  ;;  %v3130_v36 = vpack.c.bf16 %v686_v24, %v684_v23  ;;  %v957_v15 = vld [vmem:[#allocation2 + $0xde8] sm:$0xff]  ;;  %v700_v23 = vld [vmem:[#allocation2 + $0x5e0] sm:$0xff] }
  0xd5   :  { %3371 = vmatpush1.bf16.msra.mxu0 %v3370_v37  ;;  %3117 = vmatprep.subr.bf16.mxu1 %v3116_v38  ;;  %v3386_v37 = vpack.c.bf16 %v942_v27, %v940_v25  ;;  %v3132_v38 = vpack.c.bf16 %v691_v29, %v689_v28  ;;  %v702_v24 = vld [vmem:[#allocation2 + $0x5f0] sm:$0xff]  ;;  %v956_v25 = vld [vmem:[#allocation2 + $0xde0] sm:$0xff]  ;;  %v705_v28 = vld [vmem:[#allocation2 + $0x608] sm:$0xff] }
  0xd6   :  { %1346 = vmatmul.mubr.f32.gmra.mrb[16].mxu1 %v258_v46  ;;  %3373 = vmatprep.subr.bf16.mxu0 %v3372_v42  ;;  %v3388_v42 = vpack.c.bf16 %v947_v32, %v945_v31  ;;  %v322_v46 = vld [vmem:[%s5218_s0 + $0x610] sm:$0xff]  ;;  %v958_v27 = vld [vmem:[#allocation2 + $0xdf0] sm:$0xff]  ;;  %v707_v29 = vld [vmem:[#allocation2 + $0x618] sm:$0xff] }
  0xd7   :  { %2182 = vmatmul.mubr.f32.gmra.mrb[16].mxu0 %v266_v49  ;;  %1351 = vmatprep.mubr.f32.mxu1 %v275_v50  ;;  %v330_v49 = vld [vmem:[%s5218_s0 + $0x650] sm:$0xff]  ;;  %v339_v50 = vld [vmem:[%s5218_s0 + $0x698] sm:$0xff]  ;;  %v963_v32 = vld [vmem:[#allocation2 + $0xe18] sm:$0xff] }
  0xd8   :  { %2187 = vmatprep.mubr.f32.mxu0 %v283_v51  ;;  %3119 = vmatpush1.bf16.msra.mxu1 %v3118_v52  ;;  %v347_v51 = vld [vmem:[%s5218_s0 + $0x6d8] sm:$0xff]  ;;  %v3134_v52 = vpack.c.bf16 %v690_v40, %v688_v39  ;;  %v961_v31 = vld [vmem:[#allocation2 + $0xe08] sm:$0xff] }
  0xd9   :  { %3375 = vmatpush1.bf16.msra.mxu0 %v3374_v53  ;;  %3121 = vmatprep.subr.bf16.mxu1 %v3120_v54  ;;  %v3390_v53 = vpack.c.bf16 %v946_v43, %v944_v41  ;;  %v3136_v54 = vpack.c.bf16 %v695_v45, %v693_v44  ;;  %v3404_v39 = vpack.c.bf16 %v963_v32, %v961_v31  ;;  %v386_v40 = vld [vmem:[%s5218_s0 + $0x810] sm:$0xff]  ;;  %v411_v43 = vld [vmem:[%s5218_s0 + $0x8d8] sm:$0xff]  ;;  %v971_v32 = vld [vmem:[#allocation2 + $0xe58] sm:$0xff] }
  0xda   :  { %1352 = vmatmul.mubr.f32.gmra.mrb[18].mxu1 %v274_v62  ;;  %3377 = vmatprep.subr.bf16.mxu0 %v3376_v58  ;;  %v3392_v58 = vpack.c.bf16 %v951_v48, %v949_v47  ;;  %v338_v62 = vld [vmem:[%s5218_s0 + $0x690] sm:$0xff]  ;;  %v427_v47 = vld [vmem:[%s5218_s0 + $0x958] sm:$0xff] }
  0xdb   :  { %2188 = vmatmul.mubr.f32.gmra.mrb[18].mxu0 %v282_v1  ;;  %1357 = vmatprep.mubr.f32.mxu1 %v291_v2  ;;  %v346_v1 = vld [vmem:[%s5218_s0 + $0x6d0] sm:$0xff]  ;;  %v355_v2 = vld [vmem:[%s5218_s0 + $0x718] sm:$0xff] }
  0xdc   :  { %2193 = vmatprep.mubr.f32.mxu0 %v299_v3  ;;  %3123 = vmatpush1.bf16.msra.mxu1 %v3122_v4  ;;  %v363_v3 = vld [vmem:[%s5218_s0 + $0x758] sm:$0xff]  ;;  %v3138_v4 = vpack.c.bf16 %v694_v56, %v692_v55  ;;  %v394_v41 = vld [vmem:[%s5218_s0 + $0x850] sm:$0xff] }
  0xdd   :  { %3379 = vmatpush1.bf16.msra.mxu0 %v3378_v5  ;;  %3125 = vmatprep.subr.bf16.mxu1 %v3124_v6  ;;  %v3394_v5 = vpack.c.bf16 %v950_v59, %v948_v57  ;;  %v3140_v6 = vpack.c.bf16 %v699_v61, %v697_v60  ;;  %v402_v44 = vld [vmem:[%s5218_s0 + $0x890] sm:$0xff]  ;;  %v459_v55 = vld [vmem:[%s5218_s0 + $0xa58] sm:$0xff] }
  0xde   :  { %1358 = vmatmul.mubr.f32.gmra.mrb[20].mxu1 %v290_v14  ;;  %3381 = vmatprep.subr.bf16.mxu0 %v3380_v10  ;;  %v3396_v10 = vpack.c.bf16 %v955_v0, %v953_v63  ;;  %v354_v14 = vld [vmem:[%s5218_s0 + $0x710] sm:$0xff]  ;;  %v475_v59 = vld [vmem:[%s5218_s0 + $0xad8] sm:$0xff] }
  0xdf   :  { %2194 = vmatmul.mubr.f32.gmra.mrb[20].mxu0 %v298_v17  ;;  %1363 = vmatprep.mubr.f32.mxu1 %v307_v18  ;;  %v362_v17 = vld [vmem:[%s5218_s0 + $0x750] sm:$0xff]  ;;  %v371_v18 = vld [vmem:[%s5218_s0 + $0x798] sm:$0xff] }
  0xe0   :  { %2199 = vmatprep.mubr.f32.mxu0 %v315_v19  ;;  %3127 = vmatpush1.bf16.msra.mxu1 %v3126_v20  ;;  %v379_v19 = vld [vmem:[%s5218_s0 + $0x7d8] sm:$0xff]  ;;  %v3142_v20 = vpack.c.bf16 %v698_v8, %v696_v7  ;;  %v410_v45 = vld [vmem:[%s5218_s0 + $0x8d0] sm:$0xff]  ;;  %v704_v7 = vld [vmem:[#allocation2 + $0x600] sm:$0xff] }
  0xe1   :  { %3383 = vmatpush1.bf16.msra.mxu0 %v3382_v21  ;;  %3129 = vmatprep.subr.bf16.mxu1 %v3128_v22  ;;  %v3398_v21 = vpack.c.bf16 %v954_v11, %v952_v9  ;;  %v3144_v22 = vpack.c.bf16 %v703_v13, %v701_v12  ;;  %v418_v48 = vld [vmem:[%s5218_s0 + $0x910] sm:$0xff]  ;;  %v491_v63 = vld [vmem:[%s5218_s0 + $0xb58] sm:$0xff]  ;;  %v141_v9 = vld [vmem:[%s5218_s0 + $0x68] sm:$0xff] }
  0xe2   :  { %1364 = vmatmul.mubr.f32.gmra.mrb[22].mxu1 %v306_v30  ;;  %3385 = vmatprep.subr.bf16.mxu0 %v3384_v26  ;;  %v3400_v26 = vpack.c.bf16 %v959_v16, %v957_v15  ;;  %v370_v30 = vld [vmem:[%s5218_s0 + $0x790] sm:$0xff]  ;;  %v706_v8 = vld [vmem:[#allocation2 + $0x610] sm:$0xff]  ;;  %v711_v13 = vld [vmem:[#allocation2 + $0x638] sm:$0xff] }
  0xe3   :  { %2200 = vmatmul.mubr.f32.gmra.mrb[22].mxu0 %v314_v33  ;;  %1369 = vmatprep.mubr.f32.mxu1 %v323_v34  ;;  %v378_v33 = vld [vmem:[%s5218_s0 + $0x7d0] sm:$0xff]  ;;  %v387_v34 = vld [vmem:[%s5218_s0 + $0x818] sm:$0xff]  ;;  %v3150_v15 = vpack.c.bf16 %v706_v8, %v704_v7  ;;  %v720_v7 = vld [vmem:[#allocation2 + $0x680] sm:$0xff] }
  0xe4   :  { %2205 = vmatprep.mubr.f32.mxu0 %v331_v35  ;;  %3131 = vmatpush1.bf16.msra.mxu1 %v3130_v36  ;;  %v3146_v35 = vpack.c.bf16 %v702_v24, %v700_v23  ;;  %v395_v36 = vld [vmem:[%s5218_s0 + $0x858] sm:$0xff]  ;;  %v450_v56 = vld [vmem:[%s5218_s0 + $0xa10] sm:$0xff]  ;;  %v708_v23 = vld [vmem:[#allocation2 + $0x620] sm:$0xff] }
  0xe5   :  { %3387 = vmatpush1.bf16.msra.mxu0 %v3386_v37  ;;  %3133 = vmatprep.subr.bf16.mxu1 %v3132_v38  ;;  %v3402_v37 = vpack.c.bf16 %v958_v27, %v956_v25  ;;  %v3148_v38 = vpack.c.bf16 %v707_v29, %v705_v28  ;;  %v458_v57 = vld [vmem:[%s5218_s0 + $0xa50] sm:$0xff]  ;;  %v962_v11 = vld [vmem:[#allocation2 + $0xe10] sm:$0xff]  ;;  %v964_v25 = vld [vmem:[#allocation2 + $0xe20] sm:$0xff] }
  0xe6   :  { %1370 = vmatmul.mubr.f32.gmra.mrb[24].mxu1 %v322_v46  ;;  %3389 = vmatprep.subr.bf16.mxu0 %v3388_v42  ;;  %v403_v42 = vld [vmem:[%s5218_s0 + $0x898] sm:$0xff]  ;;  %v466_v60 = vld [vmem:[%s5218_s0 + $0xa90] sm:$0xff]  ;;  %v715_v29 = vld [vmem:[#allocation2 + $0x658] sm:$0xff] }
  0xe7   :  { %2206 = vmatmul.mubr.f32.gmra.mrb[24].mxu0 %v330_v49  ;;  %1375 = vmatprep.mubr.f32.mxu1 %v339_v50  ;;  %v419_v46 = vld [vmem:[%s5218_s0 + $0x918] sm:$0xff]  ;;  %v426_v49 = vld [vmem:[%s5218_s0 + $0x950] sm:$0xff] }
  0xe8   :  { %2211 = vmatprep.mubr.f32.mxu0 %v347_v51  ;;  %3135 = vmatpush1.bf16.msra.mxu1 %v3134_v52  ;;  %v435_v50 = vld [vmem:[%s5218_s0 + $0x998] sm:$0xff]  ;;  %v434_v52 = vld [vmem:[%s5218_s0 + $0x990] sm:$0xff] }
  0xe9   :  { %3391 = vmatpush1.bf16.msra.mxu0 %v3390_v53  ;;  %3137 = vmatprep.subr.bf16.mxu1 %v3136_v54  ;;  %v443_v51 = vld [vmem:[%s5218_s0 + $0x9d8] sm:$0xff]  ;;  %v442_v53 = vld [vmem:[%s5218_s0 + $0x9d0] sm:$0xff] }
  0xea   :  { %1376 = vmatmul.mubr.f32.gmra.mrb[26].mxu1 %v338_v62  ;;  %3393 = vmatprep.subr.bf16.mxu0 %v3392_v58  ;;  %v451_v54 = vld [vmem:[%s5218_s0 + $0xa18] sm:$0xff]  ;;  %v474_v61 = vld [vmem:[%s5218_s0 + $0xad0] sm:$0xff] }
  0xeb   :  { %2212 = vmatmul.mubr.f32.gmra.mrb[26].mxu0 %v346_v1  ;;  %1381 = vmatprep.mubr.f32.mxu1 %v355_v2  ;;  %v467_v58 = vld [vmem:[%s5218_s0 + $0xa98] sm:$0xff]  ;;  %v482_v0 = vld [vmem:[%s5218_s0 + $0xb10] sm:$0xff] }
  0xec   :  { %2217 = vmatprep.mubr.f32.mxu0 %v363_v3  ;;  %3139 = vmatpush1.bf16.msra.mxu1 %v3138_v4  ;;  %v483_v62 = vld [vmem:[%s5218_s0 + $0xb18] sm:$0xff]  ;;  %v490_v1 = vld [vmem:[%s5218_s0 + $0xb50] sm:$0xff] }
  0xed   :  { %3395 = vmatpush1.bf16.msra.mxu0 %v3394_v5  ;;  %3141 = vmatprep.subr.bf16.mxu1 %v3140_v6  ;;  %v499_v2 = vld [vmem:[%s5218_s0 + $0xb98] sm:$0xff]  ;;  %v498_v4 = vld [vmem:[%s5218_s0 + $0xb90] sm:$0xff]  ;;  %v133_v6 = vld [vmem:[%s5218_s0 + $0x28] sm:$0xff] }
  0xee   :  { %1382 = vmatmul.mubr.f32.gmra.mrb[28].mxu1 %v354_v14  ;;  %3397 = vmatprep.subr.bf16.mxu0 %v3396_v10  ;;  %v507_v3 = vld [vmem:[%s5218_s0 + $0xbd8] sm:$0xff]  ;;  %v506_v5 = vld [vmem:[%s5218_s0 + $0xbd0] sm:$0xff]  ;;  %v960_v10 = vld [vmem:[#allocation2 + $0xe00] sm:$0xff] }
  0xef   :  { %2218 = vmatmul.mubr.f32.gmra.mrb[28].mxu0 %v362_v17  ;;  %1387 = vmatprep.mubr.f32.mxu1 %v371_v18  ;;  %v709_v12 = vld [vmem:[#allocation2 + $0x628] sm:$0xff]  ;;  %v132_v14 = vld [vmem:[%s5218_s0 + $0x20] sm:$0xff]  ;;  %v710_v24 = vld [vmem:[#allocation2 + $0x630] sm:$0xff] }
  0xf0   :  { %2223 = vmatprep.mubr.f32.mxu0 %v379_v19  ;;  %3143 = vmatpush1.bf16.msra.mxu1 %v3142_v20  ;;  %v965_v16 = vld [vmem:[#allocation2 + $0xe28] sm:$0xff]  ;;  %v967_v17 = vld [vmem:[#allocation2 + $0xe38] sm:$0xff]  ;;  %v3406_v19 = vpack.c.bf16 %v962_v11, %v960_v10  ;;  %v149_v20 = vld [vmem:[%s5218_s0 + $0xa8] sm:$0xff] }
  0xf1   :  { %3399 = vmatpush1.bf16.msra.mxu0 %v3398_v21  ;;  %3145 = vmatprep.subr.bf16.mxu1 %v3144_v22  ;;  %v140_v18 = vld [vmem:[%s5218_s0 + $0x60] sm:$0xff]  ;;  %v157_v21 = vld [vmem:[%s5218_s0 + $0xe8] sm:$0xff]  ;;  %v3152_v22 = vpack.c.bf16 %v711_v13, %v709_v12  ;;  %v966_v27 = vld [vmem:[#allocation2 + $0xe30] sm:$0xff] }
  0xf2   :  { %1388 = vmatmul.mubr.f32.gmra.mrb[30].mxu1 %v370_v30  ;;  %3401 = vmatprep.subr.bf16.mxu0 %v3400_v26  ;;  %v3408_v26 = vpack.c.bf16 %v967_v17, %v965_v16  ;;  %v713_v28 = vld [vmem:[#allocation2 + $0x648] sm:$0xff]  ;;  %v148_v30 = vld [vmem:[%s5218_s0 + $0xa0] sm:$0xff]  ;;  %v722_v8 = vld [vmem:[#allocation2 + $0x690] sm:$0xff] }
  0xf3   :  { %2224 = vmatmul.mubr.f32.gmra.mrb[30].mxu0 %v378_v33  ;;  %1393 = vmatprep.mubr.f32.mxu1 %v387_v34  ;;  %v969_v31 = vld [vmem:[#allocation2 + $0xe48] sm:$0xff]  ;;  %v156_v33 = vld [vmem:[%s5218_s0 + $0xe0] sm:$0xff]  ;;  %v165_v34 = vld [vmem:[%s5218_s0 + $0x128] sm:$0xff] }
  0xf4   :  { %2229 = vmatprep.mubr.f32.mxu0 %v395_v36  ;;  %3147 = vmatpush1.bf16.msra.mxu1 %v3146_v35  ;;  %v3154_v35 = vpack.c.bf16 %v710_v24, %v708_v23  ;;  %v173_v36 = vld [vmem:[%s5218_s0 + $0x168] sm:$0xff]  ;;  %v978_v11 = vld [vmem:[#allocation2 + $0xe90] sm:$0xff]  ;;  %v725_v12 = vld [vmem:[#allocation2 + $0x6a8] sm:$0xff] }
  0xf5   :  { %3403 = vmatpush1.bf16.msra.mxu0 %v3402_v37  ;;  %3149 = vmatprep.subr.bf16.mxu1 %v3148_v38  ;;  %v3410_v37 = vpack.c.bf16 %v966_v27, %v964_v25  ;;  %v3156_v38 = vpack.c.bf16 %v715_v29, %v713_v28  ;;  %v727_v13 = vld [vmem:[#allocation2 + $0x6b8] sm:$0xff]  ;;  %v724_v23 = vld [vmem:[#allocation2 + $0x6a0] sm:$0xff]  ;;  %v726_v24 = vld [vmem:[#allocation2 + $0x6b0] sm:$0xff] }
  0xf6   :  { %1394 = vmatmul.mubr.f32.gmra.mrb[32].mxu1 %v386_v40  ;;  %3405 = vmatprep.subr.bf16.mxu0 %v3404_v39  ;;  %v712_v39 = vld [vmem:[#allocation2 + $0x640] sm:$0xff]  ;;  %v714_v40 = vld [vmem:[#allocation2 + $0x650] sm:$0xff]  ;;  %v983_v16 = vld [vmem:[#allocation2 + $0xeb8] sm:$0xff] }
  0xf7   :  { %2230 = vmatmul.mubr.f32.gmra.mrb[32].mxu0 %v394_v41  ;;  %1399 = vmatprep.mubr.f32.mxu1 %v403_v42  ;;  %v968_v41 = vld [vmem:[#allocation2 + $0xe40] sm:$0xff]  ;;  %v3412_v42 = vpack.c.bf16 %v971_v32, %v969_v31  ;;  %v204_v17 = vld [vmem:[%s5218_s0 + $0x260] sm:$0xff]  ;;  %v982_v27 = vld [vmem:[#allocation2 + $0xeb0] sm:$0xff] }
  0xf8   :  { %2235 = vmatprep.mubr.f32.mxu0 %v411_v43  ;;  %v970_v43 = vld [vmem:[#allocation2 + $0xe50] sm:$0xff]  ;;  %v980_v25 = vld [vmem:[#allocation2 + $0xea0] sm:$0xff]  ;;  %v729_v28 = vld [vmem:[#allocation2 + $0x6c8] sm:$0xff] }
  0xf9   :  { %v731_v29 = vld [vmem:[#allocation2 + $0x6d8] sm:$0xff]  ;;  %v985_v31 = vld [vmem:[#allocation2 + $0xec8] sm:$0xff] }
  0xfa   :  { %1400 = vmatmul.mubr.f32.gmra.mrb[34].mxu1 %v402_v44  ;;  %v717_v44 = vld [vmem:[#allocation2 + $0x668] sm:$0xff]  ;;  %v987_v32 = vld [vmem:[#allocation2 + $0xed8] sm:$0xff] }
  0xfb   :  { %2236 = vmatmul.mubr.f32.gmra.mrb[34].mxu0 %v410_v45  ;;  %1405 = vmatprep.mubr.f32.mxu1 %v419_v46  ;;  %v719_v45 = vld [vmem:[#allocation2 + $0x678] sm:$0xff] }
  0xfc   :  { %2241 = vmatprep.mubr.f32.mxu0 %v427_v47  ;;  %v164_v46 = vld [vmem:[%s5218_s0 + $0x120] sm:$0xff]  ;;  %v973_v47 = vld [vmem:[#allocation2 + $0xe68] sm:$0xff] }
  0xfe   :  { %1406 = vmatmul.mubr.f32.gmra.mrb[36].mxu1 %v418_v48  ;;  %v975_v48 = vld [vmem:[#allocation2 + $0xe78] sm:$0xff] }
  0xff   :  { %2242 = vmatmul.mubr.f32.gmra.mrb[36].mxu0 %v426_v49  ;;  %1411 = vmatprep.mubr.f32.mxu1 %v435_v50  ;;  %v172_v49 = vld [vmem:[%s5218_s0 + $0x160] sm:$0xff]  ;;  %v181_v50 = vld [vmem:[%s5218_s0 + $0x1a8] sm:$0xff] }
 0x100   :  { %2247 = vmatprep.mubr.f32.mxu0 %v443_v51  ;;  %v189_v51 = vld [vmem:[%s5218_s0 + $0x1e8] sm:$0xff] }
 0x102   :  { %1412 = vmatmul.mubr.f32.gmra.mrb[38].mxu1 %v434_v52  ;;  %v3158_v52 = vpack.c.bf16 %v714_v40, %v712_v39  ;;  %v728_v39 = vld [vmem:[#allocation2 + $0x6c0] sm:$0xff]  ;;  %v730_v40 = vld [vmem:[#allocation2 + $0x6d0] sm:$0xff] }
 0x103   :  { %2248 = vmatmul.mubr.f32.gmra.mrb[38].mxu0 %v442_v53  ;;  %1417 = vmatprep.mubr.f32.mxu1 %v451_v54  ;;  %v3414_v53 = vpack.c.bf16 %v970_v43, %v968_v41  ;;  %v3160_v54 = vpack.c.bf16 %v719_v45, %v717_v44  ;;  %v984_v41 = vld [vmem:[#allocation2 + $0xec0] sm:$0xff]  ;;  %v986_v43 = vld [vmem:[#allocation2 + $0xed0] sm:$0xff]  ;;  %v733_v44 = vld [vmem:[#allocation2 + $0x6e8] sm:$0xff] }
 0x104   :  { %2253 = vmatprep.mubr.f32.mxu0 %v459_v55  ;;  %v716_v55 = vld [vmem:[#allocation2 + $0x660] sm:$0xff]  ;;  %v735_v45 = vld [vmem:[#allocation2 + $0x6f8] sm:$0xff] }
 0x106   :  { %1418 = vmatmul.mubr.f32.gmra.mrb[40].mxu1 %v450_v56  ;;  %v718_v56 = vld [vmem:[#allocation2 + $0x670] sm:$0xff] }
 0x107   :  { %2254 = vmatmul.mubr.f32.gmra.mrb[40].mxu0 %v458_v57  ;;  %1423 = vmatprep.mubr.f32.mxu1 %v467_v58  ;;  %v972_v57 = vld [vmem:[#allocation2 + $0xe60] sm:$0xff]  ;;  %v3416_v58 = vpack.c.bf16 %v975_v48, %v973_v47  ;;  %v989_v47 = vld [vmem:[#allocation2 + $0xee8] sm:$0xff]  ;;  %v991_v48 = vld [vmem:[#allocation2 + $0xef8] sm:$0xff] }
 0x108   :  { %2259 = vmatprep.mubr.f32.mxu0 %v475_v59  ;;  %v974_v59 = vld [vmem:[#allocation2 + $0xe70] sm:$0xff] }
 0x10a   :  { %1424 = vmatmul.mubr.f32.gmra.mrb[42].mxu1 %v466_v60  ;;  %v721_v60 = vld [vmem:[#allocation2 + $0x688] sm:$0xff] }
 0x10b   :  { %2260 = vmatmul.mubr.f32.gmra.mrb[42].mxu0 %v474_v61  ;;  %1429 = vmatprep.mubr.f32.mxu1 %v483_v62  ;;  %v723_v61 = vld [vmem:[#allocation2 + $0x698] sm:$0xff] }
 0x10c   :  { %2265 = vmatprep.mubr.f32.mxu0 %v491_v63  ;;  %v180_v62 = vld [vmem:[%s5218_s0 + $0x1a0] sm:$0xff]  ;;  %v977_v63 = vld [vmem:[#allocation2 + $0xe88] sm:$0xff] }
 0x10e   :  { %1430 = vmatmul.mubr.f32.gmra.mrb[44].mxu1 %v482_v0  ;;  %v979_v0 = vld [vmem:[#allocation2 + $0xe98] sm:$0xff] }
 0x10f   :  { %2266 = vmatmul.mubr.f32.gmra.mrb[44].mxu0 %v490_v1  ;;  %1435 = vmatprep.mubr.f32.mxu1 %v499_v2  ;;  %v188_v1 = vld [vmem:[%s5218_s0 + $0x1e0] sm:$0xff]  ;;  %v197_v2 = vld [vmem:[%s5218_s0 + $0x228] sm:$0xff]  ;;  %v3420_v10 = vpack.c.bf16 %v979_v0, %v977_v63  ;;  %v993_v63 = vld [vmem:[#allocation2 + $0xf08] sm:$0xff] }
 0x110   :  { %2271 = vmatprep.mubr.f32.mxu0 %v507_v3  ;;  %v205_v3 = vld [vmem:[%s5218_s0 + $0x268] sm:$0xff]  ;;  %v995_v0 = vld [vmem:[#allocation2 + $0xf18] sm:$0xff] }
 0x112   :  { %1436 = vmatmul.mubr.f32.gmra.mrb[46].mxu1 %v498_v4  ;;  %v3162_v4 = vpack.c.bf16 %v718_v56, %v716_v55  ;;  %v732_v55 = vld [vmem:[#allocation2 + $0x6e0] sm:$0xff]  ;;  %v734_v56 = vld [vmem:[#allocation2 + $0x6f0] sm:$0xff] }
 0x113   :  { %2272 = vmatmul.mubr.f32.gmra.mrb[46].mxu0 %v506_v5  ;;  %1506 = vmatprep.mubr.f32.mxu1 %v133_v6  ;;  %v3418_v5 = vpack.c.bf16 %v974_v59, %v972_v57  ;;  %v3164_v6 = vpack.c.bf16 %v723_v61, %v721_v60  ;;  %v988_v57 = vld [vmem:[#allocation2 + $0xee0] sm:$0xff]  ;;  %v990_v59 = vld [vmem:[#allocation2 + $0xef0] sm:$0xff]  ;;  %v737_v60 = vld [vmem:[#allocation2 + $0x708] sm:$0xff] }
 0x114   :  { %2342 = vmatprep.mubr.f32.mxu0 %v141_v9  ;;  %v976_v9 = vld [vmem:[#allocation2 + $0xe80] sm:$0xff]  ;;  %v739_v61 = vld [vmem:[#allocation2 + $0x718] sm:$0xff] }
 0x116   :  { %1507 = vmatmul.mubr.f32.vlgmr.msra.gmra.mrb[0].mxu1 %v132_v14  ;;  %v196_v14 = vld [vmem:[%s5218_s0 + $0x220] sm:$0xff] }
 0x117   :  { %2343 = vmatmul.mubr.f32.vlgmr.msra.gmra.mrb[0].mxu0 %v140_v18  ;;  %3151 = vmatpush1.bf16.msra.mxu1 %v3150_v15  ;;  %v981_v15 = vld [vmem:[#allocation2 + $0xea8] sm:$0xff]  ;;  %v213_v18 = vld [vmem:[%s5218_s0 + $0x2a8] sm:$0xff] }
 0x118   :  { %3407 = vmatpush1.bf16.msra.mxu0 %v3406_v19  ;;  %1512 = vmatprep.mubr.f32.mxu1 %v149_v20  ;;  %v221_v19 = vld [vmem:[%s5218_s0 + $0x2e8] sm:$0xff]  ;;  %v3166_v20 = vpack.c.bf16 %v722_v8, %v720_v7  ;;  %v738_v8 = vld [vmem:[#allocation2 + $0x710] sm:$0xff] }
 0x119   :  { %2348 = vmatprep.mubr.f32.mxu0 %v157_v21  ;;  %3153 = vmatprep.subr.bf16.mxu1 %v3152_v22  ;;  %v3422_v21 = vpack.c.bf16 %v978_v11, %v976_v9  ;;  %v3168_v22 = vpack.c.bf16 %v727_v13, %v725_v12  ;;  %v736_v7 = vld [vmem:[#allocation2 + $0x700] sm:$0xff]  ;;  %v994_v11 = vld [vmem:[#allocation2 + $0xf10] sm:$0xff]  ;;  %v741_v12 = vld [vmem:[#allocation2 + $0x728] sm:$0xff] }
 0x11a   :  { %1513 = vmatmul.mubr.f32.gmra.mrb[2].mxu1 %v148_v30  ;;  %3409 = vmatprep.subr.bf16.mxu0 %v3408_v26  ;;  %v3424_v26 = vpack.c.bf16 %v983_v16, %v981_v15  ;;  %v212_v30 = vld [vmem:[%s5218_s0 + $0x2a0] sm:$0xff]  ;;  %v992_v9 = vld [vmem:[#allocation2 + $0xf00] sm:$0xff]  ;;  %v997_v15 = vld [vmem:[#allocation2 + $0xf28] sm:$0xff] }
 0x11b   :  { %2349 = vmatmul.mubr.f32.gmra.mrb[2].mxu0 %v156_v33  ;;  %1518 = vmatprep.mubr.f32.mxu1 %v165_v34  ;;  %v220_v33 = vld [vmem:[%s5218_s0 + $0x2e0] sm:$0xff]  ;;  %v229_v34 = vld [vmem:[%s5218_s0 + $0x328] sm:$0xff] }
 0x11c   :  { %3155 = vmatpush1.bf16.msra.mxu1 %v3154_v35  ;;  %2354 = vmatprep.mubr.f32.mxu0 %v173_v36  ;;  %v237_v35 = vld [vmem:[%s5218_s0 + $0x368] sm:$0xff]  ;;  %v3170_v36 = vpack.c.bf16 %v726_v24, %v724_v23  ;;  %v743_v13 = vld [vmem:[#allocation2 + $0x738] sm:$0xff]  ;;  %v742_v24 = vld [vmem:[#allocation2 + $0x730] sm:$0xff] }
 0x11d   :  { %3411 = vmatpush1.bf16.msra.mxu0 %v3410_v37  ;;  %3157 = vmatprep.subr.bf16.mxu1 %v3156_v38  ;;  %v3426_v37 = vpack.c.bf16 %v982_v27, %v980_v25  ;;  %v3172_v38 = vpack.c.bf16 %v731_v29, %v729_v28  ;;  %v999_v16 = vld [vmem:[#allocation2 + $0xf38] sm:$0xff]  ;;  %v740_v23 = vld [vmem:[#allocation2 + $0x720] sm:$0xff]  ;;  %v998_v27 = vld [vmem:[#allocation2 + $0xf30] sm:$0xff] }
 0x11e   :  { %1519 = vmatmul.mubr.f32.gmra.mrb[4].mxu1 %v164_v46  ;;  %3413 = vmatprep.subr.bf16.mxu0 %v3412_v42  ;;  %v3428_v42 = vpack.c.bf16 %v987_v32, %v985_v31  ;;  %v228_v46 = vld [vmem:[%s5218_s0 + $0x320] sm:$0xff]  ;;  %v996_v25 = vld [vmem:[#allocation2 + $0xf20] sm:$0xff]  ;;  %v745_v28 = vld [vmem:[#allocation2 + $0x748] sm:$0xff] }
 0x11f   :  { %2355 = vmatmul.mubr.f32.gmra.mrb[4].mxu0 %v172_v49  ;;  %1524 = vmatprep.mubr.f32.mxu1 %v181_v50  ;;  %v236_v49 = vld [vmem:[%s5218_s0 + $0x360] sm:$0xff]  ;;  %v245_v50 = vld [vmem:[%s5218_s0 + $0x3a8] sm:$0xff]  ;;  %v1001_v31 = vld [vmem:[#allocation2 + $0xf48] sm:$0xff] }
 0x120   :  { %2360 = vmatprep.mubr.f32.mxu0 %v189_v51  ;;  %3159 = vmatpush1.bf16.msra.mxu1 %v3158_v52  ;;  %v253_v51 = vld [vmem:[%s5218_s0 + $0x3e8] sm:$0xff]  ;;  %v3174_v52 = vpack.c.bf16 %v730_v40, %v728_v39  ;;  %v747_v29 = vld [vmem:[#allocation2 + $0x758] sm:$0xff]  ;;  %v746_v40 = vld [vmem:[#allocation2 + $0x750] sm:$0xff] }
 0x121   :  { %3415 = vmatpush1.bf16.msra.mxu0 %v3414_v53  ;;  %3161 = vmatprep.subr.bf16.mxu1 %v3160_v54  ;;  %v3430_v53 = vpack.c.bf16 %v986_v43, %v984_v41  ;;  %v3176_v54 = vpack.c.bf16 %v735_v45, %v733_v44  ;;  %v1003_v32 = vld [vmem:[#allocation2 + $0xf58] sm:$0xff]  ;;  %v744_v39 = vld [vmem:[#allocation2 + $0x740] sm:$0xff]  ;;  %v1002_v43 = vld [vmem:[#allocation2 + $0xf50] sm:$0xff] }
 0x122   :  { %1525 = vmatmul.mubr.f32.gmra.mrb[6].mxu1 %v180_v62  ;;  %3417 = vmatprep.subr.bf16.mxu0 %v3416_v58  ;;  %v3432_v58 = vpack.c.bf16 %v991_v48, %v989_v47  ;;  %v244_v62 = vld [vmem:[%s5218_s0 + $0x3a0] sm:$0xff]  ;;  %v1000_v41 = vld [vmem:[#allocation2 + $0xf40] sm:$0xff]  ;;  %v749_v44 = vld [vmem:[#allocation2 + $0x768] sm:$0xff] }
 0x123   :  { %2361 = vmatmul.mubr.f32.gmra.mrb[6].mxu0 %v188_v1  ;;  %1530 = vmatprep.mubr.f32.mxu1 %v197_v2  ;;  %v252_v1 = vld [vmem:[%s5218_s0 + $0x3e0] sm:$0xff]  ;;  %v261_v2 = vld [vmem:[%s5218_s0 + $0x428] sm:$0xff]  ;;  %v1005_v47 = vld [vmem:[#allocation2 + $0xf68] sm:$0xff] }
 0x124   :  { %2366 = vmatprep.mubr.f32.mxu0 %v205_v3  ;;  %3163 = vmatpush1.bf16.msra.mxu1 %v3162_v4  ;;  %v269_v3 = vld [vmem:[%s5218_s0 + $0x468] sm:$0xff]  ;;  %v3178_v4 = vpack.c.bf16 %v734_v56, %v732_v55  ;;  %v751_v45 = vld [vmem:[#allocation2 + $0x778] sm:$0xff]  ;;  %v750_v56 = vld [vmem:[#allocation2 + $0x770] sm:$0xff] }
 0x125   :  { %3419 = vmatpush1.bf16.msra.mxu0 %v3418_v5  ;;  %3165 = vmatprep.subr.bf16.mxu1 %v3164_v6  ;;  %v3434_v5 = vpack.c.bf16 %v990_v59, %v988_v57  ;;  %v3180_v6 = vpack.c.bf16 %v739_v61, %v737_v60  ;;  %v1007_v48 = vld [vmem:[#allocation2 + $0xf78] sm:$0xff]  ;;  %v748_v55 = vld [vmem:[#allocation2 + $0x760] sm:$0xff]  ;;  %v1006_v59 = vld [vmem:[#allocation2 + $0xf70] sm:$0xff] }
 0x126   :  { %1531 = vmatmul.mubr.f32.gmra.mrb[8].mxu1 %v196_v14  ;;  %3421 = vmatprep.subr.bf16.mxu0 %v3420_v10  ;;  %v3436_v10 = vpack.c.bf16 %v995_v0, %v993_v63  ;;  %v260_v14 = vld [vmem:[%s5218_s0 + $0x420] sm:$0xff]  ;;  %v1004_v57 = vld [vmem:[#allocation2 + $0xf60] sm:$0xff]  ;;  %v753_v60 = vld [vmem:[#allocation2 + $0x788] sm:$0xff] }
 0x127   :  { %2367 = vmatmul.mubr.f32.gmra.mrb[8].mxu0 %v204_v17  ;;  %1536 = vmatprep.mubr.f32.mxu1 %v213_v18  ;;  %v268_v17 = vld [vmem:[%s5218_s0 + $0x460] sm:$0xff]  ;;  %v277_v18 = vld [vmem:[%s5218_s0 + $0x4a8] sm:$0xff]  ;;  %v1009_v63 = vld [vmem:[#allocation2 + $0xf88] sm:$0xff] }
 0x128   :  { %2372 = vmatprep.mubr.f32.mxu0 %v221_v19  ;;  %3167 = vmatpush1.bf16.msra.mxu1 %v3166_v20  ;;  %v285_v19 = vld [vmem:[%s5218_s0 + $0x4e8] sm:$0xff]  ;;  %v3182_v20 = vpack.c.bf16 %v738_v8, %v736_v7  ;;  %v755_v61 = vld [vmem:[#allocation2 + $0x798] sm:$0xff]  ;;  %v754_v8 = vld [vmem:[#allocation2 + $0x790] sm:$0xff] }
 0x129   :  { %3423 = vmatpush1.bf16.msra.mxu0 %v3422_v21  ;;  %3169 = vmatprep.subr.bf16.mxu1 %v3168_v22  ;;  %v3438_v21 = vpack.c.bf16 %v994_v11, %v992_v9  ;;  %v3184_v22 = vpack.c.bf16 %v743_v13, %v741_v12  ;;  %v1011_v0 = vld [vmem:[#allocation2 + $0xf98] sm:$0xff]  ;;  %v752_v7 = vld [vmem:[#allocation2 + $0x780] sm:$0xff]  ;;  %v1010_v11 = vld [vmem:[#allocation2 + $0xf90] sm:$0xff] }
 0x12a   :  { %1537 = vmatmul.mubr.f32.gmra.mrb[10].mxu1 %v212_v30  ;;  %3425 = vmatprep.subr.bf16.mxu0 %v3424_v26  ;;  %v3440_v26 = vpack.c.bf16 %v999_v16, %v997_v15  ;;  %v276_v30 = vld [vmem:[%s5218_s0 + $0x4a0] sm:$0xff]  ;;  %v1008_v9 = vld [vmem:[#allocation2 + $0xf80] sm:$0xff]  ;;  %v757_v12 = vld [vmem:[#allocation2 + $0x7a8] sm:$0xff] }
 0x12b   :  { %2373 = vmatmul.mubr.f32.gmra.mrb[10].mxu0 %v220_v33  ;;  %1542 = vmatprep.mubr.f32.mxu1 %v229_v34  ;;  %v284_v33 = vld [vmem:[%s5218_s0 + $0x4e0] sm:$0xff]  ;;  %v293_v34 = vld [vmem:[%s5218_s0 + $0x528] sm:$0xff]  ;;  %v1013_v15 = vld [vmem:[#allocation2 + $0xfa8] sm:$0xff] }
 0x12c   :  { %2378 = vmatprep.mubr.f32.mxu0 %v237_v35  ;;  %3171 = vmatpush1.bf16.msra.mxu1 %v3170_v36  ;;  %v301_v35 = vld [vmem:[%s5218_s0 + $0x568] sm:$0xff]  ;;  %v3186_v36 = vpack.c.bf16 %v742_v24, %v740_v23  ;;  %v759_v13 = vld [vmem:[#allocation2 + $0x7b8] sm:$0xff]  ;;  %v758_v24 = vld [vmem:[#allocation2 + $0x7b0] sm:$0xff] }
 0x12d   :  { %3427 = vmatpush1.bf16.msra.mxu0 %v3426_v37  ;;  %3173 = vmatprep.subr.bf16.mxu1 %v3172_v38  ;;  %v3442_v37 = vpack.c.bf16 %v998_v27, %v996_v25  ;;  %v3188_v38 = vpack.c.bf16 %v747_v29, %v745_v28  ;;  %v1015_v16 = vld [vmem:[#allocation2 + $0xfb8] sm:$0xff]  ;;  %v756_v23 = vld [vmem:[#allocation2 + $0x7a0] sm:$0xff]  ;;  %v1014_v27 = vld [vmem:[#allocation2 + $0xfb0] sm:$0xff] }
 0x12e   :  { %1543 = vmatmul.mubr.f32.gmra.mrb[12].mxu1 %v228_v46  ;;  %3429 = vmatprep.subr.bf16.mxu0 %v3428_v42  ;;  %v3444_v42 = vpack.c.bf16 %v1003_v32, %v1001_v31  ;;  %v292_v46 = vld [vmem:[%s5218_s0 + $0x520] sm:$0xff]  ;;  %v1012_v25 = vld [vmem:[#allocation2 + $0xfa0] sm:$0xff]  ;;  %v761_v28 = vld [vmem:[#allocation2 + $0x7c8] sm:$0xff] }
 0x12f   :  { %2379 = vmatmul.mubr.f32.gmra.mrb[12].mxu0 %v236_v49  ;;  %1548 = vmatprep.mubr.f32.mxu1 %v245_v50  ;;  %v300_v49 = vld [vmem:[%s5218_s0 + $0x560] sm:$0xff]  ;;  %v309_v50 = vld [vmem:[%s5218_s0 + $0x5a8] sm:$0xff]  ;;  %v1017_v31 = vld [vmem:[#allocation2 + $0xfc8] sm:$0xff] }
 0x130   :  { %2384 = vmatprep.mubr.f32.mxu0 %v253_v51  ;;  %3175 = vmatpush1.bf16.msra.mxu1 %v3174_v52  ;;  %v317_v51 = vld [vmem:[%s5218_s0 + $0x5e8] sm:$0xff]  ;;  %v3190_v52 = vpack.c.bf16 %v746_v40, %v744_v39  ;;  %v763_v29 = vld [vmem:[#allocation2 + $0x7d8] sm:$0xff]  ;;  %v762_v40 = vld [vmem:[#allocation2 + $0x7d0] sm:$0xff] }
 0x131   :  { %3431 = vmatpush1.bf16.msra.mxu0 %v3430_v53  ;;  %3177 = vmatprep.subr.bf16.mxu1 %v3176_v54  ;;  %v3446_v53 = vpack.c.bf16 %v1002_v43, %v1000_v41  ;;  %v3192_v54 = vpack.c.bf16 %v751_v45, %v749_v44  ;;  %v1019_v32 = vld [vmem:[#allocation2 + $0xfd8] sm:$0xff]  ;;  %v760_v39 = vld [vmem:[#allocation2 + $0x7c0] sm:$0xff]  ;;  %v1018_v43 = vld [vmem:[#allocation2 + $0xfd0] sm:$0xff] }
 0x132   :  { %1549 = vmatmul.mubr.f32.gmra.mrb[14].mxu1 %v244_v62  ;;  %3433 = vmatprep.subr.bf16.mxu0 %v3432_v58  ;;  %v3448_v58 = vpack.c.bf16 %v1007_v48, %v1005_v47  ;;  %v308_v62 = vld [vmem:[%s5218_s0 + $0x5a0] sm:$0xff]  ;;  %v1016_v41 = vld [vmem:[#allocation2 + $0xfc0] sm:$0xff]  ;;  %v765_v44 = vld [vmem:[#allocation2 + $0x7e8] sm:$0xff] }
 0x133   :  { %2385 = vmatmul.mubr.f32.gmra.mrb[14].mxu0 %v252_v1  ;;  %1554 = vmatprep.mubr.f32.mxu1 %v261_v2  ;;  %v316_v1 = vld [vmem:[%s5218_s0 + $0x5e0] sm:$0xff]  ;;  %v325_v2 = vld [vmem:[%s5218_s0 + $0x628] sm:$0xff]  ;;  %v1021_v47 = vld [vmem:[#allocation2 + $0xfe8] sm:$0xff] }
 0x134   :  { %2390 = vmatprep.mubr.f32.mxu0 %v269_v3  ;;  %3179 = vmatpush1.bf16.msra.mxu1 %v3178_v4  ;;  %v333_v3 = vld [vmem:[%s5218_s0 + $0x668] sm:$0xff]  ;;  %v3194_v4 = vpack.c.bf16 %v750_v56, %v748_v55  ;;  %v767_v45 = vld [vmem:[#allocation2 + $0x7f8] sm:$0xff]  ;;  %v766_v56 = vld [vmem:[#allocation2 + $0x7f0] sm:$0xff] }
 0x135   :  { %3435 = vmatpush1.bf16.msra.mxu0 %v3434_v5  ;;  %3181 = vmatprep.subr.bf16.mxu1 %v3180_v6  ;;  %v3450_v5 = vpack.c.bf16 %v1006_v59, %v1004_v57  ;;  %v3196_v6 = vpack.c.bf16 %v755_v61, %v753_v60  ;;  %v1023_v48 = vld [vmem:[#allocation2 + $0xff8] sm:$0xff]  ;;  %v764_v55 = vld [vmem:[#allocation2 + $0x7e0] sm:$0xff]  ;;  %v1022_v59 = vld [vmem:[#allocation2 + $0xff0] sm:$0xff] }
 0x136   :  { %1555 = vmatmul.mubr.f32.gmra.mrb[16].mxu1 %v260_v14  ;;  %3437 = vmatprep.subr.bf16.mxu0 %v3436_v10  ;;  %v3452_v10 = vpack.c.bf16 %v1011_v0, %v1009_v63  ;;  %v324_v14 = vld [vmem:[%s5218_s0 + $0x620] sm:$0xff]  ;;  %v3464_v57 = vpack.c.bf16 %v1023_v48, %v1021_v47  ;;  %v3210_v63 = vpack.c.bf16 %v766_v56, %v764_v55  ;;  %v397_v0 = vld [vmem:[%s5218_s0 + $0x868] sm:$0xff]  ;;  %v190_v47 = vld [vmem:[%s5218_s0 + $0x1f0] sm:$0xff] }
 0x137   :  { %2391 = vmatmul.mubr.f32.gmra.mrb[16].mxu0 %v268_v17  ;;  %1560 = vmatprep.mubr.f32.mxu1 %v277_v18  ;;  %v332_v17 = vld [vmem:[%s5218_s0 + $0x660] sm:$0xff]  ;;  %v341_v18 = vld [vmem:[%s5218_s0 + $0x6a8] sm:$0xff]  ;;  %v199_v48 = vld [vmem:[%s5218_s0 + $0x238] sm:$0xff] }
 0x138   :  { %2396 = vmatprep.mubr.f32.mxu0 %v285_v19  ;;  %3183 = vmatpush1.bf16.msra.mxu1 %v3182_v20  ;;  %v349_v19 = vld [vmem:[%s5218_s0 + $0x6e8] sm:$0xff]  ;;  %v3198_v20 = vpack.c.bf16 %v754_v8, %v752_v7  ;;  %v372_v60 = vld [vmem:[%s5218_s0 + $0x7a0] sm:$0xff]  ;;  %v222_v55 = vld [vmem:[%s5218_s0 + $0x2f0] sm:$0xff] }
 0x139   :  { %3439 = vmatpush1.bf16.msra.mxu0 %v3438_v21  ;;  %3185 = vmatprep.subr.bf16.mxu1 %v3184_v22  ;;  %v3454_v21 = vpack.c.bf16 %v1010_v11, %v1008_v9  ;;  %v3200_v22 = vpack.c.bf16 %v759_v13, %v757_v12  ;;  %v380_v61 = vld [vmem:[%s5218_s0 + $0x7e0] sm:$0xff]  ;;  %v421_v8 = vld [vmem:[%s5218_s0 + $0x928] sm:$0xff]  ;;  %v231_v56 = vld [vmem:[%s5218_s0 + $0x338] sm:$0xff] }
 0x13a   :  { %1561 = vmatmul.mubr.f32.gmra.mrb[18].mxu1 %v276_v30  ;;  %3441 = vmatprep.subr.bf16.mxu0 %v3440_v26  ;;  %v3456_v26 = vpack.c.bf16 %v1015_v16, %v1013_v15  ;;  %v340_v30 = vld [vmem:[%s5218_s0 + $0x6a0] sm:$0xff]  ;;  %v429_v9 = vld [vmem:[%s5218_s0 + $0x968] sm:$0xff] }
 0x13b   :  { %2397 = vmatmul.mubr.f32.gmra.mrb[18].mxu0 %v284_v33  ;;  %1566 = vmatprep.mubr.f32.mxu1 %v293_v34  ;;  %v348_v33 = vld [vmem:[%s5218_s0 + $0x6e0] sm:$0xff]  ;;  %v357_v34 = vld [vmem:[%s5218_s0 + $0x728] sm:$0xff] }
 0x13c   :  { %2402 = vmatprep.mubr.f32.mxu0 %v301_v35  ;;  %3187 = vmatpush1.bf16.msra.mxu1 %v3186_v36  ;;  %v365_v35 = vld [vmem:[%s5218_s0 + $0x768] sm:$0xff]  ;;  %v3202_v36 = vpack.c.bf16 %v758_v24, %v756_v23  ;;  %v412_v7 = vld [vmem:[%s5218_s0 + $0x8e0] sm:$0xff] }
 0x13d   :  { %3443 = vmatpush1.bf16.msra.mxu0 %v3442_v37  ;;  %3189 = vmatprep.subr.bf16.mxu1 %v3188_v38  ;;  %v3458_v37 = vpack.c.bf16 %v1014_v27, %v1012_v25  ;;  %v3204_v38 = vpack.c.bf16 %v763_v29, %v761_v28  ;;  %v428_v11 = vld [vmem:[%s5218_s0 + $0x960] sm:$0xff]  ;;  %v437_v12 = vld [vmem:[%s5218_s0 + $0x9a8] sm:$0xff] }
 0x13e   :  { %1567 = vmatmul.mubr.f32.gmra.mrb[20].mxu1 %v292_v46  ;;  %3445 = vmatprep.subr.bf16.mxu0 %v3444_v42  ;;  %v3460_v42 = vpack.c.bf16 %v1019_v32, %v1017_v31  ;;  %v356_v46 = vld [vmem:[%s5218_s0 + $0x720] sm:$0xff]  ;;  %v445_v13 = vld [vmem:[%s5218_s0 + $0x9e8] sm:$0xff]  ;;  %v135_v32 = vld [vmem:[%s5218_s0 + $0x38] sm:$0xff] }
 0x13f   :  { %2403 = vmatmul.mubr.f32.gmra.mrb[20].mxu0 %v300_v49  ;;  %1572 = vmatprep.mubr.f32.mxu1 %v309_v50  ;;  %v364_v49 = vld [vmem:[%s5218_s0 + $0x760] sm:$0xff]  ;;  %v373_v50 = vld [vmem:[%s5218_s0 + $0x7a8] sm:$0xff] }
 0x140   :  { %2408 = vmatprep.mubr.f32.mxu0 %v317_v51  ;;  %3191 = vmatpush1.bf16.msra.mxu1 %v3190_v52  ;;  %v3206_v51 = vpack.c.bf16 %v762_v40, %v760_v39  ;;  %v381_v52 = vld [vmem:[%s5218_s0 + $0x7e8] sm:$0xff]  ;;  %v444_v15 = vld [vmem:[%s5218_s0 + $0x9e0] sm:$0xff]  ;;  %v158_v39 = vld [vmem:[%s5218_s0 + $0xf0] sm:$0xff] }
 0x141   :  { %3447 = vmatpush1.bf16.msra.mxu0 %v3446_v53  ;;  %3193 = vmatprep.subr.bf16.mxu1 %v3192_v54  ;;  %v3462_v53 = vpack.c.bf16 %v1018_v43, %v1016_v41  ;;  %v3208_v54 = vpack.c.bf16 %v767_v45, %v765_v44  ;;  %v453_v16 = vld [vmem:[%s5218_s0 + $0xa28] sm:$0xff]  ;;  %v476_v23 = vld [vmem:[%s5218_s0 + $0xae0] sm:$0xff]  ;;  %v167_v40 = vld [vmem:[%s5218_s0 + $0x138] sm:$0xff] }
 0x142   :  { %1573 = vmatmul.mubr.f32.gmra.mrb[22].mxu1 %v308_v62  ;;  %3449 = vmatprep.subr.bf16.mxu0 %v3448_v58  ;;  %v1020_v58 = vld [vmem:[#allocation2 + $0xfe0] sm:$0xff]  ;;  %v492_v27 = vld [vmem:[%s5218_s0 + $0xb60] sm:$0xff]  ;;  %v175_v41 = vld [vmem:[%s5218_s0 + $0x178] sm:$0xff] }
 0x143   :  { %2409 = vmatmul.mubr.f32.gmra.mrb[22].mxu0 %v316_v1  ;;  %1578 = vmatprep.mubr.f32.mxu1 %v325_v2  ;;  %v389_v62 = vld [vmem:[%s5218_s0 + $0x828] sm:$0xff]  ;;  %v3466_v1 = vpack.c.bf16 %v1022_v59, %v1020_v58  ;;  %v388_v2 = vld [vmem:[%s5218_s0 + $0x820] sm:$0xff]  ;;  %v174_v43 = vld [vmem:[%s5218_s0 + $0x170] sm:$0xff] }
 0x144   :  { %2414 = vmatprep.mubr.f32.mxu0 %v333_v3  ;;  %3195 = vmatpush1.bf16.msra.mxu1 %v3194_v4  ;;  %v396_v3 = vld [vmem:[%s5218_s0 + $0x860] sm:$0xff]  ;;  %v405_v4 = vld [vmem:[%s5218_s0 + $0x8a8] sm:$0xff]  ;;  %v183_v44 = vld [vmem:[%s5218_s0 + $0x1b8] sm:$0xff] }
 0x145   :  { %3451 = vmatpush1.bf16.msra.mxu0 %v3450_v5  ;;  %3197 = vmatprep.subr.bf16.mxu1 %v3196_v6  ;;  %v413_v5 = vld [vmem:[%s5218_s0 + $0x8e8] sm:$0xff]  ;;  %v404_v6 = vld [vmem:[%s5218_s0 + $0x8a0] sm:$0xff]  ;;  %v191_v45 = vld [vmem:[%s5218_s0 + $0x1f8] sm:$0xff] }
 0x146   :  { %1579 = vmatmul.mubr.f32.gmra.mrb[24].mxu1 %v324_v14  ;;  %3453 = vmatprep.subr.bf16.mxu0 %v3452_v10  ;;  %v420_v10 = vld [vmem:[%s5218_s0 + $0x920] sm:$0xff]  ;;  %v485_v24 = vld [vmem:[%s5218_s0 + $0xb28] sm:$0xff]  ;;  %v230_v58 = vld [vmem:[%s5218_s0 + $0x330] sm:$0xff] }
 0x147   :  { %2415 = vmatmul.mubr.f32.gmra.mrb[24].mxu0 %v332_v17  ;;  %1584 = vmatprep.mubr.f32.mxu1 %v341_v18  ;;  %v436_v14 = vld [vmem:[%s5218_s0 + $0x9a0] sm:$0xff]  ;;  %v461_v17 = vld [vmem:[%s5218_s0 + $0xa68] sm:$0xff]  ;;  %v238_v59 = vld [vmem:[%s5218_s0 + $0x370] sm:$0xff] }
 0x148   :  { %2420 = vmatprep.mubr.f32.mxu0 %v349_v19  ;;  %3199 = vmatpush1.bf16.msra.mxu1 %v3198_v20  ;;  %v452_v18 = vld [vmem:[%s5218_s0 + $0xa20] sm:$0xff]  ;;  %v469_v20 = vld [vmem:[%s5218_s0 + $0xaa8] sm:$0xff] }
 0x149   :  { %3455 = vmatpush1.bf16.msra.mxu0 %v3454_v21  ;;  %3201 = vmatprep.subr.bf16.mxu1 %v3200_v22  ;;  %v460_v19 = vld [vmem:[%s5218_s0 + $0xa60] sm:$0xff]  ;;  %v477_v21 = vld [vmem:[%s5218_s0 + $0xae8] sm:$0xff] }
 0x14a   :  { %1585 = vmatmul.mubr.f32.gmra.mrb[26].mxu1 %v340_v30  ;;  %3457 = vmatprep.subr.bf16.mxu0 %v3456_v26  ;;  %v468_v22 = vld [vmem:[%s5218_s0 + $0xaa0] sm:$0xff]  ;;  %v493_v25 = vld [vmem:[%s5218_s0 + $0xb68] sm:$0xff] }
 0x14b   :  { %2421 = vmatmul.mubr.f32.gmra.mrb[26].mxu0 %v348_v33  ;;  %1590 = vmatprep.mubr.f32.mxu1 %v357_v34  ;;  %v484_v26 = vld [vmem:[%s5218_s0 + $0xb20] sm:$0xff]  ;;  %v501_v28 = vld [vmem:[%s5218_s0 + $0xba8] sm:$0xff]  ;;  %v143_v33 = vld [vmem:[%s5218_s0 + $0x78] sm:$0xff] }
 0x14c   :  { %2426 = vmatprep.mubr.f32.mxu0 %v365_v35  ;;  %3203 = vmatpush1.bf16.msra.mxu1 %v3202_v36  ;;  %v509_v29 = vld [vmem:[%s5218_s0 + $0xbe8] sm:$0xff]  ;;  %v500_v30 = vld [vmem:[%s5218_s0 + $0xba0] sm:$0xff]  ;;  %v134_v34 = vld [vmem:[%s5218_s0 + $0x30] sm:$0xff] }
 0x14d   :  { %3459 = vmatpush1.bf16.msra.mxu0 %v3458_v37  ;;  %3205 = vmatprep.subr.bf16.mxu1 %v3204_v38  ;;  %v508_v31 = vld [vmem:[%s5218_s0 + $0xbe0] sm:$0xff]  ;;  %v142_v35 = vld [vmem:[%s5218_s0 + $0x70] sm:$0xff]  ;;  %v151_v36 = vld [vmem:[%s5218_s0 + $0xb8] sm:$0xff] }
 0x14e   :  { %1591 = vmatmul.mubr.f32.gmra.mrb[28].mxu1 %v356_v46  ;;  %3461 = vmatprep.subr.bf16.mxu0 %v3460_v42  ;;  %v159_v37 = vld [vmem:[%s5218_s0 + $0xf8] sm:$0xff]  ;;  %v150_v38 = vld [vmem:[%s5218_s0 + $0xb0] sm:$0xff] }
 0x14f   :  { %2427 = vmatmul.mubr.f32.gmra.mrb[28].mxu0 %v364_v49  ;;  %1596 = vmatprep.mubr.f32.mxu1 %v373_v50  ;;  %v166_v42 = vld [vmem:[%s5218_s0 + $0x130] sm:$0xff]  ;;  %v207_v49 = vld [vmem:[%s5218_s0 + $0x278] sm:$0xff] }
 0x150   :  { %2432 = vmatprep.mubr.f32.mxu0 %v381_v52  ;;  %3207 = vmatpush1.bf16.msra.mxu1 %v3206_v51  ;;  %v182_v46 = vld [vmem:[%s5218_s0 + $0x1b0] sm:$0xff]  ;;  %v215_v52 = vld [vmem:[%s5218_s0 + $0x2b8] sm:$0xff] }
 0x151   :  { %3463 = vmatpush1.bf16.msra.mxu0 %v3462_v53  ;;  %3209 = vmatprep.subr.bf16.mxu1 %v3208_v54  ;;  %v198_v50 = vld [vmem:[%s5218_s0 + $0x230] sm:$0xff]  ;;  %v223_v53 = vld [vmem:[%s5218_s0 + $0x2f8] sm:$0xff] }
 0x152   :  { %1597 = vmatmul.mubr.f32.gmra.mrb[30].mxu1 %v372_v60  ;;  %3465 = vmatprep.subr.bf16.mxu0 %v3464_v57  ;;  %v206_v51 = vld [vmem:[%s5218_s0 + $0x270] sm:$0xff]  ;;  %v239_v57 = vld [vmem:[%s5218_s0 + $0x378] sm:$0xff] }
 0x153   :  { %2433 = vmatmul.mubr.f32.gmra.mrb[30].mxu0 %v380_v61  ;;  %1602 = vmatprep.mubr.f32.mxu1 %v389_v62  ;;  %v214_v54 = vld [vmem:[%s5218_s0 + $0x2b0] sm:$0xff]  ;;  %v247_v60 = vld [vmem:[%s5218_s0 + $0x3b8] sm:$0xff] }
 0x154   :  { %2438 = vmatprep.mubr.f32.mxu0 %v397_v0  ;;  %3211 = vmatpush1.bf16.msra.mxu1 %v3210_v63  ;;  %v255_v61 = vld [vmem:[%s5218_s0 + $0x3f8] sm:$0xff]  ;;  %v246_v62 = vld [vmem:[%s5218_s0 + $0x3b0] sm:$0xff] }
 0x155   :  { %3467 = vmatpush1.bf16.msra.mxu0 %v3466_v1  ;;  %v254_v63 = vld [vmem:[%s5218_s0 + $0x3f0] sm:$0xff]  ;;  %v263_v0 = vld [vmem:[%s5218_s0 + $0x438] sm:$0xff] }
 0x156   :  { %1603 = vmatmul.mubr.f32.gmra.mrb[32].mxu1 %v388_v2  ;;  %v271_v1 = vld [vmem:[%s5218_s0 + $0x478] sm:$0xff]  ;;  %v262_v2 = vld [vmem:[%s5218_s0 + $0x430] sm:$0xff] }
 0x157   :  { %2439 = vmatmul.mubr.f32.gmra.mrb[32].mxu0 %v396_v3  ;;  %1608 = vmatprep.mubr.f32.mxu1 %v405_v4  ;;  %v270_v3 = vld [vmem:[%s5218_s0 + $0x470] sm:$0xff]  ;;  %v279_v4 = vld [vmem:[%s5218_s0 + $0x4b8] sm:$0xff] }
 0x158   :  { %2444 = vmatprep.mubr.f32.mxu0 %v413_v5  ;;  %v287_v5 = vld [vmem:[%s5218_s0 + $0x4f8] sm:$0xff] }
 0x15a   :  { %1609 = vmatmul.mubr.f32.gmra.mrb[34].mxu1 %v404_v6  ;;  %v278_v6 = vld [vmem:[%s5218_s0 + $0x4b0] sm:$0xff] }
 0x15b   :  { %2445 = vmatmul.mubr.f32.gmra.mrb[34].mxu0 %v412_v7  ;;  %1614 = vmatprep.mubr.f32.mxu1 %v421_v8  ;;  %v286_v7 = vld [vmem:[%s5218_s0 + $0x4f0] sm:$0xff]  ;;  %v295_v8 = vld [vmem:[%s5218_s0 + $0x538] sm:$0xff] }
 0x15c   :  { %2450 = vmatprep.mubr.f32.mxu0 %v429_v9  ;;  %v303_v9 = vld [vmem:[%s5218_s0 + $0x578] sm:$0xff] }
 0x15e   :  { %1615 = vmatmul.mubr.f32.gmra.mrb[36].mxu1 %v420_v10  ;;  %v294_v10 = vld [vmem:[%s5218_s0 + $0x530] sm:$0xff] }
 0x15f   :  { %2451 = vmatmul.mubr.f32.gmra.mrb[36].mxu0 %v428_v11  ;;  %1620 = vmatprep.mubr.f32.mxu1 %v437_v12  ;;  %v302_v11 = vld [vmem:[%s5218_s0 + $0x570] sm:$0xff]  ;;  %v311_v12 = vld [vmem:[%s5218_s0 + $0x5b8] sm:$0xff] }
 0x160   :  { %2456 = vmatprep.mubr.f32.mxu0 %v445_v13  ;;  %v319_v13 = vld [vmem:[%s5218_s0 + $0x5f8] sm:$0xff] }
 0x162   :  { %1621 = vmatmul.mubr.f32.gmra.mrb[38].mxu1 %v436_v14  ;;  %v310_v14 = vld [vmem:[%s5218_s0 + $0x5b0] sm:$0xff] }
 0x163   :  { %2457 = vmatmul.mubr.f32.gmra.mrb[38].mxu0 %v444_v15  ;;  %1626 = vmatprep.mubr.f32.mxu1 %v453_v16  ;;  %v318_v15 = vld [vmem:[%s5218_s0 + $0x5f0] sm:$0xff]  ;;  %v327_v16 = vld [vmem:[%s5218_s0 + $0x638] sm:$0xff] }
 0x164   :  { %2462 = vmatprep.mubr.f32.mxu0 %v461_v17  ;;  %v335_v17 = vld [vmem:[%s5218_s0 + $0x678] sm:$0xff] }
 0x166   :  { %1627 = vmatmul.mubr.f32.gmra.mrb[40].mxu1 %v452_v18  ;;  %v326_v18 = vld [vmem:[%s5218_s0 + $0x630] sm:$0xff] }
 0x167   :  { %2463 = vmatmul.mubr.f32.gmra.mrb[40].mxu0 %v460_v19  ;;  %1632 = vmatprep.mubr.f32.mxu1 %v469_v20  ;;  %v334_v19 = vld [vmem:[%s5218_s0 + $0x670] sm:$0xff]  ;;  %v343_v20 = vld [vmem:[%s5218_s0 + $0x6b8] sm:$0xff] }
 0x168   :  { %2468 = vmatprep.mubr.f32.mxu0 %v477_v21  ;;  %v351_v21 = vld [vmem:[%s5218_s0 + $0x6f8] sm:$0xff] }
 0x16a   :  { %1633 = vmatmul.mubr.f32.gmra.mrb[42].mxu1 %v468_v22  ;;  %v342_v22 = vld [vmem:[%s5218_s0 + $0x6b0] sm:$0xff] }
 0x16b   :  { %2469 = vmatmul.mubr.f32.gmra.mrb[42].mxu0 %v476_v23  ;;  %1638 = vmatprep.mubr.f32.mxu1 %v485_v24  ;;  %v350_v23 = vld [vmem:[%s5218_s0 + $0x6f0] sm:$0xff]  ;;  %v359_v24 = vld [vmem:[%s5218_s0 + $0x738] sm:$0xff] }
 0x16c   :  { %2474 = vmatprep.mubr.f32.mxu0 %v493_v25  ;;  %v367_v25 = vld [vmem:[%s5218_s0 + $0x778] sm:$0xff] }
 0x16e   :  { %1639 = vmatmul.mubr.f32.gmra.mrb[44].mxu1 %v484_v26  ;;  %v358_v26 = vld [vmem:[%s5218_s0 + $0x730] sm:$0xff] }
 0x16f   :  { %2475 = vmatmul.mubr.f32.gmra.mrb[44].mxu0 %v492_v27  ;;  %1644 = vmatprep.mubr.f32.mxu1 %v501_v28  ;;  %v366_v27 = vld [vmem:[%s5218_s0 + $0x770] sm:$0xff]  ;;  %v375_v28 = vld [vmem:[%s5218_s0 + $0x7b8] sm:$0xff] }
 0x170   :  { %2480 = vmatprep.mubr.f32.mxu0 %v509_v29  ;;  %v383_v29 = vld [vmem:[%s5218_s0 + $0x7f8] sm:$0xff] }
 0x172   :  { %1645 = vmatmul.mubr.f32.gmra.mrb[46].mxu1 %v500_v30  ;;  %v374_v30 = vld [vmem:[%s5218_s0 + $0x7b0] sm:$0xff] }
 0x173   :  { %2481 = vmatmul.mubr.f32.gmra.mrb[46].mxu0 %v508_v31  ;;  %1715 = vmatprep.mubr.f32.mxu1 %v135_v32  ;;  %v382_v31 = vld [vmem:[%s5218_s0 + $0x7f0] sm:$0xff]  ;;  %v391_v32 = vld [vmem:[%s5218_s0 + $0x838] sm:$0xff] }
 0x174   :  { %2551 = vmatprep.mubr.f32.mxu0 %v143_v33  ;;  %v399_v33 = vld [vmem:[%s5218_s0 + $0x878] sm:$0xff] }
 0x176   :  { %1716 = vmatmul.mubr.f32.vlgmr.msra.gmra.mrb[0].mxu1 %v134_v34  ;;  %v390_v34 = vld [vmem:[%s5218_s0 + $0x830] sm:$0xff] }
 0x177   :  { %2552 = vmatmul.mubr.f32.vlgmr.msra.gmra.mrb[0].mxu0 %v142_v35  ;;  %1721 = vmatprep.mubr.f32.mxu1 %v151_v36  ;;  %v398_v35 = vld [vmem:[%s5218_s0 + $0x870] sm:$0xff]  ;;  %v407_v36 = vld [vmem:[%s5218_s0 + $0x8b8] sm:$0xff] }
 0x178   :  { %2557 = vmatprep.mubr.f32.mxu0 %v159_v37  ;;  %v415_v37 = vld [vmem:[%s5218_s0 + $0x8f8] sm:$0xff] }
 0x17a   :  { %1722 = vmatmul.mubr.f32.gmra.mrb[2].mxu1 %v150_v38  ;;  %v406_v38 = vld [vmem:[%s5218_s0 + $0x8b0] sm:$0xff] }
 0x17b   :  { %2558 = vmatmul.mubr.f32.gmra.mrb[2].mxu0 %v158_v39  ;;  %1727 = vmatprep.mubr.f32.mxu1 %v167_v40  ;;  %v414_v39 = vld [vmem:[%s5218_s0 + $0x8f0] sm:$0xff]  ;;  %v423_v40 = vld [vmem:[%s5218_s0 + $0x938] sm:$0xff] }
 0x17c   :  { %2563 = vmatprep.mubr.f32.mxu0 %v175_v41  ;;  %v431_v41 = vld [vmem:[%s5218_s0 + $0x978] sm:$0xff] }
 0x17e   :  { %1728 = vmatmul.mubr.f32.gmra.mrb[4].mxu1 %v166_v42  ;;  %v422_v42 = vld [vmem:[%s5218_s0 + $0x930] sm:$0xff] }
 0x17f   :  { %2564 = vmatmul.mubr.f32.gmra.mrb[4].mxu0 %v174_v43  ;;  %1733 = vmatprep.mubr.f32.mxu1 %v183_v44  ;;  %v430_v43 = vld [vmem:[%s5218_s0 + $0x970] sm:$0xff]  ;;  %v439_v44 = vld [vmem:[%s5218_s0 + $0x9b8] sm:$0xff] }
 0x180   :  { %2569 = vmatprep.mubr.f32.mxu0 %v191_v45  ;;  %v447_v45 = vld [vmem:[%s5218_s0 + $0x9f8] sm:$0xff] }
 0x182   :  { %1734 = vmatmul.mubr.f32.gmra.mrb[6].mxu1 %v182_v46  ;;  %v438_v46 = vld [vmem:[%s5218_s0 + $0x9b0] sm:$0xff] }
 0x183   :  { %2570 = vmatmul.mubr.f32.gmra.mrb[6].mxu0 %v190_v47  ;;  %1739 = vmatprep.mubr.f32.mxu1 %v199_v48  ;;  %v446_v47 = vld [vmem:[%s5218_s0 + $0x9f0] sm:$0xff]  ;;  %v455_v48 = vld [vmem:[%s5218_s0 + $0xa38] sm:$0xff] }
 0x184   :  { %2575 = vmatprep.mubr.f32.mxu0 %v207_v49  ;;  %v463_v49 = vld [vmem:[%s5218_s0 + $0xa78] sm:$0xff] }
 0x186   :  { %1740 = vmatmul.mubr.f32.gmra.mrb[8].mxu1 %v198_v50  ;;  %v454_v50 = vld [vmem:[%s5218_s0 + $0xa30] sm:$0xff] }
 0x187   :  { %2576 = vmatmul.mubr.f32.gmra.mrb[8].mxu0 %v206_v51  ;;  %1745 = vmatprep.mubr.f32.mxu1 %v215_v52  ;;  %v462_v51 = vld [vmem:[%s5218_s0 + $0xa70] sm:$0xff]  ;;  %v471_v52 = vld [vmem:[%s5218_s0 + $0xab8] sm:$0xff] }
 0x188   :  { %2581 = vmatprep.mubr.f32.mxu0 %v223_v53  ;;  %v479_v53 = vld [vmem:[%s5218_s0 + $0xaf8] sm:$0xff] }
 0x18a   :  { %1746 = vmatmul.mubr.f32.gmra.mrb[10].mxu1 %v214_v54  ;;  %v470_v54 = vld [vmem:[%s5218_s0 + $0xab0] sm:$0xff] }
 0x18b   :  { %2582 = vmatmul.mubr.f32.gmra.mrb[10].mxu0 %v222_v55  ;;  %1751 = vmatprep.mubr.f32.mxu1 %v231_v56  ;;  %v478_v55 = vld [vmem:[%s5218_s0 + $0xaf0] sm:$0xff]  ;;  %v487_v56 = vld [vmem:[%s5218_s0 + $0xb38] sm:$0xff] }
 0x18c   :  { %2587 = vmatprep.mubr.f32.mxu0 %v239_v57  ;;  %v495_v57 = vld [vmem:[%s5218_s0 + $0xb78] sm:$0xff] }
 0x18e   :  { %1752 = vmatmul.mubr.f32.gmra.mrb[12].mxu1 %v230_v58  ;;  %v486_v58 = vld [vmem:[%s5218_s0 + $0xb30] sm:$0xff] }
 0x18f   :  { %2588 = vmatmul.mubr.f32.gmra.mrb[12].mxu0 %v238_v59  ;;  %1757 = vmatprep.mubr.f32.mxu1 %v247_v60  ;;  %v494_v59 = vld [vmem:[%s5218_s0 + $0xb70] sm:$0xff]  ;;  %v503_v60 = vld [vmem:[%s5218_s0 + $0xbb8] sm:$0xff] }
 0x190   :  { %2593 = vmatprep.mubr.f32.mxu0 %v255_v61  ;;  %v511_v61 = vld [vmem:[%s5218_s0 + $0xbf8] sm:$0xff] }
 0x192   :  { %1758 = vmatmul.mubr.f32.gmra.mrb[14].mxu1 %v246_v62  ;;  %v502_v62 = vld [vmem:[%s5218_s0 + $0xbb0] sm:$0xff] }
 0x193   :  { %2594 = vmatmul.mubr.f32.gmra.mrb[14].mxu0 %v254_v63  ;;  %1763 = vmatprep.mubr.f32.mxu1 %v263_v0  ;;  %v510_v63 = vld [vmem:[%s5218_s0 + $0xbf0] sm:$0xff]  ;;  %v2845_v0 = vlaneseq }
 0x194   :  { %2599 = vmatprep.mubr.f32.mxu0 %v271_v1 }
 0x195   :  { %v2846_v1 = vshrl.u32 %v2845_v0, 7 }
 0x196   :  { %1764 = vmatmul.mubr.f32.gmra.mrb[16].mxu1 %v262_v2 }
 0x197   :  { %2600 = vmatmul.mubr.f32.gmra.mrb[16].mxu0 %v270_v3  ;;  %1769 = vmatprep.mubr.f32.mxu1 %v279_v4  ;;  %v2847_v2 = vsub.s32 0, %v2846_v1  ;;  %v2843_v3 = vld [vmem:[%s5220_s2] sm:$0x3]  ;;  %v2851_v4 = vsub.s32 1, %v2846_v1 }
 0x198   :  { %2605 = vmatprep.mubr.f32.mxu0 %v287_v5 }
 0x19a   :  { %1770 = vmatmul.mubr.f32.gmra.mrb[18].mxu1 %v278_v6 }
 0x19b   :  { %2606 = vmatmul.mubr.f32.gmra.mrb[18].mxu0 %v286_v7  ;;  %1775 = vmatprep.mubr.f32.mxu1 %v295_v8 }
 0x19c   :  { %2611 = vmatprep.mubr.f32.mxu0 %v303_v9  ;;  %v5022_v9 = vrot.slane %v2843_v3, %v2847_v2 }
 0x19e   :  { %1776 = vmatmul.mubr.f32.gmra.mrb[20].mxu1 %v294_v10 }
 0x19f   :  { %2612 = vmatmul.mubr.f32.gmra.mrb[20].mxu0 %v302_v11  ;;  %1781 = vmatprep.mubr.f32.mxu1 %v311_v12  ;;  %v5024_v12 = vrot.slane %v2843_v3, %v2851_v4 }
 0x1a0   :  { %2617 = vmatprep.mubr.f32.mxu0 %v319_v13 }
 0x1a2   :  { %1782 = vmatmul.mubr.f32.gmra.mrb[22].mxu1 %v310_v14 }
 0x1a3   :  { %2618 = vmatmul.mubr.f32.gmra.mrb[22].mxu0 %v318_v15  ;;  %1787 = vmatprep.mubr.f32.mxu1 %v327_v16 }
 0x1a4   :  { %2623 = vmatprep.mubr.f32.mxu0 %v335_v17 }
 0x1a6   :  { %1788 = vmatmul.mubr.f32.gmra.mrb[24].mxu1 %v326_v18 }
 0x1a7   :  { %2624 = vmatmul.mubr.f32.gmra.mrb[24].mxu0 %v334_v19  ;;  %1793 = vmatprep.mubr.f32.mxu1 %v343_v20 }
 0x1a8   :  { %2629 = vmatprep.mubr.f32.mxu0 %v351_v21 }
 0x1aa   :  { %1794 = vmatmul.mubr.f32.gmra.mrb[26].mxu1 %v342_v22 }
 0x1ab   :  { %2630 = vmatmul.mubr.f32.gmra.mrb[26].mxu0 %v350_v23  ;;  %1799 = vmatprep.mubr.f32.mxu1 %v359_v24 }
 0x1ac   :  { %2635 = vmatprep.mubr.f32.mxu0 %v367_v25 }
 0x1ae   :  { %1800 = vmatmul.mubr.f32.gmra.mrb[28].mxu1 %v358_v26 }
 0x1af   :  { %2636 = vmatmul.mubr.f32.gmra.mrb[28].mxu0 %v366_v27  ;;  %1805 = vmatprep.mubr.f32.mxu1 %v375_v28 }
 0x1b0   :  { %2641 = vmatprep.mubr.f32.mxu0 %v383_v29 }
 0x1b2   :  { %1806 = vmatmul.mubr.f32.gmra.mrb[30].mxu1 %v374_v30 }
 0x1b3   :  { %2642 = vmatmul.mubr.f32.gmra.mrb[30].mxu0 %v382_v31  ;;  %1811 = vmatprep.mubr.f32.mxu1 %v391_v32 }
 0x1b4   :  { %2647 = vmatprep.mubr.f32.mxu0 %v399_v33 }
 0x1b6   :  { %1812 = vmatmul.mubr.f32.gmra.mrb[32].mxu1 %v390_v34 }
 0x1b7   :  { %2648 = vmatmul.mubr.f32.gmra.mrb[32].mxu0 %v398_v35  ;;  %1817 = vmatprep.mubr.f32.mxu1 %v407_v36 }
 0x1b8   :  { %2653 = vmatprep.mubr.f32.mxu0 %v415_v37 }
 0x1ba   :  { %1818 = vmatmul.mubr.f32.gmra.mrb[34].mxu1 %v406_v38 }
 0x1bb   :  { %2654 = vmatmul.mubr.f32.gmra.mrb[34].mxu0 %v414_v39  ;;  %1823 = vmatprep.mubr.f32.mxu1 %v423_v40 }
 0x1bc   :  { %2659 = vmatprep.mubr.f32.mxu0 %v431_v41 }
 0x1be   :  { %1824 = vmatmul.mubr.f32.gmra.mrb[36].mxu1 %v422_v42 }
 0x1bf   :  { %2660 = vmatmul.mubr.f32.gmra.mrb[36].mxu0 %v430_v43  ;;  %1829 = vmatprep.mubr.f32.mxu1 %v439_v44 }
 0x1c0   :  { %2665 = vmatprep.mubr.f32.mxu0 %v447_v45 }
 0x1c2   :  { %1830 = vmatmul.mubr.f32.gmra.mrb[38].mxu1 %v438_v46 }
 0x1c3   :  { %2666 = vmatmul.mubr.f32.gmra.mrb[38].mxu0 %v446_v47  ;;  %1835 = vmatprep.mubr.f32.mxu1 %v455_v48 }
 0x1c4   :  { %2671 = vmatprep.mubr.f32.mxu0 %v463_v49 }
 0x1c6   :  { %1836 = vmatmul.mubr.f32.gmra.mrb[40].mxu1 %v454_v50 }
 0x1c7   :  { %2672 = vmatmul.mubr.f32.gmra.mrb[40].mxu0 %v462_v51  ;;  %1841 = vmatprep.mubr.f32.mxu1 %v471_v52 }
 0x1c8   :  { %2677 = vmatprep.mubr.f32.mxu0 %v479_v53 }
 0x1ca   :  { %1842 = vmatmul.mubr.f32.gmra.mrb[42].mxu1 %v470_v54 }
 0x1cb   :  { %2678 = vmatmul.mubr.f32.gmra.mrb[42].mxu0 %v478_v55  ;;  %1847 = vmatprep.mubr.f32.mxu1 %v487_v56 }
 0x1cc   :  { %2683 = vmatprep.mubr.f32.mxu0 %v495_v57 }
 0x1ce   :  { %1848 = vmatmul.mubr.f32.gmra.mrb[44].mxu1 %v486_v58 }
 0x1cf   :  { %2684 = vmatmul.mubr.f32.gmra.mrb[44].mxu0 %v494_v59  ;;  %1853 = vmatprep.mubr.f32.mxu1 %v503_v60 }
 0x1d0   :  { %2689 = vmatprep.mubr.f32.mxu0 %v511_v61 }
 0x1d2   :  { %1854 = vmatmul.mubr.f32.gmra.mrb[46].mxu1 %v502_v62 }
 0x1d3   :  { %2690 = vmatmul.mubr.f32.gmra.mrb[46].mxu0 %v510_v63 }
 0x249   :  { %v1717_v5 = vpop.f32.mrb[0].mxu1 }
 0x24a   :  { %v2553_v6 = vpop.f32.mrb[0].mxu0  ;;  %v1719_v7 = vpop.f32.mrb[1].mxu1 }
 0x24b   :  { %v3468_v8 = vadd.f32 %v2553_v6, %v1717_v5  ;;  %v2555_v10 = vpop.f32.mrb[1].mxu0 }
 0x24c   :  { %v3469_v11 = vadd.f32 %v2555_v10, %v1719_v7 }
 0x24d   :  { %v1723_v13 = vpop.f32.mrb[2].mxu1  ;;  %v2855_v16 = vadd.f32 %v3468_v8, %v5022_v9 }
 0x24e   :  { %v2559_v14 = vpop.f32.mrb[2].mxu0  ;;  %v1725_v15 = vpop.f32.mrb[3].mxu1  ;;  %v2856_v19 = vadd.f32 %v3469_v11, %v5024_v12 }
 0x24f   :  { %v3470_v17 = vadd.f32 %v2559_v14, %v1723_v13  ;;  %v2561_v18 = vpop.f32.mrb[3].mxu0  ;;  %2903 = vst [vmem:[%s5221_s3] sm:$0xff] %v2855_v16 }
 0x250   :  { %v3471_v20 = vadd.f32 %v2561_v18, %v1725_v15  ;;  %2904 = vst [vmem:[%s5221_s3 + $0x8] sm:$0xff] %v2856_v19 }
 0x251   :  { %v1729_v21 = vpop.f32.mrb[4].mxu1  ;;  %v2857_v24 = vadd.f32 %v3470_v17, %v5022_v9 }
 0x252   :  { %v2565_v22 = vpop.f32.mrb[4].mxu0  ;;  %v1731_v23 = vpop.f32.mrb[5].mxu1  ;;  %v2858_v27 = vadd.f32 %v3471_v20, %v5024_v12 }
 0x253   :  { %v3472_v25 = vadd.f32 %v2565_v22, %v1729_v21  ;;  %v2567_v26 = vpop.f32.mrb[5].mxu0  ;;  %2905 = vst [vmem:[%s5221_s3 + $0x10] sm:$0xff] %v2857_v24 }
 0x254   :  { %v3473_v28 = vadd.f32 %v2567_v26, %v1731_v23  ;;  %2906 = vst [vmem:[%s5221_s3 + $0x18] sm:$0xff] %v2858_v27 }
 0x255   :  { %v1735_v29 = vpop.f32.mrb[6].mxu1  ;;  %v2859_v32 = vadd.f32 %v3472_v25, %v5022_v9 }
 0x256   :  { %v2571_v30 = vpop.f32.mrb[6].mxu0  ;;  %v1737_v31 = vpop.f32.mrb[7].mxu1  ;;  %v2860_v35 = vadd.f32 %v3473_v28, %v5024_v12 }
 0x257   :  { %v3474_v33 = vadd.f32 %v2571_v30, %v1735_v29  ;;  %v2573_v34 = vpop.f32.mrb[7].mxu0  ;;  %2907 = vst [vmem:[%s5221_s3 + $0x20] sm:$0xff] %v2859_v32 }
 0x258   :  { %v3475_v36 = vadd.f32 %v2573_v34, %v1737_v31  ;;  %2908 = vst [vmem:[%s5221_s3 + $0x28] sm:$0xff] %v2860_v35 }
 0x259   :  { %v1741_v37 = vpop.f32.mrb[8].mxu1  ;;  %v2861_v40 = vadd.f32 %v3474_v33, %v5022_v9 }
 0x25a   :  { %v2577_v38 = vpop.f32.mrb[8].mxu0  ;;  %v1743_v39 = vpop.f32.mrb[9].mxu1  ;;  %v2862_v43 = vadd.f32 %v3475_v36, %v5024_v12 }
 0x25b   :  { %v3476_v41 = vadd.f32 %v2577_v38, %v1741_v37  ;;  %v2579_v42 = vpop.f32.mrb[9].mxu0  ;;  %2909 = vst [vmem:[%s5221_s3 + $0x30] sm:$0xff] %v2861_v40 }
 0x25c   :  { %v3477_v44 = vadd.f32 %v2579_v42, %v1743_v39  ;;  %2910 = vst [vmem:[%s5221_s3 + $0x38] sm:$0xff] %v2862_v43 }
 0x25d   :  { %v1747_v45 = vpop.f32.mrb[10].mxu1  ;;  %v2863_v48 = vadd.f32 %v3476_v41, %v5022_v9 }
 0x25e   :  { %v2583_v46 = vpop.f32.mrb[10].mxu0  ;;  %v1749_v47 = vpop.f32.mrb[11].mxu1  ;;  %v2864_v51 = vadd.f32 %v3477_v44, %v5024_v12 }
 0x25f   :  { %v3478_v49 = vadd.f32 %v2583_v46, %v1747_v45  ;;  %v2585_v50 = vpop.f32.mrb[11].mxu0  ;;  %2911 = vst [vmem:[%s5221_s3 + $0x40] sm:$0xff] %v2863_v48 }
 0x260   :  { %v3479_v52 = vadd.f32 %v2585_v50, %v1749_v47  ;;  %2912 = vst [vmem:[%s5221_s3 + $0x48] sm:$0xff] %v2864_v51 }
 0x261   :  { %v1753_v53 = vpop.f32.mrb[12].mxu1  ;;  %v2865_v56 = vadd.f32 %v3478_v49, %v5022_v9 }
 0x262   :  { %v2589_v54 = vpop.f32.mrb[12].mxu0  ;;  %v1755_v55 = vpop.f32.mrb[13].mxu1  ;;  %v2866_v59 = vadd.f32 %v3479_v52, %v5024_v12 }
 0x263   :  { %v3480_v57 = vadd.f32 %v2589_v54, %v1753_v53  ;;  %v2591_v58 = vpop.f32.mrb[13].mxu0  ;;  %2913 = vst [vmem:[%s5221_s3 + $0x50] sm:$0xff] %v2865_v56 }
 0x264   :  { %v3481_v60 = vadd.f32 %v2591_v58, %v1755_v55  ;;  %2914 = vst [vmem:[%s5221_s3 + $0x58] sm:$0xff] %v2866_v59 }
 0x265   :  { %v1759_v61 = vpop.f32.mrb[14].mxu1  ;;  %v2867_v0 = vadd.f32 %v3480_v57, %v5022_v9 }
 0x266   :  { %v2595_v62 = vpop.f32.mrb[14].mxu0  ;;  %v1761_v63 = vpop.f32.mrb[15].mxu1  ;;  %v2868_v3 = vadd.f32 %v3481_v60, %v5024_v12 }
 0x267   :  { %v3482_v1 = vadd.f32 %v2595_v62, %v1759_v61  ;;  %v2597_v2 = vpop.f32.mrb[15].mxu0  ;;  %2915 = vst [vmem:[%s5221_s3 + $0x60] sm:$0xff] %v2867_v0 }
 0x268   :  { %v3483_v4 = vadd.f32 %v2597_v2, %v1761_v63  ;;  %2916 = vst [vmem:[%s5221_s3 + $0x68] sm:$0xff] %v2868_v3 }
 0x269   :  { %v1765_v5 = vpop.f32.mrb[16].mxu1  ;;  %v2869_v8 = vadd.f32 %v3482_v1, %v5022_v9 }
 0x26a   :  { %v2601_v6 = vpop.f32.mrb[16].mxu0  ;;  %v1767_v7 = vpop.f32.mrb[17].mxu1  ;;  %v2870_v13 = vadd.f32 %v3483_v4, %v5024_v12 }
 0x26b   :  { %v3484_v10 = vadd.f32 %v2601_v6, %v1765_v5  ;;  %v2603_v11 = vpop.f32.mrb[17].mxu0  ;;  %2917 = vst [vmem:[%s5221_s3 + $0x70] sm:$0xff] %v2869_v8 }
 0x26c   :  { %v3485_v14 = vadd.f32 %v2603_v11, %v1767_v7  ;;  %2918 = vst [vmem:[%s5221_s3 + $0x78] sm:$0xff] %v2870_v13 }
 0x26d   :  { %v1771_v15 = vpop.f32.mrb[18].mxu1  ;;  %v2871_v18 = vadd.f32 %v3484_v10, %v5022_v9 }
 0x26e   :  { %v2607_v16 = vpop.f32.mrb[18].mxu0  ;;  %v1773_v17 = vpop.f32.mrb[19].mxu1  ;;  %v2872_v21 = vadd.f32 %v3485_v14, %v5024_v12 }
 0x26f   :  { %v3486_v19 = vadd.f32 %v2607_v16, %v1771_v15  ;;  %v2609_v20 = vpop.f32.mrb[19].mxu0  ;;  %2919 = vst [vmem:[%s5221_s3 + $0x80] sm:$0xff] %v2871_v18 }
 0x270   :  { %v3487_v22 = vadd.f32 %v2609_v20, %v1773_v17  ;;  %2920 = vst [vmem:[%s5221_s3 + $0x88] sm:$0xff] %v2872_v21 }
 0x271   :  { %v1777_v23 = vpop.f32.mrb[20].mxu1  ;;  %v2873_v26 = vadd.f32 %v3486_v19, %v5022_v9 }
 0x272   :  { %v2613_v24 = vpop.f32.mrb[20].mxu0  ;;  %v1779_v25 = vpop.f32.mrb[21].mxu1  ;;  %v2874_v29 = vadd.f32 %v3487_v22, %v5024_v12 }
 0x273   :  { %v3488_v27 = vadd.f32 %v2613_v24, %v1777_v23  ;;  %v2615_v28 = vpop.f32.mrb[21].mxu0  ;;  %2921 = vst [vmem:[%s5221_s3 + $0x90] sm:$0xff] %v2873_v26 }
 0x274   :  { %v3489_v30 = vadd.f32 %v2615_v28, %v1779_v25  ;;  %2922 = vst [vmem:[%s5221_s3 + $0x98] sm:$0xff] %v2874_v29 }
 0x275   :  { %v1783_v31 = vpop.f32.mrb[22].mxu1  ;;  %v2875_v34 = vadd.f32 %v3488_v27, %v5022_v9 }
 0x276   :  { %v2619_v32 = vpop.f32.mrb[22].mxu0  ;;  %v1785_v33 = vpop.f32.mrb[23].mxu1  ;;  %v2876_v37 = vadd.f32 %v3489_v30, %v5024_v12 }
 0x277   :  { %v3490_v35 = vadd.f32 %v2619_v32, %v1783_v31  ;;  %v2621_v36 = vpop.f32.mrb[23].mxu0  ;;  %2923 = vst [vmem:[%s5221_s3 + $0xa0] sm:$0xff] %v2875_v34 }
 0x278   :  { %v3491_v38 = vadd.f32 %v2621_v36, %v1785_v33  ;;  %2924 = vst [vmem:[%s5221_s3 + $0xa8] sm:$0xff] %v2876_v37 }
 0x279   :  { %v1789_v39 = vpop.f32.mrb[24].mxu1  ;;  %v2877_v42 = vadd.f32 %v3490_v35, %v5022_v9 }
 0x27a   :  { %v2625_v40 = vpop.f32.mrb[24].mxu0  ;;  %v1791_v41 = vpop.f32.mrb[25].mxu1  ;;  %v2878_v45 = vadd.f32 %v3491_v38, %v5024_v12 }
 0x27b   :  { %v3492_v43 = vadd.f32 %v2625_v40, %v1789_v39  ;;  %v2627_v44 = vpop.f32.mrb[25].mxu0  ;;  %2925 = vst [vmem:[%s5221_s3 + $0xb0] sm:$0xff] %v2877_v42 }
 0x27c   :  { %v3493_v46 = vadd.f32 %v2627_v44, %v1791_v41  ;;  %2926 = vst [vmem:[%s5221_s3 + $0xb8] sm:$0xff] %v2878_v45 }
 0x27d   :  { %v1795_v47 = vpop.f32.mrb[26].mxu1  ;;  %v2879_v50 = vadd.f32 %v3492_v43, %v5022_v9 }
 0x27e   :  { %v2631_v48 = vpop.f32.mrb[26].mxu0  ;;  %v1797_v49 = vpop.f32.mrb[27].mxu1  ;;  %v2880_v53 = vadd.f32 %v3493_v46, %v5024_v12 }
 0x27f   :  { %v3494_v51 = vadd.f32 %v2631_v48, %v1795_v47  ;;  %v2633_v52 = vpop.f32.mrb[27].mxu0  ;;  %2927 = vst [vmem:[%s5221_s3 + $0xc0] sm:$0xff] %v2879_v50 }
 0x280   :  { %v3495_v54 = vadd.f32 %v2633_v52, %v1797_v49  ;;  %2928 = vst [vmem:[%s5221_s3 + $0xc8] sm:$0xff] %v2880_v53 }
 0x281   :  { %v1801_v55 = vpop.f32.mrb[28].mxu1  ;;  %v2881_v58 = vadd.f32 %v3494_v51, %v5022_v9 }
 0x282   :  { %v2637_v56 = vpop.f32.mrb[28].mxu0  ;;  %v1803_v57 = vpop.f32.mrb[29].mxu1  ;;  %v2882_v61 = vadd.f32 %v3495_v54, %v5024_v12 }
 0x283   :  { %v3496_v59 = vadd.f32 %v2637_v56, %v1801_v55  ;;  %v2639_v60 = vpop.f32.mrb[29].mxu0  ;;  %2929 = vst [vmem:[%s5221_s3 + $0xd0] sm:$0xff] %v2881_v58 }
 0x284   :  { %v3497_v62 = vadd.f32 %v2639_v60, %v1803_v57  ;;  %2930 = vst [vmem:[%s5221_s3 + $0xd8] sm:$0xff] %v2882_v61 }
 0x285   :  { %v1807_v63 = vpop.f32.mrb[30].mxu1  ;;  %v2883_v2 = vadd.f32 %v3496_v59, %v5022_v9 }
 0x286   :  { %v2643_v0 = vpop.f32.mrb[30].mxu0  ;;  %v1809_v1 = vpop.f32.mrb[31].mxu1  ;;  %v2884_v5 = vadd.f32 %v3497_v62, %v5024_v12 }
 0x287   :  { %v3498_v3 = vadd.f32 %v2643_v0, %v1807_v63  ;;  %v2645_v4 = vpop.f32.mrb[31].mxu0  ;;  %2931 = vst [vmem:[%s5221_s3 + $0xe0] sm:$0xff] %v2883_v2 }
 0x288   :  { %v3499_v6 = vadd.f32 %v2645_v4, %v1809_v1  ;;  %2932 = vst [vmem:[%s5221_s3 + $0xe8] sm:$0xff] %v2884_v5 }
 0x289   :  { %v1813_v7 = vpop.f32.mrb[32].mxu1  ;;  %v2885_v11 = vadd.f32 %v3498_v3, %v5022_v9 }
 0x28a   :  { %v2649_v8 = vpop.f32.mrb[32].mxu0  ;;  %v1815_v10 = vpop.f32.mrb[33].mxu1  ;;  %v2886_v15 = vadd.f32 %v3499_v6, %v5024_v12 }
 0x28b   :  { %v3500_v13 = vadd.f32 %v2649_v8, %v1813_v7  ;;  %v2651_v14 = vpop.f32.mrb[33].mxu0  ;;  %2933 = vst [vmem:[%s5221_s3 + $0xf0] sm:$0xff] %v2885_v11 }
 0x28c   :  { %v3501_v16 = vadd.f32 %v2651_v14, %v1815_v10  ;;  %2934 = vst [vmem:[%s5221_s3 + $0xf8] sm:$0xff] %v2886_v15 }
 0x28d   :  { %v1819_v17 = vpop.f32.mrb[34].mxu1  ;;  %v2887_v20 = vadd.f32 %v3500_v13, %v5022_v9 }
 0x28e   :  { %v2655_v18 = vpop.f32.mrb[34].mxu0  ;;  %v1821_v19 = vpop.f32.mrb[35].mxu1  ;;  %v2888_v23 = vadd.f32 %v3501_v16, %v5024_v12 }
 0x28f   :  { %v3502_v21 = vadd.f32 %v2655_v18, %v1819_v17  ;;  %v2657_v22 = vpop.f32.mrb[35].mxu0  ;;  %2935 = vst [vmem:[%s5221_s3 + $0x100] sm:$0xff] %v2887_v20 }
 0x290   :  { %v3503_v24 = vadd.f32 %v2657_v22, %v1821_v19  ;;  %2936 = vst [vmem:[%s5221_s3 + $0x108] sm:$0xff] %v2888_v23 }
 0x291   :  { %v1825_v25 = vpop.f32.mrb[36].mxu1  ;;  %v2889_v28 = vadd.f32 %v3502_v21, %v5022_v9 }
 0x292   :  { %v2661_v26 = vpop.f32.mrb[36].mxu0  ;;  %v1827_v27 = vpop.f32.mrb[37].mxu1  ;;  %v2890_v31 = vadd.f32 %v3503_v24, %v5024_v12 }
 0x293   :  { %v3504_v29 = vadd.f32 %v2661_v26, %v1825_v25  ;;  %v2663_v30 = vpop.f32.mrb[37].mxu0  ;;  %2937 = vst [vmem:[%s5221_s3 + $0x110] sm:$0xff] %v2889_v28 }
 0x294   :  { %v3505_v32 = vadd.f32 %v2663_v30, %v1827_v27  ;;  %2938 = vst [vmem:[%s5221_s3 + $0x118] sm:$0xff] %v2890_v31 }
 0x295   :  { %v1831_v33 = vpop.f32.mrb[38].mxu1  ;;  %v2891_v36 = vadd.f32 %v3504_v29, %v5022_v9 }
 0x296   :  { %v2667_v34 = vpop.f32.mrb[38].mxu0  ;;  %v1833_v35 = vpop.f32.mrb[39].mxu1  ;;  %v2892_v39 = vadd.f32 %v3505_v32, %v5024_v12 }
 0x297   :  { %v3506_v37 = vadd.f32 %v2667_v34, %v1831_v33  ;;  %v2669_v38 = vpop.f32.mrb[39].mxu0  ;;  %2939 = vst [vmem:[%s5221_s3 + $0x120] sm:$0xff] %v2891_v36 }
 0x298   :  { %v3507_v40 = vadd.f32 %v2669_v38, %v1833_v35  ;;  %2940 = vst [vmem:[%s5221_s3 + $0x128] sm:$0xff] %v2892_v39 }
 0x299   :  { %v1837_v41 = vpop.f32.mrb[40].mxu1  ;;  %v2893_v44 = vadd.f32 %v3506_v37, %v5022_v9 }
 0x29a   :  { %v2673_v42 = vpop.f32.mrb[40].mxu0  ;;  %v1839_v43 = vpop.f32.mrb[41].mxu1  ;;  %v2894_v47 = vadd.f32 %v3507_v40, %v5024_v12 }
 0x29b   :  { %v3508_v45 = vadd.f32 %v2673_v42, %v1837_v41  ;;  %v2675_v46 = vpop.f32.mrb[41].mxu0  ;;  %2941 = vst [vmem:[%s5221_s3 + $0x130] sm:$0xff] %v2893_v44 }
 0x29c   :  { %v3509_v48 = vadd.f32 %v2675_v46, %v1839_v43  ;;  %2942 = vst [vmem:[%s5221_s3 + $0x138] sm:$0xff] %v2894_v47 }
 0x29d   :  { %v1843_v49 = vpop.f32.mrb[42].mxu1  ;;  %v2895_v52 = vadd.f32 %v3508_v45, %v5022_v9 }
 0x29e   :  { %v2679_v50 = vpop.f32.mrb[42].mxu0  ;;  %v1845_v51 = vpop.f32.mrb[43].mxu1  ;;  %v2896_v55 = vadd.f32 %v3509_v48, %v5024_v12 }
 0x29f   :  { %v3510_v53 = vadd.f32 %v2679_v50, %v1843_v49  ;;  %v2681_v54 = vpop.f32.mrb[43].mxu0  ;;  %2943 = vst [vmem:[%s5221_s3 + $0x140] sm:$0xff] %v2895_v52 }
 0x2a0   :  { %v3511_v56 = vadd.f32 %v2681_v54, %v1845_v51  ;;  %2944 = vst [vmem:[%s5221_s3 + $0x148] sm:$0xff] %v2896_v55 }
 0x2a1   :  { %v1849_v57 = vpop.f32.mrb[44].mxu1  ;;  %v2897_v60 = vadd.f32 %v3510_v53, %v5022_v9 }
 0x2a2   :  { %v2685_v58 = vpop.f32.mrb[44].mxu0  ;;  %v1851_v59 = vpop.f32.mrb[45].mxu1  ;;  %v2898_v63 = vadd.f32 %v3511_v56, %v5024_v12 }
 0x2a3   :  { %v3512_v61 = vadd.f32 %v2685_v58, %v1849_v57  ;;  %v2687_v62 = vpop.f32.mrb[45].mxu0  ;;  %2945 = vst [vmem:[%s5221_s3 + $0x150] sm:$0xff] %v2897_v60 }
 0x2a4   :  { %v3513_v0 = vadd.f32 %v2687_v62, %v1851_v59  ;;  %2946 = vst [vmem:[%s5221_s3 + $0x158] sm:$0xff] %v2898_v63 }
 0x2a5   :  { %v1855_v1 = vpop.f32.mrb[46].mxu1  ;;  %v2899_v4 = vadd.f32 %v3512_v61, %v5022_v9 }
 0x2a6   :  { %v2691_v2 = vpop.f32.mrb[46].mxu0  ;;  %v1857_v3 = vpop.f32.mrb[47].mxu1  ;;  %v2900_v7 = vadd.f32 %v3513_v0, %v5024_v12 }
 0x2a7   :  { %v3514_v5 = vadd.f32 %v2691_v2, %v1855_v1  ;;  %v2693_v6 = vpop.f32.mrb[47].mxu0  ;;  %2947 = vst [vmem:[%s5221_s3 + $0x160] sm:$0xff] %v2899_v4 }
 0x2a8   :  { %v3515_v8 = vadd.f32 %v2693_v6, %v1857_v3  ;;  %2948 = vst [vmem:[%s5221_s3 + $0x168] sm:$0xff] %v2900_v7 }
 0x2a9   :  { %v2901_v10 = vadd.f32 %v3514_v5, %v5022_v9 }
 0x2aa   :  { %v2902_v11 = vadd.f32 %v3515_v8, %v5024_v12 }
 0x2ab   :  { %2949 = vst [vmem:[%s5221_s3 + $0x170] sm:$0xff] %v2901_v10 }
 0x2ac   :  { %2950 = vst [vmem:[%s5221_s3 + $0x178] sm:$0xff] %v2902_v11 }
 0x2ad   :  { %2955 = vsyncpa [#allocation3], 1 }

// kernel: model_forward.4
= control target key start
LH: loop header
LB: loop body
LE: loop exit
PB: predicated region body
PF: predicated region fallthrough
CT: control target
= control target key end

     0   :  { %s1706_s1 = inlined_call_operand.vmem [shape: f32[1536,128], index: 1, kind: input, shape index: {}]   ;;  %s1707_s0 = inlined_call_operand.vmem [shape: f32[8,1536], index: 0, kind: input, shape index: {}]   ;;  %s1708_s2 = inlined_call_operand.vmem [shape: f32[1,128], index: 2, kind: input, shape index: {}]   ;;  %s1709_s3 = inlined_call_operand.vmem [shape: f32[8,128], index: 3, kind: output, shape index: {}]  }
   0x1   :  { %v48_v0 = vld [vmem:[%s1706_s1 + $0x80] sm:$0xff]  ;;  %v49_v1 = vld [vmem:[%s1706_s1 + $0x88] sm:$0xff]  ;;  %v50_v11 = vld [vmem:[%s1706_s1 + $0x90] sm:$0xff] }
   0x2   :  { %v80_v2 = vld [vmem:[%s1706_s1 + $0x180] sm:$0xff]  ;;  %v875_v3 = vpack.c.bf16 %v49_v1, %v48_v0  ;;  %v81_v4 = vld [vmem:[%s1706_s1 + $0x188] sm:$0xff]  ;;  %v51_v13 = vld [vmem:[%s1706_s1 + $0x98] sm:$0xff] }
   0x3   :  { %v32_v5 = vld [vmem:[%s1706_s1] sm:$0xff]  ;;  %v33_v6 = vld [vmem:[%s1706_s1 + $0x8] sm:$0xff]  ;;  %v907_v7 = vpack.c.bf16 %v81_v4, %v80_v2  ;;  %v82_v14 = vld [vmem:[%s1706_s1 + $0x190] sm:$0xff]  ;;  %v879_v16 = vpack.c.bf16 %v51_v13, %v50_v11 }
   0x4   :  { %v877_v8 = vpack.c.bf16 %v33_v6, %v32_v5  ;;  %v64_v9 = vld [vmem:[%s1706_s1 + $0x100] sm:$0xff]  ;;  %v65_v10 = vld [vmem:[%s1706_s1 + $0x108] sm:$0xff]  ;;  %876 = vmatprep.subr.bf16.mxu0 %v875_v3  ;;  %v83_v15 = vld [vmem:[%s1706_s1 + $0x198] sm:$0xff] }
   0x5   :  { %v909_v12 = vpack.c.bf16 %v65_v10, %v64_v9  ;;  %908 = vmatprep.subr.bf16.mxu1 %v907_v7  ;;  %v911_v17 = vpack.c.bf16 %v83_v15, %v82_v14  ;;  %v34_v18 = vld [vmem:[%s1706_s1 + $0x10] sm:$0xff]  ;;  %v35_v19 = vld [vmem:[%s1706_s1 + $0x18] sm:$0xff]  ;;  %v52_v23 = vld [vmem:[%s1706_s1 + $0xa0] sm:$0xff] }
   0x6   :  { %878 = vmatpush3.bf16.msra.mxu0 %v877_v8  ;;  %v66_v20 = vld [vmem:[%s1706_s1 + $0x110] sm:$0xff]  ;;  %v881_v21 = vpack.c.bf16 %v35_v19, %v34_v18  ;;  %v67_v22 = vld [vmem:[%s1706_s1 + $0x118] sm:$0xff]  ;;  %v53_v24 = vld [vmem:[%s1706_s1 + $0xa8] sm:$0xff] }
   0x7   :  { %910 = vmatpush3.bf16.msra.mxu1 %v909_v12  ;;  %880 = vmatprep.subr.bf16.mxu0 %v879_v16  ;;  %v913_v25 = vpack.c.bf16 %v67_v22, %v66_v20  ;;  %v883_v26 = vpack.c.bf16 %v53_v24, %v52_v23  ;;  %v84_v27 = vld [vmem:[%s1706_s1 + $0x1a0] sm:$0xff]  ;;  %v85_v28 = vld [vmem:[%s1706_s1 + $0x1a8] sm:$0xff]  ;;  %v54_v35 = vld [vmem:[%s1706_s1 + $0xb0] sm:$0xff] }
   0x8   :  { %912 = vmatprep.subr.bf16.mxu1 %v911_v17  ;;  %v36_v29 = vld [vmem:[%s1706_s1 + $0x20] sm:$0xff]  ;;  %v915_v30 = vpack.c.bf16 %v85_v28, %v84_v27  ;;  %v37_v31 = vld [vmem:[%s1706_s1 + $0x28] sm:$0xff]  ;;  %v55_v36 = vld [vmem:[%s1706_s1 + $0xb8] sm:$0xff] }
   0x9   :  { %v68_v32 = vld [vmem:[%s1706_s1 + $0x120] sm:$0xff]  ;;  %v69_v33 = vld [vmem:[%s1706_s1 + $0x128] sm:$0xff]  ;;  %v885_v34 = vpack.c.bf16 %v37_v31, %v36_v29  ;;  %v86_v37 = vld [vmem:[%s1706_s1 + $0x1b0] sm:$0xff]  ;;  %v887_v39 = vpack.c.bf16 %v55_v36, %v54_v35 }
   0xa   :  { %882 = vmatpush3.bf16.msra.mxu0 %v881_v21  ;;  %v917_v38 = vpack.c.bf16 %v69_v33, %v68_v32  ;;  %v87_v40 = vld [vmem:[%s1706_s1 + $0x1b8] sm:$0xff]  ;;  %v38_v41 = vld [vmem:[%s1706_s1 + $0x30] sm:$0xff]  ;;  %v56_v46 = vld [vmem:[%s1706_s1 + $0xc0] sm:$0xff] }
   0xb   :  { %914 = vmatpush3.bf16.msra.mxu1 %v913_v25  ;;  %884 = vmatprep.subr.bf16.mxu0 %v883_v26  ;;  %v39_v42 = vld [vmem:[%s1706_s1 + $0x38] sm:$0xff]  ;;  %v919_v43 = vpack.c.bf16 %v87_v40, %v86_v37  ;;  %v70_v44 = vld [vmem:[%s1706_s1 + $0x130] sm:$0xff]  ;;  %v57_v47 = vld [vmem:[%s1706_s1 + $0xc8] sm:$0xff] }
   0xc   :  { %916 = vmatprep.subr.bf16.mxu1 %v915_v30  ;;  %v71_v45 = vld [vmem:[%s1706_s1 + $0x138] sm:$0xff]  ;;  %v88_v48 = vld [vmem:[%s1706_s1 + $0x1c0] sm:$0xff]  ;;  %v89_v49 = vld [vmem:[%s1706_s1 + $0x1c8] sm:$0xff]  ;;  %v889_v50 = vpack.c.bf16 %v39_v42, %v38_v41  ;;  %v891_v52 = vpack.c.bf16 %v57_v47, %v56_v46 }
   0xd   :  { %v921_v51 = vpack.c.bf16 %v71_v45, %v70_v44  ;;  %v40_v53 = vld [vmem:[%s1706_s1 + $0x40] sm:$0xff]  ;;  %v41_v54 = vld [vmem:[%s1706_s1 + $0x48] sm:$0xff]  ;;  %v923_v56 = vpack.c.bf16 %v89_v49, %v88_v48  ;;  %v58_v58 = vld [vmem:[%s1706_s1 + $0xd0] sm:$0xff] }
   0xe   :  { %886 = vmatpush3.bf16.msra.mxu0 %v885_v34  ;;  %v72_v55 = vld [vmem:[%s1706_s1 + $0x140] sm:$0xff]  ;;  %v73_v57 = vld [vmem:[%s1706_s1 + $0x148] sm:$0xff]  ;;  %v59_v59 = vld [vmem:[%s1706_s1 + $0xd8] sm:$0xff]  ;;  %v893_v62 = vpack.c.bf16 %v41_v54, %v40_v53 }
   0xf   :  { %918 = vmatpush3.bf16.msra.mxu1 %v917_v38  ;;  %888 = vmatprep.subr.bf16.mxu0 %v887_v39  ;;  %v90_v60 = vld [vmem:[%s1706_s1 + $0x1d0] sm:$0xff]  ;;  %v91_v61 = vld [vmem:[%s1706_s1 + $0x1d8] sm:$0xff]  ;;  %v925_v63 = vpack.c.bf16 %v73_v57, %v72_v55  ;;  %v895_v0 = vpack.c.bf16 %v59_v59, %v58_v58  ;;  %v60_v6 = vld [vmem:[%s1706_s1 + $0xe0] sm:$0xff] }
  0x10   :  { %920 = vmatprep.subr.bf16.mxu1 %v919_v43  ;;  %v42_v1 = vld [vmem:[%s1706_s1 + $0x50] sm:$0xff]  ;;  %v43_v2 = vld [vmem:[%s1706_s1 + $0x58] sm:$0xff]  ;;  %v927_v4 = vpack.c.bf16 %v91_v61, %v90_v60  ;;  %v61_v7 = vld [vmem:[%s1706_s1 + $0xe8] sm:$0xff] }
  0x11   :  { %v74_v3 = vld [vmem:[%s1706_s1 + $0x150] sm:$0xff]  ;;  %v75_v5 = vld [vmem:[%s1706_s1 + $0x158] sm:$0xff]  ;;  %v92_v8 = vld [vmem:[%s1706_s1 + $0x1e0] sm:$0xff]  ;;  %v897_v10 = vpack.c.bf16 %v43_v2, %v42_v1  ;;  %v899_v14 = vpack.c.bf16 %v61_v7, %v60_v6 }
  0x12   :  { %890 = vmatpush3.bf16.msra.mxu0 %v889_v50  ;;  %v93_v9 = vld [vmem:[%s1706_s1 + $0x1e8] sm:$0xff]  ;;  %v44_v11 = vld [vmem:[%s1706_s1 + $0x60] sm:$0xff]  ;;  %v929_v13 = vpack.c.bf16 %v75_v5, %v74_v3  ;;  %v23_v17 = vld [vmem:[%s1707_s0 + $0x18] sm:$0xff] }
  0x13   :  { %922 = vmatpush3.bf16.msra.mxu1 %v921_v51  ;;  %892 = vmatprep.subr.bf16.mxu0 %v891_v52  ;;  %v45_v12 = vld [vmem:[%s1706_s1 + $0x68] sm:$0xff]  ;;  %v76_v15 = vld [vmem:[%s1706_s1 + $0x160] sm:$0xff]  ;;  %v931_v18 = vpack.c.bf16 %v93_v9, %v92_v8  ;;  %v62_v20 = vld [vmem:[%s1706_s1 + $0xf0] sm:$0xff] }
  0x14   :  { %924 = vmatprep.subr.bf16.mxu1 %v923_v56  ;;  %v21_v16 = vld [vmem:[%s1707_s0 + $0x8] sm:$0xff]  ;;  %v63_v21 = vld [vmem:[%s1706_s1 + $0xf8] sm:$0xff]  ;;  %v94_v22 = vld [vmem:[%s1706_s1 + $0x1f0] sm:$0xff]  ;;  %358 = vmatprep.mubr.f32.mxu1 %v23_v17  ;;  %v901_v24 = vpack.c.bf16 %v45_v12, %v44_v11 }
  0x15   :  { %v77_v19 = vld [vmem:[%s1706_s1 + $0x168] sm:$0xff]  ;;  %288 = vmatprep.mubr.f32.mxu0 %v21_v16  ;;  %v95_v23 = vld [vmem:[%s1706_s1 + $0x1f8] sm:$0xff]  ;;  %v903_v26 = vpack.c.bf16 %v63_v21, %v62_v20  ;;  %v46_v27 = vld [vmem:[%s1706_s1 + $0x70] sm:$0xff] }
  0x16   :  { %894 = vmatpush3.bf16.msra.mxu0 %v893_v62  ;;  %v933_v25 = vpack.c.bf16 %v77_v19, %v76_v15  ;;  %v47_v28 = vld [vmem:[%s1706_s1 + $0x78] sm:$0xff]  ;;  %v78_v29 = vld [vmem:[%s1706_s1 + $0x170] sm:$0xff]  ;;  %v935_v30 = vpack.c.bf16 %v95_v23, %v94_v22  ;;  %v112_v32 = vld [vmem:[%s1706_s1 + $0x280] sm:$0xff] }
  0x17   :  { %926 = vmatpush3.bf16.msra.mxu1 %v925_v63  ;;  %896 = vmatprep.subr.bf16.mxu0 %v895_v0  ;;  %v79_v31 = vld [vmem:[%s1706_s1 + $0x178] sm:$0xff]  ;;  %v113_v33 = vld [vmem:[%s1706_s1 + $0x288] sm:$0xff]  ;;  %v144_v34 = vld [vmem:[%s1706_s1 + $0x380] sm:$0xff]  ;;  %v905_v36 = vpack.c.bf16 %v47_v28, %v46_v27 }
  0x18   :  { %928 = vmatprep.subr.bf16.mxu1 %v927_v4  ;;  %v145_v35 = vld [vmem:[%s1706_s1 + $0x388] sm:$0xff]  ;;  %v937_v37 = vpack.c.bf16 %v79_v31, %v78_v29  ;;  %v939_v38 = vpack.c.bf16 %v113_v33, %v112_v32  ;;  %v96_v39 = vld [vmem:[%s1706_s1 + $0x200] sm:$0xff]  ;;  %v114_v44 = vld [vmem:[%s1706_s1 + $0x290] sm:$0xff] }
  0x19   :  { %v97_v40 = vld [vmem:[%s1706_s1 + $0x208] sm:$0xff]  ;;  %v128_v41 = vld [vmem:[%s1706_s1 + $0x300] sm:$0xff]  ;;  %v971_v42 = vpack.c.bf16 %v145_v35, %v144_v34  ;;  %v115_v45 = vld [vmem:[%s1706_s1 + $0x298] sm:$0xff] }
  0x1a   :  { %898 = vmatpush3.bf16.msra.mxu0 %v897_v10  ;;  %v129_v43 = vld [vmem:[%s1706_s1 + $0x308] sm:$0xff]  ;;  %v146_v46 = vld [vmem:[%s1706_s1 + $0x390] sm:$0xff]  ;;  %v147_v47 = vld [vmem:[%s1706_s1 + $0x398] sm:$0xff]  ;;  %v941_v50 = vpack.c.bf16 %v97_v40, %v96_v39  ;;  %v943_v52 = vpack.c.bf16 %v115_v45, %v114_v44 }
  0x1b   :  { %930 = vmatpush3.bf16.msra.mxu1 %v929_v13  ;;  %900 = vmatprep.subr.bf16.mxu0 %v899_v14  ;;  %v20_v48 = vld [vmem:[%s1707_s0] sm:$0xff]  ;;  %v22_v49 = vld [vmem:[%s1707_s0 + $0x10] sm:$0xff]  ;;  %v973_v51 = vpack.c.bf16 %v129_v43, %v128_v41  ;;  %v99_v54 = vld [vmem:[%s1706_s1 + $0x218] sm:$0xff]  ;;  %v975_v56 = vpack.c.bf16 %v147_v47, %v146_v46 }
  0x1c   :  { %932 = vmatprep.subr.bf16.mxu1 %v931_v18  ;;  %v98_v53 = vld [vmem:[%s1706_s1 + $0x210] sm:$0xff]  ;;  %v131_v57 = vld [vmem:[%s1706_s1 + $0x318] sm:$0xff]  ;;  %v116_v58 = vld [vmem:[%s1706_s1 + $0x2a0] sm:$0xff] }
  0x1d   :  { %v130_v55 = vld [vmem:[%s1706_s1 + $0x310] sm:$0xff]  ;;  %v117_v59 = vld [vmem:[%s1706_s1 + $0x2a8] sm:$0xff]  ;;  %v148_v60 = vld [vmem:[%s1706_s1 + $0x3a0] sm:$0xff]  ;;  %v945_v62 = vpack.c.bf16 %v99_v54, %v98_v53 }
  0x1e   :  { %902 = vmatpush3.bf16.msra.mxu0 %v901_v24  ;;  %v149_v61 = vld [vmem:[%s1706_s1 + $0x3a8] sm:$0xff]  ;;  %v977_v63 = vpack.c.bf16 %v131_v57, %v130_v55  ;;  %v947_v0 = vpack.c.bf16 %v117_v59, %v116_v58  ;;  %v100_v1 = vld [vmem:[%s1706_s1 + $0x220] sm:$0xff]  ;;  %v118_v6 = vld [vmem:[%s1706_s1 + $0x2b0] sm:$0xff] }
  0x1f   :  { %934 = vmatpush3.bf16.msra.mxu1 %v933_v25  ;;  %904 = vmatprep.subr.bf16.mxu0 %v903_v26  ;;  %v101_v2 = vld [vmem:[%s1706_s1 + $0x228] sm:$0xff]  ;;  %v132_v3 = vld [vmem:[%s1706_s1 + $0x320] sm:$0xff]  ;;  %v979_v4 = vpack.c.bf16 %v149_v61, %v148_v60  ;;  %v119_v7 = vld [vmem:[%s1706_s1 + $0x2b8] sm:$0xff] }
  0x20   :  { %936 = vmatprep.subr.bf16.mxu1 %v935_v30  ;;  %v133_v5 = vld [vmem:[%s1706_s1 + $0x328] sm:$0xff]  ;;  %v150_v8 = vld [vmem:[%s1706_s1 + $0x3b0] sm:$0xff]  ;;  %v151_v9 = vld [vmem:[%s1706_s1 + $0x3b8] sm:$0xff]  ;;  %v949_v10 = vpack.c.bf16 %v101_v2, %v100_v1  ;;  %v951_v12 = vpack.c.bf16 %v119_v7, %v118_v6 }
  0x21   :  { %v981_v11 = vpack.c.bf16 %v133_v5, %v132_v3  ;;  %v102_v13 = vld [vmem:[%s1706_s1 + $0x230] sm:$0xff]  ;;  %v103_v14 = vld [vmem:[%s1706_s1 + $0x238] sm:$0xff]  ;;  %v983_v16 = vpack.c.bf16 %v151_v9, %v150_v8  ;;  %v120_v18 = vld [vmem:[%s1706_s1 + $0x2c0] sm:$0xff] }
  0x22   :  { %906 = vmatpush3.bf16.msra.mxu0 %v905_v36  ;;  %v134_v15 = vld [vmem:[%s1706_s1 + $0x330] sm:$0xff]  ;;  %v135_v17 = vld [vmem:[%s1706_s1 + $0x338] sm:$0xff]  ;;  %v121_v19 = vld [vmem:[%s1706_s1 + $0x2c8] sm:$0xff]  ;;  %v953_v22 = vpack.c.bf16 %v103_v14, %v102_v13 }
  0x23   :  { %938 = vmatpush3.bf16.msra.mxu1 %v937_v37  ;;  %940 = vmatprep.subr.bf16.mxu0 %v939_v38  ;;  %v152_v20 = vld [vmem:[%s1706_s1 + $0x3c0] sm:$0xff]  ;;  %v153_v21 = vld [vmem:[%s1706_s1 + $0x3c8] sm:$0xff]  ;;  %v985_v25 = vpack.c.bf16 %v135_v17, %v134_v15  ;;  %v955_v26 = vpack.c.bf16 %v121_v19, %v120_v18  ;;  %v27_v29 = vld [vmem:[%s1707_s0 + $0x38] sm:$0xff] }
  0x24   :  { %972 = vmatprep.subr.bf16.mxu1 %v971_v42  ;;  %v104_v23 = vld [vmem:[%s1706_s1 + $0x240] sm:$0xff]  ;;  %v25_v24 = vld [vmem:[%s1707_s0 + $0x28] sm:$0xff]  ;;  %v987_v30 = vpack.c.bf16 %v153_v21, %v152_v20  ;;  %v122_v32 = vld [vmem:[%s1706_s1 + $0x2d0] sm:$0xff] }
  0x25   :  { %289 = vmatmul.mubr.f32.vlgmr.msra.gmra.mrb[0].mxu0 %v20_v48  ;;  %v105_v27 = vld [vmem:[%s1706_s1 + $0x248] sm:$0xff]  ;;  %v136_v28 = vld [vmem:[%s1706_s1 + $0x340] sm:$0xff]  ;;  %v123_v33 = vld [vmem:[%s1706_s1 + $0x2d8] sm:$0xff] }
  0x26   :  { %359 = vmatmul.mubr.f32.vlgmr.msra.gmra.mrb[0].mxu1 %v22_v49  ;;  %942 = vmatpush3.bf16.msra.mxu0 %v941_v50  ;;  %v137_v31 = vld [vmem:[%s1706_s1 + $0x348] sm:$0xff]  ;;  %v154_v34 = vld [vmem:[%s1706_s1 + $0x3d0] sm:$0xff]  ;;  %v155_v35 = vld [vmem:[%s1706_s1 + $0x3d8] sm:$0xff]  ;;  %v957_v36 = vpack.c.bf16 %v105_v27, %v104_v23  ;;  %v959_v38 = vpack.c.bf16 %v123_v33, %v122_v32 }
  0x27   :  { %974 = vmatpush3.bf16.msra.mxu1 %v973_v51  ;;  %944 = vmatprep.subr.bf16.mxu0 %v943_v52  ;;  %v989_v37 = vpack.c.bf16 %v137_v31, %v136_v28  ;;  %v106_v39 = vld [vmem:[%s1706_s1 + $0x250] sm:$0xff]  ;;  %v107_v40 = vld [vmem:[%s1706_s1 + $0x258] sm:$0xff]  ;;  %v991_v42 = vpack.c.bf16 %v155_v35, %v154_v34  ;;  %v124_v44 = vld [vmem:[%s1706_s1 + $0x2e0] sm:$0xff] }
  0x28   :  { %976 = vmatprep.subr.bf16.mxu1 %v975_v56  ;;  %428 = vmatprep.mubr.f32.mxu0 %v25_v24  ;;  %v138_v41 = vld [vmem:[%s1706_s1 + $0x350] sm:$0xff]  ;;  %v139_v43 = vld [vmem:[%s1706_s1 + $0x358] sm:$0xff]  ;;  %v125_v45 = vld [vmem:[%s1706_s1 + $0x2e8] sm:$0xff]  ;;  %v961_v48 = vpack.c.bf16 %v107_v40, %v106_v39 }
  0x29   :  { %498 = vmatprep.mubr.f32.mxu1 %v27_v29  ;;  %v156_v46 = vld [vmem:[%s1706_s1 + $0x3e0] sm:$0xff]  ;;  %v157_v47 = vld [vmem:[%s1706_s1 + $0x3e8] sm:$0xff]  ;;  %v993_v49 = vpack.c.bf16 %v139_v43, %v138_v41  ;;  %v963_v50 = vpack.c.bf16 %v125_v45, %v124_v44  ;;  %v126_v56 = vld [vmem:[%s1706_s1 + $0x2f0] sm:$0xff] }
  0x2a   :  { %946 = vmatpush3.bf16.msra.mxu0 %v945_v62  ;;  %v108_v51 = vld [vmem:[%s1706_s1 + $0x260] sm:$0xff]  ;;  %v109_v52 = vld [vmem:[%s1706_s1 + $0x268] sm:$0xff]  ;;  %v995_v54 = vpack.c.bf16 %v157_v47, %v156_v46  ;;  %v127_v57 = vld [vmem:[%s1706_s1 + $0x2f8] sm:$0xff] }
  0x2b   :  { %978 = vmatpush3.bf16.msra.mxu1 %v977_v63  ;;  %948 = vmatprep.subr.bf16.mxu0 %v947_v0  ;;  %v140_v53 = vld [vmem:[%s1706_s1 + $0x360] sm:$0xff]  ;;  %v141_v55 = vld [vmem:[%s1706_s1 + $0x368] sm:$0xff]  ;;  %v158_v58 = vld [vmem:[%s1706_s1 + $0x3f0] sm:$0xff]  ;;  %v965_v60 = vpack.c.bf16 %v109_v52, %v108_v51  ;;  %v967_v62 = vpack.c.bf16 %v127_v57, %v126_v56 }
  0x2c   :  { %980 = vmatprep.subr.bf16.mxu1 %v979_v4  ;;  %v159_v59 = vld [vmem:[%s1706_s1 + $0x3f8] sm:$0xff]  ;;  %v997_v61 = vpack.c.bf16 %v141_v55, %v140_v53  ;;  %v110_v63 = vld [vmem:[%s1706_s1 + $0x270] sm:$0xff]  ;;  %v176_v4 = vld [vmem:[%s1706_s1 + $0x480] sm:$0xff] }
  0x2d   :  { %v111_v0 = vld [vmem:[%s1706_s1 + $0x278] sm:$0xff]  ;;  %v142_v1 = vld [vmem:[%s1706_s1 + $0x370] sm:$0xff]  ;;  %v999_v2 = vpack.c.bf16 %v159_v59, %v158_v58  ;;  %v177_v5 = vld [vmem:[%s1706_s1 + $0x488] sm:$0xff] }
  0x2e   :  { %950 = vmatpush3.bf16.msra.mxu0 %v949_v10  ;;  %v143_v3 = vld [vmem:[%s1706_s1 + $0x378] sm:$0xff]  ;;  %v208_v6 = vld [vmem:[%s1706_s1 + $0x580] sm:$0xff]  ;;  %v209_v7 = vld [vmem:[%s1706_s1 + $0x588] sm:$0xff]  ;;  %v969_v8 = vpack.c.bf16 %v111_v0, %v110_v63  ;;  %v1003_v10 = vpack.c.bf16 %v177_v5, %v176_v4 }
  0x2f   :  { %982 = vmatpush3.bf16.msra.mxu1 %v981_v11  ;;  %952 = vmatprep.subr.bf16.mxu0 %v951_v12  ;;  %v1001_v9 = vpack.c.bf16 %v143_v3, %v142_v1  ;;  %v160_v11 = vld [vmem:[%s1706_s1 + $0x400] sm:$0xff]  ;;  %v161_v12 = vld [vmem:[%s1706_s1 + $0x408] sm:$0xff]  ;;  %v1035_v14 = vpack.c.bf16 %v209_v7, %v208_v6  ;;  %v179_v17 = vld [vmem:[%s1706_s1 + $0x498] sm:$0xff] }
  0x30   :  { %984 = vmatprep.subr.bf16.mxu1 %v983_v16  ;;  %v192_v13 = vld [vmem:[%s1706_s1 + $0x500] sm:$0xff]  ;;  %v193_v15 = vld [vmem:[%s1706_s1 + $0x508] sm:$0xff]  ;;  %v178_v16 = vld [vmem:[%s1706_s1 + $0x490] sm:$0xff]  ;;  %v1005_v21 = vpack.c.bf16 %v161_v12, %v160_v11 }
  0x31   :  { %v210_v18 = vld [vmem:[%s1706_s1 + $0x590] sm:$0xff]  ;;  %v211_v19 = vld [vmem:[%s1706_s1 + $0x598] sm:$0xff]  ;;  %v24_v20 = vld [vmem:[%s1707_s0 + $0x20] sm:$0xff]  ;;  %v1037_v23 = vpack.c.bf16 %v193_v15, %v192_v13  ;;  %v1007_v24 = vpack.c.bf16 %v179_v17, %v178_v16 }
  0x32   :  { %954 = vmatpush3.bf16.msra.mxu0 %v953_v22  ;;  %v26_v22 = vld [vmem:[%s1707_s0 + $0x30] sm:$0xff]  ;;  %v1039_v28 = vpack.c.bf16 %v211_v19, %v210_v18  ;;  %v195_v29 = vld [vmem:[%s1706_s1 + $0x518] sm:$0xff]  ;;  %v181_v31 = vld [vmem:[%s1706_s1 + $0x4a8] sm:$0xff] }
  0x33   :  { %986 = vmatpush3.bf16.msra.mxu1 %v985_v25  ;;  %956 = vmatprep.subr.bf16.mxu0 %v955_v26  ;;  %v162_v25 = vld [vmem:[%s1706_s1 + $0x410] sm:$0xff]  ;;  %v163_v26 = vld [vmem:[%s1706_s1 + $0x418] sm:$0xff]  ;;  %v212_v32 = vld [vmem:[%s1706_s1 + $0x5a0] sm:$0xff] }
  0x34   :  { %988 = vmatprep.subr.bf16.mxu1 %v987_v30  ;;  %v194_v27 = vld [vmem:[%s1706_s1 + $0x510] sm:$0xff]  ;;  %v180_v30 = vld [vmem:[%s1706_s1 + $0x4a0] sm:$0xff]  ;;  %v213_v33 = vld [vmem:[%s1706_s1 + $0x5a8] sm:$0xff]  ;;  %v1009_v35 = vpack.c.bf16 %v163_v26, %v162_v25 }
  0x35   :  { %v29_v34 = vld [vmem:[%s1707_s0 + $0x48] sm:$0xff]  ;;  %v164_v39 = vld [vmem:[%s1706_s1 + $0x420] sm:$0xff]  ;;  %v182_v44 = vld [vmem:[%s1706_s1 + $0x4b0] sm:$0xff] }
  0x36   :  { %958 = vmatpush3.bf16.msra.mxu0 %v957_v36  ;;  %v31_v36 = vld [vmem:[%s1707_s0 + $0x58] sm:$0xff]  ;;  %v165_v40 = vld [vmem:[%s1706_s1 + $0x428] sm:$0xff]  ;;  %v196_v41 = vld [vmem:[%s1706_s1 + $0x520] sm:$0xff] }
  0x37   :  { %990 = vmatpush3.bf16.msra.mxu1 %v989_v37  ;;  %960 = vmatprep.subr.bf16.mxu0 %v959_v38  ;;  %v1041_v37 = vpack.c.bf16 %v195_v29, %v194_v27  ;;  %v1011_v38 = vpack.c.bf16 %v181_v31, %v180_v30  ;;  %v197_v43 = vld [vmem:[%s1706_s1 + $0x528] sm:$0xff]  ;;  %v183_v45 = vld [vmem:[%s1706_s1 + $0x4b8] sm:$0xff]  ;;  %v214_v46 = vld [vmem:[%s1706_s1 + $0x5b0] sm:$0xff] }
  0x38   :  { %992 = vmatprep.subr.bf16.mxu1 %v991_v42  ;;  %v1043_v42 = vpack.c.bf16 %v213_v33, %v212_v32  ;;  %v215_v47 = vld [vmem:[%s1706_s1 + $0x5b8] sm:$0xff]  ;;  %v166_v51 = vld [vmem:[%s1706_s1 + $0x430] sm:$0xff]  ;;  %v184_v56 = vld [vmem:[%s1706_s1 + $0x4c0] sm:$0xff] }
  0x39   :  { %v167_v52 = vld [vmem:[%s1706_s1 + $0x438] sm:$0xff]  ;;  %v198_v53 = vld [vmem:[%s1706_s1 + $0x530] sm:$0xff]  ;;  %v185_v57 = vld [vmem:[%s1706_s1 + $0x4c8] sm:$0xff] }
  0x3a   :  { %962 = vmatpush3.bf16.msra.mxu0 %v961_v48  ;;  %v1013_v48 = vpack.c.bf16 %v165_v40, %v164_v39  ;;  %v199_v55 = vld [vmem:[%s1706_s1 + $0x538] sm:$0xff]  ;;  %v216_v58 = vld [vmem:[%s1706_s1 + $0x5c0] sm:$0xff]  ;;  %v217_v59 = vld [vmem:[%s1706_s1 + $0x5c8] sm:$0xff] }
  0x3b   :  { %994 = vmatpush3.bf16.msra.mxu1 %v993_v49  ;;  %964 = vmatprep.subr.bf16.mxu0 %v963_v50  ;;  %v1045_v49 = vpack.c.bf16 %v197_v43, %v196_v41  ;;  %v1015_v50 = vpack.c.bf16 %v183_v45, %v182_v44  ;;  %v168_v63 = vld [vmem:[%s1706_s1 + $0x440] sm:$0xff]  ;;  %v169_v0 = vld [vmem:[%s1706_s1 + $0x448] sm:$0xff]  ;;  %v186_v4 = vld [vmem:[%s1706_s1 + $0x4d0] sm:$0xff] }
  0x3c   :  { %996 = vmatprep.subr.bf16.mxu1 %v995_v54  ;;  %v1047_v54 = vpack.c.bf16 %v215_v47, %v214_v46  ;;  %v200_v1 = vld [vmem:[%s1706_s1 + $0x540] sm:$0xff]  ;;  %v201_v3 = vld [vmem:[%s1706_s1 + $0x548] sm:$0xff]  ;;  %v187_v5 = vld [vmem:[%s1706_s1 + $0x4d8] sm:$0xff] }
  0x3d   :  { %v218_v6 = vld [vmem:[%s1706_s1 + $0x5d0] sm:$0xff]  ;;  %v219_v7 = vld [vmem:[%s1706_s1 + $0x5d8] sm:$0xff]  ;;  %v188_v16 = vld [vmem:[%s1706_s1 + $0x4e0] sm:$0xff] }
  0x3e   :  { %966 = vmatpush3.bf16.msra.mxu0 %v965_v60  ;;  %v1017_v60 = vpack.c.bf16 %v167_v52, %v166_v51  ;;  %v170_v11 = vld [vmem:[%s1706_s1 + $0x450] sm:$0xff]  ;;  %v171_v12 = vld [vmem:[%s1706_s1 + $0x458] sm:$0xff]  ;;  %v189_v17 = vld [vmem:[%s1706_s1 + $0x4e8] sm:$0xff] }
  0x3f   :  { %998 = vmatpush3.bf16.msra.mxu1 %v997_v61  ;;  %968 = vmatprep.subr.bf16.mxu0 %v967_v62  ;;  %v1049_v61 = vpack.c.bf16 %v199_v55, %v198_v53  ;;  %v1019_v62 = vpack.c.bf16 %v185_v57, %v184_v56  ;;  %v202_v13 = vld [vmem:[%s1706_s1 + $0x550] sm:$0xff]  ;;  %v203_v15 = vld [vmem:[%s1706_s1 + $0x558] sm:$0xff]  ;;  %v220_v18 = vld [vmem:[%s1706_s1 + $0x5e0] sm:$0xff] }
  0x40   :  { %1000 = vmatprep.subr.bf16.mxu1 %v999_v2  ;;  %v1051_v2 = vpack.c.bf16 %v217_v59, %v216_v58  ;;  %v221_v19 = vld [vmem:[%s1706_s1 + $0x5e8] sm:$0xff]  ;;  %v204_v25 = vld [vmem:[%s1706_s1 + $0x560] sm:$0xff]  ;;  %v191_v29 = vld [vmem:[%s1706_s1 + $0x4f8] sm:$0xff] }
  0x41   :  { %v1059_v26 = vpack.c.bf16 %v221_v19, %v220_v18  ;;  %v205_v27 = vld [vmem:[%s1706_s1 + $0x568] sm:$0xff]  ;;  %v222_v30 = vld [vmem:[%s1706_s1 + $0x5f0] sm:$0xff]  ;;  %v223_v31 = vld [vmem:[%s1706_s1 + $0x5f8] sm:$0xff] }
  0x42   :  { %970 = vmatpush3.bf16.msra.mxu0 %v969_v8  ;;  %v1021_v8 = vpack.c.bf16 %v169_v0, %v168_v63  ;;  %v1061_v33 = vpack.c.bf16 %v205_v27, %v204_v25  ;;  %v207_v39 = vld [vmem:[%s1706_s1 + $0x578] sm:$0xff]  ;;  %v30_v43 = vld [vmem:[%s1707_s0 + $0x50] sm:$0xff] }
  0x43   :  { %1002 = vmatpush3.bf16.msra.mxu1 %v1001_v9  ;;  %1004 = vmatprep.subr.bf16.mxu0 %v1003_v10  ;;  %v1053_v9 = vpack.c.bf16 %v201_v3, %v200_v1  ;;  %v1023_v10 = vpack.c.bf16 %v187_v5, %v186_v4  ;;  %v664_v3 = vld [vmem:[%s1708_s2] ss:$0 sm:$0xff] }
  0x44   :  { %1036 = vmatprep.subr.bf16.mxu1 %v1035_v14  ;;  %v1055_v14 = vpack.c.bf16 %v219_v7, %v218_v6 }
  0x45   :  { %429 = vmatmul.mubr.f32.vlgmr.msra.gmra.mrb[2].mxu0 %v24_v20  ;;  %v1025_v20 = vpack.c.bf16 %v171_v12, %v170_v11 }
  0x46   :  { %1006 = vmatpush3.bf16.msra.mxu0 %v1005_v21  ;;  %499 = vmatmul.mubr.f32.vlgmr.msra.gmra.mrb[2].mxu1 %v26_v22  ;;  %v1057_v21 = vpack.c.bf16 %v203_v15, %v202_v13  ;;  %v1027_v22 = vpack.c.bf16 %v189_v17, %v188_v16 }
  0x47   :  { %1038 = vmatpush3.bf16.msra.mxu1 %v1037_v23  ;;  %1008 = vmatprep.subr.bf16.mxu0 %v1007_v24  ;;  %v172_v23 = vld [vmem:[%s1706_s1 + $0x460] sm:$0xff]  ;;  %v173_v24 = vld [vmem:[%s1706_s1 + $0x468] sm:$0xff] }
  0x48   :  { %1040 = vmatprep.subr.bf16.mxu1 %v1039_v28  ;;  %568 = vmatprep.mubr.f32.mxu0 %v29_v34  ;;  %v190_v28 = vld [vmem:[%s1706_s1 + $0x4f0] sm:$0xff]  ;;  %v1029_v32 = vpack.c.bf16 %v173_v24, %v172_v23 }
  0x49   :  { %638 = vmatprep.mubr.f32.mxu1 %v31_v36  ;;  %v1031_v34 = vpack.c.bf16 %v191_v29, %v190_v28  ;;  %v175_v36 = vld [vmem:[%s1706_s1 + $0x478] sm:$0xff] }
  0x4a   :  { %1010 = vmatpush3.bf16.msra.mxu0 %v1009_v35  ;;  %v174_v35 = vld [vmem:[%s1706_s1 + $0x470] sm:$0xff] }
  0x4b   :  { %1042 = vmatpush3.bf16.msra.mxu1 %v1041_v37  ;;  %1012 = vmatprep.subr.bf16.mxu0 %v1011_v38  ;;  %v1063_v37 = vpack.c.bf16 %v223_v31, %v222_v30  ;;  %v206_v38 = vld [vmem:[%s1706_s1 + $0x570] sm:$0xff]  ;;  %v1033_v40 = vpack.c.bf16 %v175_v36, %v174_v35 }
  0x4c   :  { %1044 = vmatprep.subr.bf16.mxu1 %v1043_v42  ;;  %v1065_v41 = vpack.c.bf16 %v207_v39, %v206_v38  ;;  %v28_v42 = vld [vmem:[%s1707_s0 + $0x40] sm:$0xff] }
  0x4e   :  { %1014 = vmatpush3.bf16.msra.mxu0 %v1013_v48 }
  0x4f   :  { %1046 = vmatpush3.bf16.msra.mxu1 %v1045_v49  ;;  %1016 = vmatprep.subr.bf16.mxu0 %v1015_v50 }
  0x50   :  { %1048 = vmatprep.subr.bf16.mxu1 %v1047_v54 }
  0x52   :  { %1018 = vmatpush3.bf16.msra.mxu0 %v1017_v60 }
  0x53   :  { %1050 = vmatpush3.bf16.msra.mxu1 %v1049_v61  ;;  %1020 = vmatprep.subr.bf16.mxu0 %v1019_v62 }
  0x54   :  { %1052 = vmatprep.subr.bf16.mxu1 %v1051_v2 }
  0x56   :  { %1022 = vmatpush3.bf16.msra.mxu0 %v1021_v8 }
  0x57   :  { %1054 = vmatpush3.bf16.msra.mxu1 %v1053_v9  ;;  %1024 = vmatprep.subr.bf16.mxu0 %v1023_v10 }
  0x58   :  { %1056 = vmatprep.subr.bf16.mxu1 %v1055_v14 }
  0x5a   :  { %1026 = vmatpush3.bf16.msra.mxu0 %v1025_v20 }
  0x5b   :  { %1058 = vmatpush3.bf16.msra.mxu1 %v1057_v21  ;;  %1028 = vmatprep.subr.bf16.mxu0 %v1027_v22 }
  0x5c   :  { %1060 = vmatprep.subr.bf16.mxu1 %v1059_v26 }
  0x5e   :  { %1030 = vmatpush3.bf16.msra.mxu0 %v1029_v32 }
  0x5f   :  { %1062 = vmatpush3.bf16.msra.mxu1 %v1061_v33  ;;  %1032 = vmatprep.subr.bf16.mxu0 %v1031_v34 }
  0x60   :  { %1064 = vmatprep.subr.bf16.mxu1 %v1063_v37 }
  0x62   :  { %1034 = vmatpush3.bf16.msra.mxu0 %v1033_v40 }
  0x63   :  { %1066 = vmatpush3.bf16.msra.mxu1 %v1065_v41 }
  0x65   :  { %569 = vmatmul.mubr.f32.vlgmr.msra.gmra.mrb[4].mxu0 %v28_v42 }
  0x66   :  { %639 = vmatmul.mubr.f32.vlgmr.msra.gmra.mrb[4].mxu1 %v30_v43 }
  0xf8   :  { %v697_v44 = vpop.f32.mrb[0].mxu0 }
  0xf9   :  { %v732_v45 = vpop.f32.mrb[0].mxu1  ;;  %v698_v46 = vpop.f32.mrb[1].mxu0 }
  0xfa   :  { %v699_v47 = vadd.f32 %v698_v46, %v697_v44  ;;  %v733_v48 = vpop.f32.mrb[1].mxu1 }
  0xfb   :  { %v734_v49 = vadd.f32 %v733_v48, %v732_v45 }
  0xfd   :  { %v361_v50 = vadd.f32 %v734_v49, %v699_v47 }
 0x118   :  { %v767_v51 = vpop.f32.mrb[2].mxu0 }
 0x119   :  { %v768_v52 = vpop.f32.mrb[3].mxu0  ;;  %v802_v53 = vpop.f32.mrb[2].mxu1 }
 0x11a   :  { %v769_v54 = vadd.f32 %v768_v52, %v767_v51  ;;  %v803_v55 = vpop.f32.mrb[3].mxu1 }
 0x11b   :  { %v804_v56 = vadd.f32 %v803_v55, %v802_v53 }
 0x11c   :  { %v431_v57 = vadd.f32 %v769_v54, %v361_v50 }
 0x11e   :  { %v501_v58 = vadd.f32 %v804_v56, %v431_v57 }
 0x138   :  { %v837_v59 = vpop.f32.mrb[4].mxu0 }
 0x139   :  { %v838_v60 = vpop.f32.mrb[5].mxu0  ;;  %v872_v61 = vpop.f32.mrb[4].mxu1 }
 0x13a   :  { %v839_v62 = vadd.f32 %v838_v60, %v837_v59  ;;  %v873_v63 = vpop.f32.mrb[5].mxu1 }
 0x13b   :  { %v874_v0 = vadd.f32 %v873_v63, %v872_v61 }
 0x13c   :  { %v571_v1 = vadd.f32 %v839_v62, %v501_v58 }
 0x13e   :  { %v641_v2 = vadd.f32 %v874_v0, %v571_v1 }
 0x140   :  { %v657_v4 = vadd.f32 %v664_v3, %v641_v2 }
 0x142   :  { %v658_v5 = vmax.f32 %v657_v4, 0.0 }
 0x144   :  { %659 = vst [vmem:[%s1709_s3] sm:$0xff] %v658_v5 }

// kernel: squeeze.2
= control target key start
LH: loop header
LB: loop body
LE: loop exit
PB: predicated region body
PF: predicated region fallthrough
CT: control target
= control target key end

     0   :  { %vm6_vm0 = vcmask 1041409   ;;  %vm10_vm1 = vcmask 1042434   ;;  %s4612_s14 = smov 124   ;;  %s89_s21 = smov 3  ;;  %vm94_vm2 = vcmask 1043458   ;;  %vm7250_vm3 = vcmask 31744   ;;  %s7247_s0 = inlined_call_operand.vmem [shape: f32[1,1,152,162], index: 0, kind: input, shape index: {}]   ;;  %s7248_s1 = inlined_call_operand.vmem [shape: f32[1,24624], index: 1, kind: output, shape index: {}]  }
   0x1   :  { %v3917_v0 = vld [vmem:[%s7247_s0 + $0x36] sm:$0x1]   ;;  %v3910_v3 = vld [vmem:[%s7247_s0 + $0x97] sm:$0x1]   ;;  %v3913_v7 = vld [vmem:[%s7247_s0 + $0xbe] sm:$0x1]  }
   0x2   :  { %v3918_v1 = vld [vmem:[%s7247_s0 + $0xb5] sm:$0x2]   ;;  %v3911_v4 = vld [vmem:[%s7247_s0 + $0x116] sm:$0x2]   ;;  %v3914_v8 = vld [vmem:[%s7247_s0 + $0x3d] sm:$0x2]  }
   0x3   :  { %v113_v2 = vsel %vm6_vm0, %v3918_v1, %v3917_v0  ;;  %v70_v5 = vsel %vm6_vm0, %v3911_v4, %v3910_v3  ;;  %v3912_v6 = vld [vmem:[%s7247_s0 + $0x15] sm:$0x4]   ;;  %s92_s22 = smov 12  ;;  %v3903_v10 = vld [vmem:[%s7247_s0 + $0x1f] sm:$0x1]   ;;  %s4613_s25 = smov 126   ;;  %v87_v11 = vsel %vm6_vm0, %v3914_v8, %v3913_v7 }
   0x4   :  { %114 = vrot.lane.b32.xlu1 %v113_v2, %s4612_s14  ;;  %v74_v9 = vsel %vm10_vm1, %v3912_v6, %v70_v5  ;;  %v3915_v12 = vld [vmem:[%s7247_s0 + $0x36] ss:$8 sm:%s89_s21]   ;;  %v3904_v13 = vld [vmem:[%s7247_s0 + $0x9e] sm:$0x2]   ;;  %s38_s30 = smov 6  ;;  %vm40_vm4 = vcmask 1042433  }
   0x5   :  { %75 = vrot.lane.b32.xlu0 %v74_v9, %s4613_s25  ;;  %v3916_v14 = vld [vmem:[%s7247_s0 + $0xce] ss:$-8 sm:%s92_s22]   ;;  %v30_v15 = vsel %vm6_vm0, %v3904_v13, %v3903_v10  ;;  %v3905_v16 = vld [vmem:[%s7247_s0 + $0x11d] sm:$0x4]   ;;  %s43_s10 = smov 24  ;;  %vm45_vm5 = vcmask 1044483  }
   0x6   :  { %v3906_v17 = vld [vmem:[%s7247_s0 + $0x9f] sm:$0x1]   ;;  %v95_v18 = vsel %vm94_vm2, %v3916_v14, %v3915_v12  ;;  %v34_v19 = vsel %vm10_vm1, %v3905_v16, %v30_v15  ;;  %v3909_v21 = vld [vmem:[%s7247_s0 + $0x92] sm:$0x20]   ;;  %vm49_vm6 = vcmask 1045509   ;;  %vm7249_vm7 = vcmask 15360  }
   0x7   :  { %v3907_v20 = vld [vmem:[%s7247_s0 + $0x227] ss:$-264 sm:%s38_s30]   ;;  %v97_v22 = vsel %vm7250_vm3, %v95_v18, %v87_v11  ;;  %v3919_v25 = vld [vmem:[%s7247_s0 + $0x5d] sm:$0x1]   ;;  %s126_s19 = smov 3  ;;  %s129_s20 = smov 12 }
   0x8   :  { %v41_v23 = vsel %vm40_vm4, %v3907_v20, %v3906_v17  ;;  %v3908_v24 = vld [vmem:[%s7247_s0 - $0x2c9] ss:$248 sm:%s43_s10]   ;;  %98 = vrot.lane.b32.xlu1 %v97_v22, %s4612_s14  ;;  %v3920_v27 = vld [vmem:[%s7247_s0 + $0xdc] sm:$0x2]   ;;  %vm7251_vm8 = vcmask 48128   ;;  %vm171_vm9 = vcmask 1043459  }
   0x9   :  { %v46_v26 = vsel %vm45_vm5, %v3908_v24, %v41_v23  ;;  %v124_v29 = vsel %vm6_vm0, %v3920_v27, %v3919_v25  ;;  %v3921_v30 = vld [vmem:[%s7247_s0 + $0x55] ss:$8 sm:%s126_s19]   ;;  %s165_s26 = smov 6  ;;  %v3925_v36 = vld [vmem:[%s7247_s0 + $0x7c] sm:$0x1]   ;;  %s4614_s9 = smov 122  }
   0xa   :  { %v50_v28 = vsel %vm49_vm6, %v3909_v21, %v46_v26  ;;  %v3922_v31 = vld [vmem:[%s7247_s0 + $0xed] ss:$-8 sm:%s129_s20]   ;;  %v3926_v38 = vld [vmem:[%s7247_s0 + $0xfb] sm:$0x2]   ;;  %v3929_v40 = vld [vmem:[%s7247_s0 + $0xf1] sm:$0x8]  }
   0xb   :  { %v52_v32 = vsel %vm7249_vm7, %v50_v28, %v34_v19  ;;  %v132_v33 = vsel %vm94_vm2, %v3922_v31, %v3921_v30  ;;  %v3923_v34 = vld [vmem:[%s7247_s0 + $0x55] sm:$0x1]   ;;  %v3927_v39 = vld [vmem:[%s7247_s0 + $0x7c] sm:$0x1]   ;;  %vm7252_vm10 = vcmask 64512   ;;  %v161_v44 = vsel %vm6_vm0, %v3926_v38, %v3925_v36  ;;  %s207_s22 = smov 3 }
   0xc   :  { %v3924_v35 = vld [vmem:[%s7247_s0 + $0xd4] sm:$0x2]   ;;  %53 = vrot.lane.b32.xlu0 %v52_v32, %s4613_s25  ;;  %v134_v41 = vsel %vm7251_vm8, %v132_v33, %v124_v29  ;;  %v3928_v42 = vld [vmem:[%s7247_s0 + $0x184] ss:$-136 sm:%s165_s26]   ;;  %s214_s26 = smov 24  ;;  %s4615_s2 = smov 120  }
   0xd   :  { %v150_v37 = vsel %vm6_vm0, %v3924_v35, %v3923_v34  ;;  %v3930_v43 = vld [vmem:[%s7247_s0 + $0x74] sm:$0x1]   ;;  %v168_v45 = vsel %vm40_vm4, %v3928_v42, %v3927_v39  ;;  %v3932_v47 = vld [vmem:[%s7247_s0 + $0x9b] sm:$0x1]   ;;  %v3938_v55 = vld [vmem:[%s7247_s0 + $0x10e] sm:$0x20]  }
   0xe   :  { %151 = vrot.lane.b32.xlu1 %v150_v37, %s4614_s9  ;;  %v3931_v46 = vld [vmem:[%s7247_s0 + $0xf3] sm:$0x2]   ;;  %v3933_v48 = vld [vmem:[%s7247_s0 + $0x11a] sm:$0x2]   ;;  %v172_v49 = vsel %vm171_vm9, %v3929_v40, %v168_v45  ;;  %v3939_v59 = vld [vmem:[%s7247_s0 + $0x113] sm:$0x1]  }
   0xf   :  { %v190_v50 = vsel %vm6_vm0, %v3931_v46, %v3930_v43  ;;  %v201_v51 = vsel %vm6_vm0, %v3933_v48, %v3932_v47  ;;  %v3934_v52 = vld [vmem:[%s7247_s0 + $0x19] sm:$0x4]   ;;  %v174_v56 = vsel %vm7252_vm10, %v172_v49, %v161_v44  ;;  %s262_s6 = smov 3  ;;  %s265_s7 = smov 12  ;;  %vm7253_vm11 = vcmask 80896  }
  0x10   :  { %v3936_v53 = vld [vmem:[%s7247_s0 + $0x19] sm:$0x4]   ;;  %135 = vrot.lane.b32.xlu0 %v134_v41, %s4614_s9  ;;  %v205_v60 = vsel %vm10_vm1, %v3934_v52, %v201_v51  ;;  %v3940_v62 = vld [vmem:[%s7247_s0 + $0x12] sm:$0x2]   ;;  %v3942_v2 = vld [vmem:[%s7247_s0 + $0x3a] sm:$0x1]  }
  0x11   :  { %v3935_v54 = vld [vmem:[%s7247_s0 + $0x11b] ss:$-264 sm:%s207_s22]   ;;  %v243_v1 = vsel %vm6_vm0, %v3940_v62, %v3939_v59  ;;  %v3943_v3 = vld [vmem:[%s7247_s0 + $0xb9] sm:$0x2]   ;;  %vm7290_vm12 = vcmask 97280   ;;  %s301_s22 = smov 6 }
  0x12   :  { %191 = vrot.lane.b32.xlu1 %v190_v50, %s4615_s2  ;;  %v212_v57 = vsel %vm10_vm1, %v3936_v53, %v3935_v54  ;;  %v3937_v58 = vld [vmem:[%s7247_s0 + $0xb3] ss:$-8 sm:%s214_s26]   ;;  %v3946_v7 = vld [vmem:[%s7247_s0 + $0x32] sm:$0x1]   ;;  %s4616_s23 = smov 118   ;;  %v260_v12 = vsel %vm6_vm0, %v3943_v3, %v3942_v2  ;;  %s339_s11 = smov 3 }
  0x13   :  { %v217_v61 = vsel %vm45_vm5, %v3937_v58, %v212_v57  ;;  %v3941_v63 = vld [vmem:[%s7247_s0 + $0x91] sm:$0x4]   ;;  %v3944_v4 = vld [vmem:[%s7247_s0 + $0x32] ss:$8 sm:%s262_s6]   ;;  %v3948_v10 = vld [vmem:[%s7247_s0 + $0x59] sm:$0x1]  }
  0x14   :  { %v221_v0 = vsel %vm49_vm6, %v3938_v55, %v217_v61  ;;  %175 = vrot.lane.b32.xlu0 %v174_v56, %s4615_s2  ;;  %v247_v5 = vsel %vm10_vm1, %v3941_v63, %v243_v1  ;;  %v3945_v6 = vld [vmem:[%s7247_s0 + $0xca] ss:$-8 sm:%s265_s7]   ;;  %v3949_v11 = vld [vmem:[%s7247_s0 + $0xd8] sm:$0x2]   ;;  %s342_s12 = smov 12  ;;  %s4617_s13 = smov 116  }
  0x15   :  { %v223_v8 = vsel %vm7253_vm11, %v221_v0, %v205_v60  ;;  %v3947_v9 = vld [vmem:[%s7247_s0 + $0xb1] sm:$0x2]   ;;  %v268_v13 = vsel %vm94_vm2, %v3945_v6, %v3944_v4  ;;  %v3950_v15 = vld [vmem:[%s7247_s0 + $0x59] sm:$0x1]   ;;  %v3952_v17 = vld [vmem:[%s7247_s0 + $0xce] sm:$0x8]   ;;  %v297_v25 = vsel %vm6_vm0, %v3949_v11, %v3948_v10 }
  0x16   :  { %248 = vrot.lane.b32.xlu1 %v247_v5, %s4616_s23  ;;  %v286_v14 = vsel %vm6_vm0, %v3947_v9, %v3946_v7  ;;  %v3951_v16 = vld [vmem:[%s7247_s0 + $0x161] ss:$-136 sm:%s301_s22]   ;;  %v270_v21 = vsel %vm7290_vm12, %v268_v13, %v260_v12  ;;  %vm7287_vm13 = vcmask 113664   ;;  %v3955_v22 = vld [vmem:[%s7247_s0 + $0x78] sm:$0x1]   ;;  %s382_s2 = smov 3 }
  0x17   :  { %v304_v18 = vsel %vm40_vm4, %v3951_v16, %v3950_v15  ;;  %v3953_v19 = vld [vmem:[%s7247_s0 + $0x51] sm:$0x1]   ;;  %v3956_v23 = vld [vmem:[%s7247_s0 + $0xf7] sm:$0x2]   ;;  %v3959_v29 = vld [vmem:[%s7247_s0 + $0xf0] sm:$0x1]  }
  0x18   :  { %v3954_v20 = vld [vmem:[%s7247_s0 + $0xd0] sm:$0x2]   ;;  %224 = vrot.lane.b32.xlu0 %v223_v8, %s4616_s23  ;;  %v3957_v24 = vld [vmem:[%s7247_s0 + $0xf8] ss:$-136 sm:%s339_s11]   ;;  %v308_v26 = vsel %vm171_vm9, %v3952_v17, %v304_v18  ;;  %s389_s3 = smov 24  ;;  %s4618_s7 = smov 114   ;;  %v337_v40 = vsel %vm6_vm0, %v3956_v23, %v3955_v22 }
  0x19   :  { %v326_v27 = vsel %vm6_vm0, %v3954_v20, %v3953_v19  ;;  %v3958_v28 = vld [vmem:[%s7247_s0 - $0x78] ss:$120 sm:%s342_s12]   ;;  %v3961_v31 = vld [vmem:[%s7247_s0 + $0x10f] sm:$0x1]   ;;  %v310_v35 = vsel %vm7287_vm13, %v308_v26, %v297_v25  ;;  %vm7286_vm14 = vcmask 130048   ;;  %s445_s18 = smov 12 }
  0x1a   :  { %287 = vrot.lane.b32.xlu1 %v286_v14, %s4617_s13  ;;  %v3960_v30 = vld [vmem:[%s7247_s0 + $0x6f] sm:$0x2]   ;;  %v3962_v32 = vld [vmem:[%s7247_s0 + $0xe] sm:$0x2]   ;;  %v3967_v39 = vld [vmem:[%s7247_s0 + $0x102] sm:$0x20]   ;;  %v345_v41 = vsel %vm94_vm2, %v3958_v28, %v3957_v24 }
  0x1b   :  { %v3964_v33 = vld [vmem:[%s7247_s0 + $0x7] ss:$8 sm:%s382_s2]   ;;  %v365_v42 = vsel %vm6_vm0, %v3960_v30, %v3959_v29  ;;  %vm451_vm15 = vcmask 1044484   ;;  %v376_v45 = vsel %vm6_vm0, %v3962_v32, %v3961_v31  ;;  %v3971_v49 = vld [vmem:[%s7247_s0 + $0x2e] sm:$0x1]   ;;  %v347_v54 = vsel %vm7286_vm14, %v345_v41, %v337_v40  ;;  %s491_s16 = smov 3 }
  0x1c   :  { %271 = vrot.lane.b32.xlu0 %v270_v21, %s4617_s13  ;;  %v3965_v34 = vld [vmem:[%s7247_s0 + $0x8d] sm:$0x4]   ;;  %v3968_v43 = vld [vmem:[%s7247_s0 + $0x7] sm:$0x1]   ;;  %v3972_v50 = vld [vmem:[%s7247_s0 + $0xad] sm:$0x2]  }
  0x1d   :  { %v3963_v36 = vld [vmem:[%s7247_s0 + $0x8d] sm:$0x4]   ;;  %v387_v37 = vsel %vm10_vm1, %v3965_v34, %v3964_v33  ;;  %v3969_v44 = vld [vmem:[%s7247_s0 + $0x86] sm:$0x2]   ;;  %v3974_v51 = vld [vmem:[%s7247_s0 + $0x2e] sm:$0x1]   ;;  %v433_v0 = vsel %vm6_vm0, %v3972_v50, %v3971_v49 }
  0x1e   :  { %327 = vrot.lane.b32.xlu1 %v326_v27, %s4618_s7  ;;  %v3966_v38 = vld [vmem:[%s7247_s0 + $0x2a7] ss:$-136 sm:%s389_s3]   ;;  %v418_v47 = vsel %vm6_vm0, %v3969_v44, %v3968_v43  ;;  %v3975_v52 = vld [vmem:[%s7247_s0 + $0xad] sm:$0x2]   ;;  %s4619_s3 = smov 112   ;;  %vm7283_vm7 = vcmask 146432   ;;  %v380_v57 = vsel %vm10_vm1, %v3963_v36, %v376_v45 }
  0x1f   :  { %v392_v46 = vsel %vm45_vm5, %v3966_v38, %v387_v37  ;;  %v3970_v48 = vld [vmem:[%s7247_s0 + $0x105] sm:$0x4]   ;;  %v3977_v53 = vld [vmem:[%s7247_s0 + $0xa2] sm:$0x10]   ;;  %v443_v55 = vsel %vm6_vm0, %v3975_v52, %v3974_v51  ;;  %v3973_v60 = vld [vmem:[%s7247_s0 + $0x12c] sm:$0x4]  }
  0x20   :  { %311 = vrot.lane.b32.xlu0 %v310_v35, %s4618_s7  ;;  %v3976_v56 = vld [vmem:[%s7247_s0 + $0x33e] ss:$-264 sm:%s445_s18]   ;;  %v396_v58 = vsel %vm49_vm6, %v3967_v39, %v392_v46  ;;  %v422_v59 = vsel %vm10_vm1, %v3970_v48, %v418_v47  ;;  %s494_s17 = smov 12  ;;  %s4620_s14 = smov 110   ;;  %vm7281_vm3 = vcmask 162816   ;;  %v437_v7 = vsel %vm10_vm1, %v3973_v60, %v433_v0 }
  0x21   :  { %v448_v61 = vsel %vm94_vm2, %v3976_v56, %v443_v55  ;;  %v3979_v62 = vld [vmem:[%s7247_s0 + $0x26] sm:$0x1]   ;;  %v398_v5 = vsel %vm7283_vm7, %v396_v58, %v380_v57  ;;  %v3982_v6 = vld [vmem:[%s7247_s0 + $0x4d] sm:$0x1]   ;;  %s530_s24 = smov 3  ;;  %s533_s26 = smov 12 }
  0x22   :  { %366 = vrot.lane.b32.xlu1 %v365_v42, %s4619_s3  ;;  %v3980_v63 = vld [vmem:[%s7247_s0 + $0xa5] sm:$0x2]   ;;  %v452_v1 = vsel %vm451_vm15, %v3977_v53, %v448_v61  ;;  %v3983_v10 = vld [vmem:[%s7247_s0 + $0xcc] sm:$0x2]   ;;  %v3986_v13 = vld [vmem:[%s7247_s0 + $0xc5] sm:$0x1]  }
  0x23   :  { %v3978_v2 = vld [vmem:[%s7247_s0 + $0x121] sm:$0x20]   ;;  %v474_v3 = vsel %vm6_vm0, %v3980_v63, %v3979_v62  ;;  %v3984_v11 = vld [vmem:[%s7247_s0 + $0xcd] ss:$-136 sm:%s491_s16]   ;;  %vm7279_vm8 = vcmask 179200   ;;  %s4621_s25 = smov 108   ;;  %v489_v23 = vsel %vm6_vm0, %v3983_v10, %v3982_v6 }
  0x24   :  { %v3981_v4 = vld [vmem:[%s7247_s0 + $0x124] sm:$0x4]   ;;  %348 = vrot.lane.b32.xlu0 %v347_v54, %s4619_s3  ;;  %v456_v8 = vsel %vm49_vm6, %v3978_v2, %v452_v1  ;;  %v3985_v12 = vld [vmem:[%s7247_s0 - $0xa3] ss:$120 sm:%s494_s17]   ;;  %s577_s22 = smov 12  ;;  %s629_s4 = smov 6 }
  0x25   :  { %v478_v9 = vsel %vm10_vm1, %v3981_v4, %v474_v3  ;;  %v3987_v14 = vld [vmem:[%s7247_s0 + $0x44] sm:$0x2]   ;;  %v458_v15 = vsel %vm7281_vm3, %v456_v8, %v437_v7  ;;  %v3988_v16 = vld [vmem:[%s7247_s0 + $0xec] sm:$0x1]   ;;  %v3992_v20 = vld [vmem:[%s7247_s0 + $0x64] sm:$0x1]   ;;  %v497_v24 = vsel %vm94_vm2, %v3985_v12, %v3984_v11 }
  0x26   :  { %423 = vrot.lane.b32.xlu1 %v422_v59, %s4620_s14  ;;  %v3989_v17 = vld [vmem:[%s7247_s0 + $0x6b] sm:$0x2]   ;;  %v3997_v21 = vld [vmem:[%s7247_s0 + $0xb] sm:$0x1]   ;;  %v517_v25 = vsel %vm6_vm0, %v3987_v14, %v3986_v13  ;;  %v3993_v26 = vld [vmem:[%s7247_s0 + $0xe3] sm:$0x2]   ;;  %v499_v35 = vsel %vm7279_vm8, %v497_v24, %v489_v23 }
  0x27   :  { %v3990_v18 = vld [vmem:[%s7247_s0 + $0x64] ss:$8 sm:%s530_s24]   ;;  %v3998_v22 = vld [vmem:[%s7247_s0 + $0x8a] sm:$0x2]   ;;  %v4000_v31 = vld [vmem:[%s7247_s0 + $0x7f] sm:$0x10]   ;;  %v528_v38 = vsel %vm6_vm0, %v3989_v17, %v3988_v16  ;;  %v554_v40 = vsel %vm6_vm0, %v3993_v26, %v3992_v20 }
  0x28   :  { %399 = vrot.lane.b32.xlu0 %v398_v5, %s4620_s14  ;;  %v3991_v19 = vld [vmem:[%s7247_s0 + $0xfc] ss:$-8 sm:%s533_s26]   ;;  %v3994_v27 = vld [vmem:[%s7247_s0 + $0xb] sm:$0x1]   ;;  %v575_v28 = vsel %vm6_vm0, %v3998_v22, %v3997_v21  ;;  %s4622_s5 = smov 106   ;;  %vm7278_vm10 = vcmask 195584  }
  0x29   :  { %v3995_v29 = vld [vmem:[%s7247_s0 + $0x8a] sm:$0x2]   ;;  %v4002_v33 = vld [vmem:[%s7247_s0 + $0x3] sm:$0x1]   ;;  %v4008_v37 = vld [vmem:[%s7247_s0 + $0xaa] sm:$0x1]   ;;  %v536_v39 = vsel %vm94_vm2, %v3991_v19, %v3990_v18 }
  0x2a   :  { %479 = vrot.lane.b32.xlu1 %v478_v9, %s4621_s25  ;;  %v3999_v30 = vld [vmem:[%s7247_s0 + $0x31b] ss:$-264 sm:%s577_s22]   ;;  %s634_s15 = smov 24  ;;  %v565_v43 = vsel %vm6_vm0, %v3995_v29, %v3994_v27  ;;  %v4005_v47 = vld [vmem:[%s7247_s0 + $0x2a] sm:$0x1]   ;;  %v538_v53 = vsel %vm7278_vm10, %v536_v39, %v528_v38  ;;  %s4623_s28 = smov 104  }
  0x2b   :  { %v580_v32 = vsel %vm94_vm2, %v3999_v30, %v575_v28  ;;  %v4003_v34 = vld [vmem:[%s7247_s0 + $0x82] sm:$0x2]   ;;  %v3996_v36 = vld [vmem:[%s7247_s0 + $0x109] sm:$0x4]   ;;  %v4009_v42 = vld [vmem:[%s7247_s0 + $0x232] ss:$-264 sm:%s629_s4]  }
  0x2c   :  { %459 = vrot.lane.b32.xlu0 %v458_v15, %s4621_s25  ;;  %v4001_v41 = vld [vmem:[%s7247_s0 + $0xfe] sm:$0x20]   ;;  %v584_v44 = vsel %vm451_vm15, %v4000_v31, %v580_v32  ;;  %v606_v45 = vsel %vm6_vm0, %v4003_v34, %v4002_v33  ;;  %v4010_v48 = vld [vmem:[%s7247_s0 - $0x2be] ss:$248 sm:%s634_s15]   ;;  %v632_v50 = vsel %vm40_vm4, %v4009_v42, %v4008_v37  ;;  %vm7273_vm15 = vcmask 211968   ;;  %s683_s6 = smov 12 }
  0x2d   :  { %v4004_v46 = vld [vmem:[%s7247_s0 + $0x101] sm:$0x4]   ;;  %v4006_v49 = vld [vmem:[%s7247_s0 + $0xa9] sm:$0x2]   ;;  %v4012_v51 = vld [vmem:[%s7247_s0 + $0xa2] sm:$0x1]   ;;  %v569_v54 = vsel %vm10_vm1, %v3996_v36, %v565_v43  ;;  %v588_v55 = vsel %vm49_vm6, %v4001_v41, %v584_v44  ;;  %v637_v59 = vsel %vm45_vm5, %v4010_v48, %v632_v50 }
  0x2e   :  { %518 = vrot.lane.b32.xlu1 %v517_v25, %s4622_s5  ;;  %v4013_v52 = vld [vmem:[%s7247_s0 + $0x121] sm:$0x2]   ;;  %v610_v56 = vsel %vm10_vm1, %v4004_v46, %v606_v45  ;;  %v4007_v57 = vld [vmem:[%s7247_s0 + $0x128] sm:$0x4]   ;;  %v621_v58 = vsel %vm6_vm0, %v4006_v49, %v4005_v47  ;;  %v590_v63 = vsel %vm7273_vm15, %v588_v55, %v569_v54  ;;  %s4624_s7 = smov 102   ;;  %vm7271_vm5 = vcmask 228352  }
  0x2f   :  { %v4011_v60 = vld [vmem:[%s7247_s0 + $0x9d] sm:$0x20]   ;;  %v661_v61 = vsel %vm6_vm0, %v4013_v52, %v4012_v51  ;;  %v4015_v0 = vld [vmem:[%s7247_s0 + $0xc9] sm:$0x1]   ;;  %v625_v2 = vsel %vm10_vm1, %v4007_v57, %v621_v58  ;;  %v4019_v7 = vld [vmem:[%s7247_s0 + $0x41] sm:$0x1]  }
  0x30   :  { %500 = vrot.lane.b32.xlu0 %v499_v35, %s4622_s5  ;;  %v4014_v62 = vld [vmem:[%s7247_s0 + $0x20] sm:$0x4]   ;;  %s680_s5 = smov 3  ;;  %v4016_v1 = vld [vmem:[%s7247_s0 + $0x48] sm:$0x2]   ;;  %v641_v3 = vsel %vm49_vm6, %v4011_v60, %v637_v59  ;;  %s717_s20 = smov 3 }
  0x31   :  { %v665_v4 = vsel %vm10_vm1, %v4014_v62, %v661_v61  ;;  %v4017_v5 = vld [vmem:[%s7247_s0 + $0x41] ss:$8 sm:%s680_s5]   ;;  %s720_s21 = smov 12  ;;  %s756_s22 = smov 6  ;;  %v4032_v9 = vld [vmem:[%s7247_s0 + $0x116] sm:$0x1]   ;;  %v643_v10 = vsel %vm7271_vm5, %v641_v3, %v625_v2  ;;  %v678_v16 = vsel %vm6_vm0, %v4016_v1, %v4015_v0 }
  0x32   :  { %555 = vrot.lane.b32.xlu1 %v554_v40, %s4623_s28  ;;  %v4018_v6 = vld [vmem:[%s7247_s0 + $0xd9] ss:$-8 sm:%s683_s6]   ;;  %s4625_s26 = smov 100   ;;  %v4021_v11 = vld [vmem:[%s7247_s0 + $0x68] sm:$0x1]   ;;  %vm7272_vm6 = vcmask 244736  }
  0x33   :  { %v4020_v8 = vld [vmem:[%s7247_s0 + $0xc0] sm:$0x2]   ;;  %v4022_v12 = vld [vmem:[%s7247_s0 + $0xe7] sm:$0x2]   ;;  %v4033_v13 = vld [vmem:[%s7247_s0 + $0x15] sm:$0x2]   ;;  %v686_v17 = vsel %vm94_vm2, %v4018_v6, %v4017_v5 }
  0x34   :  { %539 = vrot.lane.b32.xlu0 %v538_v53, %s4623_s28  ;;  %v4035_v14 = vld [vmem:[%s7247_s0 + $0x11e] sm:$0x1]   ;;  %v704_v18 = vsel %vm6_vm0, %v4020_v8, %v4019_v7  ;;  %v4023_v19 = vld [vmem:[%s7247_s0 + $0x60] ss:$8 sm:%s717_s20]   ;;  %v781_v25 = vsel %vm6_vm0, %v4033_v13, %v4032_v9  ;;  %v688_v29 = vsel %vm7272_vm6, %v686_v17, %v678_v16  ;;  %s4626_s23 = smov 98   ;;  %vm7270_vm11 = vcmask 261120  }
  0x35   :  { %v4036_v15 = vld [vmem:[%s7247_s0 + $0x1d] sm:$0x2]   ;;  %v4024_v20 = vld [vmem:[%s7247_s0 + $0xf8] ss:$-8 sm:%s720_s21]   ;;  %v4029_v24 = vld [vmem:[%s7247_s0 + $0x7f] sm:$0x1]   ;;  %v715_v30 = vsel %vm6_vm0, %v4022_v12, %v4021_v11 }
  0x36   :  { %611 = vrot.lane.b32.xlu1 %v610_v56, %s4624_s7  ;;  %v4025_v21 = vld [vmem:[%s7247_s0 + $0x60] sm:$0x1]   ;;  %v4030_v23 = vld [vmem:[%s7247_s0 + $0x187] ss:$-136 sm:%s756_s22]   ;;  %v791_v27 = vsel %vm6_vm0, %v4036_v15, %v4035_v14  ;;  %v723_v31 = vsel %vm94_vm2, %v4024_v20, %v4023_v19  ;;  %vm7254_vm2 = vcmask 293888   ;;  %s4627_s9 = smov 96  }
  0x37   :  { %v4026_v22 = vld [vmem:[%s7247_s0 + $0xdf] sm:$0x2]   ;;  %v4034_v26 = vld [vmem:[%s7247_s0 + $0x94] sm:$0x4]   ;;  %v4037_v28 = vld [vmem:[%s7247_s0 + $0x9c] sm:$0x4]   ;;  %v759_v35 = vsel %vm40_vm4, %v4030_v23, %v4029_v24  ;;  %v725_v43 = vsel %vm7270_vm11, %v723_v31, %v715_v30 }
  0x38   :  { %591 = vrot.lane.b32.xlu0 %v590_v63, %s4624_s7  ;;  %v741_v32 = vsel %vm6_vm0, %v4026_v22, %v4025_v21  ;;  %v4027_v33 = vld [vmem:[%s7247_s0 + $0x77] sm:$0x1]   ;;  %v785_v37 = vsel %vm10_vm1, %v4034_v26, %v781_v25  ;;  %v795_v38 = vsel %vm10_vm1, %v4037_v28, %v791_v27  ;;  %v4041_v39 = vld [vmem:[%s7247_s0 + $0x35] sm:$0x1]   ;;  %v4043_v41 = vld [vmem:[%s7247_s0 + $0x3d] sm:$0x1]  }
  0x39   :  { %v4028_v34 = vld [vmem:[%s7247_s0 + $0xf6] sm:$0x2]   ;;  %v4042_v40 = vld [vmem:[%s7247_s0 + $0xb4] sm:$0x2]   ;;  %v4044_v42 = vld [vmem:[%s7247_s0 + $0xbc] sm:$0x2]   ;;  %v797_v46 = vsel %vm7254_vm2, %v795_v38, %v785_v37 }
  0x3a   :  { %666 = vrot.lane.b32.xlu1 %v665_v4, %s4625_s26  ;;  %v4031_v36 = vld [vmem:[%s7247_s0 + $0xf4] sm:$0x8]   ;;  %vm7269_vm4 = vcmask 277504   ;;  %v752_v44 = vsel %vm6_vm0, %v4028_v34, %v4027_v33  ;;  %v4038_v47 = vld [vmem:[%s7247_s0 + $0x16] sm:$0x1]   ;;  %v830_v49 = vsel %vm6_vm0, %v4042_v40, %v4041_v39  ;;  %v836_v50 = vsel %vm6_vm0, %v4044_v42, %v4043_v41  ;;  %s4628_s22 = smov 92  }
  0x3b   :  { %v763_v45 = vsel %vm171_vm9, %v4031_v36, %v759_v35  ;;  %v4039_v48 = vld [vmem:[%s7247_s0 + $0x95] sm:$0x2]   ;;  %vm7255_vm9 = vcmask 310272   ;;  %v4047_v51 = vld [vmem:[%s7247_s0 + $0x54] sm:$0x1]   ;;  %vm7256_vm2 = vcmask 326656  }
  0x3c   :  { %644 = vrot.lane.b32.xlu0 %v643_v10, %s4625_s26  ;;  %v4048_v52 = vld [vmem:[%s7247_s0 + $0xd3] sm:$0x2]   ;;  %v4049_v53 = vld [vmem:[%s7247_s0 + $0x5c] sm:$0x1]   ;;  %v765_v55 = vsel %vm7269_vm4, %v763_v45, %v752_v44  ;;  %v815_v56 = vsel %vm6_vm0, %v4039_v48, %v4038_v47  ;;  %v4040_v57 = vld [vmem:[%s7247_s0 + $0x114] sm:$0x4]   ;;  %v838_v58 = vsel %vm7255_vm9, %v836_v50, %v830_v49 }
  0x3d   :  { %v4050_v54 = vld [vmem:[%s7247_s0 + $0xdb] sm:$0x2]   ;;  %v863_v59 = vsel %vm6_vm0, %v4048_v52, %v4047_v51  ;;  %v4053_v61 = vld [vmem:[%s7247_s0 + $0xf3] sm:$0x1]   ;;  %s4629_s30 = smov 94   ;;  %v819_v2 = vsel %vm10_vm1, %v4040_v57, %v815_v56  ;;  %s4630_s7 = smov 90  }
  0x3e   :  { %705 = vrot.lane.b32.xlu1 %v704_v18, %s4626_s23  ;;  %v869_v60 = vsel %vm6_vm0, %v4050_v54, %v4049_v53  ;;  %v4054_v62 = vld [vmem:[%s7247_s0 + $0x72] sm:$0x2]   ;;  %v4055_v63 = vld [vmem:[%s7247_s0 + $0xfb] sm:$0x1]   ;;  %v4059_v1 = vld [vmem:[%s7247_s0 + $0x12] sm:$0x1]  }
  0x3f   :  { %v4056_v0 = vld [vmem:[%s7247_s0 + $0x7a] sm:$0x2]   ;;  %v4060_v3 = vld [vmem:[%s7247_s0 + $0x91] sm:$0x2]   ;;  %v4062_v4 = vld [vmem:[%s7247_s0 + $0x1a] sm:$0x1]   ;;  %v871_v8 = vsel %vm7256_vm2, %v869_v60, %v863_v59  ;;  %v896_v9 = vsel %vm6_vm0, %v4054_v62, %v4053_v61 }
  0x40   :  { %689 = vrot.lane.b32.xlu0 %v688_v29, %s4626_s23  ;;  %v4063_v5 = vld [vmem:[%s7247_s0 + $0x99] sm:$0x2]   ;;  %v4045_v6 = vld [vmem:[%s7247_s0 + $0x35] sm:$0x1]   ;;  %v902_v10 = vsel %vm6_vm0, %v4056_v0, %v4055_v63  ;;  %vm7257_vm9 = vcmask 343040   ;;  %v929_v11 = vsel %vm6_vm0, %v4060_v3, %v4059_v1  ;;  %vm7258_vm2 = vcmask 359424  }
  0x41   :  { %v4046_v7 = vld [vmem:[%s7247_s0 + $0xb4] sm:$0x2]   ;;  %v4061_v12 = vld [vmem:[%s7247_s0 + $0x110] sm:$0x4]   ;;  %v939_v13 = vsel %vm6_vm0, %v4063_v5, %v4062_v4  ;;  %v4064_v14 = vld [vmem:[%s7247_s0 + $0x118] sm:$0x4]   ;;  %v904_v18 = vsel %vm7257_vm9, %v902_v10, %v896_v9 }
  0x42   :  { %742 = vrot.lane.b32.xlu1 %v741_v32, %s4627_s9  ;;  %v852_v15 = vsel %vm6_vm0, %v4046_v7, %v4045_v6  ;;  %v4051_v16 = vld [vmem:[%s7247_s0 + $0xd4] sm:$0x1]   ;;  %v933_v19 = vsel %vm10_vm1, %v4061_v12, %v929_v11  ;;  %v943_v20 = vsel %vm10_vm1, %v4064_v14, %v939_v13  ;;  %v4068_v21 = vld [vmem:[%s7247_s0 + $0x31] sm:$0x1]   ;;  %v4070_v23 = vld [vmem:[%s7247_s0 + $0x39] sm:$0x1]  }
  0x43   :  { %v4052_v17 = vld [vmem:[%s7247_s0 + $0x53] sm:$0x2]   ;;  %v4069_v22 = vld [vmem:[%s7247_s0 + $0xb0] sm:$0x2]   ;;  %v4071_v24 = vld [vmem:[%s7247_s0 + $0xb8] sm:$0x2]   ;;  %v945_v28 = vsel %vm7258_vm2, %v943_v20, %v933_v19 }
  0x44   :  { %726 = vrot.lane.b32.xlu0 %v725_v43, %s4627_s9  ;;  %v885_v25 = vsel %vm6_vm0, %v4052_v17, %v4051_v16  ;;  %s4632_s6 = smov 86   ;;  %v4057_v26 = vld [vmem:[%s7247_s0 + $0x73] sm:$0x1]   ;;  %v4065_v29 = vld [vmem:[%s7247_s0 + $0x12] sm:$0x1]   ;;  %v974_v31 = vsel %vm6_vm0, %v4069_v22, %v4068_v21  ;;  %v980_v32 = vsel %vm6_vm0, %v4071_v24, %v4070_v23  ;;  %vm7259_vm9 = vcmask 375808  }
  0x45   :  { %v4058_v27 = vld [vmem:[%s7247_s0 + $0xf2] sm:$0x2]   ;;  %v4066_v30 = vld [vmem:[%s7247_s0 + $0x91] sm:$0x2]   ;;  %v4074_v33 = vld [vmem:[%s7247_s0 + $0xd0] sm:$0x1]   ;;  %v982_v40 = vsel %vm7259_vm9, %v980_v32, %v974_v31 }
  0x46   :  { %798 = vrot.lane.b32.xlu1 %v797_v46, %s4628_s22  ;;  %v4075_v34 = vld [vmem:[%s7247_s0 + $0x4f] sm:$0x2]   ;;  %v4076_v35 = vld [vmem:[%s7247_s0 + $0xd8] sm:$0x1]   ;;  %v918_v37 = vsel %vm6_vm0, %v4058_v27, %v4057_v26  ;;  %s4633_s23 = smov 84   ;;  %v959_v38 = vsel %vm6_vm0, %v4066_v30, %v4065_v29  ;;  %vm7260_vm2 = vcmask 392192  }
  0x47   :  { %v4077_v36 = vld [vmem:[%s7247_s0 + $0x57] sm:$0x2]   ;;  %v4067_v39 = vld [vmem:[%s7247_s0 + $0x110] sm:$0x4]   ;;  %v1007_v41 = vsel %vm6_vm0, %v4075_v34, %v4074_v33  ;;  %v4080_v43 = vld [vmem:[%s7247_s0 + $0x67] sm:$0x1]  }
  0x48   :  { %766 = vrot.lane.b32.xlu0 %v765_v55, %s4629_s30  ;;  %v1013_v42 = vsel %vm6_vm0, %v4077_v36, %v4076_v35  ;;  %v4081_v44 = vld [vmem:[%s7247_s0 + $0xe6] sm:$0x2]   ;;  %v4082_v45 = vld [vmem:[%s7247_s0 + $0x6f] sm:$0x1]   ;;  %v4086_v47 = vld [vmem:[%s7247_s0 + $0x6] sm:$0x1]   ;;  %v963_v48 = vsel %vm10_vm1, %v4067_v39, %v959_v38 }
  0x49   :  { %v4083_v46 = vld [vmem:[%s7247_s0 + $0xee] sm:$0x2]   ;;  %v4087_v49 = vld [vmem:[%s7247_s0 + $0x85] sm:$0x2]   ;;  %v4089_v50 = vld [vmem:[%s7247_s0 + $0xe] sm:$0x1]   ;;  %v1015_v54 = vsel %vm7260_vm2, %v1013_v42, %v1007_v41  ;;  %v1040_v55 = vsel %vm6_vm0, %v4081_v44, %v4080_v43 }
  0x4a   :  { %839 = vrot.lane.b32.xlu1 %v838_v58, %s4630_s7  ;;  %v4090_v51 = vld [vmem:[%s7247_s0 + $0x8d] sm:$0x2]   ;;  %v4072_v52 = vld [vmem:[%s7247_s0 + $0xb1] sm:$0x1]   ;;  %v1046_v56 = vsel %vm6_vm0, %v4083_v46, %v4082_v45  ;;  %vm7261_vm9 = vcmask 408576   ;;  %v1073_v57 = vsel %vm6_vm0, %v4087_v49, %v4086_v47  ;;  %s4635_s24 = smov 80  }
  0x4b   :  { %v4073_v53 = vld [vmem:[%s7247_s0 + $0x30] sm:$0x2]   ;;  %v4088_v58 = vld [vmem:[%s7247_s0 + $0x104] sm:$0x4]   ;;  %v1083_v59 = vsel %vm6_vm0, %v4090_v51, %v4089_v50  ;;  %v4091_v60 = vld [vmem:[%s7247_s0 + $0x10c] sm:$0x4]   ;;  %v1048_v4 = vsel %vm7261_vm9, %v1046_v56, %v1040_v55 }
  0x4c   :  { %820 = vrot.lane.b32.xlu0 %v819_v2, %s4628_s22  ;;  %s4631_s22 = smov 88   ;;  %v4095_v61 = vld [vmem:[%s7247_s0 + $0xa5] sm:$0x1]   ;;  %v996_v62 = vsel %vm6_vm0, %v4073_v53, %v4072_v52  ;;  %v4098_v0 = vld [vmem:[%s7247_s0 + $0xad] sm:$0x1]   ;;  %v1077_v5 = vsel %vm10_vm1, %v4088_v58, %v1073_v57  ;;  %v1087_v6 = vsel %vm10_vm1, %v4091_v60, %v1083_v59  ;;  %vm7262_vm2 = vcmask 424960  }
  0x4d   :  { %v4096_v63 = vld [vmem:[%s7247_s0 + $0x124] sm:$0x2]   ;;  %v4099_v1 = vld [vmem:[%s7247_s0 + $0x12c] sm:$0x2]   ;;  %v4078_v2 = vld [vmem:[%s7247_s0 + $0x50] sm:$0x1]   ;;  %v1089_v14 = vsel %vm7262_vm2, %v1087_v6, %v1077_v5 }
  0x4e   :  { %872 = vrot.lane.b32.xlu1 %v871_v8, %s4631_s22  ;;  %v4079_v3 = vld [vmem:[%s7247_s0 + $0xcf] sm:$0x2]   ;;  %v1120_v7 = vsel %vm6_vm0, %v4096_v63, %v4095_v61  ;;  %v4097_v8 = vld [vmem:[%s7247_s0 + $0x23] sm:$0x4]   ;;  %v1130_v9 = vsel %vm6_vm0, %v4099_v1, %v4098_v0  ;;  %v4100_v10 = vld [vmem:[%s7247_s0 + $0x2b] sm:$0x4]  }
  0x4f   :  { %v1029_v11 = vsel %vm6_vm0, %v4079_v3, %v4078_v2  ;;  %s4636_s10 = smov 78   ;;  %v4084_v12 = vld [vmem:[%s7247_s0 + $0x67] sm:$0x1]   ;;  %vm7263_vm9 = vcmask 441344   ;;  %v4093_v16 = vld [vmem:[%s7247_s0 + $0x105] sm:$0x2]   ;;  %v1124_v17 = vsel %vm10_vm1, %v4097_v8, %v1120_v7 }
  0x50   :  { %853 = vrot.lane.b32.xlu0 %v852_v15, %s4630_s7  ;;  %s4634_s7 = smov 82   ;;  %v4085_v13 = vld [vmem:[%s7247_s0 + $0xe6] sm:$0x2]   ;;  %v4092_v15 = vld [vmem:[%s7247_s0 + $0x86] sm:$0x1]   ;;  %s4637_s28 = smov 76  }
  0x51   :  { %v4104_v19 = vld [vmem:[%s7247_s0 + $0x44] sm:$0x1]   ;;  %v4106_v21 = vld [vmem:[%s7247_s0 + $0x4c] sm:$0x1]   ;;  %v1062_v23 = vsel %vm6_vm0, %v4085_v13, %v4084_v12  ;;  %v4094_v24 = vld [vmem:[%s7247_s0 + $0x4] sm:$0x4]  }
  0x52   :  { %905 = vrot.lane.b32.xlu1 %v904_v18, %s4632_s6  ;;  %v1134_v18 = vsel %vm10_vm1, %v4100_v10, %v1130_v9  ;;  %v4105_v20 = vld [vmem:[%s7247_s0 + $0xc3] sm:$0x2]   ;;  %v4107_v22 = vld [vmem:[%s7247_s0 + $0xcb] sm:$0x2]   ;;  %v4101_v27 = vld [vmem:[%s7247_s0 + $0x125] sm:$0x1]  }
  0x53   :  { %v1136_v26 = vsel %vm7263_vm9, %v1134_v18, %v1124_v17  ;;  %v1171_v29 = vsel %vm6_vm0, %v4105_v20, %v4104_v19  ;;  %v1177_v30 = vsel %vm6_vm0, %v4107_v22, %v4106_v21  ;;  %vm7264_vm2 = vcmask 457728   ;;  %v4110_v31 = vld [vmem:[%s7247_s0 + $0x63] sm:$0x1]   ;;  %v4112_v33 = vld [vmem:[%s7247_s0 + $0x6b] sm:$0x1]   ;;  %s4638_s16 = smov 74  }
  0x54   :  { %886 = vrot.lane.b32.xlu0 %v885_v25, %s4631_s22  ;;  %v1103_v25 = vsel %vm6_vm0, %v4093_v16, %v4092_v15  ;;  %v4111_v32 = vld [vmem:[%s7247_s0 + $0xe2] sm:$0x2]   ;;  %v4113_v34 = vld [vmem:[%s7247_s0 + $0xea] sm:$0x2]   ;;  %v4116_v35 = vld [vmem:[%s7247_s0 + $0x82] sm:$0x1]   ;;  %v1179_v42 = vsel %vm7264_vm2, %v1177_v30, %v1171_v29 }
  0x55   :  { %v1107_v36 = vsel %vm10_vm1, %v4094_v24, %v1103_v25  ;;  %v4118_v38 = vld [vmem:[%s7247_s0 + $0x8a] sm:$0x1]   ;;  %v4103_v41 = vld [vmem:[%s7247_s0 + $0xa3] sm:$0x4]   ;;  %v1204_v43 = vsel %vm6_vm0, %v4111_v32, %v4110_v31  ;;  %v1210_v44 = vsel %vm6_vm0, %v4113_v34, %v4112_v33  ;;  %vm7265_vm9 = vcmask 474112   ;;  %s4639_s2 = smov 72  }
  0x56   :  { %946 = vrot.lane.b32.xlu1 %v945_v28, %s4633_s23  ;;  %v4102_v28 = vld [vmem:[%s7247_s0 + $0x24] sm:$0x2]   ;;  %v4119_v39 = vld [vmem:[%s7247_s0 + $0x109] sm:$0x2]   ;;  %v1238_v46 = vld [vmem:[%s7247_s0] sm:$0x4]   ;;  %v1212_v56 = vsel %vm7265_vm9, %v1210_v44, %v1204_v43 }
  0x57   :  { %v1246_v47 = vsel %vm6_vm0, %v4119_v39, %v4118_v38  ;;  %v4124_v49 = vld [vmem:[%s7247_s0 + $0x121] sm:$0x1]   ;;  %v4127_v52 = vld [vmem:[%s7247_s0 + $0x129] sm:$0x1]   ;;  %v4109_v55 = vld [vmem:[%s7247_s0 + $0xc3] sm:$0x2]  }
  0x58   :  { %919 = vrot.lane.b32.xlu0 %v918_v37, %s4632_s6  ;;  %v4117_v37 = vld [vmem:[%s7247_s0 + $0x101] sm:$0x2]   ;;  %v4125_v51 = vld [vmem:[%s7247_s0 + $0x20] sm:$0x2]   ;;  %v4128_v53 = vld [vmem:[%s7247_s0 + $0x28] sm:$0x2]  }
  0x59   :  { %v1237_v45 = vsel %vm6_vm0, %v4117_v37, %v4116_v35  ;;  %vm7266_vm2 = vcmask 490496   ;;  %v1287_v59 = vsel %vm6_vm0, %v4125_v51, %v4124_v49  ;;  %v4126_v60 = vld [vmem:[%s7247_s0 + $0x9f] sm:$0x4]   ;;  %v1297_v61 = vsel %vm6_vm0, %v4128_v53, %v4127_v52  ;;  %s4640_s17 = smov 70   ;;  %v4114_v0 = vld [vmem:[%s7247_s0 + $0x63] sm:$0x1]  }
  0x5a   :  { %983 = vrot.lane.b32.xlu1 %v982_v40, %s4634_s7  ;;  %v1154_v40 = vsel %vm6_vm0, %v4102_v28, %v4101_v27  ;;  %v1240_v57 = vsel %vm10_vm1, %v1238_v46, %v1237_v45  ;;  %v4115_v1 = vld [vmem:[%s7247_s0 + $0xe2] sm:$0x2]   ;;  %v4121_v3 = vld [vmem:[%s7247_s0 + $0x102] sm:$0x1]   ;;  %v1291_v5 = vsel %vm10_vm1, %v4126_v60, %v1287_v59  ;;  %vm7267_vm9 = vcmask 506880   ;;  %s4641_s4 = smov 68  }
  0x5b   :  { %v1158_v50 = vsel %vm10_vm1, %v4103_v41, %v1154_v40  ;;  %v4133_v7 = vld [vmem:[%s7247_s0 + $0x40] sm:$0x1]   ;;  %v4135_v9 = vld [vmem:[%s7247_s0 + $0x48] sm:$0x1]   ;;  %v4130_v16 = vld [vmem:[%s7247_s0 + $0x21] sm:$0x1]  }
  0x5c   :  { %964 = vrot.lane.b32.xlu0 %v963_v48, %s4633_s23  ;;  %v4120_v48 = vld [vmem:[%s7247_s0 + $0x8] sm:$0x4]   ;;  %v4134_v8 = vld [vmem:[%s7247_s0 + $0xbf] sm:$0x2]   ;;  %v4136_v10 = vld [vmem:[%s7247_s0 + $0xc7] sm:$0x2]  }
  0x5d   :  { %v1250_v58 = vsel %vm10_vm1, %v4120_v48, %v1246_v47  ;;  %v4131_v18 = vld [vmem:[%s7247_s0 + $0xa0] sm:$0x2]   ;;  %v1336_v19 = vsel %vm6_vm0, %v4134_v8, %v4133_v7  ;;  %v1342_v20 = vsel %vm6_vm0, %v4136_v10, %v4135_v9  ;;  %v4139_v21 = vld [vmem:[%s7247_s0 + $0x57] sm:$0x1]   ;;  %v4142_v24 = vld [vmem:[%s7247_s0 + $0xde] sm:$0x2]  }
  0x5e   :  { %1016 = vrot.lane.b32.xlu1 %v1015_v54, %s4635_s24  ;;  %v4108_v54 = vld [vmem:[%s7247_s0 + $0x44] sm:$0x1]   ;;  %v1252_v2 = vsel %vm7266_vm2, %v1250_v58, %v1240_v57  ;;  %vm7268_vm2 = vcmask 523264   ;;  %v4140_v22 = vld [vmem:[%s7247_s0 + $0xd6] sm:$0x2]   ;;  %s4642_s19 = smov 66  }
  0x5f   :  { %v1193_v63 = vsel %vm6_vm0, %v4109_v55, %v4108_v54  ;;  %v4132_v27 = vld [vmem:[%s7247_s0 + $0x11f] sm:$0x4]   ;;  %v1344_v28 = vsel %vm7268_vm2, %v1342_v20, %v1336_v19  ;;  %vm58_vm2 = vcmask 1048560   ;;  %vm7274_vm4 = vcmask 539648   ;;  %v4145_v32 = vld [vmem:[%s7247_s0 + $0xf6] sm:$0x1]  }
  0x60   :  { %997 = vrot.lane.b32.xlu0 %v996_v62, %s4634_s7  ;;  %v4129_v62 = vld [vmem:[%s7247_s0 + $0xa7] sm:$0x4]   ;;  %v1369_v30 = vsel %vm6_vm0, %v4140_v22, %v4139_v21  ;;  %v4146_v33 = vld [vmem:[%s7247_s0 + $0x75] sm:$0x2]   ;;  %v4147_v34 = vld [vmem:[%s7247_s0 + $0xfe] sm:$0x1]  }
  0x61   :  { %v1301_v6 = vsel %vm10_vm1, %v4129_v62, %v1297_v61  ;;  %v4148_v35 = vld [vmem:[%s7247_s0 + $0x7d] sm:$0x2]   ;;  %s4643_s25 = smov 64   ;;  %v4152_v38 = vld [vmem:[%s7247_s0 + $0x94] sm:$0x2]   ;;  %v1402_v46 = vsel %vm6_vm0, %v4146_v33, %v4145_v32  ;;  %s4644_s18 = smov 62  }
  0x62   :  { %1049 = vrot.lane.b32.xlu1 %v1048_v4, %s4636_s10  ;;  %v4122_v4 = vld [vmem:[%s7247_s0 + $0x1] sm:$0x2]   ;;  %v1303_v15 = vsel %vm7267_vm9, %v1301_v6, %v1291_v5  ;;  %vm103_vm9 = vcmask 1048544   ;;  %v4154_v39 = vld [vmem:[%s7247_s0 + $0x1d] sm:$0x1]   ;;  %v1408_v47 = vsel %vm6_vm0, %v4148_v35, %v4147_v34  ;;  %s4645_s3 = smov 60  }
  0x63   :  { %v1270_v13 = vsel %vm6_vm0, %v4122_v4, %v4121_v3  ;;  %v4155_v40 = vld [vmem:[%s7247_s0 + $0x9c] sm:$0x2]   ;;  %v4138_v43 = vld [vmem:[%s7247_s0 + $0xbf] sm:$0x2]   ;;  %v4153_v49 = vld [vmem:[%s7247_s0 + $0x113] sm:$0x4]  }
  0x64   :  { %1030 = vrot.lane.b32.xlu0 %v1029_v11, %s4635_s24  ;;  %v1226_v11 = vsel %vm6_vm0, %v4115_v1, %v4114_v0  ;;  %v4156_v51 = vld [vmem:[%s7247_s0 + $0x11b] sm:$0x4]   ;;  %v4143_v54 = vld [vmem:[%s7247_s0 + $0xd7] sm:$0x1]   ;;  %v4160_v60 = vld [vmem:[%s7247_s0 + $0x34] sm:$0x1]  }
  0x65   :  { %v4144_v55 = vld [vmem:[%s7247_s0 + $0x56] sm:$0x2]   ;;  %v4161_v61 = vld [vmem:[%s7247_s0 + $0xb3] sm:$0x2]   ;;  %v4162_v62 = vld [vmem:[%s7247_s0 + $0x3c] sm:$0x1]  }
  0x66   :  { %1090 = vrot.lane.b32.xlu1 %v1089_v14, %s4637_s28  ;;  %v4123_v14 = vld [vmem:[%s7247_s0 + $0x80] sm:$0x4]   ;;  %v1391_v0 = vsel %vm6_vm0, %v4144_v55, %v4143_v54  ;;  %v4149_v1 = vld [vmem:[%s7247_s0 + $0x76] sm:$0x1]   ;;  %v4157_v5 = vld [vmem:[%s7247_s0 + $0x15] sm:$0x1]   ;;  %v1480_v8 = vsel %vm6_vm0, %v4161_v61, %v4160_v60 }
  0x67   :  { %v1274_v25 = vsel %vm10_vm1, %v4123_v14, %v1270_v13  ;;  %v4150_v3 = vld [vmem:[%s7247_s0 + $0xf5] sm:$0x2]   ;;  %v4158_v7 = vld [vmem:[%s7247_s0 + $0x94] sm:$0x2]   ;;  %v4166_v10 = vld [vmem:[%s7247_s0 + $0xd3] sm:$0x1]  }
  0x68   :  { %1063 = vrot.lane.b32.xlu0 %v1062_v23, %s4636_s10  ;;  %v4141_v23 = vld [vmem:[%s7247_s0 + $0x5f] sm:$0x1]   ;;  %v4168_v13 = vld [vmem:[%s7247_s0 + $0xdb] sm:$0x1]   ;;  %v1465_v19 = vsel %vm6_vm0, %v4158_v7, %v4157_v5  ;;  %v4172_v21 = vld [vmem:[%s7247_s0 + $0x72] sm:$0x1]  }
  0x69   :  { %v1375_v31 = vsel %vm6_vm0, %v4142_v24, %v4141_v23  ;;  %v4169_v14 = vld [vmem:[%s7247_s0 + $0x5a] sm:$0x2]   ;;  %s4647_s7 = smov 56   ;;  %v4179_v32 = vld [vmem:[%s7247_s0 + $0x90] sm:$0x2]   ;;  %s4648_s27 = smov 54  }
  0x6a   :  { %1137 = vrot.lane.b32.xlu1 %v1136_v26, %s4638_s16  ;;  %v1321_v26 = vsel %vm6_vm0, %v4131_v18, %v4130_v16  ;;  %v1377_v44 = vsel %vm7274_vm4, %v1375_v31, %v1369_v30  ;;  %vm7292_vm4 = vcmask 965632   ;;  %v4159_v16 = vld [vmem:[%s7247_s0 + $0x113] sm:$0x4]   ;;  %v4178_v30 = vld [vmem:[%s7247_s0 + $0x11] sm:$0x1]   ;;  %s4650_s9 = smov 50  }
  0x6b   :  { %v1325_v37 = vsel %vm10_vm1, %v4132_v27, %v1321_v26  ;;  %v1519_v26 = vsel %vm6_vm0, %v4169_v14, %v4168_v13  ;;  %v4173_v27 = vld [vmem:[%s7247_s0 + $0xf1] sm:$0x2]   ;;  %v1469_v31 = vsel %vm10_vm1, %v4159_v16, %v1465_v19  ;;  %v4181_v33 = vld [vmem:[%s7247_s0 + $0x19] sm:$0x1]   ;;  %v4188_v60 = vld [vmem:[%s7247_s0 + $0x2f] sm:$0x2]  }
  0x6c   :  { %1108 = vrot.lane.b32.xlu0 %v1107_v36, %s4637_s28  ;;  %v4151_v36 = vld [vmem:[%s7247_s0 + $0x15] sm:$0x1]   ;;  %v4182_v34 = vld [vmem:[%s7247_s0 + $0x98] sm:$0x2]   ;;  %v4189_v61 = vld [vmem:[%s7247_s0 + $0xb8] sm:$0x1]  }
  0x6d   :  { %v1435_v48 = vsel %vm6_vm0, %v4152_v38, %v4151_v36  ;;  %v4164_v36 = vld [vmem:[%s7247_s0 + $0xb4] sm:$0x1]   ;;  %v4185_v5 = vld [vmem:[%s7247_s0 + $0x110] sm:$0x2]   ;;  %v4194_v13 = vld [vmem:[%s7247_s0 + $0xc6] sm:$0x2]  }
  0x6e   :  { %1180 = vrot.lane.b32.xlu1 %v1179_v42, %s4639_s2  ;;  %v4137_v42 = vld [vmem:[%s7247_s0 + $0x40] sm:$0x1]   ;;  %v1439_v58 = vsel %vm10_vm1, %v4153_v49, %v1435_v48  ;;  %v4170_v49 = vld [vmem:[%s7247_s0 + $0x53] sm:$0x1]   ;;  %v4195_v14 = vld [vmem:[%s7247_s0 + $0x4f] sm:$0x1]  }
  0x6f   :  { %v1358_v52 = vsel %vm6_vm0, %v4138_v43, %v4137_v42  ;;  %v1546_v42 = vsel %vm6_vm0, %v4173_v27, %v4172_v21  ;;  %s4651_s26 = smov 48   ;;  %s4658_s6 = smov 34  }
  0x70   :  { %1159 = vrot.lane.b32.xlu0 %v1158_v50, %s4638_s16  ;;  %v1445_v50 = vsel %vm6_vm0, %v4155_v40, %v4154_v39  ;;  %s4657_s16 = smov 36   ;;  %s4660_s10 = smov 32  }
  0x71   :  { %v1449_v59 = vsel %vm10_vm1, %v4156_v51, %v1445_v50  ;;  %v4171_v51 = vld [vmem:[%s7247_s0 + $0xd2] sm:$0x2]   ;;  %s4661_s14 = smov 26   ;;  %s4664_s13 = smov 24  }
  0x72   :  { %1213 = vrot.lane.b32.xlu1 %v1212_v56, %s4640_s17  ;;  %s4665_s24 = smov 18   ;;  %s4668_s30 = smov 16  }
  0x73   :  { %s4670_s29 = smov 12   ;;  %s4673_s5 = smov 2  }
  0x74   :  { %1194 = vrot.lane.b32.xlu0 %v1193_v63, %s4639_s2  ;;  %v4163_v63 = vld [vmem:[%s7247_s0 + $0xbb] sm:$0x2]   ;;  %s4663_s2 = smov 22  }
  0x75   :  { %v1486_v9 = vsel %vm6_vm0, %v4163_v63, %v4162_v62  ;;  %v4190_v62 = vld [vmem:[%s7247_s0 + $0x37] sm:$0x2]   ;;  %v1535_v63 = vsel %vm6_vm0, %v4171_v51, %v4170_v49  ;;  %v4210_v49 = vld [vmem:[%s7247_s0 + $0xb] sm:$0x4]  }
  0x76   :  { %v5547_v12 = vpop.permute.xlu1 %114   ;;  %1253 = vrot.lane.b32.xlu1 %v1252_v2, %s4641_s4 }
  0x77   :  { %v5558_v17 = vpop.permute.xlu0 %75  }
  0x78   :  { %1227 = vrot.lane.b32.xlu0 %v1226_v11, %s4640_s17  ;;  %v4167_v11 = vld [vmem:[%s7247_s0 + $0x52] sm:$0x2]   ;;  %s4649_s17 = smov 52  }
  0x7a   :  { %1304 = vrot.lane.b32.xlu1 %v1303_v15, %s4642_s19  ;;  %v99_v29 = vpop.permute.xlu1 %98   ;;  %v1424_v15 = vsel %vm6_vm0, %v4150_v3, %v4149_v1  ;;  %v4177_v1 = vld [vmem:[%s7247_s0 + $0xf1] sm:$0x2]  }
  0x7b   :  { %105 = vst.msk [vmem:[#allocation0 + $0x128] ss:$8 sm:$0x3] %vm103_vm9, %v99_v29   ;;  %107 = vst.msk [vmem:[#allocation0 + $0x3c8] ss:$-8 sm:$0xc] %vm103_vm9, %v99_v29  }
  0x7c   :  { %1275 = vrot.lane.b32.xlu0 %v1274_v25, %s4641_s4  ;;  %102 = vst.msk [vmem:[#allocation0 + $0x3c0] ss:$-648 sm:$0x3] %vm7272_vm6, %v99_v29   ;;  %vm140_vm9 = vcmask 1048528   ;;  %vm7284_vm6 = vcmask 982016   ;;  %v1513_v25 = vsel %vm6_vm0, %v4167_v11, %v4166_v10  ;;  %v1632_v10 = vsel %vm6_vm0, %v4190_v62, %v4189_v61  ;;  %s4654_s4 = smov 42  }
  0x7d   :  { %v4175_v29 = vld [vmem:[%s7247_s0 + $0xf9] sm:$0x2]   ;;  %v4193_v11 = vld [vmem:[%s7247_s0 + $0x47] sm:$0x1]  }
  0x7e   :  { %1345 = vrot.lane.b32.xlu1 %v1344_v28, %s4643_s25  ;;  %v54_v41 = vpop.permute.xlu0 %53   ;;  %v4174_v28 = vld [vmem:[%s7247_s0 + $0x7a] sm:$0x1]  }
  0x7f   :  { %57 = vst.msk [vmem:[#allocation0 + $0xa0] ss:$648 sm:$0x7] %vm7270_vm11, %v54_v41   ;;  %vm7288_vm11 = vcmask 998400   ;;  %v1552_v43 = vsel %vm6_vm0, %v4175_v29, %v4174_v28  ;;  %v4200_v28 = vld [vmem:[%s7247_s0 + $0xe5] sm:$0x2]  }
  0x80   :  { %60 = vst.msk [vmem:[#allocation0 + $0x320] ss:$648 sm:$0x3] %vm58_vm2, %v54_v41   ;;  %62 = vst.msk [vmem:[#allocation0 + $0x80] ss:$8 sm:$0xc] %vm58_vm2, %v54_v41   ;;  %v152_v45 = vpop.permute.xlu1 %151   ;;  %1326 = vrot.lane.b32.xlu0 %v1325_v37, %s4642_s19 }
  0x81   :  { %64 = vst.msk [vmem:[#allocation0 + $0xfc0] ss:$-648 sm:$0x30] %vm58_vm2, %v54_v41   ;;  %vm7275_vm2 = vcmask 556032   ;;  %s4646_s19 = smov 58  }
  0x82   :  { %1378 = vrot.lane.b32.xlu1 %v1377_v44, %s4644_s18  ;;  %v136_v53 = vpop.permute.xlu0 %135   ;;  %v1410_v56 = vsel %vm7275_vm2, %v1408_v47, %v1402_v46  ;;  %vm276_vm2 = vcmask 1048480   ;;  %v4165_v37 = vld [vmem:[%s7247_s0 + $0x33] sm:$0x2]   ;;  %v1579_v44 = vsel %vm6_vm0, %v4179_v32, %v4178_v30  ;;  %v1589_v46 = vsel %vm6_vm0, %v4182_v34, %v4181_v33  ;;  %v4183_v47 = vld [vmem:[%s7247_s0 + $0x117] sm:$0x4]  }
  0x83   :  { %142 = vst.msk [vmem:[#allocation0 + $0x1c0] ss:$8 sm:$0x3] %vm140_vm9, %v136_v53   ;;  %144 = vst.msk [vmem:[#allocation0 + $0x460] ss:$-8 sm:$0xc] %vm140_vm9, %v136_v53   ;;  %v1502_v48 = vsel %vm6_vm0, %v4165_v37, %v4164_v36 }
  0x84   :  { %139 = vst.msk [vmem:[#allocation0 + $0x1d0] ss:$648 sm:$0x3] %vm7271_vm5, %v136_v53   ;;  %vm180_vm9 = vcmask 1048512   ;;  %v192_v57 = vpop.permute.xlu1 %191   ;;  %vm7276_vm5 = vcmask 572416   ;;  %1359 = vrot.lane.b32.xlu0 %v1358_v52, %s4643_s25 }
  0x85   :  { %155 = vst.msk [vmem:[#allocation0 + $0x1c8] ss:$648 sm:$0x3] %vm7288_vm11, %v152_v45   ;;  %v1451_v4 = vsel %vm7276_vm5, %v1449_v59, %v1439_v58  ;;  %vm7289_vm5 = vcmask 949248   ;;  %v4180_v45 = vld [vmem:[%s7247_s0 + $0x10f] sm:$0x4]   ;;  %v1593_v59 = vsel %vm10_vm1, %v4183_v47, %v1589_v46 }
  0x86   :  { %1411 = vrot.lane.b32.xlu1 %v1410_v56, %s4645_s3  ;;  %v176_v2 = vpop.permute.xlu0 %175   ;;  %v4187_v53 = vld [vmem:[%s7247_s0 + $0xb0] sm:$0x1]   ;;  %v1583_v58 = vsel %vm10_vm1, %v4180_v45, %v1579_v44  ;;  %v4201_v29 = vld [vmem:[%s7247_s0 + $0x6e] sm:$0x1]   ;;  %v4206_v33 = vld [vmem:[%s7247_s0 + $0x104] sm:$0x2]  }
  0x87   :  { %179 = vst.msk [vmem:[#allocation0 + $0x268] ss:$648 sm:$0x3] %vm7273_vm15, %v176_v2   ;;  %vm7277_vm15 = vcmask 588800   ;;  %v4202_v30 = vld [vmem:[%s7247_s0 + $0xed] sm:$0x2]  }
  0x88   :  { %182 = vst.msk [vmem:[#allocation0 + $0x260] ss:$648 sm:$0x3] %vm180_vm9, %v176_v2   ;;  %184 = vst.msk [vmem:[#allocation0 - $0x2b8] ss:$648 sm:$0xc] %vm180_vm9, %v176_v2   ;;  %v249_v6 = vpop.permute.xlu1 %248   ;;  %1392 = vrot.lane.b32.xlu0 %v1391_v0, %s4644_s18  ;;  %v1488_v20 = vsel %vm7277_vm15, %v1486_v9, %v1480_v8  ;;  %v1626_v9 = vsel %vm6_vm0, %v4188_v60, %v4187_v53  ;;  %v1698_v44 = vsel %vm6_vm0, %v4202_v30, %v4201_v29 }
  0x89   :  { %vm231_vm9 = vcmask 1048496   ;;  %195 = vst.msk [vmem:[#allocation0 + $0x260] ss:$648 sm:$0x3] %vm7284_vm6, %v192_v57   ;;  %vm7280_vm15 = vcmask 605184   ;;  %vm7296_vm6 = vcmask 883712  }
  0x8a   :  { %1452 = vrot.lane.b32.xlu1 %v1451_v4, %s4646_s19  ;;  %v225_v18 = vpop.permute.xlu0 %224   ;;  %v1521_v38 = vsel %vm7280_vm15, %v1519_v26, %v1513_v25  ;;  %vm7285_vm15 = vcmask 637952   ;;  %v4176_v0 = vld [vmem:[%s7247_s0 + $0x72] sm:$0x1]   ;;  %v4184_v4 = vld [vmem:[%s7247_s0 + $0x91] sm:$0x1]   ;;  %v1659_v26 = vsel %vm6_vm0, %v4194_v13, %v4193_v11  ;;  %vm7299_vm11 = vcmask 850944  }
  0x8b   :  { %228 = vst.msk [vmem:[#allocation0 + $0x300] ss:$648 sm:$0x3] %vm7278_vm10, %v225_v18   ;;  %230 = vst.msk [vmem:[#allocation0 + $0x76] sm:$0x4] %vm7278_vm10, %v225_v18   ;;  %vm7295_vm10 = vcmask 932864   ;;  %v1595_v3 = vsel %vm7285_vm15, %v1593_v59, %v1583_v58  ;;  %v1568_v16 = vsel %vm6_vm0, %v4177_v1, %v4176_v0 }
  0x8c   :  { %v2892_v22 = vld [vmem:[#allocation0 + $0x1c8] sm:$0x1]  ;;  %v3378_v23 = vld [vmem:[#allocation0 + $0x450] sm:$0x1]  ;;  %v288_v24 = vpop.permute.xlu1 %287   ;;  %1425 = vrot.lane.b32.xlu0 %v1424_v15, %s4645_s3  ;;  %v4196_v15 = vld [vmem:[%s7247_s0 + $0xce] sm:$0x2]  }
  0x8d   :  { %233 = vst.msk [vmem:[#allocation0 + $0x580] ss:$-1304 sm:$0x3] %vm231_vm9, %v225_v18   ;;  %235 = vst.msk [vmem:[#allocation0 - $0x4a0] ss:$648 sm:$0xc] %vm231_vm9, %v225_v18   ;;  %v1665_v27 = vsel %vm6_vm0, %v4196_v15, %v4195_v14 }
  0x8e   :  { %237 = vst.msk [vmem:[#allocation0 - $0x730] ss:$648 sm:$0x30] %vm231_vm9, %v225_v18   ;;  %4413 = vst [vmem:[%s7248_s1 + $0x39] sm:$0x1] %v2892_v22  ;;  %1489 = vrot.lane.b32.xlu1 %v1488_v20, %s4647_s7  ;;  %v272_v35 = vpop.permute.xlu0 %271   ;;  %vm316_vm9 = vcmask 1048464   ;;  %v1609_v20 = vsel %vm6_vm0, %v4185_v5, %v4184_v4 }
  0x8f   :  { %4494 = vst [vmem:[%s7248_s1 + $0x8a] sm:$0x1] %v3378_v23  ;;  %252 = vst.msk [vmem:[#allocation0 + $0x580] ss:$-1296 sm:$0x3] %vm7292_vm4, %v249_v6   ;;  %vm7294_vm15 = vcmask 670720  }
  0x90   :  { %254 = vst.msk [vmem:[#allocation0 + $0x2f6] sm:$0x4] %vm7292_vm4, %v249_v6   ;;  %v3006_v39 = vld [vmem:[#allocation0 + $0x260] sm:$0x1]  ;;  %v3492_v40 = vld [vmem:[#allocation0 + $0x4e8] sm:$0x1]  ;;  %v328_v41 = vpop.permute.xlu1 %327   ;;  %1470 = vrot.lane.b32.xlu0 %v1469_v31, %s4646_s19 }
  0x91   :  { %278 = vst.msk [vmem:[#allocation0 + $0x100] ss:$8 sm:$0x3] %vm276_vm2, %v272_v35   ;;  %280 = vst.msk [vmem:[#allocation0 + $0x3a0] ss:$-8 sm:$0xc] %vm276_vm2, %v272_v35  }
  0x92   :  { %275 = vst.msk [vmem:[#allocation0 + $0x110] ss:$648 sm:$0x3] %vm7279_vm8, %v272_v35   ;;  %vm7282_vm2 = vcmask 621568   ;;  %4432 = vst [vmem:[%s7248_s1 + $0x4c] sm:$0x1] %v3006_v39  ;;  %1522 = vrot.lane.b32.xlu1 %v1521_v38, %s4648_s27  ;;  %v312_v50 = vpop.permute.xlu0 %311   ;;  %v1667_v39 = vsel %vm7294_vm15, %v1665_v27, %v1659_v26 }
  0x93   :  { %4513 = vst [vmem:[%s7248_s1 + $0x9d] sm:$0x1] %v3492_v40  ;;  %291 = vst.msk [vmem:[#allocation0 + $0x108] ss:$648 sm:$0x3] %vm7289_vm5, %v288_v24   ;;  %vm353_vm8 = vcmask 1048448   ;;  %v1554_v52 = vsel %vm7282_vm2, %v1552_v43, %v1546_v42 }
  0x94   :  { %315 = vst.msk [vmem:[#allocation0 + $0x1a8] ss:$648 sm:$0x3] %vm7281_vm3, %v312_v50   ;;  %v367_v57 = vpop.permute.xlu1 %366   ;;  %1503 = vrot.lane.b32.xlu0 %v1502_v48, %s4647_s7  ;;  %vm406_vm3 = vcmask 1048432   ;;  %vm7291_vm2 = vcmask 654336   ;;  %vm7300_vm5 = vcmask 703488  }
  0x95   :  { %318 = vst.msk [vmem:[#allocation0 + $0x1a0] ss:$648 sm:$0x3] %vm316_vm9, %v312_v50   ;;  %320 = vst.msk [vmem:[#allocation0 - $0x378] ss:$648 sm:$0xc] %vm316_vm9, %v312_v50   ;;  %v1634_v21 = vsel %vm7291_vm2, %v1632_v10, %v1626_v9 }
  0x96   :  { %v2634_v54 = vld [vmem:[#allocation0 + $0x70] sm:$0x1]  ;;  %v3606_v56 = vld [vmem:[#allocation0 + $0x580] sm:$0x1]  ;;  %vm7293_vm9 = vcmask 916480   ;;  %1555 = vrot.lane.b32.xlu1 %v1554_v52, %s4649_s17  ;;  %v349_v2 = vpop.permute.xlu0 %348   ;;  %vm874_vm2 = vcmask 719872  }
  0x97   :  { %v3120_v55 = vld [vmem:[#allocation0 + $0x2f8] sm:$0x1]  ;;  %4370 = vst [vmem:[%s7248_s1 + $0xe] sm:$0x1] %v2634_v54  ;;  %4532 = vst [vmem:[%s7248_s1 + $0xb0] sm:$0x1] %v3606_v56 }
  0x98   :  { %4451 = vst [vmem:[%s7248_s1 + $0x5f] sm:$0x1] %v3120_v55  ;;  %331 = vst.msk [vmem:[#allocation0 + $0x1a0] ss:$648 sm:$0x3] %vm7295_vm10, %v328_v41   ;;  %v424_v8 = vpop.permute.xlu1 %423   ;;  %1536 = vrot.lane.b32.xlu0 %v1535_v63, %s4648_s27  ;;  %vm668_vm4 = vcmask 818176  }
  0x99   :  { %352 = vst.msk [vmem:[#allocation0 + $0x240] ss:$648 sm:$0x3] %vm7283_vm7, %v349_v2   ;;  %vm464_vm7 = vcmask 1048416   ;;  %v4186_v18 = vld [vmem:[%s7247_s0 + $0xf] sm:$0x4]  }
  0x9a   :  { %v2748_v6 = vld [vmem:[#allocation0 + $0x108] sm:$0x1]  ;;  %v3234_v7 = vld [vmem:[#allocation0 + $0x390] sm:$0x1]  ;;  %357 = vst.msk [vmem:[#allocation0 + $0x236] sm:$0x4] %vm353_vm8, %v349_v2   ;;  %1596 = vrot.lane.b32.xlu1 %v1595_v3, %s4650_s9  ;;  %v400_v19 = vpop.permute.xlu0 %399   ;;  %v1613_v32 = vsel %vm10_vm1, %v4186_v18, %v1609_v20 }
  0x9b   :  { %355 = vst.msk [vmem:[#allocation0 + $0x4c0] ss:$-656 sm:$0x3] %vm353_vm8, %v349_v2   ;;  %359 = vst.msk [vmem:[#allocation0 + $0x4b5] sm:$0x8] %vm353_vm8, %v349_v2   ;;  %vm7298_vm8 = vcmask 900096  }
  0x9c   :  { %4389 = vst [vmem:[%s7248_s1 + $0x21] sm:$0x1] %v2748_v6  ;;  %4470 = vst [vmem:[%s7248_s1 + $0x72] sm:$0x1] %v3234_v7  ;;  %v4199_v22 = vld [vmem:[%s7247_s0 + $0x66] sm:$0x1]   ;;  %v480_v25 = vpop.permute.xlu1 %479   ;;  %1569 = vrot.lane.b32.xlu0 %v1568_v16, %s4649_s17 }
  0x9d   :  { %370 = vst.msk [vmem:[#allocation0 + $0x4c0] ss:$-648 sm:$0x3] %vm7293_vm9, %v367_v57   ;;  %v4205_v31 = vld [vmem:[%s7247_s0 + $0x85] sm:$0x1]   ;;  %v1692_v43 = vsel %vm6_vm0, %v4200_v28, %v4199_v22  ;;  %s4652_s17 = smov 46  }
  0x9e   :  { %403 = vst.msk [vmem:[#allocation0 + $0x560] ss:$-1296 sm:$0x3] %vm7286_vm14, %v400_v19   ;;  %405 = vst.msk [vmem:[#allocation0 + $0x2d6] sm:$0x4] %vm7286_vm14, %v400_v19   ;;  %1635 = vrot.lane.b32.xlu1 %v1634_v21, %s4651_s26  ;;  %v460_v36 = vpop.permute.xlu0 %459   ;;  %vm7297_vm14 = vcmask 687104   ;;  %v1725_v46 = vsel %vm6_vm0, %v4206_v33, %v4205_v31 }
  0x9f   :  { %v2862_v23 = vld [vmem:[#allocation0 + $0x1a0] sm:$0x1]  ;;  %v3348_v24 = vld [vmem:[#allocation0 + $0x428] sm:$0x1]  ;;  %v4208_v34 = vld [vmem:[%s7247_s0 + $0x8d] sm:$0x1]   ;;  %v1700_v57 = vsel %vm7297_vm14, %v1698_v44, %v1692_v43 }
  0xa0   :  { %408 = vst.msk [vmem:[#allocation0 + $0x40] ss:$8 sm:$0x3] %vm406_vm3, %v400_v19   ;;  %410 = vst.msk [vmem:[#allocation0 - $0x240] ss:$648 sm:$0xc] %vm406_vm3, %v400_v19   ;;  %v519_v42 = vpop.permute.xlu1 %518   ;;  %1614 = vrot.lane.b32.xlu0 %v1613_v32, %s4650_s9 }
  0xa1   :  { %412 = vst.msk [vmem:[#allocation0 - $0x758] ss:$648 sm:$0x30] %vm406_vm3, %v400_v19   ;;  %4408 = vst [vmem:[%s7248_s1 + $0x34] sm:$0x1] %v2862_v23  ;;  %vm505_vm3 = vcmask 1048400  }
  0xa2   :  { %4489 = vst [vmem:[%s7248_s1 + $0x85] sm:$0x1] %v3348_v24  ;;  %427 = vst.msk [vmem:[#allocation0 + $0x48] ss:$648 sm:$0x7] %vm7298_vm8, %v424_v8   ;;  %1668 = vrot.lane.b32.xlu1 %v1667_v39, %s4652_s17  ;;  %v501_v55 = vpop.permute.xlu0 %500   ;;  %s4653_s9 = smov 44  }
  0xa3   :  { %v4209_v35 = vld [vmem:[%s7247_s0 + $0x10c] sm:$0x2]   ;;  %v4191_v37 = vld [vmem:[%s7247_s0 + $0x30] sm:$0x1]   ;;  %v4197_v45 = vld [vmem:[%s7247_s0 + $0x47] sm:$0x1]  }
  0xa4   :  { %v4192_v38 = vld [vmem:[%s7247_s0 + $0xaf] sm:$0x2]   ;;  %v2976_v40 = vld [vmem:[#allocation0 + $0x238] sm:$0x1]  ;;  %v3462_v41 = vld [vmem:[#allocation0 + $0x4c0] sm:$0x1]  ;;  %v1735_v48 = vsel %vm6_vm0, %v4209_v35, %v4208_v34  ;;  %v556_v61 = vpop.permute.xlu1 %555  }
  0xa5   :  { %468 = vst.msk [vmem:[#allocation0 - $0x6c0] ss:$648 sm:$0x38] %vm464_vm7, %v460_v36   ;;  %466 = vst.msk [vmem:[#allocation0 + $0xe0] ss:$648 sm:$0x7] %vm464_vm7, %v460_v36   ;;  %v1648_v51 = vsel %vm6_vm0, %v4192_v38, %v4191_v37  ;;  %v1739_v63 = vsel %vm10_vm1, %v4210_v49, %v1735_v48 }
  0xa6   :  { %463 = vst.msk [vmem:[#allocation0 + $0xe8] ss:$648 sm:$0x7] %vm7287_vm13, %v460_v36   ;;  %vm7302_vm7 = vcmask 867328   ;;  %4427 = vst [vmem:[%s7248_s1 + $0x47] sm:$0x1] %v2976_v40  ;;  %1649 = vrot.lane.b32.xlu0 %v1648_v51, %s4651_s26  ;;  %1701 = vrot.lane.b32.xlu1 %v1700_v57, %s4653_s9  ;;  %v540_v8 = vpop.permute.xlu0 %539  }
  0xa7   :  { %4508 = vst [vmem:[%s7248_s1 + $0x98] sm:$0x1] %v3462_v41  ;;  %483 = vst.msk [vmem:[#allocation0 + $0xe0] ss:$648 sm:$0x7] %vm7296_vm6, %v480_v25   ;;  %vm544_vm13 = vcmask 1048384  }
  0xa8   :  { %v4207_v47 = vld [vmem:[%s7247_s0 + $0x3] sm:$0x4]   ;;  %v4214_v50 = vld [vmem:[%s7247_s0 + $0x124] sm:$0x1]   ;;  %v4217_v53 = vld [vmem:[%s7247_s0 + $0x12c] sm:$0x1]   ;;  %v612_v16 = vpop.permute.xlu1 %611  }
  0xa9   :  { %v4215_v52 = vld [vmem:[%s7247_s0 + $0x23] sm:$0x2]   ;;  %v4218_v54 = vld [vmem:[%s7247_s0 + $0x2b] sm:$0x2]   ;;  %v4198_v56 = vld [vmem:[%s7247_s0 + $0xc6] sm:$0x2]   ;;  %v1729_v62 = vsel %vm10_vm1, %v4207_v47, %v1725_v46 }
  0xaa   :  { %v2604_v58 = vld [vmem:[#allocation0 + $0x48] sm:$0x1]  ;;  %v3090_v59 = vld [vmem:[#allocation0 + $0x2d0] sm:$0x1]  ;;  %v3576_v60 = vld [vmem:[#allocation0 + $0x558] sm:$0x1]  ;;  %v1776_v1 = vsel %vm6_vm0, %v4215_v52, %v4214_v50  ;;  %v1786_v3 = vsel %vm6_vm0, %v4218_v54, %v4217_v53  ;;  %v1681_v5 = vsel %vm6_vm0, %v4198_v56, %v4197_v45  ;;  %v1741_v9 = vsel %vm7300_vm5, %v1739_v63, %v1729_v62  ;;  %v592_v26 = vpop.permute.xlu0 %591  }
  0xab   :  { %504 = vst.msk [vmem:[#allocation0 + $0x180] ss:$648 sm:$0x3] %vm7290_vm12, %v501_v55   ;;  %4365 = vst [vmem:[%s7248_s1 + $0x9] sm:$0x1] %v2604_v58  ;;  %vm613_vm12 = vcmask 834560   ;;  %1682 = vrot.lane.b32.xlu0 %v1681_v5, %s4652_s17  ;;  %1742 = vrot.lane.b32.xlu1 %v1741_v9, %s4654_s4 }
  0xac   :  { %507 = vst.msk [vmem:[#allocation0 + $0x400] ss:$-656 sm:$0x3] %vm505_vm3, %v501_v55   ;;  %509 = vst.msk [vmem:[#allocation0 + $0x176] sm:$0x4] %vm505_vm3, %v501_v55   ;;  %vm841_vm9 = vcmask 736256   ;;  %v667_v33 = vpop.permute.xlu1 %666  }
  0xad   :  { %511 = vst.msk [vmem:[#allocation0 + $0x3f5] sm:$0x8] %vm505_vm3, %v501_v55   ;;  %4446 = vst [vmem:[%s7248_s1 + $0x5a] sm:$0x1] %v3090_v59  ;;  %v4203_v0 = vld [vmem:[%s7247_s0 + $0x66] sm:$0x1]  }
  0xae   :  { %4527 = vst [vmem:[%s7248_s1 + $0xab] sm:$0x1] %v3576_v60  ;;  %522 = vst.msk [vmem:[#allocation0 + $0x400] ss:$-648 sm:$0x3] %vm7302_vm7, %v519_v42   ;;  %vm596_vm3 = vcmask 1048368   ;;  %v645_v46 = vpop.permute.xlu0 %644  }
  0xaf   :  { %v4216_v2 = vld [vmem:[%s7247_s0 + $0xa2] sm:$0x4]   ;;  %v4219_v4 = vld [vmem:[%s7247_s0 + $0xaa] sm:$0x4]   ;;  %v4204_v6 = vld [vmem:[%s7247_s0 + $0xe5] sm:$0x2]  }
  0xb0   :  { %v4211_v7 = vld [vmem:[%s7247_s0 + $0x105] sm:$0x1]   ;;  %v4223_v11 = vld [vmem:[%s7247_s0 + $0x43] sm:$0x1]   ;;  %v2718_v13 = vld [vmem:[#allocation0 + $0xe0] sm:$0x1]  ;;  %v1780_v18 = vsel %vm10_vm1, %v4216_v2, %v1776_v1  ;;  %v1790_v19 = vsel %vm10_vm1, %v4219_v4, %v1786_v3  ;;  %v1714_v23 = vsel %vm6_vm0, %v4204_v6, %v4203_v0  ;;  %v706_v50 = vpop.permute.xlu1 %705  }
  0xb1   :  { %v4212_v10 = vld [vmem:[%s7247_s0 + $0x4] sm:$0x2]   ;;  %v3204_v14 = vld [vmem:[#allocation0 + $0x368] sm:$0x1]  ;;  %v3690_v15 = vld [vmem:[#allocation0 + $0x5f0] sm:$0x1]  ;;  %v1792_v28 = vsel %vm874_vm2, %v1790_v19, %v1780_v18  ;;  %1715 = vrot.lane.b32.xlu0 %v1714_v23, %s4653_s9 }
  0xb2   :  { %546 = vst.msk [vmem:[#allocation0 + $0x208] ss:$8 sm:$0x3] %vm544_vm13, %v540_v8   ;;  %548 = vst.msk [vmem:[#allocation0 + $0x4a8] ss:$-8 sm:$0xc] %vm544_vm13, %v540_v8   ;;  %v1759_v27 = vsel %vm6_vm0, %v4212_v10, %v4211_v7 }
  0xb3   :  { %vm7304_vm13 = vcmask 80896   ;;  %4384 = vst [vmem:[%s7248_s1 + $0x1c] sm:$0x1] %v2718_v13  ;;  %4465 = vst [vmem:[%s7248_s1 + $0x6d] sm:$0x1] %v3204_v14  ;;  %vm7305_vm15 = vcmask 64512  }
  0xb4   :  { %543 = vst.msk [vmem:[#allocation0 + $0x4a0] ss:$-648 sm:$0x3] %vm7304_vm13, %v540_v8   ;;  %4546 = vst [vmem:[%s7248_s1 + $0xbe] sm:$0x1] %v3690_v15  ;;  %vm649_vm13 = vcmask 1048352   ;;  %v743_v6 = vpop.permute.xlu1 %742  }
  0xb5   :  { %559 = vst.msk [vmem:[#allocation0 + $0x210] ss:$648 sm:$0x3] %vm7299_vm11, %v556_v61   ;;  %v4224_v20 = vld [vmem:[%s7247_s0 + $0xc2] sm:$0x2]   ;;  %s4655_s17 = smov 40  }
  0xb6   :  { %v4225_v21 = vld [vmem:[%s7247_s0 + $0x4b] sm:$0x1]   ;;  %v4213_v24 = vld [vmem:[%s7247_s0 + $0x83] sm:$0x4]   ;;  %v4220_v25 = vld [vmem:[%s7247_s0 + $0x24] sm:$0x1]   ;;  %v1825_v35 = vsel %vm6_vm0, %v4224_v20, %v4223_v11  ;;  %1793 = vrot.lane.b32.xlu1 %v1792_v28, %s4655_s17 }
  0xb7   :  { %v4226_v22 = vld [vmem:[%s7247_s0 + $0xca] sm:$0x2]   ;;  %v4221_v29 = vld [vmem:[%s7247_s0 + $0xa3] sm:$0x2]   ;;  %v4229_v30 = vld [vmem:[%s7247_s0 + $0x62] sm:$0x1]   ;;  %v1763_v41 = vsel %vm10_vm1, %v4213_v24, %v1759_v27 }
  0xb8   :  { %v2832_v31 = vld [vmem:[#allocation0 + $0x178] sm:$0x1]  ;;  %v3318_v32 = vld [vmem:[#allocation0 + $0x400] sm:$0x1]  ;;  %v4222_v34 = vld [vmem:[%s7247_s0 + $0x122] sm:$0x4]   ;;  %v1831_v36 = vsel %vm6_vm0, %v4226_v22, %v4225_v21  ;;  %v1810_v42 = vsel %vm6_vm0, %v4221_v29, %v4220_v25  ;;  %1764 = vrot.lane.b32.xlu0 %v1763_v41, %s4654_s4  ;;  %v799_v25 = vpop.permute.xlu1 %798  }
  0xb9   :  { %600 = vst.msk [vmem:[#allocation0 - $0x780] ss:$648 sm:$0x38] %vm596_vm3, %v592_v26   ;;  %598 = vst.msk [vmem:[#allocation0 + $0x20] ss:$648 sm:$0x7] %vm596_vm3, %v592_v26   ;;  %v1833_v47 = vsel %vm841_vm9, %v1831_v36, %v1825_v35  ;;  %v1814_v53 = vsel %vm10_vm1, %v4222_v34, %v1810_v42 }
  0xba   :  { %595 = vst.msk [vmem:[#allocation0 + $0x28] ss:$648 sm:$0x7] %vm7305_vm15, %v592_v26   ;;  %v4230_v37 = vld [vmem:[%s7247_s0 + $0xe1] sm:$0x2]   ;;  %vm694_vm15 = vcmask 1048336  }
  0xbb   :  { %4403 = vst [vmem:[%s7248_s1 + $0x2f] sm:$0x1] %v2832_v31  ;;  %4484 = vst [vmem:[%s7248_s1 + $0x80] sm:$0x1] %v3318_v32  ;;  %v4231_v38 = vld [vmem:[%s7247_s0 + $0x6a] sm:$0x1]   ;;  %v1858_v51 = vsel %vm6_vm0, %v4230_v37, %v4229_v30 }
  0xbc   :  { %615 = vst.msk [vmem:[#allocation0 + $0x20] ss:$648 sm:$0x7] %vm613_vm12, %v612_v16   ;;  %v4232_v39 = vld [vmem:[%s7247_s0 + $0xe9] sm:$0x2]   ;;  %vm707_vm3 = vcmask 801792   ;;  %1815 = vrot.lane.b32.xlu0 %v1814_v53, %s4655_s17 }
  0xbd   :  { %v4235_v40 = vld [vmem:[%s7247_s0 + $0x101] sm:$0x1]   ;;  %v4237_v44 = vld [vmem:[%s7247_s0 + $0x109] sm:$0x1]   ;;  %v2946_v48 = vld [vmem:[#allocation0 + $0x210] sm:$0x1]  ;;  %v1864_v52 = vsel %vm6_vm0, %v4232_v39, %v4231_v38 }
  0xbe   :  { %v1888_v43 = vld [vmem:[%s7247_s0] sm:$0x2]   ;;  %v4238_v45 = vld [vmem:[%s7247_s0 + $0x8] sm:$0x2]   ;;  %v3432_v49 = vld [vmem:[#allocation0 + $0x498] sm:$0x1] }
  0xbf   :  { %vm7306_vm10 = vcmask 48128   ;;  %651 = vst.msk [vmem:[#allocation0 + $0x340] ss:$648 sm:$0x3] %vm649_vm13, %v645_v46   ;;  %4422 = vst [vmem:[%s7248_s1 + $0x42] sm:$0x1] %v2946_v48  ;;  %v1890_v56 = vsel %vm6_vm0, %v1888_v43, %v4235_v40  ;;  %v1900_v58 = vsel %vm6_vm0, %v4238_v45, %v4237_v44 }
  0xc0   :  { %648 = vst.msk [vmem:[#allocation0 + $0xc0] ss:$648 sm:$0x7] %vm7306_vm10, %v645_v46   ;;  %vm731_vm10 = vcmask 1048320   ;;  %4503 = vst [vmem:[%s7248_s1 + $0x93] sm:$0x1] %v3432_v49 }
  0xc1   :  { %653 = vst.msk [vmem:[#allocation0 + $0xa0] ss:$8 sm:$0xc] %vm649_vm13, %v645_v46   ;;  %655 = vst.msk [vmem:[#allocation0 + $0xfe0] ss:$-648 sm:$0x30] %vm649_vm13, %v645_v46  }
  0xc2   :  { %vm800_vm13 = vcmask 752640   ;;  %670 = vst.msk [vmem:[#allocation0 + $0x340] ss:$648 sm:$0x3] %vm668_vm4, %v667_v33   ;;  %672 = vst.msk [vmem:[#allocation0 + $0xb6] sm:$0x4] %vm668_vm4, %v667_v33  }
  0xc3   :  { %v4227_v54 = vld [vmem:[%s7247_s0 + $0x43] sm:$0x1]   ;;  %v4236_v57 = vld [vmem:[%s7247_s0 + $0x7f] sm:$0x4]   ;;  %v4239_v59 = vld [vmem:[%s7247_s0 + $0x87] sm:$0x4]   ;;  %v1866_v60 = vsel %vm800_vm13, %v1864_v52, %v1858_v51  ;;  %v840_v51 = vpop.permute.xlu1 %839  }
  0xc4   :  { %v4228_v55 = vld [vmem:[%s7247_s0 + $0xc2] sm:$0x2]   ;;  %vm7301_vm6 = vcmask 1014784   ;;  %s4656_s18 = smov 38   ;;  %vm744_vm14 = vcmask 785408   ;;  %vm768_vm8 = vcmask 769024   ;;  %v1894_v7 = vsel %vm10_vm1, %v4236_v57, %v1890_v56 }
  0xc5   :  { %1834 = vrot.lane.b32.xlu1 %v1833_v47, %s4656_s18  ;;  %vm771_vm11 = vcmask 1048304   ;;  %vm805_vm5 = vcmask 1031904   ;;  %118 = vst.msk [vmem:[#allocation0 + $0x130] ss:$648 sm:$0x3] %vm7301_vm6, %v5547_v12   ;;  %v690_v12 = vpop.permute.xlu0 %689   ;;  %vm7307_vm6 = vcmask 31744   ;;  %v1904_v8 = vsel %vm10_vm1, %v4239_v59, %v1900_v58 }
  0xc6   :  { %v4243_v61 = vld [vmem:[%s7247_s0 + $0x20] sm:$0x1]   ;;  %v4246_v63 = vld [vmem:[%s7247_s0 + $0x28] sm:$0x1]   ;;  %v4252_v1 = vld [vmem:[%s7247_s0 + $0x37] sm:$0x1]   ;;  %v1847_v14 = vsel %vm6_vm0, %v4228_v55, %v4227_v54  ;;  %v1906_v18 = vsel %vm768_vm8, %v1904_v8, %v1894_v7 }
  0xc7   :  { %v4244_v62 = vld [vmem:[%s7247_s0 + $0x9f] sm:$0x2]   ;;  %v4247_v0 = vld [vmem:[%s7247_s0 + $0xa7] sm:$0x2]   ;;  %v4253_v2 = vld [vmem:[%s7247_s0 + $0xb6] sm:$0x2]   ;;  %1848 = vrot.lane.b32.xlu0 %v1847_v14, %s4656_s18 }
  0xc8   :  { %v2574_v3 = vld [vmem:[#allocation0 + $0x20] sm:$0x1]  ;;  %v3060_v4 = vld [vmem:[#allocation0 + $0x2a8] sm:$0x1]  ;;  %v3546_v5 = vld [vmem:[#allocation0 + $0x530] sm:$0x1]  ;;  %v1939_v26 = vsel %vm6_vm0, %v4244_v62, %v4243_v61  ;;  %v1949_v27 = vsel %vm6_vm0, %v4247_v0, %v4246_v63  ;;  %v1984_v28 = vsel %vm6_vm0, %v4253_v2, %v4252_v1 }
  0xc9   :  { %693 = vst.msk [vmem:[#allocation0 + $0x3e0] ss:$-648 sm:$0x3] %vm7307_vm6, %v690_v12   ;;  %4360 = vst [vmem:[%s7248_s1 + $0x4] sm:$0x1] %v2574_v3  ;;  %vm7303_vm6 = vcmask 1031168   ;;  %1867 = vrot.lane.b32.xlu1 %v1866_v60, %s4657_s16 }
  0xca   :  { %696 = vst.msk [vmem:[#allocation0 + $0x148] ss:$8 sm:$0x3] %vm694_vm15, %v690_v12   ;;  %698 = vst.msk [vmem:[#allocation0 + $0x3e8] ss:$-8 sm:$0xc] %vm694_vm15, %v690_v12  }
  0xcb   :  { %4441 = vst [vmem:[%s7248_s1 + $0x55] sm:$0x1] %v3060_v4  ;;  %4522 = vst [vmem:[%s7248_s1 + $0xa6] sm:$0x1] %v3546_v5  ;;  %v4233_v9 = vld [vmem:[%s7247_s0 + $0xe2] sm:$0x1]  }
  0xcc   :  { %709 = vst.msk [vmem:[#allocation0 + $0x150] ss:$648 sm:$0x3] %vm707_vm3, %v706_v50   ;;  %v4234_v10 = vld [vmem:[%s7247_s0 + $0x61] sm:$0x2]   ;;  %vm822_vm15 = vcmask 1048288  }
  0xcd   :  { %v4254_v11 = vld [vmem:[%s7247_s0 + $0x3f] sm:$0x1]   ;;  %v4245_v15 = vld [vmem:[%s7247_s0 + $0x11e] sm:$0x4]   ;;  %v4248_v16 = vld [vmem:[%s7247_s0 + $0x126] sm:$0x4]   ;;  %v1880_v33 = vsel %vm6_vm0, %v4234_v10, %v4233_v9  ;;  %1907 = vrot.lane.b32.xlu1 %v1906_v18, %s4658_s6 }
  0xce   :  { %v4255_v13 = vld [vmem:[%s7247_s0 + $0xbe] sm:$0x2]   ;;  %vm844_vm7 = vcmask 1015504   ;;  %79 = vst.msk [vmem:[#allocation0 + $0x320] ss:$648 sm:$0x3] %vm7303_vm6, %v5558_v17   ;;  %v1943_v39 = vsel %vm10_vm1, %v4245_v15, %v1939_v26  ;;  %v1953_v40 = vsel %vm10_vm1, %v4248_v16, %v1949_v27  ;;  %1881 = vrot.lane.b32.xlu0 %v1880_v33, %s4657_s16 }
  0xcf   :  { %81 = vst.msk [vmem:[#allocation0 + $0x96] sm:$0x4] %vm7303_vm6, %v5558_v17   ;;  %v727_v17 = vpop.permute.xlu0 %726   ;;  %v4264_v19 = vld [vmem:[%s7247_s0 + $0x75] sm:$0x1]   ;;  %v4266_v21 = vld [vmem:[%s7247_s0 + $0x7d] sm:$0x1]   ;;  %v1990_v29 = vsel %vm6_vm0, %v4255_v13, %v4254_v11  ;;  %v1955_v58 = vsel %vm744_vm14, %v1953_v40, %v1943_v39 }
  0xd0   :  { %v4265_v20 = vld [vmem:[%s7247_s0 + $0xf4] sm:$0x2]   ;;  %v2688_v22 = vld [vmem:[#allocation0 + $0xb8] sm:$0x1]  ;;  %v3174_v23 = vld [vmem:[#allocation0 + $0x340] sm:$0x1]  ;;  %v1992_v41 = vsel %vm707_vm3, %v1990_v29, %v1984_v28 }
  0xd1   :  { %v3660_v24 = vld [vmem:[#allocation0 + $0x5c8] sm:$0x1]  ;;  %vm7308_vm6 = vcmask 15360   ;;  %733 = vst.msk [vmem:[#allocation0 + $0x1e0] ss:$8 sm:$0x3] %vm731_vm10, %v727_v17   ;;  %v2050_v52 = vsel %vm6_vm0, %v4265_v20, %v4264_v19 }
  0xd2   :  { %730 = vst.msk [vmem:[#allocation0 + $0x1f0] ss:$648 sm:$0x3] %vm7308_vm6, %v727_v17   ;;  %4379 = vst [vmem:[%s7248_s1 + $0x17] sm:$0x1] %v2688_v22  ;;  %s4659_s16 = smov 30   ;;  %1956 = vrot.lane.b32.xlu0 %v1955_v58, %s4660_s10 }
  0xd3   :  { %735 = vst.msk [vmem:[#allocation0 + $0x480] ss:$-8 sm:$0xc] %vm731_vm10, %v727_v17   ;;  %4460 = vst [vmem:[%s7248_s1 + $0x68] sm:$0x1] %v3174_v23  ;;  %vm877_vm10 = vcmask 999104   ;;  %v767_v38 = vpop.permute.xlu0 %766   ;;  %1993 = vrot.lane.b32.xlu1 %v1992_v41, %s4659_s16 }
  0xd4   :  { %4541 = vst [vmem:[%s7248_s1 + $0xb9] sm:$0x1] %v3660_v24  ;;  %746 = vst.msk [vmem:[#allocation0 + $0x1e8] ss:$648 sm:$0x3] %vm744_vm14, %v743_v6   ;;  %vm910_vm14 = vcmask 982704   ;;  %v873_v6 = vpop.permute.xlu1 %872  }
  0xd5   :  { %802 = vst.msk [vmem:[#allocation0 + $0x5a0] ss:$-1296 sm:$0x3] %vm800_vm13, %v799_v25   ;;  %804 = vst.msk [vmem:[#allocation0 + $0x316] sm:$0x4] %vm800_vm13, %v799_v25   ;;  %s4662_s9 = smov 28  }
  0xd6   :  { %v4267_v30 = vld [vmem:[%s7247_s0 + $0xfc] sm:$0x2]   ;;  %v2778_v31 = vld [vmem:[#allocation0 + $0x130] sm:$0x1]  ;;  %v3264_v32 = vld [vmem:[#allocation0 + $0x3b8] sm:$0x1] }
  0xd7   :  { %807 = vst.msk [vmem:[#allocation0 + $0x5a0] ss:$-1296 sm:$0x3] %vm805_vm5, %v799_v25   ;;  %809 = vst.msk [vmem:[#allocation0 + $0x316] sm:$0x4] %vm805_vm5, %v799_v25   ;;  %vm855_vm5 = vcmask 1048272   ;;  %v2056_v53 = vsel %vm6_vm0, %v4267_v30, %v4266_v21  ;;  %v821_v60 = vpop.permute.xlu0 %820  }
  0xd8   :  { %v4258_v34 = vld [vmem:[%s7247_s0 + $0xd6] sm:$0x1]   ;;  %v4260_v36 = vld [vmem:[%s7247_s0 + $0xde] sm:$0x1]   ;;  %4394 = vst [vmem:[%s7248_s1 + $0x26] sm:$0x1] %v2778_v31  ;;  %v2058_v63 = vsel %vm613_vm12, %v2056_v53, %v2050_v52 }
  0xd9   :  { %v4259_v35 = vld [vmem:[%s7247_s0 + $0x55] sm:$0x2]   ;;  %v4261_v37 = vld [vmem:[%s7247_s0 + $0x5d] sm:$0x2]   ;;  %4475 = vst [vmem:[%s7248_s1 + $0x77] sm:$0x1] %v3264_v32  ;;  %2059 = vrot.lane.b32.xlu1 %v2058_v63, %s4661_s14 }
  0xda   :  { %v4270_v42 = vld [vmem:[%s7247_s0 + $0x14] sm:$0x1]   ;;  %v4273_v44 = vld [vmem:[%s7247_s0 + $0x1c] sm:$0x1]   ;;  %v4279_v46 = vld [vmem:[%s7247_s0 + $0xb3] sm:$0x1]   ;;  %v2017_v61 = vsel %vm6_vm0, %v4259_v35, %v4258_v34  ;;  %v2023_v62 = vsel %vm6_vm0, %v4261_v37, %v4260_v36  ;;  %v906_v34 = vpop.permute.xlu1 %905  }
  0xdb   :  { %v4271_v43 = vld [vmem:[%s7247_s0 + $0x93] sm:$0x2]   ;;  %v4274_v45 = vld [vmem:[%s7247_s0 + $0x9b] sm:$0x2]   ;;  %v4280_v47 = vld [vmem:[%s7247_s0 + $0x32] sm:$0x2]   ;;  %v2025_v16 = vsel %vm668_vm4, %v2023_v62, %v2017_v61  ;;  %v854_v24 = vpop.permute.xlu0 %853  }
  0xdc   :  { %v4281_v48 = vld [vmem:[%s7247_s0 + $0xbb] sm:$0x1]   ;;  %v2802_v49 = vld [vmem:[#allocation0 + $0x150] sm:$0x1]  ;;  %v3288_v50 = vld [vmem:[#allocation0 + $0x3d8] sm:$0x1]  ;;  %v2083_v7 = vsel %vm6_vm0, %v4271_v43, %v4270_v42  ;;  %v2093_v8 = vsel %vm6_vm0, %v4274_v45, %v4273_v44  ;;  %v2130_v9 = vsel %vm6_vm0, %v4280_v47, %v4279_v46  ;;  %2026 = vrot.lane.b32.xlu0 %v2025_v16, %s4662_s9 }
  0xdd   :  { %770 = vst.msk [vmem:[#allocation0 + $0x280] ss:$648 sm:$0x3] %vm768_vm8, %v767_v38   ;;  %v4282_v54 = vld [vmem:[%s7247_s0 + $0x3a] sm:$0x2]   ;;  %vm921_vm12 = vcmask 1048240  }
  0xde   :  { %775 = vst.msk [vmem:[#allocation0 - $0x298] ss:$648 sm:$0xc] %vm771_vm11, %v767_v38   ;;  %4398 = vst [vmem:[%s7248_s1 + $0x2a] sm:$0x1] %v2802_v49  ;;  %v2136_v10 = vsel %vm6_vm0, %v4282_v54, %v4281_v48  ;;  %vm7309_vm4 = vcmask 867328  }
  0xdf   :  { %4479 = vst [vmem:[%s7248_s1 + $0x7b] sm:$0x1] %v3288_v50  ;;  %773 = vst.msk [vmem:[#allocation0 + $0x280] ss:$648 sm:$0x3] %vm771_vm11, %v767_v38   ;;  %vm888_vm11 = vcmask 1048256   ;;  %v2138_v27 = vsel %vm7309_vm4, %v2136_v10, %v2130_v9  ;;  %v887_v45 = vpop.permute.xlu0 %886  }
  0xe0   :  { %843 = vst.msk [vmem:[#allocation0 + $0x128] ss:$648 sm:$0x3] %vm841_vm9, %v840_v51   ;;  %v2664_v55 = vld [vmem:[#allocation0 + $0x98] sm:$0x1]  ;;  %vm7311_vm9 = vcmask 850944   ;;  %2139 = vrot.lane.b32.xlu1 %v2138_v27, %s4663_s2 }
  0xe1   :  { %v3150_v56 = vld [vmem:[#allocation0 + $0x320] sm:$0x1]  ;;  %v3636_v57 = vld [vmem:[#allocation0 + $0x5a8] sm:$0x1]  ;;  %v4272_v59 = vld [vmem:[%s7247_s0 + $0x112] sm:$0x4]  }
  0xe2   :  { %846 = vst.msk [vmem:[#allocation0 + $0x128] ss:$648 sm:$0x3] %vm844_vm7, %v840_v51   ;;  %v4275_v12 = vld [vmem:[%s7247_s0 + $0x11a] sm:$0x4]   ;;  %v2087_v25 = vsel %vm10_vm1, %v4272_v59, %v2083_v7  ;;  %vm951_vm8 = vcmask 966304   ;;  %v947_v51 = vpop.permute.xlu1 %946  }
  0xe3   :  { %4375 = vst [vmem:[%s7248_s1 + $0x13] sm:$0x1] %v2664_v55  ;;  %4456 = vst [vmem:[%s7248_s1 + $0x64] sm:$0x1] %v3150_v56  ;;  %v4291_v0 = vld [vmem:[%s7247_s0 + $0x71] sm:$0x1]   ;;  %v2097_v26 = vsel %vm10_vm1, %v4275_v12, %v2093_v8 }
  0xe4   :  { %4537 = vst [vmem:[%s7248_s1 + $0xb5] sm:$0x1] %v3636_v57  ;;  %v4292_v1 = vld [vmem:[%s7247_s0 + $0xf0] sm:$0x2]   ;;  %v4293_v2 = vld [vmem:[%s7247_s0 + $0x79] sm:$0x1]   ;;  %v2099_v43 = vsel %vm7311_vm9, %v2097_v26, %v2087_v25 }
  0xe5   :  { %v4294_v3 = vld [vmem:[%s7247_s0 + $0xf8] sm:$0x2]   ;;  %v2916_v4 = vld [vmem:[#allocation0 + $0x1e8] sm:$0x1]  ;;  %v3402_v5 = vld [vmem:[#allocation0 + $0x470] sm:$0x1]  ;;  %v2196_v35 = vsel %vm6_vm0, %v4292_v1, %v4291_v0  ;;  %2100 = vrot.lane.b32.xlu0 %v2099_v43, %s4664_s13 }
  0xe6   :  { %824 = vst.msk [vmem:[#allocation0 + $0x88] ss:$648 sm:$0x7] %vm822_vm15, %v821_v60   ;;  %v4306_v11 = vld [vmem:[%s7247_s0 + $0x127] sm:$0x1]   ;;  %v2202_v36 = vsel %vm6_vm0, %v4294_v3, %v4293_v2  ;;  %vm966_vm7 = vcmask 1048224  }
  0xe7   :  { %4417 = vst [vmem:[%s7248_s1 + $0x3d] sm:$0x1] %v2916_v4  ;;  %4498 = vst [vmem:[%s7248_s1 + $0x8e] sm:$0x1] %v3402_v5  ;;  %v2658_v13 = vld [vmem:[#allocation0 + $0x90] sm:$0x1]  ;;  %v920_v4 = vpop.permute.xlu0 %919  }
  0xe8   :  { %v3144_v14 = vld [vmem:[#allocation0 + $0x318] sm:$0x1]  ;;  %v3630_v15 = vld [vmem:[#allocation0 + $0x5a0] sm:$0x1]  ;;  %4374 = vst [vmem:[%s7248_s1 + $0x12] sm:$0x1] %v2658_v13 }
  0xe9   :  { %876 = vst.msk [vmem:[#allocation0 + $0x1c0] ss:$648 sm:$0x3] %vm874_vm2, %v873_v6   ;;  %4455 = vst [vmem:[%s7248_s1 + $0x63] sm:$0x1] %v3144_v14  ;;  %vm7310_vm2 = vcmask 703488  }
  0xea   :  { %4536 = vst [vmem:[%s7248_s1 + $0xb4] sm:$0x1] %v3630_v15  ;;  %879 = vst.msk [vmem:[#allocation0 + $0x1c0] ss:$648 sm:$0x3] %vm877_vm10, %v873_v6   ;;  %vm7312_vm3 = vcmask 900096  }
  0xeb   :  { %v4285_v17 = vld [vmem:[%s7247_s0 + $0x52] sm:$0x1]   ;;  %v4287_v19 = vld [vmem:[%s7247_s0 + $0x5a] sm:$0x1]   ;;  %v4307_v21 = vld [vmem:[%s7247_s0 + $0x26] sm:$0x2]   ;;  %v2204_v48 = vsel %vm7312_vm3, %v2202_v36, %v2196_v35 }
  0xec   :  { %v4286_v18 = vld [vmem:[%s7247_s0 + $0xd1] sm:$0x2]   ;;  %v4288_v20 = vld [vmem:[%s7247_s0 + $0xd9] sm:$0x2]   ;;  %v4309_v22 = vld [vmem:[%s7247_s0 + $0x12f] sm:$0x1]   ;;  %v2280_v40 = vsel %vm6_vm0, %v4307_v21, %v4306_v11  ;;  %2205 = vrot.lane.b32.xlu1 %v2204_v48, %s4665_s24  ;;  %v984_v11 = vpop.permute.xlu1 %983  }
  0xed   :  { %v4310_v23 = vld [vmem:[%s7247_s0 + $0x2e] sm:$0x2]   ;;  %v4297_v28 = vld [vmem:[%s7247_s0 + $0x90] sm:$0x1]   ;;  %v4300_v30 = vld [vmem:[%s7247_s0 + $0x98] sm:$0x1]   ;;  %v2163_v46 = vsel %vm6_vm0, %v4286_v18, %v4285_v17  ;;  %v2169_v47 = vsel %vm6_vm0, %v4288_v20, %v4287_v19 }
  0xee   :  { %v4298_v29 = vld [vmem:[%s7247_s0 + $0x10f] sm:$0x2]   ;;  %v4301_v31 = vld [vmem:[%s7247_s0 + $0x117] sm:$0x2]   ;;  %v3030_v32 = vld [vmem:[#allocation0 + $0x280] sm:$0x1]  ;;  %v2290_v41 = vsel %vm6_vm0, %v4310_v23, %v4309_v22 }
  0xef   :  { %v3516_v33 = vld [vmem:[#allocation0 + $0x508] sm:$0x1]  ;;  %857 = vst.msk [vmem:[#allocation0 + $0x120] ss:$648 sm:$0x3] %vm855_vm5, %v854_v24   ;;  %vm988_vm13 = vcmask 949904   ;;  %v2229_v52 = vsel %vm6_vm0, %v4298_v29, %v4297_v28  ;;  %v2239_v53 = vsel %vm6_vm0, %v4301_v31, %v4300_v30  ;;  %v965_v24 = vpop.permute.xlu0 %964  }
  0xf0   :  { %v4308_v37 = vld [vmem:[%s7247_s0 + $0xa5] sm:$0x4]   ;;  %4436 = vst [vmem:[%s7248_s1 + $0x50] sm:$0x1] %v3030_v32  ;;  %4517 = vst [vmem:[%s7248_s1 + $0xa1] sm:$0x1] %v3516_v33  ;;  %v1017_v31 = vpop.permute.xlu1 %1016  }
  0xf1   :  { %v2772_v38 = vld [vmem:[#allocation0 + $0x128] sm:$0x1]  ;;  %v3258_v39 = vld [vmem:[#allocation0 + $0x3b0] sm:$0x1]  ;;  %v4311_v42 = vld [vmem:[%s7247_s0 + $0xad] sm:$0x4]   ;;  %v2284_v54 = vsel %vm10_vm1, %v4308_v37, %v2280_v40 }
  0xf2   :  { %909 = vst.msk [vmem:[#allocation0 + $0x4e0] ss:$-648 sm:$0x3] %vm7310_vm2, %v906_v34   ;;  %4393 = vst [vmem:[%s7248_s1 + $0x25] sm:$0x1] %v2772_v38  ;;  %v2294_v55 = vsel %vm10_vm1, %v4311_v42, %v2290_v41  ;;  %vm7313_vm6 = vcmask 687104  }
  0xf3   :  { %4474 = vst [vmem:[%s7248_s1 + $0x76] sm:$0x1] %v3258_v39  ;;  %912 = vst.msk [vmem:[#allocation0 + $0x4e0] ss:$-648 sm:$0x3] %vm910_vm14, %v906_v34   ;;  %vm7314_vm15 = vcmask 883712   ;;  %v998_v43 = vpop.permute.xlu0 %997  }
  0xf4   :  { %v4299_v44 = vld [vmem:[%s7247_s0 + $0xe] sm:$0x4]   ;;  %v4302_v49 = vld [vmem:[%s7247_s0 + $0x16] sm:$0x4]   ;;  %v4321_v50 = vld [vmem:[%s7247_s0 + $0x65] sm:$0x1]   ;;  %v2171_v61 = vsel %vm7314_vm15, %v2169_v47, %v2163_v46 }
  0xf5   :  { %890 = vst.msk [vmem:[#allocation0 + $0x440] ss:$-648 sm:$0x3] %vm888_vm11, %v887_v45   ;;  %v4322_v56 = vld [vmem:[%s7247_s0 + $0xe4] sm:$0x2]   ;;  %v2233_v5 = vsel %vm10_vm1, %v4299_v44, %v2229_v52  ;;  %v2243_v6 = vsel %vm10_vm1, %v4302_v49, %v2239_v53  ;;  %vm7315_vm5 = vcmask 932864   ;;  %v1050_v49 = vpop.permute.xlu1 %1049  }
  0xf6   :  { %v4323_v57 = vld [vmem:[%s7247_s0 + $0x6d] sm:$0x1]   ;;  %v2886_v59 = vld [vmem:[#allocation0 + $0x1c0] sm:$0x1]  ;;  %v3372_v12 = vld [vmem:[#allocation0 + $0x448] sm:$0x1]  ;;  %v2296_v7 = vsel %vm7315_vm5, %v2294_v55, %v2284_v54  ;;  %v2362_v13 = vsel %vm6_vm0, %v4322_v56, %v4321_v50 }
  0xf7   :  { %v4324_v58 = vld [vmem:[%s7247_s0 + $0xec] sm:$0x2]   ;;  %950 = vst.msk [vmem:[#allocation0 + $0x68] ss:$648 sm:$0x7] %vm7313_vm6, %v947_v51   ;;  %s4666_s3 = smov 20  }
  0xf8   :  { %v4336_v60 = vld [vmem:[%s7247_s0 + $0x23] sm:$0x1]   ;;  %4412 = vst [vmem:[%s7248_s1 + $0x38] sm:$0x1] %v2886_v59  ;;  %4493 = vst [vmem:[%s7248_s1 + $0x89] sm:$0x1] %v3372_v12  ;;  %v2368_v14 = vsel %vm6_vm0, %v4324_v58, %v4323_v57  ;;  %2172 = vrot.lane.b32.xlu0 %v2171_v61, %s4666_s3  ;;  %v1031_v59 = vpop.permute.xlu0 %1030  }
  0xf9   :  { %953 = vst.msk [vmem:[#allocation0 + $0x68] ss:$648 sm:$0x7] %vm951_vm8, %v947_v51   ;;  %v4315_v62 = vld [vmem:[%s7247_s0 + $0x46] sm:$0x1]   ;;  %vm7316_vm10 = vcmask 670720  }
  0xfa   :  { %v4316_v63 = vld [vmem:[%s7247_s0 + $0xc5] sm:$0x2]   ;;  %v4317_v0 = vld [vmem:[%s7247_s0 + $0x4e] sm:$0x1]   ;;  %v4337_v1 = vld [vmem:[%s7247_s0 + $0xa2] sm:$0x2]  }
  0xfb   :  { %v4339_v2 = vld [vmem:[%s7247_s0 + $0x2b] sm:$0x1]   ;;  %v4318_v8 = vld [vmem:[%s7247_s0 + $0xcd] sm:$0x2]   ;;  %v4327_v9 = vld [vmem:[%s7247_s0 + $0x104] sm:$0x1]   ;;  %v2444_v20 = vsel %vm6_vm0, %v4337_v1, %v4336_v60  ;;  %v2329_v25 = vsel %vm6_vm0, %v4316_v63, %v4315_v62  ;;  %v1091_v62 = vpop.permute.xlu1 %1090  }
  0xfc   :  { %v4340_v3 = vld [vmem:[%s7247_s0 + $0xaa] sm:$0x2]   ;;  %v4328_v10 = vld [vmem:[%s7247_s0 + $0x3] sm:$0x2]   ;;  %v4330_v15 = vld [vmem:[%s7247_s0 + $0x10c] sm:$0x1]   ;;  %v2335_v26 = vsel %vm6_vm0, %v4318_v8, %v4317_v0  ;;  %v1064_v8 = vpop.permute.xlu0 %1063  }
  0xfd   :  { %923 = vst.msk [vmem:[#allocation0 + $0x250] ss:$648 sm:$0x3] %vm921_vm12, %v920_v4   ;;  %v4331_v16 = vld [vmem:[%s7247_s0 + $0xb] sm:$0x2]   ;;  %v2454_v21 = vsel %vm6_vm0, %v4340_v3, %v4339_v2  ;;  %vm7317_vm11 = vcmask 916480   ;;  %v2395_v32 = vsel %vm6_vm0, %v4328_v10, %v4327_v9 }
  0xfe   :  { %v4338_v17 = vld [vmem:[%s7247_s0 + $0x121] sm:$0x4]   ;;  %v3000_v18 = vld [vmem:[#allocation0 + $0x258] sm:$0x1]  ;;  %v3486_v19 = vld [vmem:[#allocation0 + $0x4e0] sm:$0x1]  ;;  %v2245_v23 = vsel %vm7317_vm11, %v2243_v6, %v2233_v5  ;;  %v2405_v33 = vsel %vm6_vm0, %v4331_v16, %v4330_v15 }
  0xff   :  { %987 = vst.msk [vmem:[#allocation0 + $0x100] ss:$648 sm:$0x3] %vm7316_vm10, %v984_v11   ;;  %v4341_v22 = vld [vmem:[%s7247_s0 + $0x129] sm:$0x4]   ;;  %vm999_vm14 = vcmask 1048208   ;;  %v2448_v34 = vsel %vm10_vm1, %v4338_v17, %v2444_v20  ;;  %2246 = vrot.lane.b32.xlu0 %v2245_v23, %s4668_s30 }
 0x100   :  { %4431 = vst [vmem:[%s7248_s1 + $0x4b] sm:$0x1] %v3000_v18  ;;  %4512 = vst [vmem:[%s7248_s1 + $0x9c] sm:$0x1] %v3486_v19  ;;  %s4667_s17 = smov 14   ;;  %vm1021_vm12 = vcmask 933504   ;;  %v2458_v35 = vsel %vm10_vm1, %v4341_v22, %v2454_v21 }
 0x101   :  { %990 = vst.msk [vmem:[#allocation0 + $0x100] ss:$648 sm:$0x3] %vm988_vm13, %v984_v11   ;;  %2297 = vrot.lane.b32.xlu1 %v2296_v7, %s4667_s17  ;;  %vm7318_vm4 = vcmask 965632   ;;  %v4329_v28 = vld [vmem:[%s7247_s0 + $0x82] sm:$0x4]  }
 0x102   :  { %v2370_v27 = vsel %vm7318_vm4, %v2368_v14, %v2362_v13  ;;  %v4332_v29 = vld [vmem:[%s7247_s0 + $0x8a] sm:$0x4]   ;;  %v4351_v30 = vld [vmem:[%s7247_s0 + $0xe1] sm:$0x1]   ;;  %v4353_v37 = vld [vmem:[%s7247_s0 + $0xe9] sm:$0x1]   ;;  %v2399_v44 = vsel %vm10_vm1, %v4329_v28, %v2395_v32  ;;  %v1138_v14 = vpop.permute.xlu1 %1137  }
 0x103   :  { %968 = vst.msk [vmem:[#allocation0 + $0x60] ss:$648 sm:$0x7] %vm966_vm7, %v965_v24   ;;  %v4352_v36 = vld [vmem:[%s7247_s0 + $0x60] sm:$0x2]   ;;  %vm7319_vm2 = vcmask 654336   ;;  %v2409_v45 = vsel %vm10_vm1, %v4332_v29, %v2405_v33  ;;  %v1109_v24 = vpop.permute.xlu0 %1108  }
 0x104   :  { %v4354_v38 = vld [vmem:[%s7247_s0 + $0x68] sm:$0x2]   ;;  %v2628_v39 = vld [vmem:[#allocation0 + $0x68] sm:$0x1]  ;;  %v3114_v40 = vld [vmem:[#allocation0 + $0x2f0] sm:$0x1]  ;;  %v2522_v52 = vsel %vm6_vm0, %v4352_v36, %v4351_v30 }
 0x105   :  { %v3600_v41 = vld [vmem:[#allocation0 + $0x578] sm:$0x1]  ;;  %1020 = vst.msk [vmem:[#allocation0 + $0x420] ss:$-648 sm:$0x3] %vm7319_vm2, %v1017_v31   ;;  %vm7320_vm9 = vcmask 949248   ;;  %v2528_v53 = vsel %vm6_vm0, %v4354_v38, %v4353_v37 }
 0x106   :  { %4369 = vst [vmem:[%s7248_s1 + $0xd] sm:$0x1] %v2628_v39  ;;  %4450 = vst [vmem:[%s7248_s1 + $0x5e] sm:$0x1] %v3114_v40  ;;  %v2337_v42 = vsel %vm7320_vm9, %v2335_v26, %v2329_v25  ;;  %vm1032_vm8 = vcmask 1048192   ;;  %s4669_s4 = smov 10   ;;  %v1181_v28 = vpop.permute.xlu1 %1180  }
 0x107   :  { %4531 = vst [vmem:[%s7248_s1 + $0xaf] sm:$0x1] %v3600_v41  ;;  %1023 = vst.msk [vmem:[#allocation0 + $0x420] ss:$-648 sm:$0x3] %vm1021_vm12, %v1017_v31   ;;  %2371 = vrot.lane.b32.xlu1 %v2370_v27, %s4669_s4  ;;  %vm1054_vm7 = vcmask 917104   ;;  %2338 = vrot.lane.b32.xlu0 %v2337_v42, %s4670_s29  ;;  %v1160_v36 = vpop.permute.xlu0 %1159  }
 0x108   :  { %vm7321_vm3 = vcmask 998400   ;;  %v4345_v47 = vld [vmem:[%s7247_s0 + $0x42] sm:$0x1]   ;;  %1001 = vst.msk [vmem:[#allocation0 + $0x380] ss:$-648 sm:$0x3] %vm999_vm14, %v998_v43  }
 0x109   :  { %v2460_v46 = vsel %vm7321_vm3, %v2458_v35, %v2448_v34  ;;  %v4346_v48 = vld [vmem:[%s7247_s0 + $0xc1] sm:$0x2]   ;;  %v4347_v50 = vld [vmem:[%s7247_s0 + $0x4a] sm:$0x1]   ;;  %v4249_v54 = vld [vmem:[%s7247_s0 + $0x20] sm:$0x1]  }
 0x10a   :  { %v4348_v51 = vld [vmem:[%s7247_s0 + $0xc9] sm:$0x2]   ;;  %v2742_v55 = vld [vmem:[#allocation0 + $0x100] sm:$0x1]  ;;  %v3228_v56 = vld [vmem:[#allocation0 + $0x388] sm:$0x1]  ;;  %v2489_v12 = vsel %vm6_vm0, %v4346_v48, %v4345_v47  ;;  %v1214_v40 = vpop.permute.xlu1 %1213  }
 0x10b   :  { %vm7322_vm13 = vcmask 637952   ;;  %v4250_v57 = vld [vmem:[%s7247_s0 + $0x9f] sm:$0x2]   ;;  %4388 = vst [vmem:[%s7248_s1 + $0x20] sm:$0x1] %v2742_v55  ;;  %vm7323_vm6 = vcmask 982016   ;;  %v2495_v60 = vsel %vm6_vm0, %v4348_v51, %v4347_v50  ;;  %v1195_v48 = vpop.permute.xlu0 %1194  }
 0x10c   :  { %1053 = vst.msk [vmem:[#allocation0 + $0x230] ss:$648 sm:$0x3] %vm7322_vm13, %v1050_v49   ;;  %4469 = vst [vmem:[%s7248_s1 + $0x71] sm:$0x1] %v3228_v56  ;;  %v2411_v58 = vsel %vm7323_vm6, %v2409_v45, %v2399_v44  ;;  %s4671_s7 = smov 6   ;;  %v1969_v1 = vsel %vm6_vm0, %v4250_v57, %v4249_v54 }
 0x10d   :  { %1056 = vst.msk [vmem:[#allocation0 + $0x230] ss:$648 sm:$0x3] %vm1054_vm7, %v1050_v49   ;;  %2461 = vrot.lane.b32.xlu1 %v2460_v46, %s4671_s7  ;;  %vm1095_vm15 = vcmask 900704   ;;  %vm7324_vm5 = vcmask 1031168   ;;  %s4672_s19 = smov 8  }
 0x10e   :  { %v2530_v61 = vsel %vm7324_vm5, %v2528_v53, %v2522_v52  ;;  %1034 = vst.msk [vmem:[#allocation0 + $0x190] ss:$648 sm:$0x3] %vm1032_vm8, %v1031_v59   ;;  %v4240_v63 = vld [vmem:[%s7247_s0 + $0x1] sm:$0x1]   ;;  %2412 = vrot.lane.b32.xlu0 %v2411_v58, %s4672_s19  ;;  %vm1065_vm10 = vcmask 1048176   ;;  %v1254_v52 = vpop.permute.xlu1 %1253  }
 0x10f   :  { %v4241_v0 = vld [vmem:[%s7247_s0 + $0x80] sm:$0x2]   ;;  %v4251_v2 = vld [vmem:[%s7247_s0 + $0x11e] sm:$0x4]   ;;  %v3342_v4 = vld [vmem:[#allocation0 + $0x420] sm:$0x1] }
 0x110   :  { %v2856_v3 = vld [vmem:[#allocation0 + $0x198] sm:$0x1]  ;;  %vm7325_vm11 = vcmask 621568   ;;  %4488 = vst [vmem:[%s7248_s1 + $0x84] sm:$0x1] %v3342_v4  ;;  %vm7326_vm14 = vcmask 1014784   ;;  %v1924_v9 = vsel %vm6_vm0, %v4241_v0, %v4240_v63  ;;  %v1973_v10 = vsel %vm10_vm1, %v4251_v2, %v1969_v1 }
 0x111   :  { %1094 = vst.msk [vmem:[#allocation0 + $0x40] ss:$648 sm:$0x7] %vm7325_vm11, %v1091_v62   ;;  %4407 = vst [vmem:[%s7248_s1 + $0x33] sm:$0x1] %v2856_v3  ;;  %v2497_v5 = vsel %vm7326_vm14, %v2495_v60, %v2489_v12  ;;  %2531 = vrot.lane.b32.xlu1 %v2530_v61, %s4673_s5  ;;  %vm1110_vm12 = vcmask 1048160   ;;  %v1228_v12 = vpop.permute.xlu0 %1227  }
 0x112   :  { %1097 = vst.msk [vmem:[#allocation0 + $0x40] ss:$648 sm:$0x7] %vm1095_vm15, %v1091_v62   ;;  %v4242_v6 = vld [vmem:[%s7247_s0 + $0xff] sm:$0x4]   ;;  %vm1144_vm4 = vcmask 884304   ;;  %v1305_v63 = vpop.permute.xlu1 %1304  }
 0x113   :  { %v3900_v7 = vld [vmem:[%s7247_s0 + $0x106] sm:$0x4]   ;;  %1067 = vst.msk [vmem:[#allocation0 + $0x228] ss:$648 sm:$0x3] %vm1065_vm10, %v1064_v8   ;;  %s4674_s26 = smov 4   ;;  %v1928_v23 = vsel %vm10_vm1, %v4242_v6, %v1924_v9 }
 0x114   :  { %v3898_v11 = vld [vmem:[%s7247_s0 + $0x8] sm:$0x1]   ;;  %v4262_v15 = vld [vmem:[%s7247_s0 + $0x56] sm:$0x1]   ;;  %v4276_v17 = vld [vmem:[%s7247_s0 + $0x94] sm:$0x1]   ;;  %2498 = vrot.lane.b32.xlu0 %v2497_v5, %s4674_s26 }
 0x115   :  { %v3899_v13 = vld [vmem:[%s7247_s0 + $0x87] sm:$0x2]   ;;  %v4263_v16 = vld [vmem:[%s7247_s0 + $0xd5] sm:$0x2]   ;;  %v2970_v19 = vld [vmem:[#allocation0 + $0x230] sm:$0x1]  ;;  %1974 = vrot.lane.b32.xlu1 %v1973_v10, %s4660_s10 }
 0x116   :  { %v7_v18 = vsel %vm6_vm0, %v3899_v13, %v3898_v11  ;;  %v3456_v20 = vld [vmem:[#allocation0 + $0x4b8] sm:$0x1]  ;;  %vm7327_vm2 = vcmask 605184   ;;  %v4277_v21 = vld [vmem:[%s7247_s0 + $0x113] sm:$0x2]   ;;  %vm7329_vm8 = vcmask 277504   ;;  %v2039_v27 = vsel %vm6_vm0, %v4263_v16, %v4262_v15  ;;  %v1346_v11 = vpop.permute.xlu1 %1345  }
 0x117   :  { %1141 = vst.msk [vmem:[#allocation0 + $0x360] ss:$648 sm:$0x3] %vm7327_vm2, %v1138_v14   ;;  %vm7328_vm9 = vmmov %vm7327_vm2  ;;  %v11_v22 = vsel %vm10_vm1, %v3900_v7, %v7_v18  ;;  %v4256_v25 = vld [vmem:[%s7247_s0 + $0xb7] sm:$0x1]   ;;  %vm1185_vm7 = vcmask 867904   ;;  %v2113_v29 = vsel %vm6_vm0, %v4277_v21, %v4276_v17  ;;  %v1276_v7 = vpop.permute.xlu0 %1275  }
 0x118   :  { %1143 = vst.msk [vmem:[#allocation0 + $0xd6] sm:$0x4] %vm7328_vm9, %v1138_v14   ;;  %4426 = vst [vmem:[%s7248_s1 + $0x46] sm:$0x1] %v2970_v19  ;;  %v4257_v26 = vld [vmem:[%s7247_s0 + $0x36] sm:$0x2]   ;;  %1929 = vrot.lane.b32.xlu0 %v1928_v23, %s4658_s6 }
 0x119   :  { %4507 = vst [vmem:[%s7248_s1 + $0x97] sm:$0x1] %v3456_v20  ;;  %1146 = vst.msk [vmem:[#allocation0 + $0x360] ss:$648 sm:$0x3] %vm1144_vm4, %v1138_v14   ;;  %vm1161_vm3 = vcmask 1048144   ;;  %v2006_v34 = vsel %vm6_vm0, %v4257_v26, %v4256_v25  ;;  %2040 = vrot.lane.b32.xlu1 %v2039_v27, %s4662_s9 }
 0x11a   :  { %1148 = vst.msk [vmem:[#allocation0 + $0xd6] sm:$0x4] %vm1144_vm4, %v1138_v14   ;;  %v4278_v30 = vld [vmem:[%s7247_s0 + $0x12] sm:$0x4]   ;;  %v2598_v31 = vld [vmem:[#allocation0 + $0x40] sm:$0x1] }
 0x11b   :  { %14 = vst.msk [vmem:[#allocation0 + $0x8] ss:$648 sm:$0x7] %vm7329_vm8, %v11_v22   ;;  %v3084_v32 = vld [vmem:[#allocation0 + $0x2c8] sm:$0x1]  ;;  %vm7330_vm13 = vcmask 588800   ;;  %v2117_v38 = vsel %vm10_vm1, %v4278_v30, %v2113_v29  ;;  %v1327_v20 = vpop.permute.xlu0 %1326  }
 0x11c   :  { %1112 = vst.msk [vmem:[#allocation0 + $0x2c0] ss:$648 sm:$0x3] %vm1110_vm12, %v1109_v24   ;;  %1114 = vst.msk [vmem:[#allocation0 + $0x36] sm:$0x4] %vm1110_vm12, %v1109_v24   ;;  %vm1196_vm6 = vcmask 1048128   ;;  %2007 = vrot.lane.b32.xlu0 %v2006_v34, %s4659_s16  ;;  %v1379_v24 = vpop.permute.xlu1 %1378  }
 0x11d   :  { %v3570_v33 = vld [vmem:[#allocation0 + $0x550] sm:$0x1]  ;;  %1184 = vst.msk [vmem:[#allocation0 + $0x170] ss:$648 sm:$0x3] %vm7330_vm13, %v1181_v28   ;;  %vm1218_vm15 = vcmask 851504   ;;  %2118 = vrot.lane.b32.xlu1 %v2117_v38, %s4664_s13 }
 0x11e   :  { %4364 = vst [vmem:[%s7248_s1 + $0x8] sm:$0x1] %v2598_v31  ;;  %4445 = vst [vmem:[%s7248_s1 + $0x59] sm:$0x1] %v3084_v32  ;;  %v4268_v35 = vld [vmem:[%s7247_s0 + $0x75] sm:$0x1]  }
 0x11f   :  { %4526 = vst [vmem:[%s7248_s1 + $0xaa] sm:$0x1] %v3570_v33  ;;  %1187 = vst.msk [vmem:[#allocation0 + $0x170] ss:$648 sm:$0x3] %vm1185_vm7, %v1181_v28   ;;  %vm7331_vm5 = vcmask 572416   ;;  %v1360_v32 = vpop.permute.xlu0 %1359  }
 0x120   :  { %v4269_v37 = vld [vmem:[%s7247_s0 + $0xf4] sm:$0x2]   ;;  %v4289_v39 = vld [vmem:[%s7247_s0 + $0x52] sm:$0x1]   ;;  %1165 = vst.msk [vmem:[#allocation0 + $0x356] sm:$0x4] %vm1161_vm3, %v1160_v36  }
 0x121   :  { %1163 = vst.msk [vmem:[#allocation0 + $0x5e0] ss:$-1296 sm:$0x3] %vm1161_vm3, %v1160_v36   ;;  %v4290_v41 = vld [vmem:[%s7247_s0 + $0xd1] sm:$0x2]   ;;  %v2072_v47 = vsel %vm6_vm0, %v4269_v37, %v4268_v35  ;;  %vm1260_vm10 = vcmask 835104   ;;  %v1412_v36 = vpop.permute.xlu1 %1411  }
 0x122   :  { %v4303_v42 = vld [vmem:[%s7247_s0 + $0x110] sm:$0x1]   ;;  %v2712_v44 = vld [vmem:[#allocation0 + $0xd8] sm:$0x1]  ;;  %v3198_v45 = vld [vmem:[#allocation0 + $0x360] sm:$0x1]  ;;  %v2185_v51 = vsel %vm6_vm0, %v4290_v41, %v4289_v39  ;;  %2073 = vrot.lane.b32.xlu0 %v2072_v47, %s4661_s14 }
 0x123   :  { %v4304_v43 = vld [vmem:[%s7247_s0 + $0xf] sm:$0x2]   ;;  %1217 = vst.msk [vmem:[#allocation0 + $0x208] ss:$648 sm:$0x3] %vm7331_vm5, %v1214_v40   ;;  %vm1229_vm11 = vcmask 1048112   ;;  %2186 = vrot.lane.b32.xlu1 %v2185_v51, %s4666_s3 }
 0x124   :  { %v3684_v46 = vld [vmem:[#allocation0 + $0x5e8] sm:$0x1]  ;;  %4383 = vst [vmem:[%s7248_s1 + $0x1b] sm:$0x1] %v2712_v44  ;;  %4464 = vst [vmem:[%s7248_s1 + $0x6c] sm:$0x1] %v3198_v45  ;;  %v2263_v53 = vsel %vm6_vm0, %v4304_v43, %v4303_v42 }
 0x125   :  { %4545 = vst [vmem:[%s7248_s1 + $0xbd] sm:$0x1] %v3684_v46  ;;  %1220 = vst.msk [vmem:[#allocation0 + $0x208] ss:$648 sm:$0x3] %vm1218_vm15, %v1214_v40   ;;  %vm7332_vm14 = vcmask 556032   ;;  %v1393_v40 = vpop.permute.xlu0 %1392   ;;  %v1453_v43 = vpop.permute.xlu1 %1452  }
 0x126   :  { %v4283_v49 = vld [vmem:[%s7247_s0 + $0x33] sm:$0x1]   ;;  %1198 = vst.msk [vmem:[#allocation0 + $0x168] ss:$648 sm:$0x3] %vm1196_vm6, %v1195_v48   ;;  %vm7333_vm12 = vmmov %vm7332_vm14  ;;  %vm1277_vm4 = vcmask 1048096  }
 0x127   :  { %v4284_v50 = vld [vmem:[%s7247_s0 + $0xb2] sm:$0x2]   ;;  %v4305_v54 = vld [vmem:[%s7247_s0 + $0x8e] sm:$0x4]   ;;  %v2826_v55 = vld [vmem:[#allocation0 + $0x170] sm:$0x1] }
 0x128   :  { %v3312_v56 = vld [vmem:[#allocation0 + $0x3f8] sm:$0x1]  ;;  %1257 = vst.msk [vmem:[#allocation0 + $0x2a0] ss:$648 sm:$0x3] %vm7332_vm14, %v1254_v52   ;;  %v2152_v57 = vsel %vm6_vm0, %v4284_v50, %v4283_v49  ;;  %vm1311_vm2 = vcmask 818704   ;;  %v2267_v60 = vsel %vm10_vm1, %v4305_v54, %v2263_v53 }
 0x129   :  { %1259 = vst.msk [vmem:[#allocation0 + $0x16] sm:$0x4] %vm7333_vm12, %v1254_v52   ;;  %4402 = vst [vmem:[%s7248_s1 + $0x2e] sm:$0x1] %v2826_v55  ;;  %v4295_v58 = vld [vmem:[%s7247_s0 + $0x71] sm:$0x1]   ;;  %2153 = vrot.lane.b32.xlu0 %v2152_v57, %s4663_s2  ;;  %2268 = vrot.lane.b32.xlu1 %v2267_v60, %s4668_s30  ;;  %v1490_v53 = vpop.permute.xlu1 %1489  }
 0x12a   :  { %4483 = vst [vmem:[%s7248_s1 + $0x7f] sm:$0x1] %v3312_v56  ;;  %1262 = vst.msk [vmem:[#allocation0 + $0x2a0] ss:$648 sm:$0x3] %vm1260_vm10, %v1254_v52   ;;  %vm7334_vm9 = vcmask 539648  }
 0x12b   :  { %1264 = vst.msk [vmem:[#allocation0 + $0x16] sm:$0x4] %vm1260_vm10, %v1254_v52   ;;  %v4296_v59 = vld [vmem:[%s7247_s0 + $0xf0] sm:$0x2]   ;;  %v4312_v61 = vld [vmem:[%s7247_s0 + $0x27] sm:$0x1]   ;;  %vm7335_vm8 = vmmov %vm7334_vm9  ;;  %v1426_v52 = vpop.permute.xlu0 %1425  }
 0x12c   :  { %v4313_v62 = vld [vmem:[%s7247_s0 + $0xa6] sm:$0x2]   ;;  %1231 = vst.msk [vmem:[#allocation0 + $0x200] ss:$648 sm:$0x3] %vm1229_vm11, %v1228_v12   ;;  %v2218_v6 = vsel %vm6_vm0, %v4296_v59, %v4295_v58  ;;  %vm1350_vm7 = vcmask 802304  }
 0x12d   :  { %v4319_v0 = vld [vmem:[%s7247_s0 + $0x46] sm:$0x1]   ;;  %v4333_v2 = vld [vmem:[%s7247_s0 + $0x4] sm:$0x1]   ;;  %v2940_v3 = vld [vmem:[#allocation0 + $0x208] sm:$0x1]  ;;  %v2314_v8 = vsel %vm6_vm0, %v4313_v62, %v4312_v61  ;;  %2219 = vrot.lane.b32.xlu0 %v2218_v6, %s4665_s24  ;;  %v1523_v57 = vpop.permute.xlu1 %1522  }
 0x12e   :  { %v4320_v1 = vld [vmem:[%s7247_s0 + $0xc5] sm:$0x2]   ;;  %v3426_v4 = vld [vmem:[#allocation0 + $0x490] sm:$0x1]  ;;  %1310 = vst.msk [vmem:[#allocation0 + $0x336] sm:$0x4] %vm7335_vm8, %v1305_v63  }
 0x12f   :  { %1308 = vst.msk [vmem:[#allocation0 + $0x5c0] ss:$-1296 sm:$0x3] %vm7334_vm9, %v1305_v63   ;;  %v4334_v5 = vld [vmem:[%s7247_s0 + $0x83] sm:$0x2]   ;;  %v2351_v10 = vsel %vm6_vm0, %v4320_v1, %v4319_v0  ;;  %vm1328_vm3 = vcmask 1048080   ;;  %v1471_v56 = vpop.permute.xlu0 %1470  }
 0x130   :  { %4421 = vst [vmem:[%s7248_s1 + $0x41] sm:$0x1] %v2940_v3  ;;  %4502 = vst [vmem:[%s7248_s1 + $0x92] sm:$0x1] %v3426_v4  ;;  %v4314_v9 = vld [vmem:[%s7247_s0 + $0x125] sm:$0x4]   ;;  %v2429_v13 = vsel %vm6_vm0, %v4334_v5, %v4333_v2  ;;  %2352 = vrot.lane.b32.xlu1 %v2351_v10, %s4670_s29 }
 0x131   :  { %1313 = vst.msk [vmem:[#allocation0 + $0x5c0] ss:$-1296 sm:$0x3] %vm1311_vm2, %v1305_v63   ;;  %1315 = vst.msk [vmem:[#allocation0 + $0x336] sm:$0x4] %vm1311_vm2, %v1305_v63   ;;  %vm7336_vm13 = vcmask 523264   ;;  %v2318_v18 = vsel %vm10_vm1, %v4314_v9, %v2314_v8  ;;  %v1556_v0 = vpop.permute.xlu1 %1555  }
 0x132   :  { %1279 = vst.msk [vmem:[#allocation0 + $0x520] ss:$-1296 sm:$0x3] %vm1277_vm4, %v1276_v7   ;;  %1281 = vst.msk [vmem:[#allocation0 + $0x296] sm:$0x4] %vm1277_vm4, %v1276_v7   ;;  %vm1361_vm6 = vcmask 1048064   ;;  %2319 = vrot.lane.b32.xlu0 %v2318_v18, %s4667_s17 }
 0x133   :  { %v4335_v14 = vld [vmem:[%s7247_s0 + $0x102] sm:$0x4]   ;;  %v2568_v15 = vld [vmem:[#allocation0 + $0x18] sm:$0x1]  ;;  %v3054_v16 = vld [vmem:[#allocation0 + $0x2a0] sm:$0x1]  ;;  %v1504_v63 = vpop.permute.xlu0 %1503  }
 0x134   :  { %v3540_v17 = vld [vmem:[#allocation0 + $0x528] sm:$0x1]  ;;  %1349 = vst.msk [vmem:[#allocation0 + $0x148] ss:$648 sm:$0x3] %vm7336_vm13, %v1346_v11   ;;  %vm1383_vm15 = vcmask 785904   ;;  %v2433_v22 = vsel %vm10_vm1, %v4335_v14, %v2429_v13 }
 0x135   :  { %4359 = vst [vmem:[%s7248_s1 + $0x3] sm:$0x1] %v2568_v15  ;;  %4440 = vst [vmem:[%s7248_s1 + $0x54] sm:$0x1] %v3054_v16  ;;  %v4325_v19 = vld [vmem:[%s7247_s0 + $0xe5] sm:$0x1]   ;;  %2434 = vrot.lane.b32.xlu1 %v2433_v22, %s4672_s19  ;;  %v1597_v4 = vpop.permute.xlu1 %1596  }
 0x136   :  { %4521 = vst [vmem:[%s7248_s1 + $0xa5] sm:$0x1] %v3540_v17  ;;  %1352 = vst.msk [vmem:[#allocation0 + $0x148] ss:$648 sm:$0x3] %vm1350_vm7, %v1346_v11   ;;  %vm7337_vm5 = vcmask 506880  }
 0x137   :  { %v4326_v21 = vld [vmem:[%s7247_s0 + $0x64] sm:$0x2]   ;;  %v4342_v23 = vld [vmem:[%s7247_s0 + $0x23] sm:$0x1]   ;;  %v4349_v26 = vld [vmem:[%s7247_s0 + $0xc2] sm:$0x1]   ;;  %v1537_v3 = vpop.permute.xlu0 %1536  }
 0x138   :  { %1330 = vst.msk [vmem:[#allocation0 + $0xa8] ss:$648 sm:$0x7] %vm1328_vm3, %v1327_v20   ;;  %v4343_v25 = vld [vmem:[%s7247_s0 + $0xa2] sm:$0x2]   ;;  %v2384_v31 = vsel %vm6_vm0, %v4326_v21, %v4325_v19  ;;  %vm1416_vm10 = vcmask 769504  }
 0x139   :  { %v4350_v27 = vld [vmem:[%s7247_s0 + $0x41] sm:$0x2]   ;;  %v2682_v28 = vld [vmem:[#allocation0 + $0xb0] sm:$0x1]  ;;  %v3168_v29 = vld [vmem:[#allocation0 + $0x338] sm:$0x1]  ;;  %v2474_v33 = vsel %vm6_vm0, %v4343_v25, %v4342_v23  ;;  %2385 = vrot.lane.b32.xlu0 %v2384_v31, %s4669_s4  ;;  %v1636_v8 = vpop.permute.xlu1 %1635  }
 0x13a   :  { %v3654_v30 = vld [vmem:[#allocation0 + $0x5c0] sm:$0x1]  ;;  %1382 = vst.msk [vmem:[#allocation0 + $0x1e0] ss:$648 sm:$0x3] %vm7337_vm5, %v1379_v24   ;;  %v2511_v35 = vsel %vm6_vm0, %v4350_v27, %v4349_v26  ;;  %vm1394_vm11 = vcmask 1048048  }
 0x13b   :  { %4378 = vst [vmem:[%s7248_s1 + $0x16] sm:$0x1] %v2682_v28  ;;  %4459 = vst [vmem:[%s7248_s1 + $0x67] sm:$0x1] %v3168_v29  ;;  %v4344_v34 = vld [vmem:[%s7247_s0 + $0x121] sm:$0x4]   ;;  %2512 = vrot.lane.b32.xlu1 %v2511_v35, %s4674_s26  ;;  %v1570_v7 = vpop.permute.xlu0 %1569  }
 0x13c   :  { %4540 = vst [vmem:[%s7248_s1 + $0xb8] sm:$0x1] %v3654_v30  ;;  %1385 = vst.msk [vmem:[#allocation0 + $0x1e0] ss:$648 sm:$0x3] %vm1383_vm15, %v1379_v24   ;;  %vm7338_vm14 = vcmask 490496   ;;  %v2478_v39 = vsel %vm10_vm1, %v4344_v34, %v2474_v33 }
 0x13d   :  { %1363 = vst.msk [vmem:[#allocation0 + $0x140] ss:$648 sm:$0x3] %vm1361_vm6, %v1360_v32   ;;  %v2796_v37 = vld [vmem:[#allocation0 + $0x148] sm:$0x1]  ;;  %vm1457_vm12 = vcmask 753104   ;;  %2479 = vrot.lane.b32.xlu0 %v2478_v39, %s4671_s7  ;;  %v1669_v13 = vpop.permute.xlu1 %1668  }
 0x13e   :  { %v3282_v38 = vld [vmem:[#allocation0 + $0x3d0] sm:$0x1]  ;;  %1415 = vst.msk [vmem:[#allocation0 + $0x500] ss:$-648 sm:$0x3] %vm7338_vm14, %v1412_v36   ;;  %vm1427_vm4 = vcmask 1048032  }
 0x13f   :  { %4397 = vst [vmem:[%s7248_s1 + $0x29] sm:$0x1] %v2796_v37  ;;  %4478 = vst [vmem:[%s7248_s1 + $0x7a] sm:$0x1] %v3282_v38  ;;  %v4355_v41 = vld [vmem:[%s7247_s0 + $0x61] sm:$0x1]   ;;  %v1615_v11 = vpop.permute.xlu0 %1614  }
 0x140   :  { %1418 = vst.msk [vmem:[#allocation0 + $0x500] ss:$-648 sm:$0x3] %vm1416_vm10, %v1412_v36   ;;  %v4356_v42 = vld [vmem:[%s7247_s0 + $0xe0] sm:$0x2]   ;;  %vm7339_vm2 = vcmask 474112  }
 0x141   :  { %1396 = vst.msk [vmem:[#allocation0 + $0x460] ss:$-648 sm:$0x3] %vm1394_vm11, %v1393_v40   ;;  %v15_v44 = vld [vmem:[%s7247_s0] sm:$0x1]   ;;  %v2544_v50 = vsel %vm6_vm0, %v4356_v42, %v4355_v41  ;;  %vm7340_vm9 = vcmask 457728   ;;  %v1702_v18 = vpop.permute.xlu1 %1701  }
 0x142   :  { %v3901_v45 = vld [vmem:[%s7247_s0 + $0x7f] sm:$0x2]   ;;  %1456 = vst.msk [vmem:[#allocation0 + $0x88] ss:$648 sm:$0x7] %vm7339_vm2, %v1453_v43   ;;  %2545 = vrot.lane.b32.xlu0 %v2544_v50, %s4673_s5  ;;  %vm1527_vm8 = vcmask 720304  }
 0x143   :  { %v3902_v46 = vld [vmem:[%s7247_s0 + $0xfe] sm:$0x4]   ;;  %v2910_v47 = vld [vmem:[#allocation0 + $0x1e0] sm:$0x1]  ;;  %v3396_v48 = vld [vmem:[#allocation0 + $0x468] sm:$0x1]  ;;  %v19_v49 = vsel %vm6_vm0, %v3901_v45, %v15_v44  ;;  %v1650_v17 = vpop.permute.xlu0 %1649  }
 0x144   :  { %4416 = vst [vmem:[%s7248_s1 + $0x3c] sm:$0x1] %v2910_v47  ;;  %4497 = vst [vmem:[%s7248_s1 + $0x8d] sm:$0x1] %v3396_v48  ;;  %v23_v51 = vsel %vm10_vm1, %v3902_v46, %v19_v49  ;;  %vm1494_vm0 = vcmask 736704   ;;  %vm1472_vm1 = vcmask 1048016  }
 0x145   :  { %1459 = vst.msk [vmem:[#allocation0 + $0x88] ss:$648 sm:$0x7] %vm1457_vm12, %v1453_v43   ;;  %24 = vst [vmem:[#allocation0] ss:$648 sm:$0x7] %v23_v51   ;;  %v1743_v22 = vpop.permute.xlu1 %1742  }
 0x146   :  { %1429 = vst.msk [vmem:[#allocation0 + $0x270] ss:$648 sm:$0x3] %vm1427_vm4, %v1426_v52   ;;  %vm1505_vm7 = vcmask 1048000   ;;  %vm7341_vm3 = vcmask 441344   ;;  %vm1560_vm13 = vcmask 703904  }
 0x147   :  { %v3024_v54 = vld [vmem:[#allocation0 + $0x278] sm:$0x1]  ;;  %v3510_v55 = vld [vmem:[#allocation0 + $0x500] sm:$0x1]  ;;  %vm1538_vm6 = vcmask 1047984   ;;  %vm7342_vm15 = vcmask 424960   ;;  %v1683_v21 = vpop.permute.xlu0 %1682  }
 0x148   :  { %1493 = vst.msk [vmem:[#allocation0 + $0x120] ss:$648 sm:$0x3] %vm7340_vm9, %v1490_v53   ;;  %4435 = vst [vmem:[%s7248_s1 + $0x4f] sm:$0x1] %v3024_v54  ;;  %vm1601_vm5 = vcmask 687504  }
 0x149   :  { %4516 = vst [vmem:[%s7248_s1 + $0xa0] sm:$0x1] %v3510_v55  ;;  %1496 = vst.msk [vmem:[#allocation0 + $0x120] ss:$648 sm:$0x3] %vm1494_vm0, %v1490_v53   ;;  %vm1571_vm10 = vcmask 1047968   ;;  %v1794_v26 = vpop.permute.xlu1 %1793  }
 0x14a   :  { %1474 = vst.msk [vmem:[#allocation0 + $0x80] ss:$648 sm:$0x7] %vm1472_vm1, %v1471_v56   ;;  %vm7343_vm11 = vcmask 408576   ;;  %vm1640_vm14 = vcmask 671104   ;;  %vm1616_vm12 = vcmask 1047952  }
 0x14b   :  { %1526 = vst.msk [vmem:[#allocation0 + $0x440] ss:$-648 sm:$0x3] %vm7341_vm3, %v1523_v57   ;;  %vm7344_vm4 = vcmask 392192   ;;  %vm1673_vm2 = vcmask 654704   ;;  %vm1651_vm0 = vcmask 1047936   ;;  %v1716_v25 = vpop.permute.xlu0 %1715  }
 0x14c   :  { %v2652_v58 = vld [vmem:[#allocation0 + $0x88] sm:$0x1]  ;;  %v3138_v59 = vld [vmem:[#allocation0 + $0x310] sm:$0x1]  ;;  %v3624_v12 = vld [vmem:[#allocation0 + $0x598] sm:$0x1] }
 0x14d   :  { %4373 = vst [vmem:[%s7248_s1 + $0x11] sm:$0x1] %v2652_v58  ;;  %4454 = vst [vmem:[%s7248_s1 + $0x62] sm:$0x1] %v3138_v59  ;;  %v2553_v60 = vld [vmem:[#allocation0] sm:$0x1]  ;;  %v1835_v30 = vpop.permute.xlu1 %1834  }
 0x14e   :  { %4535 = vst [vmem:[%s7248_s1 + $0xb3] sm:$0x1] %v3624_v12  ;;  %1529 = vst.msk [vmem:[#allocation0 + $0x440] ss:$-648 sm:$0x3] %vm1527_vm8, %v1523_v57   ;;  %vm7345_vm1 = vcmask 375808  }
 0x14f   :  { %v3036_v61 = vld [vmem:[#allocation0 + $0x288] sm:$0x1]  ;;  %v3522_v62 = vld [vmem:[#allocation0 + $0x510] sm:$0x1]  ;;  %2555 = vst [vmem:[%s7248_s1] sm:$0x1] %v2553_v60  ;;  %vm1706_vm9 = vcmask 638304   ;;  %v1765_v29 = vpop.permute.xlu0 %1764  }
 0x150   :  { %4437 = vst [vmem:[%s7248_s1 + $0x51] sm:$0x1] %v3036_v61  ;;  %4518 = vst [vmem:[%s7248_s1 + $0xa2] sm:$0x1] %v3522_v62  ;;  %v2766_v1 = vld [vmem:[#allocation0 + $0x120] sm:$0x1] }
 0x151   :  { %1507 = vst.msk [vmem:[#allocation0 + $0x3a0] ss:$-648 sm:$0x3] %vm1505_vm7, %v1504_v63   ;;  %v3252_v2 = vld [vmem:[#allocation0 + $0x3a8] sm:$0x1]  ;;  %vm1684_vm8 = vcmask 1047920   ;;  %v1868_v35 = vpop.permute.xlu1 %1867  }
 0x152   :  { %1559 = vst.msk [vmem:[#allocation0 + $0x250] ss:$648 sm:$0x3] %vm7342_vm15, %v1556_v0   ;;  %4392 = vst [vmem:[%s7248_s1 + $0x24] sm:$0x1] %v2766_v1  ;;  %vm7346_vm7 = vcmask 359424  }
 0x153   :  { %4473 = vst [vmem:[%s7248_s1 + $0x75] sm:$0x1] %v3252_v2  ;;  %1562 = vst.msk [vmem:[#allocation0 + $0x250] ss:$648 sm:$0x3] %vm1560_vm13, %v1556_v0   ;;  %vm1749_vm3 = vcmask 621904   ;;  %v1816_v34 = vpop.permute.xlu0 %1815  }
 0x154   :  { %1540 = vst.msk [vmem:[#allocation0 + $0x1b0] ss:$648 sm:$0x3] %vm1538_vm6, %v1537_v3   ;;  %vm1717_vm13 = vcmask 1047904   ;;  %vm7347_vm6 = vcmask 343040  }
 0x155   :  { %v2880_v5 = vld [vmem:[#allocation0 + $0x1b8] sm:$0x1]  ;;  %v3366_v6 = vld [vmem:[#allocation0 + $0x440] sm:$0x1]  ;;  %1620 = vst.msk [vmem:[#allocation0 + $0x56] sm:$0x4] %vm1616_vm12, %v1615_v11   ;;  %vm7348_vm15 = vmmov %vm7347_vm6  ;;  %v1908_v40 = vpop.permute.xlu1 %1907  }
 0x156   :  { %1600 = vst.msk [vmem:[#allocation0 + $0x60] ss:$648 sm:$0x7] %vm7343_vm11, %v1597_v4   ;;  %4411 = vst [vmem:[%s7248_s1 + $0x37] sm:$0x1] %v2880_v5  ;;  %vm7349_vm11 = vcmask 326656  }
 0x157   :  { %4492 = vst [vmem:[%s7248_s1 + $0x88] sm:$0x1] %v3366_v6  ;;  %1603 = vst.msk [vmem:[#allocation0 + $0x60] ss:$648 sm:$0x7] %vm1601_vm5, %v1597_v4   ;;  %vm1800_vm5 = vcmask 605504   ;;  %v1849_v39 = vpop.permute.xlu0 %1848  }
 0x158   :  { %1573 = vst.msk [vmem:[#allocation0 + $0x248] ss:$648 sm:$0x3] %vm1571_vm10, %v1570_v7   ;;  %vm1766_vm10 = vcmask 1047888  }
 0x159   :  { %1639 = vst.msk [vmem:[#allocation0 + $0x380] ss:$-648 sm:$0x3] %vm7344_vm4, %v1636_v8   ;;  %vm1817_vm4 = vcmask 1047872   ;;  %v1994_v44 = vpop.permute.xlu1 %1993  }
 0x15a   :  { %v2994_v9 = vld [vmem:[#allocation0 + $0x250] sm:$0x1]  ;;  %v3480_v10 = vld [vmem:[#allocation0 + $0x4d8] sm:$0x1]  ;;  %1748 = vst.msk [vmem:[#allocation0 + $0x36] sm:$0x4] %vm7348_vm15, %v1743_v22  }
 0x15b   :  { %4430 = vst [vmem:[%s7248_s1 + $0x4a] sm:$0x1] %v2994_v9  ;;  %4511 = vst [vmem:[%s7248_s1 + $0x9b] sm:$0x1] %v3480_v10  ;;  %v1882_v43 = vpop.permute.xlu0 %1881   ;;  %vm7355_vm15 = vcmask 244736  }
 0x15c   :  { %1642 = vst.msk [vmem:[#allocation0 + $0x380] ss:$-648 sm:$0x3] %vm1640_vm14, %v1636_v8   ;;  %vm7350_vm14 = vmmov %vm7349_vm11 }
 0x15d   :  { %1618 = vst.msk [vmem:[#allocation0 + $0x2e0] ss:$648 sm:$0x3] %vm1616_vm12, %v1615_v11   ;;  %vm1839_vm12 = vcmask 589104   ;;  %v2060_v48 = vpop.permute.xlu1 %2059  }
 0x15e   :  { %v2622_v14 = vld [vmem:[#allocation0 + $0x60] sm:$0x1]  ;;  %v3108_v15 = vld [vmem:[#allocation0 + $0x2e8] sm:$0x1]  ;;  %v3594_v16 = vld [vmem:[#allocation0 + $0x570] sm:$0x1] }
 0x15f   :  { %1672 = vst.msk [vmem:[#allocation0 + $0x190] ss:$648 sm:$0x3] %vm7345_vm1, %v1669_v13   ;;  %4368 = vst [vmem:[%s7248_s1 + $0xc] sm:$0x1] %v2622_v14  ;;  %vm1850_vm1 = vcmask 1047856   ;;  %v1957_v47 = vpop.permute.xlu0 %1956  }
 0x160   :  { %4449 = vst [vmem:[%s7248_s1 + $0x5d] sm:$0x1] %v3108_v15  ;;  %4530 = vst [vmem:[%s7248_s1 + $0xae] sm:$0x1] %v3594_v16 }
 0x161   :  { %1675 = vst.msk [vmem:[#allocation0 + $0x190] ss:$648 sm:$0x3] %vm1673_vm2, %v1669_v13   ;;  %vm7351_vm2 = vcmask 310272   ;;  %v2140_v53 = vpop.permute.xlu1 %2139  }
 0x162   :  { %1653 = vst.msk [vmem:[#allocation0 + $0xf0] ss:$648 sm:$0x3] %vm1651_vm0, %v1650_v17   ;;  %vm1872_vm0 = vcmask 572704  }
 0x163   :  { %v2736_v19 = vld [vmem:[#allocation0 + $0xf8] sm:$0x1]  ;;  %v3222_v20 = vld [vmem:[#allocation0 + $0x380] sm:$0x1]  ;;  %1753 = vst.msk [vmem:[#allocation0 + $0x36] sm:$0x4] %vm1749_vm3, %v1743_v22   ;;  %v2027_v52 = vpop.permute.xlu0 %2026  }
 0x164   :  { %1705 = vst.msk [vmem:[#allocation0 + $0x228] ss:$648 sm:$0x3] %vm7346_vm7, %v1702_v18   ;;  %4387 = vst [vmem:[%s7248_s1 + $0x1f] sm:$0x1] %v2736_v19  ;;  %vm1883_vm7 = vcmask 1047840  }
 0x165   :  { %4468 = vst [vmem:[%s7248_s1 + $0x70] sm:$0x1] %v3222_v20  ;;  %1708 = vst.msk [vmem:[#allocation0 + $0x228] ss:$648 sm:$0x3] %vm1706_vm9, %v1702_v18   ;;  %vm7352_vm9 = vcmask 293888   ;;  %v2206_v12 = vpop.permute.xlu1 %2205  }
 0x166   :  { %1686 = vst.msk [vmem:[#allocation0 + $0x188] ss:$648 sm:$0x3] %vm1684_vm8, %v1683_v21   ;;  %vm1914_vm8 = vcmask 556304  }
 0x167   :  { %1746 = vst.msk [vmem:[#allocation0 + $0x2c0] ss:$648 sm:$0x3] %vm7347_vm6, %v1743_v22   ;;  %vm1998_vm6 = vcmask 523504   ;;  %v2101_v56 = vpop.permute.xlu0 %2100  }
 0x168   :  { %v2850_v23 = vld [vmem:[#allocation0 + $0x190] sm:$0x1]  ;;  %v3336_v24 = vld [vmem:[#allocation0 + $0x418] sm:$0x1]  ;;  %1799 = vst.msk [vmem:[#allocation0 + $0x356] sm:$0x4] %vm7350_vm14, %v1794_v26  }
 0x169   :  { %4406 = vst [vmem:[%s7248_s1 + $0x32] sm:$0x1] %v2850_v23  ;;  %4487 = vst [vmem:[%s7248_s1 + $0x83] sm:$0x1] %v3336_v24  ;;  %vm7357_vm14 = vcmask 211968  }
 0x16a   :  { %1751 = vst.msk [vmem:[#allocation0 + $0x2c0] ss:$648 sm:$0x3] %vm1749_vm3, %v1743_v22   ;;  %v2592_v31 = vld [vmem:[#allocation0 + $0x38] sm:$0x1]  ;;  %vm7353_vm3 = vcmask 277504  }
 0x16b   :  { %1719 = vst.msk [vmem:[#allocation0 + $0x220] ss:$648 sm:$0x3] %vm1717_vm13, %v1716_v25   ;;  %4363 = vst [vmem:[%s7248_s1 + $0x7] sm:$0x1] %v2592_v31  ;;  %v2173_v62 = vpop.permute.xlu0 %2172  }
 0x16c   :  { %v2964_v27 = vld [vmem:[#allocation0 + $0x228] sm:$0x1]  ;;  %v3450_v28 = vld [vmem:[#allocation0 + $0x4b0] sm:$0x1]  ;;  %1804 = vst.msk [vmem:[#allocation0 + $0x356] sm:$0x4] %vm1800_vm5, %v1794_v26   ;;  %vm7354_vm13 = vmmov %vm7353_vm3 }
 0x16d   :  { %1797 = vst.msk [vmem:[#allocation0 + $0x5e0] ss:$-1296 sm:$0x3] %vm7349_vm11, %v1794_v26   ;;  %4425 = vst [vmem:[%s7248_s1 + $0x45] sm:$0x1] %v2964_v27  ;;  %vm7356_vm11 = vcmask 261120  }
 0x16e   :  { %4506 = vst [vmem:[%s7248_s1 + $0x96] sm:$0x1] %v3450_v28  ;;  %1802 = vst.msk [vmem:[#allocation0 + $0x5e0] ss:$-1296 sm:$0x3] %vm1800_vm5, %v1794_v26   ;;  %vm1961_vm5 = vcmask 539904  }
 0x16f   :  { %1768 = vst.msk [vmem:[#allocation0 + $0x540] ss:$-1296 sm:$0x3] %vm1766_vm10, %v1765_v29   ;;  %1770 = vst.msk [vmem:[#allocation0 + $0x2b6] sm:$0x4] %vm1766_vm10, %v1765_v29   ;;  %vm2064_vm10 = vcmask 490704  }
 0x170   :  { %1838 = vst.msk [vmem:[#allocation0 + $0x168] ss:$648 sm:$0x3] %vm7351_vm2, %v1835_v30   ;;  %vm7358_vm2 = vcmask 228352  }
 0x171   :  { %v3078_v32 = vld [vmem:[#allocation0 + $0x2c0] sm:$0x1]  ;;  %v3564_v33 = vld [vmem:[#allocation0 + $0x548] sm:$0x1]  ;;  %1913 = vst.msk [vmem:[#allocation0 + $0x296] sm:$0x4] %vm7354_vm13, %v1908_v40   ;;  %v2247_v4 = vpop.permute.xlu0 %2246  }
 0x172   :  { %4444 = vst [vmem:[%s7248_s1 + $0x58] sm:$0x1] %v3078_v32  ;;  %4525 = vst [vmem:[%s7248_s1 + $0xa9] sm:$0x1] %v3564_v33  ;;  %vm2304_vm13 = vcmask 392304  }
 0x173   :  { %1841 = vst.msk [vmem:[#allocation0 + $0x168] ss:$648 sm:$0x3] %vm1839_vm12, %v1835_v30   ;;  %v3192_v37 = vld [vmem:[#allocation0 + $0x358] sm:$0x1]  ;;  %vm2031_vm12 = vcmask 507104   ;;  %v2298_v1 = vpop.permute.xlu1 %2297  }
 0x174   :  { %1819 = vst.msk [vmem:[#allocation0 + $0xc8] ss:$648 sm:$0x7] %vm1817_vm4, %v1816_v34   ;;  %4463 = vst [vmem:[%s7248_s1 + $0x6b] sm:$0x1] %v3192_v37  ;;  %vm2144_vm4 = vcmask 457904  }
 0x175   :  { %v2706_v36 = vld [vmem:[#allocation0 + $0xd0] sm:$0x1]  ;;  %v3678_v38 = vld [vmem:[#allocation0 + $0x5e0] sm:$0x1]  ;;  %1918 = vst.msk [vmem:[#allocation0 + $0x296] sm:$0x4] %vm1914_vm8, %v1908_v40  }
 0x176   :  { %1871 = vst.msk [vmem:[#allocation0 + $0x200] ss:$648 sm:$0x3] %vm7352_vm9, %v1868_v35   ;;  %4382 = vst [vmem:[%s7248_s1 + $0x1a] sm:$0x1] %v2706_v36  ;;  %vm2210_vm9 = vcmask 425104  }
 0x177   :  { %4544 = vst [vmem:[%s7248_s1 + $0xbc] sm:$0x1] %v3678_v38  ;;  %1874 = vst.msk [vmem:[#allocation0 + $0x200] ss:$648 sm:$0x3] %vm1872_vm0, %v1868_v35   ;;  %vm7359_vm0 = vcmask 179200  }
 0x178   :  { %1852 = vst.msk [vmem:[#allocation0 + $0x160] ss:$648 sm:$0x3] %vm1850_vm1, %v1849_v39   ;;  %vm2105_vm1 = vcmask 474304  }
 0x179   :  { %1911 = vst.msk [vmem:[#allocation0 + $0x520] ss:$-1296 sm:$0x3] %vm7353_vm3, %v1908_v40   ;;  %vm2177_vm3 = vcmask 441504   ;;  %v2372_v8 = vpop.permute.xlu1 %2371   ;;  %v2339_v11 = vpop.permute.xlu0 %2338  }
 0x17a   :  { %v2820_v41 = vld [vmem:[#allocation0 + $0x168] sm:$0x1]  ;;  %v3306_v42 = vld [vmem:[#allocation0 + $0x3f0] sm:$0x1] }
 0x17b   :  { %4401 = vst [vmem:[%s7248_s1 + $0x2d] sm:$0x1] %v2820_v41  ;;  %4482 = vst [vmem:[%s7248_s1 + $0x7e] sm:$0x1] %v3306_v42 }
 0x17c   :  { %1916 = vst.msk [vmem:[#allocation0 + $0x520] ss:$-1296 sm:$0x3] %vm1914_vm8, %v1908_v40   ;;  %v3048_v50 = vld [vmem:[#allocation0 + $0x298] sm:$0x1]  ;;  %vm7360_vm8 = vcmask 195584  }
 0x17d   :  { %1885 = vst.msk [vmem:[#allocation0 + $0x480] ss:$-648 sm:$0x3] %vm1883_vm7, %v1882_v43   ;;  %4439 = vst [vmem:[%s7248_s1 + $0x53] sm:$0x1] %v3048_v50  ;;  %vm7361_vm7 = vcmask 146432  }
 0x17e   :  { %v2934_v45 = vld [vmem:[#allocation0 + $0x200] sm:$0x1]  ;;  %v3420_v46 = vld [vmem:[#allocation0 + $0x488] sm:$0x1] }
 0x17f   :  { %1997 = vst.msk [vmem:[#allocation0 + $0x140] ss:$648 sm:$0x3] %vm7355_vm15, %v1994_v44   ;;  %4420 = vst [vmem:[%s7248_s1 + $0x40] sm:$0x1] %v2934_v45  ;;  %vm7363_vm15 = vcmask 113664   ;;  %v2462_v15 = vpop.permute.xlu1 %2461  }
 0x180   :  { %4501 = vst [vmem:[%s7248_s1 + $0x91] sm:$0x1] %v3420_v46  ;;  %2000 = vst.msk [vmem:[#allocation0 + $0x140] ss:$648 sm:$0x3] %vm1998_vm6, %v1994_v44   ;;  %vm7362_vm6 = vcmask 162816   ;;  %v2413_v19 = vpop.permute.xlu0 %2412  }
 0x181   :  { %1960 = vst.msk [vmem:[#allocation0 + $0xa8] ss:$648 sm:$0x7] %vm7356_vm11, %v1957_v47   ;;  %vm2376_vm11 = vcmask 359504  }
 0x182   :  { %1963 = vst.msk [vmem:[#allocation0 + $0xa8] ss:$648 sm:$0x7] %vm1961_vm5, %v1957_v47   ;;  %vm7364_vm5 = vmmov %vm7363_vm15 }
 0x183   :  { %v2562_v49 = vld [vmem:[#allocation0 + $0x10] sm:$0x1]  ;;  %v3534_v51 = vld [vmem:[#allocation0 + $0x520] sm:$0x1]  ;;  %2303 = vst.msk [vmem:[#allocation0 + $0x376] sm:$0x4] %vm7364_vm5, %v2298_v1   ;;  %v2532_v23 = vpop.permute.xlu1 %2531  }
 0x184   :  { %2063 = vst.msk [vmem:[#allocation0 + $0x270] ss:$648 sm:$0x3] %vm7357_vm14, %v2060_v48   ;;  %4358 = vst [vmem:[%s7248_s1 + $0x2] sm:$0x1] %v2562_v49  ;;  %vm7365_vm14 = vcmask 130048  }
 0x185   :  { %4520 = vst [vmem:[%s7248_s1 + $0xa4] sm:$0x1] %v3534_v51  ;;  %2066 = vst.msk [vmem:[#allocation0 + $0x270] ss:$648 sm:$0x3] %vm2064_vm10, %v2060_v48   ;;  %vm2253_vm10 = vcmask 408704  }
 0x186   :  { %2030 = vst.msk [vmem:[#allocation0 + $0x460] ss:$-648 sm:$0x3] %vm7358_vm2, %v2027_v52   ;;  %vm2343_vm2 = vcmask 375904   ;;  %vm1976_vm5 = vcmask 1047808   ;;  %v2499_v26 = vpop.permute.xlu0 %2498  }
 0x187   :  { %v2790_v54 = vld [vmem:[#allocation0 + $0x140] sm:$0x1]  ;;  %v3276_v55 = vld [vmem:[#allocation0 + $0x3c8] sm:$0x1]  ;;  %2308 = vst.msk [vmem:[#allocation0 + $0x376] sm:$0x4] %vm2304_vm13, %v2298_v1   ;;  %v1975_v29 = vpop.permute.xlu1 %1974  }
 0x188   :  { %2033 = vst.msk [vmem:[#allocation0 + $0x460] ss:$-648 sm:$0x3] %vm2031_vm12, %v2027_v52   ;;  %4396 = vst [vmem:[%s7248_s1 + $0x28] sm:$0x1] %v2790_v54 }
 0x189   :  { %2143 = vst.msk [vmem:[#allocation0 + $0x3a0] ss:$-648 sm:$0x3] %vm7359_vm0, %v2140_v53   ;;  %4477 = vst [vmem:[%s7248_s1 + $0x79] sm:$0x1] %v3276_v55  ;;  %vm2466_vm0 = vcmask 326704  }
 0x18a   :  { %2146 = vst.msk [vmem:[#allocation0 + $0x3a0] ss:$-648 sm:$0x3] %vm2144_vm4, %v2140_v53   ;;  %v2676_v57 = vld [vmem:[#allocation0 + $0xa8] sm:$0x1]  ;;  %vm7366_vm12 = vmmov %vm7365_vm14  ;;  %vm7367_vm4 = vcmask 80896   ;;  %v1930_v33 = vpop.permute.xlu0 %1929  }
 0x18b   :  { %v3162_v58 = vld [vmem:[#allocation0 + $0x330] sm:$0x1]  ;;  %v3648_v59 = vld [vmem:[#allocation0 + $0x5b8] sm:$0x1]  ;;  %4377 = vst [vmem:[%s7248_s1 + $0x15] sm:$0x1] %v2676_v57  ;;  %v2041_v37 = vpop.permute.xlu1 %2040  }
 0x18c   :  { %2104 = vst.msk [vmem:[#allocation0 + $0x80] ss:$648 sm:$0x7] %vm7360_vm8, %v2101_v56   ;;  %4458 = vst [vmem:[%s7248_s1 + $0x66] sm:$0x1] %v3162_v58  ;;  %vm2419_vm8 = vcmask 343104  }
 0x18d   :  { %4539 = vst [vmem:[%s7248_s1 + $0xb7] sm:$0x1] %v3648_v59  ;;  %v3018_v60 = vld [vmem:[#allocation0 + $0x270] sm:$0x1]  ;;  %v3504_v61 = vld [vmem:[#allocation0 + $0x4f8] sm:$0x1] }
 0x18e   :  { %2107 = vst.msk [vmem:[#allocation0 + $0x80] ss:$648 sm:$0x7] %vm2105_vm1, %v2101_v56   ;;  %4434 = vst [vmem:[%s7248_s1 + $0x4e] sm:$0x1] %v3018_v60  ;;  %vm7368_vm1 = vcmask 97280   ;;  %v2008_v40 = vpop.permute.xlu0 %2007  }
 0x18f   :  { %2209 = vst.msk [vmem:[#allocation0 + $0x248] ss:$648 sm:$0x3] %vm7361_vm7, %v2206_v12   ;;  %4515 = vst [vmem:[%s7248_s1 + $0x9f] sm:$0x1] %v3504_v61  ;;  %vm2536_vm7 = vcmask 293904   ;;  %v2119_v44 = vpop.permute.xlu1 %2118  }
 0x190   :  { %2212 = vst.msk [vmem:[#allocation0 + $0x248] ss:$648 sm:$0x3] %vm2210_vm9, %v2206_v12   ;;  %v2904_v63 = vld [vmem:[#allocation0 + $0x1d8] sm:$0x1]  ;;  %vm7369_vm9 = vcmask 48128  }
 0x191   :  { %v3390_v0 = vld [vmem:[#allocation0 + $0x460] sm:$0x1]  ;;  %2176 = vst.msk [vmem:[#allocation0 + $0x1b0] ss:$648 sm:$0x3] %vm7362_vm6, %v2173_v62   ;;  %vm7372_vm6 = vcmask 15360  }
 0x192   :  { %4415 = vst [vmem:[%s7248_s1 + $0x3b] sm:$0x1] %v2904_v63  ;;  %4496 = vst [vmem:[%s7248_s1 + $0x8c] sm:$0x1] %v3390_v0  ;;  %v2760_v2 = vld [vmem:[#allocation0 + $0x118] sm:$0x1] }
 0x193   :  { %v3246_v3 = vld [vmem:[#allocation0 + $0x3a0] sm:$0x1]  ;;  %2179 = vst.msk [vmem:[#allocation0 + $0x1b0] ss:$648 sm:$0x3] %vm2177_vm3, %v2173_v62   ;;  %vm7370_vm3 = vcmask 64512  }
 0x194   :  { %2301 = vst.msk [vmem:[#allocation0 + $0x600] ss:$-1296 sm:$0x3] %vm7363_vm15, %v2298_v1   ;;  %4391 = vst [vmem:[%s7248_s1 + $0x23] sm:$0x1] %v2760_v2  ;;  %vm2503_vm15 = vcmask 310304   ;;  %v2074_v50 = vpop.permute.xlu0 %2073  }
 0x195   :  { %4472 = vst [vmem:[%s7248_s1 + $0x74] sm:$0x1] %v3246_v3  ;;  %2306 = vst.msk [vmem:[#allocation0 + $0x600] ss:$-1296 sm:$0x3] %vm2304_vm13, %v2298_v1   ;;  %v2187_v53 = vpop.permute.xlu1 %2186  }
 0x196   :  { %v2646_v5 = vld [vmem:[#allocation0 + $0x80] sm:$0x1]  ;;  %v3132_v6 = vld [vmem:[#allocation0 + $0x308] sm:$0x1]  ;;  %v3618_v7 = vld [vmem:[#allocation0 + $0x590] sm:$0x1] }
 0x197   :  { %2250 = vst.msk [vmem:[#allocation0 + $0x2e0] ss:$648 sm:$0x3] %vm7365_vm14, %v2247_v4   ;;  %4372 = vst [vmem:[%s7248_s1 + $0x10] sm:$0x1] %v2646_v5  ;;  %vm2042_vm14 = vcmask 1047776  }
 0x198   :  { %2252 = vst.msk [vmem:[#allocation0 + $0x56] sm:$0x4] %vm7366_vm12, %v2247_v4   ;;  %4453 = vst [vmem:[%s7248_s1 + $0x61] sm:$0x1] %v3132_v6  ;;  %v2988_v9 = vld [vmem:[#allocation0 + $0x248] sm:$0x1] }
 0x199   :  { %4534 = vst [vmem:[%s7248_s1 + $0xb2] sm:$0x1] %v3618_v7  ;;  %v3474_v10 = vld [vmem:[#allocation0 + $0x4d0] sm:$0x1]  ;;  %2257 = vst.msk [vmem:[#allocation0 + $0x56] sm:$0x4] %vm2253_vm10, %v2247_v4  }
 0x19a   :  { %2255 = vst.msk [vmem:[#allocation0 + $0x2e0] ss:$648 sm:$0x3] %vm2253_vm10, %v2247_v4   ;;  %4429 = vst [vmem:[%s7248_s1 + $0x49] sm:$0x1] %v2988_v9  ;;  %vm7373_vm10 = vcmask 31744  }
 0x19b   :  { %2375 = vst.msk [vmem:[#allocation0 + $0x220] ss:$648 sm:$0x3] %vm7367_vm4, %v2372_v8   ;;  %4510 = vst [vmem:[%s7248_s1 + $0x9a] sm:$0x1] %v3474_v10  ;;  %vm2009_vm12 = vcmask 1047792   ;;  %v2154_v56 = vpop.permute.xlu0 %2153   ;;  %v2269_v12 = vpop.permute.xlu1 %2268  }
 0x19c   :  { %2378 = vst.msk [vmem:[#allocation0 + $0x220] ss:$648 sm:$0x3] %vm2376_vm11, %v2372_v8   ;;  %v2874_v13 = vld [vmem:[#allocation0 + $0x1b0] sm:$0x1]  ;;  %vm7371_vm13 = vmmov %vm7370_vm3  ;;  %vm1931_vm11 = vcmask 1047824  }
 0x19d   :  { %v3360_v14 = vld [vmem:[#allocation0 + $0x438] sm:$0x1]  ;;  %2342 = vst.msk [vmem:[#allocation0 + $0x188] ss:$648 sm:$0x3] %vm7368_vm1, %v2339_v11   ;;  %vm2120_vm4 = vcmask 1047744  }
 0x19e   :  { %4410 = vst [vmem:[%s7248_s1 + $0x36] sm:$0x1] %v2874_v13  ;;  %4491 = vst [vmem:[%s7248_s1 + $0x87] sm:$0x1] %v3360_v14  ;;  %v2730_v16 = vld [vmem:[#allocation0 + $0xf0] sm:$0x1] }
 0x19f   :  { %2345 = vst.msk [vmem:[#allocation0 + $0x188] ss:$648 sm:$0x3] %vm2343_vm2, %v2339_v11   ;;  %v3216_v17 = vld [vmem:[#allocation0 + $0x378] sm:$0x1]  ;;  %vm2075_vm2 = vcmask 1047760   ;;  %v2220_v62 = vpop.permute.xlu0 %2219  }
 0x1a0   :  { %v3702_v18 = vld [vmem:[#allocation0 + $0x600] sm:$0x1]  ;;  %2465 = vst.msk [vmem:[#allocation0 + $0xc8] ss:$648 sm:$0x7] %vm7369_vm9, %v2462_v15   ;;  %vm2155_vm1 = vcmask 1047728  }
 0x1a1   :  { %4386 = vst [vmem:[%s7248_s1 + $0x1e] sm:$0x1] %v2730_v16  ;;  %4467 = vst [vmem:[%s7248_s1 + $0x6f] sm:$0x1] %v3216_v17  ;;  %v2616_v20 = vld [vmem:[#allocation0 + $0x58] sm:$0x1] }
 0x1a2   :  { %4548 = vst [vmem:[%s7248_s1 + $0xc0] sm:$0x1] %v3702_v18  ;;  %2468 = vst.msk [vmem:[#allocation0 + $0xc8] ss:$648 sm:$0x7] %vm2466_vm0, %v2462_v15   ;;  %vm2188_vm0 = vcmask 1047712   ;;  %v2353_v1 = vpop.permute.xlu1 %2352  }
 0x1a3   :  { %v3102_v21 = vld [vmem:[#allocation0 + $0x2e0] sm:$0x1]  ;;  %v3588_v22 = vld [vmem:[#allocation0 + $0x568] sm:$0x1]  ;;  %2418 = vst.msk [vmem:[#allocation0 + $0x2b6] sm:$0x4] %vm7371_vm13, %v2413_v19  }
 0x1a4   :  { %2416 = vst.msk [vmem:[#allocation0 + $0x540] ss:$-1296 sm:$0x3] %vm7370_vm3, %v2413_v19   ;;  %4367 = vst [vmem:[%s7248_s1 + $0xb] sm:$0x1] %v2616_v20  ;;  %vm2270_vm9 = vcmask 1047680   ;;  %v2320_v4 = vpop.permute.xlu0 %2319  }
 0x1a5   :  { %4448 = vst [vmem:[%s7248_s1 + $0x5c] sm:$0x1] %v3102_v21  ;;  %4529 = vst [vmem:[%s7248_s1 + $0xad] sm:$0x1] %v3588_v22  ;;  %v2958_v24 = vld [vmem:[#allocation0 + $0x220] sm:$0x1] }
 0x1a6   :  { %v3444_v25 = vld [vmem:[#allocation0 + $0x4a8] sm:$0x1]  ;;  %2421 = vst.msk [vmem:[#allocation0 + $0x540] ss:$-1296 sm:$0x3] %vm2419_vm8, %v2413_v19   ;;  %vm2321_vm3 = vcmask 1047664  }
 0x1a7   :  { %2423 = vst.msk [vmem:[#allocation0 + $0x2b6] sm:$0x4] %vm2419_vm8, %v2413_v19   ;;  %4424 = vst [vmem:[%s7248_s1 + $0x44] sm:$0x1] %v2958_v24  ;;  %v2844_v27 = vld [vmem:[#allocation0 + $0x188] sm:$0x1]  ;;  %v2435_v8 = vpop.permute.xlu1 %2434  }
 0x1a8   :  { %2535 = vst.msk [vmem:[#allocation0 + $0x480] ss:$-648 sm:$0x3] %vm7372_vm6, %v2532_v23   ;;  %4505 = vst [vmem:[%s7248_s1 + $0x95] sm:$0x1] %v3444_v25  ;;  %vm2221_vm8 = vcmask 1047696  }
 0x1a9   :  { %2538 = vst.msk [vmem:[#allocation0 + $0x480] ss:$-648 sm:$0x3] %vm2536_vm7, %v2532_v23   ;;  %v3330_v28 = vld [vmem:[#allocation0 + $0x410] sm:$0x1]  ;;  %vm2354_vm7 = vcmask 1047648  }
 0x1aa   :  { %2502 = vst.msk [vmem:[#allocation0 + $0x160] ss:$648 sm:$0x3] %vm7373_vm10, %v2499_v26   ;;  %4405 = vst [vmem:[%s7248_s1 + $0x31] sm:$0x1] %v2844_v27  ;;  %vm2436_vm13 = vcmask 1047616  }
 0x1ab   :  { %4486 = vst [vmem:[%s7248_s1 + $0x82] sm:$0x1] %v3330_v28  ;;  %v2700_v30 = vld [vmem:[#allocation0 + $0xc8] sm:$0x1]  ;;  %v3186_v31 = vld [vmem:[#allocation0 + $0x350] sm:$0x1]  ;;  %v2386_v11 = vpop.permute.xlu0 %2385  }
 0x1ac   :  { %v3672_v32 = vld [vmem:[#allocation0 + $0x5d8] sm:$0x1]  ;;  %2505 = vst.msk [vmem:[#allocation0 + $0x160] ss:$648 sm:$0x3] %vm2503_vm15, %v2499_v26   ;;  %vm2387_vm6 = vcmask 1047632  }
 0x1ad   :  { %1978 = vst.msk [vmem:[#allocation0 + $0xa0] ss:$648 sm:$0x7] %vm1976_vm5, %v1975_v29   ;;  %4381 = vst [vmem:[%s7248_s1 + $0x19] sm:$0x1] %v2700_v30  ;;  %vm2514_vm15 = vcmask 1047584   ;;  %v2513_v15 = vpop.permute.xlu1 %2512  }
 0x1ae   :  { %4462 = vst [vmem:[%s7248_s1 + $0x6a] sm:$0x1] %v3186_v31  ;;  %4543 = vst [vmem:[%s7248_s1 + $0xbb] sm:$0x1] %v3672_v32  ;;  %v2586_v34 = vld [vmem:[#allocation0 + $0x30] sm:$0x1] }
 0x1af   :  { %v3072_v35 = vld [vmem:[#allocation0 + $0x2b8] sm:$0x1]  ;;  %v3558_v36 = vld [vmem:[#allocation0 + $0x540] sm:$0x1]  ;;  %4362 = vst [vmem:[%s7248_s1 + $0x6] sm:$0x1] %v2586_v34  ;;  %v2480_v19 = vpop.permute.xlu0 %2479  }
 0x1b0   :  { %1933 = vst.msk [vmem:[#allocation0 + $0x8] ss:$648 sm:$0x7] %vm1931_vm11, %v1930_v33   ;;  %4443 = vst [vmem:[%s7248_s1 + $0x57] sm:$0x1] %v3072_v35  ;;  %vm2481_vm5 = vcmask 1047600  }
 0x1b1   :  { %4524 = vst [vmem:[%s7248_s1 + $0xa8] sm:$0x1] %v3558_v36  ;;  %v2928_v38 = vld [vmem:[#allocation0 + $0x1f8] sm:$0x1]  ;;  %v3414_v39 = vld [vmem:[#allocation0 + $0x480] sm:$0x1] }
 0x1b2   :  { %2044 = vst.msk [vmem:[#allocation0 + $0x1d0] ss:$648 sm:$0x3] %vm2042_vm14, %v2041_v37   ;;  %4419 = vst [vmem:[%s7248_s1 + $0x3f] sm:$0x1] %v2928_v38  ;;  %vm2547_vm10 = vcmask 1047568  }
 0x1b3   :  { %4500 = vst [vmem:[%s7248_s1 + $0x90] sm:$0x1] %v3414_v39  ;;  %v2814_v41 = vld [vmem:[#allocation0 + $0x160] sm:$0x1]  ;;  %v3300_v42 = vld [vmem:[#allocation0 + $0x3e8] sm:$0x1] }
 0x1b4   :  { %v2670_v43 = vld [vmem:[#allocation0 + $0xa0] sm:$0x1]  ;;  %2011 = vst.msk [vmem:[#allocation0 + $0x3c0] ss:$-648 sm:$0x3] %vm2009_vm12, %v2008_v40   ;;  %v2546_v25 = vpop.permute.xlu0 %2545  }
 0x1b5   :  { %4400 = vst [vmem:[%s7248_s1 + $0x2c] sm:$0x1] %v2814_v41  ;;  %4481 = vst [vmem:[%s7248_s1 + $0x7d] sm:$0x1] %v3300_v42  ;;  %v3156_v45 = vld [vmem:[#allocation0 + $0x328] sm:$0x1] }
 0x1b6   :  { %4376 = vst [vmem:[%s7248_s1 + $0x14] sm:$0x1] %v2670_v43  ;;  %v3642_v46 = vld [vmem:[#allocation0 + $0x5b0] sm:$0x1]  ;;  %2124 = vst.msk [vmem:[#allocation0 + $0x76] sm:$0x4] %vm2120_vm4, %v2119_v44  }
 0x1b7   :  { %2122 = vst.msk [vmem:[#allocation0 + $0x300] ss:$648 sm:$0x3] %vm2120_vm4, %v2119_v44   ;;  %4457 = vst [vmem:[%s7248_s1 + $0x65] sm:$0x1] %v3156_v45 }
 0x1b8   :  { %4538 = vst [vmem:[%s7248_s1 + $0xb6] sm:$0x1] %v3642_v46  ;;  %v2557_v47 = vld [vmem:[#allocation0 + $0x8] sm:$0x1]  ;;  %v3042_v48 = vld [vmem:[#allocation0 + $0x290] sm:$0x1] }
 0x1b9   :  { %v3528_v49 = vld [vmem:[#allocation0 + $0x518] sm:$0x1]  ;;  %4357 = vst [vmem:[%s7248_s1 + $0x1] sm:$0x1] %v2557_v47  ;;  %4438 = vst [vmem:[%s7248_s1 + $0x52] sm:$0x1] %v3042_v48 }
 0x1ba   :  { %4519 = vst [vmem:[%s7248_s1 + $0xa3] sm:$0x1] %v3528_v49  ;;  %v2898_v51 = vld [vmem:[#allocation0 + $0x1d0] sm:$0x1]  ;;  %v3384_v52 = vld [vmem:[#allocation0 + $0x458] sm:$0x1] }
 0x1bb   :  { %2077 = vst.msk [vmem:[#allocation0 + $0x268] ss:$648 sm:$0x3] %vm2075_vm2, %v2074_v50   ;;  %4414 = vst [vmem:[%s7248_s1 + $0x3a] sm:$0x1] %v2898_v51 }
 0x1bc   :  { %4495 = vst [vmem:[%s7248_s1 + $0x8b] sm:$0x1] %v3384_v52  ;;  %2190 = vst.msk [vmem:[#allocation0 + $0x1a8] ss:$648 sm:$0x3] %vm2188_vm0, %v2187_v53  }
 0x1bd   :  { %v2784_v54 = vld [vmem:[#allocation0 + $0x138] sm:$0x1]  ;;  %v3270_v55 = vld [vmem:[#allocation0 + $0x3c0] sm:$0x1]  ;;  %2274 = vst.msk [vmem:[#allocation0 + $0x2d6] sm:$0x4] %vm2270_vm9, %v2269_v12  }
 0x1be   :  { %4395 = vst [vmem:[%s7248_s1 + $0x27] sm:$0x1] %v2784_v54  ;;  %4476 = vst [vmem:[%s7248_s1 + $0x78] sm:$0x1] %v3270_v55  ;;  %v2640_v57 = vld [vmem:[#allocation0 + $0x78] sm:$0x1] }
 0x1bf   :  { %v3126_v58 = vld [vmem:[#allocation0 + $0x300] sm:$0x1]  ;;  %v3612_v59 = vld [vmem:[#allocation0 + $0x588] sm:$0x1]  ;;  %4371 = vst [vmem:[%s7248_s1 + $0xf] sm:$0x1] %v2640_v57 }
 0x1c0   :  { %2157 = vst.msk [vmem:[#allocation0 + $0x110] ss:$648 sm:$0x3] %vm2155_vm1, %v2154_v56   ;;  %4452 = vst [vmem:[%s7248_s1 + $0x60] sm:$0x1] %v3126_v58 }
 0x1c1   :  { %4533 = vst [vmem:[%s7248_s1 + $0xb1] sm:$0x1] %v3612_v59  ;;  %2272 = vst.msk [vmem:[#allocation0 + $0x560] ss:$-1296 sm:$0x3] %vm2270_vm9, %v2269_v12  }
 0x1c2   :  { %v3012_v60 = vld [vmem:[#allocation0 + $0x268] sm:$0x1]  ;;  %v3498_v61 = vld [vmem:[#allocation0 + $0x4f0] sm:$0x1] }
 0x1c3   :  { %4433 = vst [vmem:[%s7248_s1 + $0x4d] sm:$0x1] %v3012_v60  ;;  %4514 = vst [vmem:[%s7248_s1 + $0x9e] sm:$0x1] %v3498_v61  ;;  %v2868_v63 = vld [vmem:[#allocation0 + $0x1a8] sm:$0x1] }
 0x1c4   :  { %v3354_v0 = vld [vmem:[#allocation0 + $0x430] sm:$0x1]  ;;  %2223 = vst.msk [vmem:[#allocation0 + $0x240] ss:$648 sm:$0x3] %vm2221_vm8, %v2220_v62  }
 0x1c5   :  { %4409 = vst [vmem:[%s7248_s1 + $0x35] sm:$0x1] %v2868_v63  ;;  %4490 = vst [vmem:[%s7248_s1 + $0x86] sm:$0x1] %v3354_v0  ;;  %v3096_v6 = vld [vmem:[#allocation0 + $0x2d8] sm:$0x1] }
 0x1c6   :  { %2356 = vst.msk [vmem:[#allocation0 + $0x180] ss:$648 sm:$0x3] %vm2354_vm7, %v2353_v1   ;;  %4447 = vst [vmem:[%s7248_s1 + $0x5b] sm:$0x1] %v3096_v6 }
 0x1c7   :  { %v2754_v2 = vld [vmem:[#allocation0 + $0x110] sm:$0x1]  ;;  %v3240_v3 = vld [vmem:[#allocation0 + $0x398] sm:$0x1] }
 0x1c8   :  { %4390 = vst [vmem:[%s7248_s1 + $0x22] sm:$0x1] %v2754_v2  ;;  %4471 = vst [vmem:[%s7248_s1 + $0x73] sm:$0x1] %v3240_v3  ;;  %v2610_v5 = vld [vmem:[#allocation0 + $0x50] sm:$0x1] }
 0x1c9   :  { %v3582_v7 = vld [vmem:[#allocation0 + $0x560] sm:$0x1]  ;;  %2323 = vst.msk [vmem:[#allocation0 + $0xe8] ss:$648 sm:$0x7] %vm2321_vm3, %v2320_v4  }
 0x1ca   :  { %4366 = vst [vmem:[%s7248_s1 + $0xa] sm:$0x1] %v2610_v5  ;;  %4528 = vst [vmem:[%s7248_s1 + $0xac] sm:$0x1] %v3582_v7 }
 0x1cb   :  { %2438 = vst.msk [vmem:[#allocation0 + $0x28] ss:$648 sm:$0x7] %vm2436_vm13, %v2435_v8   ;;  %v2982_v9 = vld [vmem:[#allocation0 + $0x240] sm:$0x1] }
 0x1cc   :  { %v3468_v10 = vld [vmem:[#allocation0 + $0x4c8] sm:$0x1]  ;;  %4428 = vst [vmem:[%s7248_s1 + $0x48] sm:$0x1] %v2982_v9 }
 0x1cd   :  { %4509 = vst [vmem:[%s7248_s1 + $0x99] sm:$0x1] %v3468_v10  ;;  %v2838_v13 = vld [vmem:[#allocation0 + $0x180] sm:$0x1]  ;;  %v3324_v14 = vld [vmem:[#allocation0 + $0x408] sm:$0x1] }
 0x1ce   :  { %2389 = vst.msk [vmem:[#allocation0 + $0x4a0] ss:$-648 sm:$0x3] %vm2387_vm6, %v2386_v11   ;;  %4404 = vst [vmem:[%s7248_s1 + $0x30] sm:$0x1] %v2838_v13 }
 0x1cf   :  { %4485 = vst [vmem:[%s7248_s1 + $0x81] sm:$0x1] %v3324_v14  ;;  %2516 = vst.msk [vmem:[#allocation0 + $0x3e0] ss:$-648 sm:$0x3] %vm2514_vm15, %v2513_v15  }
 0x1d0   :  { %v2724_v16 = vld [vmem:[#allocation0 + $0xe8] sm:$0x1]  ;;  %v3210_v17 = vld [vmem:[#allocation0 + $0x370] sm:$0x1]  ;;  %v3696_v18 = vld [vmem:[#allocation0 + $0x5f8] sm:$0x1] }
 0x1d1   :  { %4385 = vst [vmem:[%s7248_s1 + $0x1d] sm:$0x1] %v2724_v16  ;;  %4466 = vst [vmem:[%s7248_s1 + $0x6e] sm:$0x1] %v3210_v17 }
 0x1d2   :  { %4547 = vst [vmem:[%s7248_s1 + $0xbf] sm:$0x1] %v3696_v18  ;;  %v2580_v20 = vld [vmem:[#allocation0 + $0x28] sm:$0x1]  ;;  %v3066_v21 = vld [vmem:[#allocation0 + $0x2b0] sm:$0x1] }
 0x1d3   :  { %v3552_v22 = vld [vmem:[#allocation0 + $0x538] sm:$0x1]  ;;  %2483 = vst.msk [vmem:[#allocation0 + $0xc0] ss:$648 sm:$0x7] %vm2481_vm5, %v2480_v19  }
 0x1d4   :  { %4361 = vst [vmem:[%s7248_s1 + $0x5] sm:$0x1] %v2580_v20  ;;  %4442 = vst [vmem:[%s7248_s1 + $0x56] sm:$0x1] %v3066_v21 }
 0x1d5   :  { %4523 = vst [vmem:[%s7248_s1 + $0xa7] sm:$0x1] %v3552_v22  ;;  %v2952_v23 = vld [vmem:[#allocation0 + $0x218] sm:$0x1]  ;;  %v3438_v24 = vld [vmem:[#allocation0 + $0x4a0] sm:$0x1] }
 0x1d6   :  { %4423 = vst [vmem:[%s7248_s1 + $0x43] sm:$0x1] %v2952_v23  ;;  %4504 = vst [vmem:[%s7248_s1 + $0x94] sm:$0x1] %v3438_v24  ;;  %v2808_v26 = vld [vmem:[#allocation0 + $0x158] sm:$0x1] }
 0x1d7   :  { %v3294_v27 = vld [vmem:[#allocation0 + $0x3e0] sm:$0x1]  ;;  %2549 = vst.msk [vmem:[#allocation0 + $0x1f0] ss:$648 sm:$0x3] %vm2547_vm10, %v2546_v25  }
 0x1d8   :  { %4399 = vst [vmem:[%s7248_s1 + $0x2b] sm:$0x1] %v2808_v26  ;;  %4480 = vst [vmem:[%s7248_s1 + $0x7c] sm:$0x1] %v3294_v27 }
 0x1da   :  { %v2694_v28 = vld [vmem:[#allocation0 + $0xc0] sm:$0x1]  ;;  %v3180_v29 = vld [vmem:[#allocation0 + $0x348] sm:$0x1]  ;;  %v3666_v30 = vld [vmem:[#allocation0 + $0x5d0] sm:$0x1] }
 0x1db   :  { %4380 = vst [vmem:[%s7248_s1 + $0x18] sm:$0x1] %v2694_v28  ;;  %4461 = vst [vmem:[%s7248_s1 + $0x69] sm:$0x1] %v3180_v29 }
 0x1dc   :  { %4542 = vst [vmem:[%s7248_s1 + $0xba] sm:$0x1] %v3666_v30 }
 0x1de   :  { %v2922_v31 = vld [vmem:[#allocation0 + $0x1f0] sm:$0x1]  ;;  %v3408_v32 = vld [vmem:[#allocation0 + $0x478] sm:$0x1] }
 0x1df   :  { %4418 = vst [vmem:[%s7248_s1 + $0x3e] sm:$0x1] %v2922_v31  ;;  %4499 = vst [vmem:[%s7248_s1 + $0x8f] sm:$0x1] %v3408_v32 }

// kernel: model_forward.5
= control target key start
LH: loop header
LB: loop body
LE: loop exit
PB: predicated region body
PF: predicated region fallthrough
CT: control target
= control target key end

     0   :  { %s8132_s9 = smov 0   ;;  %s8134_s10 = smov 0   ;;  %s9213_s0 = inlined_call_operand.vmem [shape: bf16[8,30720], index: 0, kind: input, shape index: {}]   ;;  %s9214_s1 = inlined_call_operand.vmem [shape: bf16[1,30720,512], index: 1, kind: input, shape index: {}]   ;;  %s9215_s2 = inlined_call_operand.vmem [shape: f32[8,512], index: 2, kind: output, shape index: {}]  }
   0x1   :  { %s8136_s11 = smov 0  }
   0x2 LB: > { %s24_s12 = sadd.s32 1, %s8110_s10  ;;  %p6080_p0 = scmp.ge.s32.totalorder %s8114_s11, 1  ;;  %s8114_s11 = sphi %s8136_s11, %s12_s11   ;;  %s8110_s10 = sphi %s8134_s10, %s9217_s10   ;;  %s8106_s9 = sphi %s8132_s9, %s9216_s9  }
   0x3   : > { %p25_p1 = scmp.ge.s32.totalorder %s24_s12, 10  ;;  %p158_p2 = scmp.lt.s32.totalorder %s8114_s11, 11 }
   0x5   : > { %s9219_s12 = smov (%p25_p1, %s24_s12), 0  ;;  %p159_p3 = pnand %p6080_p0, %p158_p2 }
   0x6   : > { %s198_s13 = smul.u32 (!%p159_p3), 24, %s8106_s9  ;;  %p6084_p6 = scmp.ne.s32.totalorder (!%p159_p3), %s8106_s9, 0 }
   0x7   : > { %162 = sbr.rel (%p159_p3) target bundleno = 1038 (0x40e), region = 28 }
   0x8   : > { %s208_s14 = smul.u32 (!%p159_p3), 384, %s8106_s9  ;;  %p201_p4 = scmp.lt.s32.totalorder (!%p159_p3), %s198_s13, 239 }
   0xa   : > { %p211_p5 = scmp.lt.s32.totalorder (!%p159_p3), %s208_s14, 3839 }
   0xe   : > { %s9221_s13 = smov (!%p201_p4, %s198_s13), 239  ;;  %s9223_s14 = smov (!%p211_p5, %s208_s14), 3839 }
   0xf   : > { %s6081_s15 = sshll.u32 %s9221_s13, 2  ;;  %s6882_s19 = sshll.u32 %s9223_s14, 4  ;;  %v8116_v0 = vmov (!%p6084_p6), 0.0  }
  0x10   : > { %s8157_s18 = scalar_lea.vmem %s9213_s0, %s6081_s15  ;;  %s8162_s22 = scalar_lea.vmem %s9214_s1, %s6882_s19  ;;  %233 = vst [vmem:[%s9215_s2] sm:$0xff] (!%p6084_p6), %v8116_v0  ;;  %234 = vst [vmem:[%s9215_s2 + $0x8] sm:$0xff] (!%p6084_p6), %v8116_v0 }
  0x11   : > { %232 = sbr.rel (%p6084_p6) target bundleno = 24 (0x18), region = 32  ;;  %235 = vst [vmem:[%s9215_s2 + $0x10] sm:$0xff] (!%p6084_p6), %v8116_v0  ;;  %236 = vst [vmem:[%s9215_s2 + $0x18] sm:$0xff] (!%p6084_p6), %v8116_v0 }
  0x18 PF: > { %v6908_v1 = vld [vmem:[%s8162_s22 + $0x4] ss:$16 sps:$4 sm:$0xff]   ;;  %v6912_v3 = vld [vmem:[%s8162_s22] ss:$16 sps:$4 sm:$0xff]   ;;  %v242_v49 = vld [vmem:[%s8157_s18 + $0x8] sm:$0xff]  ;;  %p6877_p7 = scmp.ne.s32.totalorder %s8106_s9, 9 }
  0x19   : > { %v6910_v2 = vld [vmem:[%s8162_s22 + $0x204] ss:$16 sps:$4 sm:$0xff]   ;;  %4945 = vmatprep.subr.bf16.mxu0 %v6908_v1  ;;  %v6913_v4 = vld [vmem:[%s8162_s22 + $0x200] ss:$16 sps:$4 sm:$0xff]   ;;  %v8229_v52 = vcombine.high %v242_v49, %v242_v49 }
  0x1a   : > { %4986 = vmatprep.subr.bf16.mxu1 %v6910_v2  ;;  %v6914_v5 = vld [vmem:[%s8162_s22 + $0x24] ss:$16 sps:$4 sm:$0xff]   ;;  %4946 = vmatpush1.bf16.msra.mxu0 %v6912_v3  ;;  %v6918_v7 = vld [vmem:[%s8162_s22 + $0x20] ss:$16 sps:$4 sm:$0xff]  }
  0x1b   : > { %4987 = vmatpush1.bf16.msra.mxu1 %v6913_v4  ;;  %v6916_v6 = vld [vmem:[%s8162_s22 + $0x224] ss:$16 sps:$4 sm:$0xff]   ;;  %4947 = vmatprep.subr.bf16.mxu0 %v6914_v5  ;;  %v6919_v8 = vld [vmem:[%s8162_s22 + $0x220] ss:$16 sps:$4 sm:$0xff]  }
  0x1c   : > { %4988 = vmatprep.subr.bf16.mxu1 %v6916_v6  ;;  %v6920_v9 = vld [vmem:[%s8162_s22 + $0x44] ss:$16 sps:$4 sm:$0xff]   ;;  %v6924_v11 = vld [vmem:[%s8162_s22 + $0x40] ss:$16 sps:$4 sm:$0xff]   ;;  %5018 = vmatprep.mubr.bf16.mxu1 %v8229_v52 }
  0x1d   : > { %v6922_v10 = vld [vmem:[%s8162_s22 + $0x244] ss:$16 sps:$4 sm:$0xff]   ;;  %v6925_v12 = vld [vmem:[%s8162_s22 + $0x240] ss:$16 sps:$4 sm:$0xff]  }
  0x1e   : > { %4948 = vmatpush1.bf16.msra.mxu0 %v6918_v7  ;;  %v6926_v13 = vld [vmem:[%s8162_s22 + $0x64] ss:$16 sps:$4 sm:$0xff]   ;;  %v6930_v15 = vld [vmem:[%s8162_s22 + $0x60] ss:$16 sps:$4 sm:$0xff]  }
  0x1f   : > { %4989 = vmatpush1.bf16.msra.mxu1 %v6919_v8  ;;  %4949 = vmatprep.subr.bf16.mxu0 %v6920_v9  ;;  %v6928_v14 = vld [vmem:[%s8162_s22 + $0x264] ss:$16 sps:$4 sm:$0xff]   ;;  %v6931_v16 = vld [vmem:[%s8162_s22 + $0x260] ss:$16 sps:$4 sm:$0xff]   ;;  %v8253_v8 = vcombine.low %v242_v49, %v242_v49 }
  0x20   : > { %4990 = vmatprep.subr.bf16.mxu1 %v6922_v10  ;;  %v6932_v17 = vld [vmem:[%s8162_s22 + $0x84] ss:$16 sps:$4 sm:$0xff]   ;;  %v6936_v19 = vld [vmem:[%s8162_s22 + $0x80] ss:$16 sps:$4 sm:$0xff]  }
  0x21   : > { %v6934_v18 = vld [vmem:[%s8162_s22 + $0x284] ss:$16 sps:$4 sm:$0xff]   ;;  %v6937_v20 = vld [vmem:[%s8162_s22 + $0x280] ss:$16 sps:$4 sm:$0xff]  }
  0x22   : > { %4950 = vmatpush1.bf16.msra.mxu0 %v6924_v11  ;;  %v6938_v21 = vld [vmem:[%s8162_s22 + $0xa4] ss:$16 sps:$4 sm:$0xff]   ;;  %v6942_v23 = vld [vmem:[%s8162_s22 + $0xa0] ss:$16 sps:$4 sm:$0xff]  }
  0x23   : > { %4991 = vmatpush1.bf16.msra.mxu1 %v6925_v12  ;;  %4951 = vmatprep.subr.bf16.mxu0 %v6926_v13  ;;  %v6940_v22 = vld [vmem:[%s8162_s22 + $0x2a4] ss:$16 sps:$4 sm:$0xff]   ;;  %v6943_v24 = vld [vmem:[%s8162_s22 + $0x2a0] ss:$16 sps:$4 sm:$0xff]  }
  0x24   : > { %4992 = vmatprep.subr.bf16.mxu1 %v6928_v14  ;;  %v6944_v25 = vld [vmem:[%s8162_s22 + $0xc4] ss:$16 sps:$4 sm:$0xff]   ;;  %v6948_v27 = vld [vmem:[%s8162_s22 + $0xc0] ss:$16 sps:$4 sm:$0xff]  }
  0x25   : > { %v6946_v26 = vld [vmem:[%s8162_s22 + $0x2c4] ss:$16 sps:$4 sm:$0xff]   ;;  %v6949_v28 = vld [vmem:[%s8162_s22 + $0x2c0] ss:$16 sps:$4 sm:$0xff]  }
  0x26   : > { %4952 = vmatpush1.bf16.msra.mxu0 %v6930_v15  ;;  %v6950_v29 = vld [vmem:[%s8162_s22 + $0xe4] ss:$16 sps:$4 sm:$0xff]   ;;  %v6954_v31 = vld [vmem:[%s8162_s22 + $0xe0] ss:$16 sps:$4 sm:$0xff]  }
  0x27   : > { %4993 = vmatpush1.bf16.msra.mxu1 %v6931_v16  ;;  %4953 = vmatprep.subr.bf16.mxu0 %v6932_v17  ;;  %v6952_v30 = vld [vmem:[%s8162_s22 + $0x2e4] ss:$16 sps:$4 sm:$0xff]   ;;  %v6955_v32 = vld [vmem:[%s8162_s22 + $0x2e0] ss:$16 sps:$4 sm:$0xff]  }
  0x28   : > { %4994 = vmatprep.subr.bf16.mxu1 %v6934_v18  ;;  %v6956_v33 = vld [vmem:[%s8162_s22 + $0x104] ss:$16 sps:$4 sm:$0xff]   ;;  %v6960_v35 = vld [vmem:[%s8162_s22 + $0x100] ss:$16 sps:$4 sm:$0xff]  }
  0x29   : > { %v6958_v34 = vld [vmem:[%s8162_s22 + $0x304] ss:$16 sps:$4 sm:$0xff]   ;;  %v6961_v36 = vld [vmem:[%s8162_s22 + $0x300] ss:$16 sps:$4 sm:$0xff]  }
  0x2a   : > { %4954 = vmatpush1.bf16.msra.mxu0 %v6936_v19  ;;  %v6962_v37 = vld [vmem:[%s8162_s22 + $0x124] ss:$16 sps:$4 sm:$0xff]   ;;  %v6966_v39 = vld [vmem:[%s8162_s22 + $0x120] ss:$16 sps:$4 sm:$0xff]  }
  0x2b   : > { %4995 = vmatpush1.bf16.msra.mxu1 %v6937_v20  ;;  %4955 = vmatprep.subr.bf16.mxu0 %v6938_v21  ;;  %v6964_v38 = vld [vmem:[%s8162_s22 + $0x324] ss:$16 sps:$4 sm:$0xff]   ;;  %v6967_v40 = vld [vmem:[%s8162_s22 + $0x320] ss:$16 sps:$4 sm:$0xff]  }
  0x2c   : > { %4996 = vmatprep.subr.bf16.mxu1 %v6940_v22  ;;  %v6968_v41 = vld [vmem:[%s8162_s22 + $0x144] ss:$16 sps:$4 sm:$0xff]   ;;  %v6972_v43 = vld [vmem:[%s8162_s22 + $0x140] ss:$16 sps:$4 sm:$0xff]  }
  0x2d   : > { %v6970_v42 = vld [vmem:[%s8162_s22 + $0x344] ss:$16 sps:$4 sm:$0xff]   ;;  %v6973_v44 = vld [vmem:[%s8162_s22 + $0x340] ss:$16 sps:$4 sm:$0xff]  }
  0x2e   : > { %4956 = vmatpush1.bf16.msra.mxu0 %v6942_v23  ;;  %v6974_v45 = vld [vmem:[%s8162_s22 + $0x164] ss:$16 sps:$4 sm:$0xff]   ;;  %v6978_v50 = vld [vmem:[%s8162_s22 + $0x160] ss:$16 sps:$4 sm:$0xff]  }
  0x2f   : > { %4997 = vmatpush1.bf16.msra.mxu1 %v6943_v24  ;;  %4957 = vmatprep.subr.bf16.mxu0 %v6944_v25  ;;  %v6976_v46 = vld [vmem:[%s8162_s22 + $0x364] ss:$16 sps:$4 sm:$0xff]   ;;  %v6979_v51 = vld [vmem:[%s8162_s22 + $0x360] ss:$16 sps:$4 sm:$0xff]  }
  0x30   : > { %4998 = vmatprep.subr.bf16.mxu1 %v6946_v26  ;;  %v241_v47 = vld [vmem:[%s8157_s18] sm:$0xff] }
  0x31   : > { %v8224_v48 = vcombine.high %v241_v47, %v241_v47  ;;  %v6980_v53 = vld [vmem:[%s8162_s22 + $0x184] ss:$16 sps:$4 sm:$0xff]   ;;  %v6984_v55 = vld [vmem:[%s8162_s22 + $0x180] ss:$16 sps:$4 sm:$0xff]   ;;  %v8251_v7 = vcombine.low %v241_v47, %v241_v47 }
  0x32   : > { %4958 = vmatpush1.bf16.msra.mxu0 %v6948_v27  ;;  %v6982_v54 = vld [vmem:[%s8162_s22 + $0x384] ss:$16 sps:$4 sm:$0xff]   ;;  %v6985_v56 = vld [vmem:[%s8162_s22 + $0x380] ss:$16 sps:$4 sm:$0xff]  }
  0x33   : > { %4999 = vmatpush1.bf16.msra.mxu1 %v6949_v28  ;;  %4959 = vmatprep.subr.bf16.mxu0 %v6950_v29  ;;  %v6986_v57 = vld [vmem:[%s8162_s22 + $0x1a4] ss:$16 sps:$4 sm:$0xff]   ;;  %v6990_v59 = vld [vmem:[%s8162_s22 + $0x1a0] ss:$16 sps:$4 sm:$0xff]  }
  0x34   : > { %5000 = vmatprep.subr.bf16.mxu1 %v6952_v30  ;;  %4977 = vmatprep.mubr.bf16.mxu0 %v8224_v48  ;;  %v6988_v58 = vld [vmem:[%s8162_s22 + $0x3a4] ss:$16 sps:$4 sm:$0xff]   ;;  %v6991_v60 = vld [vmem:[%s8162_s22 + $0x3a0] ss:$16 sps:$4 sm:$0xff]  }
  0x35   : > { %v6992_v61 = vld [vmem:[%s8162_s22 + $0x1c4] ss:$16 sps:$4 sm:$0xff]   ;;  %v6996_v63 = vld [vmem:[%s8162_s22 + $0x1c0] ss:$16 sps:$4 sm:$0xff]  }
  0x36   : > { %4960 = vmatpush1.bf16.msra.mxu0 %v6954_v31  ;;  %v6994_v62 = vld [vmem:[%s8162_s22 + $0x3c4] ss:$16 sps:$4 sm:$0xff]   ;;  %v6997_v0 = vld [vmem:[%s8162_s22 + $0x3c0] ss:$16 sps:$4 sm:$0xff]  }
  0x37   : > { %5001 = vmatpush1.bf16.msra.mxu1 %v6955_v32  ;;  %4961 = vmatprep.subr.bf16.mxu0 %v6956_v33  ;;  %v6998_v1 = vld [vmem:[%s8162_s22 + $0x1e4] ss:$16 sps:$4 sm:$0xff]   ;;  %v7002_v3 = vld [vmem:[%s8162_s22 + $0x1e0] ss:$16 sps:$4 sm:$0xff]  }
  0x38   : > { %5002 = vmatprep.subr.bf16.mxu1 %v6958_v34  ;;  %v7000_v2 = vld [vmem:[%s8162_s22 + $0x3e4] ss:$16 sps:$4 sm:$0xff]   ;;  %v7003_v4 = vld [vmem:[%s8162_s22 + $0x3e0] ss:$16 sps:$4 sm:$0xff]   ;;  %v8285_v34 = vld [vmem:[%s8157_s18 + $0x18] sm:$0xff] }
  0x39   : > { %v7010_v5 = vld [vmem:[%s8162_s22 + $0x404] ss:$16 sps:$4 sm:$0xff]   ;;  %v7008_v9 = vld [vmem:[%s8162_s22 + $0x400] ss:$16 sps:$4 sm:$0xff]  }
  0x3a   : > { %4962 = vmatpush1.bf16.msra.mxu0 %v6960_v35  ;;  %v7013_v6 = vld [vmem:[%s8162_s22 + $0x604] ss:$16 sps:$4 sm:$0xff]   ;;  %v7011_v10 = vld [vmem:[%s8162_s22 + $0x600] ss:$16 sps:$4 sm:$0xff]  }
  0x3b   : > { %5003 = vmatpush1.bf16.msra.mxu1 %v6961_v36  ;;  %4963 = vmatprep.subr.bf16.mxu0 %v6962_v37  ;;  %v7016_v11 = vld [vmem:[%s8162_s22 + $0x424] ss:$16 sps:$4 sm:$0xff]   ;;  %v7014_v13 = vld [vmem:[%s8162_s22 + $0x420] ss:$16 sps:$4 sm:$0xff]  }
  0x3c   : > { %5004 = vmatprep.subr.bf16.mxu1 %v6964_v38  ;;  %v7019_v12 = vld [vmem:[%s8162_s22 + $0x624] ss:$16 sps:$4 sm:$0xff]   ;;  %v7017_v14 = vld [vmem:[%s8162_s22 + $0x620] ss:$16 sps:$4 sm:$0xff]   ;;  %v8295_v38 = vcombine.high %v8285_v34, %v8285_v34 }
  0x3d   : > { %v7022_v15 = vld [vmem:[%s8162_s22 + $0x444] ss:$16 sps:$4 sm:$0xff]   ;;  %v7020_v17 = vld [vmem:[%s8162_s22 + $0x440] ss:$16 sps:$4 sm:$0xff]  }
  0x3e   : > { %4964 = vmatpush1.bf16.msra.mxu0 %v6966_v39  ;;  %v7025_v16 = vld [vmem:[%s8162_s22 + $0x644] ss:$16 sps:$4 sm:$0xff]   ;;  %v7023_v18 = vld [vmem:[%s8162_s22 + $0x640] ss:$16 sps:$4 sm:$0xff]  }
  0x3f   : > { %5005 = vmatpush1.bf16.msra.mxu1 %v6967_v40  ;;  %4965 = vmatprep.subr.bf16.mxu0 %v6968_v41  ;;  %v7028_v19 = vld [vmem:[%s8162_s22 + $0x464] ss:$16 sps:$4 sm:$0xff]   ;;  %v7026_v21 = vld [vmem:[%s8162_s22 + $0x460] ss:$16 sps:$4 sm:$0xff]  }
  0x40   : > { %5006 = vmatprep.subr.bf16.mxu1 %v6970_v42  ;;  %v7031_v20 = vld [vmem:[%s8162_s22 + $0x664] ss:$16 sps:$4 sm:$0xff]   ;;  %v7029_v22 = vld [vmem:[%s8162_s22 + $0x660] ss:$16 sps:$4 sm:$0xff]  }
  0x41   : > { %v7034_v23 = vld [vmem:[%s8162_s22 + $0x484] ss:$16 sps:$4 sm:$0xff]   ;;  %v7032_v25 = vld [vmem:[%s8162_s22 + $0x480] ss:$16 sps:$4 sm:$0xff]  }
  0x42   : > { %4966 = vmatpush1.bf16.msra.mxu0 %v6972_v43  ;;  %v7037_v24 = vld [vmem:[%s8162_s22 + $0x684] ss:$16 sps:$4 sm:$0xff]   ;;  %v7035_v26 = vld [vmem:[%s8162_s22 + $0x680] ss:$16 sps:$4 sm:$0xff]  }
  0x43   : > { %5007 = vmatpush1.bf16.msra.mxu1 %v6973_v44  ;;  %4967 = vmatprep.subr.bf16.mxu0 %v6974_v45  ;;  %v7040_v27 = vld [vmem:[%s8162_s22 + $0x4a4] ss:$16 sps:$4 sm:$0xff]   ;;  %v7038_v29 = vld [vmem:[%s8162_s22 + $0x4a0] ss:$16 sps:$4 sm:$0xff]  }
  0x44   : > { %5008 = vmatprep.subr.bf16.mxu1 %v6976_v46  ;;  %v7043_v28 = vld [vmem:[%s8162_s22 + $0x6a4] ss:$16 sps:$4 sm:$0xff]   ;;  %v7041_v30 = vld [vmem:[%s8162_s22 + $0x6a0] ss:$16 sps:$4 sm:$0xff]  }
  0x45   : > { %v7046_v31 = vld [vmem:[%s8162_s22 + $0x4c4] ss:$16 sps:$4 sm:$0xff]   ;;  %v7044_v35 = vld [vmem:[%s8162_s22 + $0x4c0] ss:$16 sps:$4 sm:$0xff]  }
  0x46   : > { %4968 = vmatpush1.bf16.msra.mxu0 %v6978_v50  ;;  %v7049_v32 = vld [vmem:[%s8162_s22 + $0x6c4] ss:$16 sps:$4 sm:$0xff]   ;;  %v7047_v36 = vld [vmem:[%s8162_s22 + $0x6c0] ss:$16 sps:$4 sm:$0xff]  }
  0x47   : > { %5009 = vmatpush1.bf16.msra.mxu1 %v6979_v51  ;;  %4969 = vmatprep.subr.bf16.mxu0 %v6980_v53  ;;  %v8282_v33 = vld [vmem:[%s8157_s18 + $0x10] sm:$0xff] }
  0x48   : > { %5010 = vmatprep.subr.bf16.mxu1 %v6982_v54  ;;  %v8291_v37 = vcombine.high %v8282_v33, %v8282_v33  ;;  %v7052_v39 = vld [vmem:[%s8162_s22 + $0x4e4] ss:$16 sps:$4 sm:$0xff]   ;;  %v7050_v41 = vld [vmem:[%s8162_s22 + $0x4e0] ss:$16 sps:$4 sm:$0xff]  }
  0x49   : > { %v7055_v40 = vld [vmem:[%s8162_s22 + $0x6e4] ss:$16 sps:$4 sm:$0xff]   ;;  %v7053_v42 = vld [vmem:[%s8162_s22 + $0x6e0] ss:$16 sps:$4 sm:$0xff]  }
  0x4a   : > { %4970 = vmatpush1.bf16.msra.mxu0 %v6984_v55  ;;  %v7058_v43 = vld [vmem:[%s8162_s22 + $0x504] ss:$16 sps:$4 sm:$0xff]   ;;  %v7056_v45 = vld [vmem:[%s8162_s22 + $0x500] ss:$16 sps:$4 sm:$0xff]  }
  0x4b   : > { %5011 = vmatpush1.bf16.msra.mxu1 %v6985_v56  ;;  %4971 = vmatprep.subr.bf16.mxu0 %v6986_v57  ;;  %v7061_v44 = vld [vmem:[%s8162_s22 + $0x704] ss:$16 sps:$4 sm:$0xff]   ;;  %v7059_v46 = vld [vmem:[%s8162_s22 + $0x700] ss:$16 sps:$4 sm:$0xff]  }
  0x4c   : > { %5012 = vmatprep.subr.bf16.mxu1 %v6988_v58  ;;  %v7064_v47 = vld [vmem:[%s8162_s22 + $0x524] ss:$16 sps:$4 sm:$0xff]   ;;  %v7062_v50 = vld [vmem:[%s8162_s22 + $0x520] ss:$16 sps:$4 sm:$0xff]  }
  0x4d   : > { %v7067_v49 = vld [vmem:[%s8162_s22 + $0x724] ss:$16 sps:$4 sm:$0xff]   ;;  %v7065_v51 = vld [vmem:[%s8162_s22 + $0x720] ss:$16 sps:$4 sm:$0xff]  }
  0x4e   : > { %4972 = vmatpush1.bf16.msra.mxu0 %v6990_v59  ;;  %v7070_v53 = vld [vmem:[%s8162_s22 + $0x544] ss:$16 sps:$4 sm:$0xff]   ;;  %v7068_v55 = vld [vmem:[%s8162_s22 + $0x540] ss:$16 sps:$4 sm:$0xff]  }
  0x4f   : > { %5013 = vmatpush1.bf16.msra.mxu1 %v6991_v60  ;;  %4973 = vmatprep.subr.bf16.mxu0 %v6992_v61  ;;  %v7073_v54 = vld [vmem:[%s8162_s22 + $0x744] ss:$16 sps:$4 sm:$0xff]   ;;  %v7071_v56 = vld [vmem:[%s8162_s22 + $0x740] ss:$16 sps:$4 sm:$0xff]  }
  0x50   : > { %5014 = vmatprep.subr.bf16.mxu1 %v6994_v62  ;;  %v7076_v57 = vld [vmem:[%s8162_s22 + $0x564] ss:$16 sps:$4 sm:$0xff]   ;;  %v7074_v59 = vld [vmem:[%s8162_s22 + $0x560] ss:$16 sps:$4 sm:$0xff]  }
  0x51   : > { %v7079_v58 = vld [vmem:[%s8162_s22 + $0x764] ss:$16 sps:$4 sm:$0xff]   ;;  %v7077_v60 = vld [vmem:[%s8162_s22 + $0x760] ss:$16 sps:$4 sm:$0xff]  }
  0x52   : > { %4974 = vmatpush1.bf16.msra.mxu0 %v6996_v63  ;;  %v7082_v61 = vld [vmem:[%s8162_s22 + $0x584] ss:$16 sps:$4 sm:$0xff]   ;;  %v7080_v63 = vld [vmem:[%s8162_s22 + $0x580] ss:$16 sps:$4 sm:$0xff]  }
  0x53   : > { %5015 = vmatpush1.bf16.msra.mxu1 %v6997_v0  ;;  %4975 = vmatprep.subr.bf16.mxu0 %v6998_v1  ;;  %v7085_v62 = vld [vmem:[%s8162_s22 + $0x784] ss:$16 sps:$4 sm:$0xff]   ;;  %v7083_v0 = vld [vmem:[%s8162_s22 + $0x780] ss:$16 sps:$4 sm:$0xff]  }
  0x54   : > { %5016 = vmatprep.subr.bf16.mxu1 %v7000_v2  ;;  %v7088_v1 = vld [vmem:[%s8162_s22 + $0x5a4] ss:$16 sps:$4 sm:$0xff]  }
  0x55   : > { %v7091_v2 = vld [vmem:[%s8162_s22 + $0x7a4] ss:$16 sps:$4 sm:$0xff]  }
  0x56   : > { %4976 = vmatpush1.bf16.msra.mxu0 %v7002_v3  ;;  %v7086_v3 = vld [vmem:[%s8162_s22 + $0x5a0] ss:$16 sps:$4 sm:$0xff]  }
  0x57   : > { %5017 = vmatpush1.bf16.msra.mxu1 %v7003_v4  ;;  %5027 = vmatprep.subr.bf16.mxu0 %v7010_v5  ;;  %v7089_v4 = vld [vmem:[%s8162_s22 + $0x7a0] ss:$16 sps:$4 sm:$0xff]   ;;  %v7094_v5 = vld [vmem:[%s8162_s22 + $0x5c4] ss:$16 sps:$4 sm:$0xff]  }
  0x58   : > { %5068 = vmatprep.subr.bf16.mxu1 %v7013_v6  ;;  %v7097_v6 = vld [vmem:[%s8162_s22 + $0x7c4] ss:$16 sps:$4 sm:$0xff]  }
  0x59   : > { %4978 = vmatmul.mubr.bf16.vlgmr.msra.gmra.mrb[0].mxu0 %v8251_v7 }
  0x5a   : > { %5019 = vmatmul.mubr.bf16.vlgmr.msra.gmra.mrb[0].mxu1 %v8253_v8  ;;  %5028 = vmatpush1.bf16.msra.mxu0 %v7008_v9  ;;  %v7092_v9 = vld [vmem:[%s8162_s22 + $0x5c0] ss:$16 sps:$4 sm:$0xff]  }
  0x5b   : > { %5069 = vmatpush1.bf16.msra.mxu1 %v7011_v10  ;;  %5029 = vmatprep.subr.bf16.mxu0 %v7016_v11  ;;  %v7095_v10 = vld [vmem:[%s8162_s22 + $0x7c0] ss:$16 sps:$4 sm:$0xff]   ;;  %v7100_v11 = vld [vmem:[%s8162_s22 + $0x5e4] ss:$16 sps:$4 sm:$0xff]  }
  0x5c   : > { %5070 = vmatprep.subr.bf16.mxu1 %v7019_v12  ;;  %5059 = vmatprep.mubr.bf16.mxu0 %v8291_v37  ;;  %v7103_v12 = vld [vmem:[%s8162_s22 + $0x7e4] ss:$16 sps:$4 sm:$0xff]  }
  0x5d   : > { %5100 = vmatprep.mubr.bf16.mxu1 %v8295_v38 }
  0x5e   : > { %5030 = vmatpush1.bf16.msra.mxu0 %v7014_v13  ;;  %v7098_v13 = vld [vmem:[%s8162_s22 + $0x5e0] ss:$16 sps:$4 sm:$0xff]  }
  0x5f   : > { %5071 = vmatpush1.bf16.msra.mxu1 %v7017_v14  ;;  %5031 = vmatprep.subr.bf16.mxu0 %v7022_v15  ;;  %v7101_v14 = vld [vmem:[%s8162_s22 + $0x7e0] ss:$16 sps:$4 sm:$0xff]   ;;  %v7110_v15 = vld [vmem:[%s8162_s22 + $0x804] ss:$16 sps:$4 sm:$0xff]  }
  0x60   : > { %5072 = vmatprep.subr.bf16.mxu1 %v7025_v16  ;;  %v7113_v16 = vld [vmem:[%s8162_s22 + $0xa04] ss:$16 sps:$4 sm:$0xff]  }
  0x62   : > { %5032 = vmatpush1.bf16.msra.mxu0 %v7020_v17  ;;  %v8339_v17 = vcombine.low %v8282_v33, %v8282_v33  ;;  %v7128_v33 = vld [vmem:[%s8162_s22 + $0x864] ss:$16 sps:$4 sm:$0xff]  }
  0x63   : > { %5073 = vmatpush1.bf16.msra.mxu1 %v7023_v18  ;;  %5033 = vmatprep.subr.bf16.mxu0 %v7028_v19  ;;  %v8343_v18 = vcombine.low %v8285_v34, %v8285_v34  ;;  %v7108_v19 = vld [vmem:[%s8162_s22 + $0x800] ss:$16 sps:$4 sm:$0xff]   ;;  %v7131_v34 = vld [vmem:[%s8162_s22 + $0xa64] ss:$16 sps:$4 sm:$0xff]  }
  0x64   : > { %5074 = vmatprep.subr.bf16.mxu1 %v7031_v20  ;;  %v7111_v20 = vld [vmem:[%s8162_s22 + $0xa00] ss:$16 sps:$4 sm:$0xff]  }
  0x66   : > { %5034 = vmatpush1.bf16.msra.mxu0 %v7026_v21  ;;  %v7116_v21 = vld [vmem:[%s8162_s22 + $0x824] ss:$16 sps:$4 sm:$0xff]  }
  0x67   : > { %5075 = vmatpush1.bf16.msra.mxu1 %v7029_v22  ;;  %5035 = vmatprep.subr.bf16.mxu0 %v7034_v23  ;;  %v7119_v22 = vld [vmem:[%s8162_s22 + $0xa24] ss:$16 sps:$4 sm:$0xff]  }
  0x68   : > { %5076 = vmatprep.subr.bf16.mxu1 %v7037_v24  ;;  %v8350_v23 = vld [vmem:[%s8157_s18 + $0x20] sm:$0xff]  ;;  %v8353_v24 = vld [vmem:[%s8157_s18 + $0x28] sm:$0xff] }
  0x6a   : > { %5036 = vmatpush1.bf16.msra.mxu0 %v7032_v25  ;;  %v8357_v25 = vcombine.high %v8350_v23, %v8350_v23 }
  0x6b   : > { %5077 = vmatpush1.bf16.msra.mxu1 %v7035_v26  ;;  %5037 = vmatprep.subr.bf16.mxu0 %v7040_v27  ;;  %v8361_v26 = vcombine.high %v8353_v24, %v8353_v24  ;;  %v7114_v27 = vld [vmem:[%s8162_s22 + $0x820] ss:$16 sps:$4 sm:$0xff]  }
  0x6c   : > { %5078 = vmatprep.subr.bf16.mxu1 %v7043_v28  ;;  %v7117_v28 = vld [vmem:[%s8162_s22 + $0xa20] ss:$16 sps:$4 sm:$0xff]  }
  0x6e   : > { %5038 = vmatpush1.bf16.msra.mxu0 %v7038_v29  ;;  %v7122_v29 = vld [vmem:[%s8162_s22 + $0x844] ss:$16 sps:$4 sm:$0xff]  }
  0x6f   : > { %5079 = vmatpush1.bf16.msra.mxu1 %v7041_v30  ;;  %5039 = vmatprep.subr.bf16.mxu0 %v7046_v31  ;;  %v7125_v30 = vld [vmem:[%s8162_s22 + $0xa44] ss:$16 sps:$4 sm:$0xff]   ;;  %v7120_v31 = vld [vmem:[%s8162_s22 + $0x840] ss:$16 sps:$4 sm:$0xff]  }
  0x70   : > { %5080 = vmatprep.subr.bf16.mxu1 %v7049_v32  ;;  %v7123_v32 = vld [vmem:[%s8162_s22 + $0xa40] ss:$16 sps:$4 sm:$0xff]  }
  0x72   : > { %5040 = vmatpush1.bf16.msra.mxu0 %v7044_v35  ;;  %v7126_v35 = vld [vmem:[%s8162_s22 + $0x860] ss:$16 sps:$4 sm:$0xff]  }
  0x73   : > { %5081 = vmatpush1.bf16.msra.mxu1 %v7047_v36  ;;  %5041 = vmatprep.subr.bf16.mxu0 %v7052_v39  ;;  %v7129_v36 = vld [vmem:[%s8162_s22 + $0xa60] ss:$16 sps:$4 sm:$0xff]   ;;  %v7134_v39 = vld [vmem:[%s8162_s22 + $0x884] ss:$16 sps:$4 sm:$0xff]  }
  0x74   : > { %5082 = vmatprep.subr.bf16.mxu1 %v7055_v40  ;;  %v7137_v40 = vld [vmem:[%s8162_s22 + $0xa84] ss:$16 sps:$4 sm:$0xff]  }
  0x76   : > { %5042 = vmatpush1.bf16.msra.mxu0 %v7050_v41  ;;  %v7132_v41 = vld [vmem:[%s8162_s22 + $0x880] ss:$16 sps:$4 sm:$0xff]  }
  0x77   : > { %5083 = vmatpush1.bf16.msra.mxu1 %v7053_v42  ;;  %5043 = vmatprep.subr.bf16.mxu0 %v7058_v43  ;;  %v7135_v42 = vld [vmem:[%s8162_s22 + $0xa80] ss:$16 sps:$4 sm:$0xff]   ;;  %v7140_v43 = vld [vmem:[%s8162_s22 + $0x8a4] ss:$16 sps:$4 sm:$0xff]  }
  0x78   : > { %5084 = vmatprep.subr.bf16.mxu1 %v7061_v44  ;;  %v7143_v44 = vld [vmem:[%s8162_s22 + $0xaa4] ss:$16 sps:$4 sm:$0xff]  }
  0x7a   : > { %5044 = vmatpush1.bf16.msra.mxu0 %v7056_v45  ;;  %v7138_v45 = vld [vmem:[%s8162_s22 + $0x8a0] ss:$16 sps:$4 sm:$0xff]  }
  0x7b   : > { %5085 = vmatpush1.bf16.msra.mxu1 %v7059_v46  ;;  %5045 = vmatprep.subr.bf16.mxu0 %v7064_v47  ;;  %v7141_v46 = vld [vmem:[%s8162_s22 + $0xaa0] ss:$16 sps:$4 sm:$0xff]   ;;  %v7146_v47 = vld [vmem:[%s8162_s22 + $0x8c4] ss:$16 sps:$4 sm:$0xff]  }
  0x7c   : > { %5086 = vmatprep.subr.bf16.mxu1 %v7067_v49  ;;  %v7149_v49 = vld [vmem:[%s8162_s22 + $0xac4] ss:$16 sps:$4 sm:$0xff]  }
  0x7e   : > { %5046 = vmatpush1.bf16.msra.mxu0 %v7062_v50  ;;  %v7144_v50 = vld [vmem:[%s8162_s22 + $0x8c0] ss:$16 sps:$4 sm:$0xff]  }
  0x7f   : > { %5087 = vmatpush1.bf16.msra.mxu1 %v7065_v51  ;;  %5047 = vmatprep.subr.bf16.mxu0 %v7070_v53  ;;  %v7147_v51 = vld [vmem:[%s8162_s22 + $0xac0] ss:$16 sps:$4 sm:$0xff]   ;;  %v7152_v53 = vld [vmem:[%s8162_s22 + $0x8e4] ss:$16 sps:$4 sm:$0xff]  }
  0x80   : > { %5088 = vmatprep.subr.bf16.mxu1 %v7073_v54  ;;  %v7155_v54 = vld [vmem:[%s8162_s22 + $0xae4] ss:$16 sps:$4 sm:$0xff]  }
  0x82   : > { %5048 = vmatpush1.bf16.msra.mxu0 %v7068_v55  ;;  %v7150_v55 = vld [vmem:[%s8162_s22 + $0x8e0] ss:$16 sps:$4 sm:$0xff]  }
  0x83   : > { %5089 = vmatpush1.bf16.msra.mxu1 %v7071_v56  ;;  %5049 = vmatprep.subr.bf16.mxu0 %v7076_v57  ;;  %v7153_v56 = vld [vmem:[%s8162_s22 + $0xae0] ss:$16 sps:$4 sm:$0xff]   ;;  %v7158_v57 = vld [vmem:[%s8162_s22 + $0x904] ss:$16 sps:$4 sm:$0xff]  }
  0x84   : > { %5090 = vmatprep.subr.bf16.mxu1 %v7079_v58  ;;  %v7161_v58 = vld [vmem:[%s8162_s22 + $0xb04] ss:$16 sps:$4 sm:$0xff]  }
  0x86   : > { %5050 = vmatpush1.bf16.msra.mxu0 %v7074_v59  ;;  %v7156_v59 = vld [vmem:[%s8162_s22 + $0x900] ss:$16 sps:$4 sm:$0xff]  }
  0x87   : > { %5091 = vmatpush1.bf16.msra.mxu1 %v7077_v60  ;;  %5051 = vmatprep.subr.bf16.mxu0 %v7082_v61  ;;  %v7159_v60 = vld [vmem:[%s8162_s22 + $0xb00] ss:$16 sps:$4 sm:$0xff]   ;;  %v7164_v61 = vld [vmem:[%s8162_s22 + $0x924] ss:$16 sps:$4 sm:$0xff]  }
  0x88   : > { %5092 = vmatprep.subr.bf16.mxu1 %v7085_v62  ;;  %v7167_v62 = vld [vmem:[%s8162_s22 + $0xb24] ss:$16 sps:$4 sm:$0xff]  }
  0x8a   : > { %5052 = vmatpush1.bf16.msra.mxu0 %v7080_v63  ;;  %v7162_v63 = vld [vmem:[%s8162_s22 + $0x920] ss:$16 sps:$4 sm:$0xff]  }
  0x8b   : > { %5093 = vmatpush1.bf16.msra.mxu1 %v7083_v0  ;;  %5053 = vmatprep.subr.bf16.mxu0 %v7088_v1  ;;  %v7165_v0 = vld [vmem:[%s8162_s22 + $0xb20] ss:$16 sps:$4 sm:$0xff]   ;;  %v7170_v1 = vld [vmem:[%s8162_s22 + $0x944] ss:$16 sps:$4 sm:$0xff]  }
  0x8c   : > { %5094 = vmatprep.subr.bf16.mxu1 %v7091_v2  ;;  %v7173_v2 = vld [vmem:[%s8162_s22 + $0xb44] ss:$16 sps:$4 sm:$0xff]  }
  0x8e   : > { %5054 = vmatpush1.bf16.msra.mxu0 %v7086_v3  ;;  %v7168_v3 = vld [vmem:[%s8162_s22 + $0x940] ss:$16 sps:$4 sm:$0xff]  }
  0x8f   : > { %5095 = vmatpush1.bf16.msra.mxu1 %v7089_v4  ;;  %5055 = vmatprep.subr.bf16.mxu0 %v7094_v5  ;;  %v7171_v4 = vld [vmem:[%s8162_s22 + $0xb40] ss:$16 sps:$4 sm:$0xff]   ;;  %v7176_v5 = vld [vmem:[%s8162_s22 + $0x964] ss:$16 sps:$4 sm:$0xff]  }
  0x90   : > { %5096 = vmatprep.subr.bf16.mxu1 %v7097_v6  ;;  %v7179_v6 = vld [vmem:[%s8162_s22 + $0xb64] ss:$16 sps:$4 sm:$0xff]  }
  0x92   : > { %5056 = vmatpush1.bf16.msra.mxu0 %v7092_v9  ;;  %v7174_v9 = vld [vmem:[%s8162_s22 + $0x960] ss:$16 sps:$4 sm:$0xff]  }
  0x93   : > { %5097 = vmatpush1.bf16.msra.mxu1 %v7095_v10  ;;  %5057 = vmatprep.subr.bf16.mxu0 %v7100_v11  ;;  %v7177_v10 = vld [vmem:[%s8162_s22 + $0xb60] ss:$16 sps:$4 sm:$0xff]   ;;  %v7182_v11 = vld [vmem:[%s8162_s22 + $0x984] ss:$16 sps:$4 sm:$0xff]  }
  0x94   : > { %5098 = vmatprep.subr.bf16.mxu1 %v7103_v12  ;;  %v7185_v12 = vld [vmem:[%s8162_s22 + $0xb84] ss:$16 sps:$4 sm:$0xff]  }
  0x96   : > { %5058 = vmatpush1.bf16.msra.mxu0 %v7098_v13  ;;  %v7180_v13 = vld [vmem:[%s8162_s22 + $0x980] ss:$16 sps:$4 sm:$0xff]  }
  0x97   : > { %5099 = vmatpush1.bf16.msra.mxu1 %v7101_v14  ;;  %5109 = vmatprep.subr.bf16.mxu0 %v7110_v15  ;;  %v7183_v14 = vld [vmem:[%s8162_s22 + $0xb80] ss:$16 sps:$4 sm:$0xff]   ;;  %v7188_v15 = vld [vmem:[%s8162_s22 + $0x9a4] ss:$16 sps:$4 sm:$0xff]  }
  0x98   : > { %5150 = vmatprep.subr.bf16.mxu1 %v7113_v16  ;;  %v7191_v16 = vld [vmem:[%s8162_s22 + $0xba4] ss:$16 sps:$4 sm:$0xff]  }
  0x99   : > { %5060 = vmatmul.mubr.bf16.vlgmr.msra.gmra.mrb[4].mxu0 %v8339_v17 }
  0x9a   : > { %5101 = vmatmul.mubr.bf16.vlgmr.msra.gmra.mrb[4].mxu1 %v8343_v18  ;;  %5110 = vmatpush1.bf16.msra.mxu0 %v7108_v19  ;;  %v7186_v19 = vld [vmem:[%s8162_s22 + $0x9a0] ss:$16 sps:$4 sm:$0xff]  }
  0x9b   : > { %5151 = vmatpush1.bf16.msra.mxu1 %v7111_v20  ;;  %5111 = vmatprep.subr.bf16.mxu0 %v7116_v21  ;;  %v7189_v20 = vld [vmem:[%s8162_s22 + $0xba0] ss:$16 sps:$4 sm:$0xff]   ;;  %v7194_v21 = vld [vmem:[%s8162_s22 + $0x9c4] ss:$16 sps:$4 sm:$0xff]  }
  0x9c   : > { %5152 = vmatprep.subr.bf16.mxu1 %v7119_v22  ;;  %5141 = vmatprep.mubr.bf16.mxu0 %v8357_v25  ;;  %v7197_v22 = vld [vmem:[%s8162_s22 + $0xbc4] ss:$16 sps:$4 sm:$0xff]  }
  0x9d   : > { %5182 = vmatprep.mubr.bf16.mxu1 %v8361_v26 }
  0x9e   : > { %5112 = vmatpush1.bf16.msra.mxu0 %v7114_v27  ;;  %v7192_v27 = vld [vmem:[%s8162_s22 + $0x9c0] ss:$16 sps:$4 sm:$0xff]  }
  0x9f   : > { %5153 = vmatpush1.bf16.msra.mxu1 %v7117_v28  ;;  %5113 = vmatprep.subr.bf16.mxu0 %v7122_v29  ;;  %v7195_v28 = vld [vmem:[%s8162_s22 + $0xbc0] ss:$16 sps:$4 sm:$0xff]   ;;  %v7200_v29 = vld [vmem:[%s8162_s22 + $0x9e4] ss:$16 sps:$4 sm:$0xff]  }
  0xa0   : > { %5154 = vmatprep.subr.bf16.mxu1 %v7125_v30  ;;  %v7203_v30 = vld [vmem:[%s8162_s22 + $0xbe4] ss:$16 sps:$4 sm:$0xff]  }
  0xa2   : > { %5114 = vmatpush1.bf16.msra.mxu0 %v7120_v31  ;;  %v7198_v31 = vld [vmem:[%s8162_s22 + $0x9e0] ss:$16 sps:$4 sm:$0xff]  }
  0xa3   : > { %5155 = vmatpush1.bf16.msra.mxu1 %v7123_v32  ;;  %5115 = vmatprep.subr.bf16.mxu0 %v7128_v33  ;;  %v7201_v32 = vld [vmem:[%s8162_s22 + $0xbe0] ss:$16 sps:$4 sm:$0xff]   ;;  %v7210_v33 = vld [vmem:[%s8162_s22 + $0xc04] ss:$16 sps:$4 sm:$0xff]  }
  0xa4   : > { %5156 = vmatprep.subr.bf16.mxu1 %v7131_v34  ;;  %v7213_v34 = vld [vmem:[%s8162_s22 + $0xe04] ss:$16 sps:$4 sm:$0xff]  }
  0xa6   : > { %5116 = vmatpush1.bf16.msra.mxu0 %v7126_v35  ;;  %v7208_v35 = vld [vmem:[%s8162_s22 + $0xc00] ss:$16 sps:$4 sm:$0xff]  }
  0xa7   : > { %5157 = vmatpush1.bf16.msra.mxu1 %v7129_v36  ;;  %5117 = vmatprep.subr.bf16.mxu0 %v7134_v39  ;;  %v7211_v36 = vld [vmem:[%s8162_s22 + $0xe00] ss:$16 sps:$4 sm:$0xff]   ;;  %v8431_v39 = vcombine.low %v8350_v23, %v8350_v23 }
  0xa8   : > { %5158 = vmatprep.subr.bf16.mxu1 %v7137_v40  ;;  %v8435_v40 = vcombine.low %v8353_v24, %v8353_v24 }
  0xaa   : > { %5118 = vmatpush1.bf16.msra.mxu0 %v7132_v41  ;;  %v8438_v41 = vld [vmem:[%s8157_s18 + $0x30] sm:$0xff] }
  0xab   : > { %5159 = vmatpush1.bf16.msra.mxu1 %v7135_v42  ;;  %5119 = vmatprep.subr.bf16.mxu0 %v7140_v43  ;;  %v8441_v42 = vld [vmem:[%s8157_s18 + $0x38] sm:$0xff]  ;;  %v7216_v43 = vld [vmem:[%s8162_s22 + $0xc24] ss:$16 sps:$4 sm:$0xff]   ;;  %v8447_v23 = vcombine.high %v8438_v41, %v8438_v41 }
  0xac   : > { %5160 = vmatprep.subr.bf16.mxu1 %v7143_v44  ;;  %v7219_v44 = vld [vmem:[%s8162_s22 + $0xe24] ss:$16 sps:$4 sm:$0xff]   ;;  %v8451_v24 = vcombine.high %v8441_v42, %v8441_v42 }
  0xae   : > { %5120 = vmatpush1.bf16.msra.mxu0 %v7138_v45  ;;  %v7214_v45 = vld [vmem:[%s8162_s22 + $0xc20] ss:$16 sps:$4 sm:$0xff]  }
  0xaf   : > { %5161 = vmatpush1.bf16.msra.mxu1 %v7141_v46  ;;  %5121 = vmatprep.subr.bf16.mxu0 %v7146_v47  ;;  %v7217_v46 = vld [vmem:[%s8162_s22 + $0xe20] ss:$16 sps:$4 sm:$0xff]   ;;  %v7222_v47 = vld [vmem:[%s8162_s22 + $0xc44] ss:$16 sps:$4 sm:$0xff]  }
  0xb0   : > { %5162 = vmatprep.subr.bf16.mxu1 %v7149_v49  ;;  %v7225_v49 = vld [vmem:[%s8162_s22 + $0xe44] ss:$16 sps:$4 sm:$0xff]  }
  0xb2   : > { %5122 = vmatpush1.bf16.msra.mxu0 %v7144_v50  ;;  %v7220_v50 = vld [vmem:[%s8162_s22 + $0xc40] ss:$16 sps:$4 sm:$0xff]  }
  0xb3   : > { %5163 = vmatpush1.bf16.msra.mxu1 %v7147_v51  ;;  %5123 = vmatprep.subr.bf16.mxu0 %v7152_v53  ;;  %v7223_v51 = vld [vmem:[%s8162_s22 + $0xe40] ss:$16 sps:$4 sm:$0xff]   ;;  %v7228_v53 = vld [vmem:[%s8162_s22 + $0xc64] ss:$16 sps:$4 sm:$0xff]  }
  0xb4   : > { %5164 = vmatprep.subr.bf16.mxu1 %v7155_v54  ;;  %v7231_v54 = vld [vmem:[%s8162_s22 + $0xe64] ss:$16 sps:$4 sm:$0xff]  }
  0xb6   : > { %5124 = vmatpush1.bf16.msra.mxu0 %v7150_v55  ;;  %v7226_v55 = vld [vmem:[%s8162_s22 + $0xc60] ss:$16 sps:$4 sm:$0xff]  }
  0xb7   : > { %5165 = vmatpush1.bf16.msra.mxu1 %v7153_v56  ;;  %5125 = vmatprep.subr.bf16.mxu0 %v7158_v57  ;;  %v7229_v56 = vld [vmem:[%s8162_s22 + $0xe60] ss:$16 sps:$4 sm:$0xff]   ;;  %v7234_v57 = vld [vmem:[%s8162_s22 + $0xc84] ss:$16 sps:$4 sm:$0xff]  }
  0xb8   : > { %5166 = vmatprep.subr.bf16.mxu1 %v7161_v58  ;;  %v7237_v58 = vld [vmem:[%s8162_s22 + $0xe84] ss:$16 sps:$4 sm:$0xff]  }
  0xba   : > { %5126 = vmatpush1.bf16.msra.mxu0 %v7156_v59  ;;  %v7232_v59 = vld [vmem:[%s8162_s22 + $0xc80] ss:$16 sps:$4 sm:$0xff]  }
  0xbb   : > { %5167 = vmatpush1.bf16.msra.mxu1 %v7159_v60  ;;  %5127 = vmatprep.subr.bf16.mxu0 %v7164_v61  ;;  %v7235_v60 = vld [vmem:[%s8162_s22 + $0xe80] ss:$16 sps:$4 sm:$0xff]   ;;  %v7240_v61 = vld [vmem:[%s8162_s22 + $0xca4] ss:$16 sps:$4 sm:$0xff]  }
  0xbc   : > { %5168 = vmatprep.subr.bf16.mxu1 %v7167_v62  ;;  %v7243_v62 = vld [vmem:[%s8162_s22 + $0xea4] ss:$16 sps:$4 sm:$0xff]  }
  0xbe   : > { %5128 = vmatpush1.bf16.msra.mxu0 %v7162_v63  ;;  %v7238_v63 = vld [vmem:[%s8162_s22 + $0xca0] ss:$16 sps:$4 sm:$0xff]  }
  0xbf   : > { %5169 = vmatpush1.bf16.msra.mxu1 %v7165_v0  ;;  %5129 = vmatprep.subr.bf16.mxu0 %v7170_v1  ;;  %v7241_v0 = vld [vmem:[%s8162_s22 + $0xea0] ss:$16 sps:$4 sm:$0xff]   ;;  %v7246_v1 = vld [vmem:[%s8162_s22 + $0xcc4] ss:$16 sps:$4 sm:$0xff]  }
  0xc0   : > { %5170 = vmatprep.subr.bf16.mxu1 %v7173_v2  ;;  %v7249_v2 = vld [vmem:[%s8162_s22 + $0xec4] ss:$16 sps:$4 sm:$0xff]  }
  0xc2   : > { %5130 = vmatpush1.bf16.msra.mxu0 %v7168_v3  ;;  %v7244_v3 = vld [vmem:[%s8162_s22 + $0xcc0] ss:$16 sps:$4 sm:$0xff]  }
  0xc3   : > { %5171 = vmatpush1.bf16.msra.mxu1 %v7171_v4  ;;  %5131 = vmatprep.subr.bf16.mxu0 %v7176_v5  ;;  %v7247_v4 = vld [vmem:[%s8162_s22 + $0xec0] ss:$16 sps:$4 sm:$0xff]   ;;  %v7252_v5 = vld [vmem:[%s8162_s22 + $0xce4] ss:$16 sps:$4 sm:$0xff]  }
  0xc4   : > { %5172 = vmatprep.subr.bf16.mxu1 %v7179_v6  ;;  %v7255_v6 = vld [vmem:[%s8162_s22 + $0xee4] ss:$16 sps:$4 sm:$0xff]  }
  0xc6   : > { %5132 = vmatpush1.bf16.msra.mxu0 %v7174_v9  ;;  %v7250_v9 = vld [vmem:[%s8162_s22 + $0xce0] ss:$16 sps:$4 sm:$0xff]  }
  0xc7   : > { %5173 = vmatpush1.bf16.msra.mxu1 %v7177_v10  ;;  %5133 = vmatprep.subr.bf16.mxu0 %v7182_v11  ;;  %v7253_v10 = vld [vmem:[%s8162_s22 + $0xee0] ss:$16 sps:$4 sm:$0xff]   ;;  %v7258_v11 = vld [vmem:[%s8162_s22 + $0xd04] ss:$16 sps:$4 sm:$0xff]  }
  0xc8   : > { %5174 = vmatprep.subr.bf16.mxu1 %v7185_v12  ;;  %v7261_v12 = vld [vmem:[%s8162_s22 + $0xf04] ss:$16 sps:$4 sm:$0xff]  }
  0xca   : > { %5134 = vmatpush1.bf16.msra.mxu0 %v7180_v13  ;;  %v7256_v13 = vld [vmem:[%s8162_s22 + $0xd00] ss:$16 sps:$4 sm:$0xff]  }
  0xcb   : > { %5175 = vmatpush1.bf16.msra.mxu1 %v7183_v14  ;;  %5135 = vmatprep.subr.bf16.mxu0 %v7188_v15  ;;  %v7259_v14 = vld [vmem:[%s8162_s22 + $0xf00] ss:$16 sps:$4 sm:$0xff]   ;;  %v7264_v15 = vld [vmem:[%s8162_s22 + $0xd24] ss:$16 sps:$4 sm:$0xff]  }
  0xcc   : > { %5176 = vmatprep.subr.bf16.mxu1 %v7191_v16  ;;  %v7267_v16 = vld [vmem:[%s8162_s22 + $0xf24] ss:$16 sps:$4 sm:$0xff]  }
  0xce   : > { %5136 = vmatpush1.bf16.msra.mxu0 %v7186_v19  ;;  %v7262_v19 = vld [vmem:[%s8162_s22 + $0xd20] ss:$16 sps:$4 sm:$0xff]  }
  0xcf   : > { %5177 = vmatpush1.bf16.msra.mxu1 %v7189_v20  ;;  %5137 = vmatprep.subr.bf16.mxu0 %v7194_v21  ;;  %v7265_v20 = vld [vmem:[%s8162_s22 + $0xf20] ss:$16 sps:$4 sm:$0xff]   ;;  %v7270_v21 = vld [vmem:[%s8162_s22 + $0xd44] ss:$16 sps:$4 sm:$0xff]  }
  0xd0   : > { %5178 = vmatprep.subr.bf16.mxu1 %v7197_v22  ;;  %v7273_v22 = vld [vmem:[%s8162_s22 + $0xf44] ss:$16 sps:$4 sm:$0xff]  }
  0xd2   : > { %5138 = vmatpush1.bf16.msra.mxu0 %v7192_v27  ;;  %v7268_v27 = vld [vmem:[%s8162_s22 + $0xd40] ss:$16 sps:$4 sm:$0xff]  }
  0xd3   : > { %5179 = vmatpush1.bf16.msra.mxu1 %v7195_v28  ;;  %5139 = vmatprep.subr.bf16.mxu0 %v7200_v29  ;;  %v7271_v28 = vld [vmem:[%s8162_s22 + $0xf40] ss:$16 sps:$4 sm:$0xff]   ;;  %v7276_v29 = vld [vmem:[%s8162_s22 + $0xd64] ss:$16 sps:$4 sm:$0xff]  }
  0xd4   : > { %5180 = vmatprep.subr.bf16.mxu1 %v7203_v30  ;;  %v7279_v30 = vld [vmem:[%s8162_s22 + $0xf64] ss:$16 sps:$4 sm:$0xff]  }
  0xd6   : > { %5140 = vmatpush1.bf16.msra.mxu0 %v7198_v31  ;;  %v7274_v31 = vld [vmem:[%s8162_s22 + $0xd60] ss:$16 sps:$4 sm:$0xff]  }
  0xd7   : > { %5181 = vmatpush1.bf16.msra.mxu1 %v7201_v32  ;;  %5191 = vmatprep.subr.bf16.mxu0 %v7210_v33  ;;  %v7277_v32 = vld [vmem:[%s8162_s22 + $0xf60] ss:$16 sps:$4 sm:$0xff]   ;;  %v7282_v33 = vld [vmem:[%s8162_s22 + $0xd84] ss:$16 sps:$4 sm:$0xff]  }
  0xd8   : > { %5232 = vmatprep.subr.bf16.mxu1 %v7213_v34  ;;  %v7285_v34 = vld [vmem:[%s8162_s22 + $0xf84] ss:$16 sps:$4 sm:$0xff]  }
  0xd9   : > { %5142 = vmatmul.mubr.bf16.vlgmr.msra.gmra.mrb[8].mxu0 %v8431_v39 }
  0xda   : > { %5183 = vmatmul.mubr.bf16.vlgmr.msra.gmra.mrb[8].mxu1 %v8435_v40  ;;  %5192 = vmatpush1.bf16.msra.mxu0 %v7208_v35  ;;  %v7280_v35 = vld [vmem:[%s8162_s22 + $0xd80] ss:$16 sps:$4 sm:$0xff]  }
  0xdb   : > { %5233 = vmatpush1.bf16.msra.mxu1 %v7211_v36  ;;  %5193 = vmatprep.subr.bf16.mxu0 %v7216_v43  ;;  %v7283_v36 = vld [vmem:[%s8162_s22 + $0xf80] ss:$16 sps:$4 sm:$0xff]   ;;  %v7288_v43 = vld [vmem:[%s8162_s22 + $0xda4] ss:$16 sps:$4 sm:$0xff]  }
  0xdc   : > { %5234 = vmatprep.subr.bf16.mxu1 %v7219_v44  ;;  %5223 = vmatprep.mubr.bf16.mxu0 %v8447_v23  ;;  %v7291_v44 = vld [vmem:[%s8162_s22 + $0xfa4] ss:$16 sps:$4 sm:$0xff]  }
  0xdd   : > { %5264 = vmatprep.mubr.bf16.mxu1 %v8451_v24 }
  0xde   : > { %5194 = vmatpush1.bf16.msra.mxu0 %v7214_v45  ;;  %v7286_v45 = vld [vmem:[%s8162_s22 + $0xda0] ss:$16 sps:$4 sm:$0xff]  }
  0xdf   : > { %5235 = vmatpush1.bf16.msra.mxu1 %v7217_v46  ;;  %5195 = vmatprep.subr.bf16.mxu0 %v7222_v47  ;;  %v7289_v46 = vld [vmem:[%s8162_s22 + $0xfa0] ss:$16 sps:$4 sm:$0xff]   ;;  %v7294_v47 = vld [vmem:[%s8162_s22 + $0xdc4] ss:$16 sps:$4 sm:$0xff]  }
  0xe0   : > { %5236 = vmatprep.subr.bf16.mxu1 %v7225_v49  ;;  %v7297_v49 = vld [vmem:[%s8162_s22 + $0xfc4] ss:$16 sps:$4 sm:$0xff]  }
  0xe2   : > { %5196 = vmatpush1.bf16.msra.mxu0 %v7220_v50  ;;  %v7292_v50 = vld [vmem:[%s8162_s22 + $0xdc0] ss:$16 sps:$4 sm:$0xff]  }
  0xe3   : > { %5237 = vmatpush1.bf16.msra.mxu1 %v7223_v51  ;;  %5197 = vmatprep.subr.bf16.mxu0 %v7228_v53  ;;  %v7295_v51 = vld [vmem:[%s8162_s22 + $0xfc0] ss:$16 sps:$4 sm:$0xff]   ;;  %v7300_v53 = vld [vmem:[%s8162_s22 + $0xde4] ss:$16 sps:$4 sm:$0xff]  }
  0xe4   : > { %5238 = vmatprep.subr.bf16.mxu1 %v7231_v54  ;;  %v7303_v54 = vld [vmem:[%s8162_s22 + $0xfe4] ss:$16 sps:$4 sm:$0xff]  }
  0xe6   : > { %5198 = vmatpush1.bf16.msra.mxu0 %v7226_v55  ;;  %v7298_v55 = vld [vmem:[%s8162_s22 + $0xde0] ss:$16 sps:$4 sm:$0xff]  }
  0xe7   : > { %5239 = vmatpush1.bf16.msra.mxu1 %v7229_v56  ;;  %5199 = vmatprep.subr.bf16.mxu0 %v7234_v57  ;;  %v7301_v56 = vld [vmem:[%s8162_s22 + $0xfe0] ss:$16 sps:$4 sm:$0xff]   ;;  %v7310_v57 = vld [vmem:[%s8162_s22 + $0x1004] ss:$16 sps:$4 sm:$0xff]  }
  0xe8   : > { %5240 = vmatprep.subr.bf16.mxu1 %v7237_v58  ;;  %v7313_v58 = vld [vmem:[%s8162_s22 + $0x1204] ss:$16 sps:$4 sm:$0xff]  }
  0xea   : > { %5200 = vmatpush1.bf16.msra.mxu0 %v7232_v59  ;;  %v8518_v59 = vld [vmem:[%s8157_s18 + $0x40] sm:$0xff] }
  0xeb   : > { %5241 = vmatpush1.bf16.msra.mxu1 %v7235_v60  ;;  %5201 = vmatprep.subr.bf16.mxu0 %v7240_v61  ;;  %v8522_v60 = vcombine.low %v8438_v41, %v8438_v41  ;;  %v8526_v61 = vcombine.low %v8441_v42, %v8441_v42  ;;  %v8537_v41 = vcombine.high %v8518_v59, %v8518_v59 }
  0xec   : > { %5242 = vmatprep.subr.bf16.mxu1 %v7243_v62  ;;  %v8529_v62 = vld [vmem:[%s8157_s18 + $0x48] sm:$0xff] }
  0xed   : > { %v8541_v42 = vcombine.high %v8529_v62, %v8529_v62 }
  0xee   : > { %5202 = vmatpush1.bf16.msra.mxu0 %v7238_v63  ;;  %v7308_v63 = vld [vmem:[%s8162_s22 + $0x1000] ss:$16 sps:$4 sm:$0xff]  }
  0xef   : > { %5243 = vmatpush1.bf16.msra.mxu1 %v7241_v0  ;;  %5203 = vmatprep.subr.bf16.mxu0 %v7246_v1  ;;  %v7311_v0 = vld [vmem:[%s8162_s22 + $0x1200] ss:$16 sps:$4 sm:$0xff]   ;;  %v7316_v1 = vld [vmem:[%s8162_s22 + $0x1024] ss:$16 sps:$4 sm:$0xff]  }
  0xf0   : > { %5244 = vmatprep.subr.bf16.mxu1 %v7249_v2  ;;  %v7319_v2 = vld [vmem:[%s8162_s22 + $0x1224] ss:$16 sps:$4 sm:$0xff]  }
  0xf2   : > { %5204 = vmatpush1.bf16.msra.mxu0 %v7244_v3  ;;  %v7314_v3 = vld [vmem:[%s8162_s22 + $0x1020] ss:$16 sps:$4 sm:$0xff]  }
  0xf3   : > { %5245 = vmatpush1.bf16.msra.mxu1 %v7247_v4  ;;  %5205 = vmatprep.subr.bf16.mxu0 %v7252_v5  ;;  %v7317_v4 = vld [vmem:[%s8162_s22 + $0x1220] ss:$16 sps:$4 sm:$0xff]   ;;  %v7322_v5 = vld [vmem:[%s8162_s22 + $0x1044] ss:$16 sps:$4 sm:$0xff]  }
  0xf4   : > { %5246 = vmatprep.subr.bf16.mxu1 %v7255_v6  ;;  %v7325_v6 = vld [vmem:[%s8162_s22 + $0x1244] ss:$16 sps:$4 sm:$0xff]  }
  0xf6   : > { %5206 = vmatpush1.bf16.msra.mxu0 %v7250_v9  ;;  %v7320_v9 = vld [vmem:[%s8162_s22 + $0x1040] ss:$16 sps:$4 sm:$0xff]  }
  0xf7   : > { %5247 = vmatpush1.bf16.msra.mxu1 %v7253_v10  ;;  %5207 = vmatprep.subr.bf16.mxu0 %v7258_v11  ;;  %v7323_v10 = vld [vmem:[%s8162_s22 + $0x1240] ss:$16 sps:$4 sm:$0xff]   ;;  %v7328_v11 = vld [vmem:[%s8162_s22 + $0x1064] ss:$16 sps:$4 sm:$0xff]  }
  0xf8   : > { %5248 = vmatprep.subr.bf16.mxu1 %v7261_v12  ;;  %v7331_v12 = vld [vmem:[%s8162_s22 + $0x1264] ss:$16 sps:$4 sm:$0xff]  }
  0xfa   : > { %5208 = vmatpush1.bf16.msra.mxu0 %v7256_v13  ;;  %v7326_v13 = vld [vmem:[%s8162_s22 + $0x1060] ss:$16 sps:$4 sm:$0xff]  }
  0xfb   : > { %5249 = vmatpush1.bf16.msra.mxu1 %v7259_v14  ;;  %5209 = vmatprep.subr.bf16.mxu0 %v7264_v15  ;;  %v7329_v14 = vld [vmem:[%s8162_s22 + $0x1260] ss:$16 sps:$4 sm:$0xff]   ;;  %v7334_v15 = vld [vmem:[%s8162_s22 + $0x1084] ss:$16 sps:$4 sm:$0xff]  }
  0xfc   : > { %5250 = vmatprep.subr.bf16.mxu1 %v7267_v16  ;;  %v7337_v16 = vld [vmem:[%s8162_s22 + $0x1284] ss:$16 sps:$4 sm:$0xff]  }
  0xfe   : > { %5210 = vmatpush1.bf16.msra.mxu0 %v7262_v19  ;;  %v7332_v19 = vld [vmem:[%s8162_s22 + $0x1080] ss:$16 sps:$4 sm:$0xff]  }
  0xff   : > { %5251 = vmatpush1.bf16.msra.mxu1 %v7265_v20  ;;  %5211 = vmatprep.subr.bf16.mxu0 %v7270_v21  ;;  %v7335_v20 = vld [vmem:[%s8162_s22 + $0x1280] ss:$16 sps:$4 sm:$0xff]   ;;  %v7340_v21 = vld [vmem:[%s8162_s22 + $0x10a4] ss:$16 sps:$4 sm:$0xff]  }
 0x100   : > { %5252 = vmatprep.subr.bf16.mxu1 %v7273_v22  ;;  %v7343_v22 = vld [vmem:[%s8162_s22 + $0x12a4] ss:$16 sps:$4 sm:$0xff]  }
 0x102   : > { %5212 = vmatpush1.bf16.msra.mxu0 %v7268_v27  ;;  %v7338_v27 = vld [vmem:[%s8162_s22 + $0x10a0] ss:$16 sps:$4 sm:$0xff]  }
 0x103   : > { %5253 = vmatpush1.bf16.msra.mxu1 %v7271_v28  ;;  %5213 = vmatprep.subr.bf16.mxu0 %v7276_v29  ;;  %v7341_v28 = vld [vmem:[%s8162_s22 + $0x12a0] ss:$16 sps:$4 sm:$0xff]   ;;  %v7346_v29 = vld [vmem:[%s8162_s22 + $0x10c4] ss:$16 sps:$4 sm:$0xff]  }
 0x104   : > { %5254 = vmatprep.subr.bf16.mxu1 %v7279_v30  ;;  %v7349_v30 = vld [vmem:[%s8162_s22 + $0x12c4] ss:$16 sps:$4 sm:$0xff]  }
 0x106   : > { %5214 = vmatpush1.bf16.msra.mxu0 %v7274_v31 }
 0x107   : > { %5255 = vmatpush1.bf16.msra.mxu1 %v7277_v32  ;;  %5215 = vmatprep.subr.bf16.mxu0 %v7282_v33  ;;  %v7344_v33 = vld [vmem:[%s8162_s22 + $0x10c0] ss:$16 sps:$4 sm:$0xff]  }
 0x108   : > { %5256 = vmatprep.subr.bf16.mxu1 %v7285_v34  ;;  %v7347_v34 = vld [vmem:[%s8162_s22 + $0x12c0] ss:$16 sps:$4 sm:$0xff]  }
 0x10a   : > { %5216 = vmatpush1.bf16.msra.mxu0 %v7280_v35 }
 0x10b   : > { %5257 = vmatpush1.bf16.msra.mxu1 %v7283_v36  ;;  %5217 = vmatprep.subr.bf16.mxu0 %v7288_v43 }
 0x10c   : > { %5258 = vmatprep.subr.bf16.mxu1 %v7291_v44 }
 0x10e   : > { %5218 = vmatpush1.bf16.msra.mxu0 %v7286_v45 }
 0x10f   : > { %5259 = vmatpush1.bf16.msra.mxu1 %v7289_v46  ;;  %5219 = vmatprep.subr.bf16.mxu0 %v7294_v47 }
 0x110   : > { %5260 = vmatprep.subr.bf16.mxu1 %v7297_v49 }
 0x112   : > { %5220 = vmatpush1.bf16.msra.mxu0 %v7292_v50  ;;  %v7352_v50 = vld [vmem:[%s8162_s22 + $0x10e4] ss:$16 sps:$4 sm:$0xff]  }
 0x113   : > { %5261 = vmatpush1.bf16.msra.mxu1 %v7295_v51  ;;  %5221 = vmatprep.subr.bf16.mxu0 %v7300_v53  ;;  %v7355_v51 = vld [vmem:[%s8162_s22 + $0x12e4] ss:$16 sps:$4 sm:$0xff]   ;;  %v7350_v53 = vld [vmem:[%s8162_s22 + $0x10e0] ss:$16 sps:$4 sm:$0xff]  }
 0x114   : > { %5262 = vmatprep.subr.bf16.mxu1 %v7303_v54  ;;  %v7353_v54 = vld [vmem:[%s8162_s22 + $0x12e0] ss:$16 sps:$4 sm:$0xff]  }
 0x116   : > { %5222 = vmatpush1.bf16.msra.mxu0 %v7298_v55  ;;  %v7358_v55 = vld [vmem:[%s8162_s22 + $0x1104] ss:$16 sps:$4 sm:$0xff]  }
 0x117   : > { %5263 = vmatpush1.bf16.msra.mxu1 %v7301_v56  ;;  %5273 = vmatprep.subr.bf16.mxu0 %v7310_v57  ;;  %v7361_v56 = vld [vmem:[%s8162_s22 + $0x1304] ss:$16 sps:$4 sm:$0xff]   ;;  %v7356_v57 = vld [vmem:[%s8162_s22 + $0x1100] ss:$16 sps:$4 sm:$0xff]  }
 0x118   : > { %5314 = vmatprep.subr.bf16.mxu1 %v7313_v58  ;;  %v7359_v58 = vld [vmem:[%s8162_s22 + $0x1300] ss:$16 sps:$4 sm:$0xff]  }
 0x119   : > { %5224 = vmatmul.mubr.bf16.vlgmr.msra.gmra.mrb[12].mxu0 %v8522_v60 }
 0x11a   : > { %5265 = vmatmul.mubr.bf16.vlgmr.msra.gmra.mrb[12].mxu1 %v8526_v61  ;;  %5274 = vmatpush1.bf16.msra.mxu0 %v7308_v63  ;;  %v7364_v63 = vld [vmem:[%s8162_s22 + $0x1124] ss:$16 sps:$4 sm:$0xff]  }
 0x11b   : > { %5315 = vmatpush1.bf16.msra.mxu1 %v7311_v0  ;;  %5275 = vmatprep.subr.bf16.mxu0 %v7316_v1  ;;  %v7367_v0 = vld [vmem:[%s8162_s22 + $0x1324] ss:$16 sps:$4 sm:$0xff]   ;;  %v7362_v1 = vld [vmem:[%s8162_s22 + $0x1120] ss:$16 sps:$4 sm:$0xff]  }
 0x11c   : > { %5316 = vmatprep.subr.bf16.mxu1 %v7319_v2  ;;  %5305 = vmatprep.mubr.bf16.mxu0 %v8537_v41  ;;  %v7365_v2 = vld [vmem:[%s8162_s22 + $0x1320] ss:$16 sps:$4 sm:$0xff]  }
 0x11d   : > { %5346 = vmatprep.mubr.bf16.mxu1 %v8541_v42 }
 0x11e   : > { %5276 = vmatpush1.bf16.msra.mxu0 %v7314_v3  ;;  %v7370_v3 = vld [vmem:[%s8162_s22 + $0x1144] ss:$16 sps:$4 sm:$0xff]  }
 0x11f   : > { %5317 = vmatpush1.bf16.msra.mxu1 %v7317_v4  ;;  %5277 = vmatprep.subr.bf16.mxu0 %v7322_v5  ;;  %v7373_v4 = vld [vmem:[%s8162_s22 + $0x1344] ss:$16 sps:$4 sm:$0xff]   ;;  %v7368_v5 = vld [vmem:[%s8162_s22 + $0x1140] ss:$16 sps:$4 sm:$0xff]  }
 0x120   : > { %5318 = vmatprep.subr.bf16.mxu1 %v7325_v6  ;;  %v7371_v6 = vld [vmem:[%s8162_s22 + $0x1340] ss:$16 sps:$4 sm:$0xff]  }
 0x122   : > { %5278 = vmatpush1.bf16.msra.mxu0 %v7320_v9  ;;  %v7376_v9 = vld [vmem:[%s8162_s22 + $0x1164] ss:$16 sps:$4 sm:$0xff]  }
 0x123   : > { %5319 = vmatpush1.bf16.msra.mxu1 %v7323_v10  ;;  %5279 = vmatprep.subr.bf16.mxu0 %v7328_v11  ;;  %v7379_v10 = vld [vmem:[%s8162_s22 + $0x1364] ss:$16 sps:$4 sm:$0xff]   ;;  %v7374_v11 = vld [vmem:[%s8162_s22 + $0x1160] ss:$16 sps:$4 sm:$0xff]  }
 0x124   : > { %5320 = vmatprep.subr.bf16.mxu1 %v7331_v12  ;;  %v7377_v12 = vld [vmem:[%s8162_s22 + $0x1360] ss:$16 sps:$4 sm:$0xff]  }
 0x126   : > { %5280 = vmatpush1.bf16.msra.mxu0 %v7326_v13  ;;  %v7382_v13 = vld [vmem:[%s8162_s22 + $0x1184] ss:$16 sps:$4 sm:$0xff]  }
 0x127   : > { %5321 = vmatpush1.bf16.msra.mxu1 %v7329_v14  ;;  %5281 = vmatprep.subr.bf16.mxu0 %v7334_v15  ;;  %v7385_v14 = vld [vmem:[%s8162_s22 + $0x1384] ss:$16 sps:$4 sm:$0xff]   ;;  %v7380_v15 = vld [vmem:[%s8162_s22 + $0x1180] ss:$16 sps:$4 sm:$0xff]  }
 0x128   : > { %5322 = vmatprep.subr.bf16.mxu1 %v7337_v16  ;;  %v7383_v16 = vld [vmem:[%s8162_s22 + $0x1380] ss:$16 sps:$4 sm:$0xff]  }
 0x12a   : > { %5282 = vmatpush1.bf16.msra.mxu0 %v7332_v19  ;;  %v7388_v19 = vld [vmem:[%s8162_s22 + $0x11a4] ss:$16 sps:$4 sm:$0xff]  }
 0x12b   : > { %5323 = vmatpush1.bf16.msra.mxu1 %v7335_v20  ;;  %5283 = vmatprep.subr.bf16.mxu0 %v7340_v21  ;;  %v7391_v20 = vld [vmem:[%s8162_s22 + $0x13a4] ss:$16 sps:$4 sm:$0xff]   ;;  %v7386_v21 = vld [vmem:[%s8162_s22 + $0x11a0] ss:$16 sps:$4 sm:$0xff]  }
 0x12c   : > { %5324 = vmatprep.subr.bf16.mxu1 %v7343_v22  ;;  %v4979_v31 = vpop.f32.mrb[0].mxu0  ;;  %v7389_v22 = vld [vmem:[%s8162_s22 + $0x13a0] ss:$16 sps:$4 sm:$0xff]  }
 0x12d   : > { %v5020_v32 = vpop.f32.mrb[0].mxu1  ;;  %v4981_v36 = vpop.f32.mrb[1].mxu0 }
 0x12e   : > { %v8569_v35 = vadd.f32 %v5020_v32, %v4979_v31  ;;  %v5022_v43 = vpop.f32.mrb[1].mxu1  ;;  %v4983_v45 = vpop.f32.mrb[2].mxu0  ;;  %5284 = vmatpush1.bf16.msra.mxu0 %v7338_v27  ;;  %v7394_v27 = vld [vmem:[%s8162_s22 + $0x11c4] ss:$16 sps:$4 sm:$0xff]  }
 0x12f   : > { %v8571_v44 = vadd.f32 %v5022_v43, %v4981_v36  ;;  %v5024_v46 = vpop.f32.mrb[2].mxu1  ;;  %5325 = vmatpush1.bf16.msra.mxu1 %v7341_v28  ;;  %v4984_v47 = vpop.f32.mrb[3].mxu0  ;;  %5285 = vmatprep.subr.bf16.mxu0 %v7346_v29  ;;  %v7397_v28 = vld [vmem:[%s8162_s22 + $0x13c4] ss:$16 sps:$4 sm:$0xff]   ;;  %v7392_v29 = vld [vmem:[%s8162_s22 + $0x11c0] ss:$16 sps:$4 sm:$0xff]  }
 0x130   : > { %v5025_v49 = vpop.f32.mrb[3].mxu1  ;;  %5326 = vmatprep.subr.bf16.mxu1 %v7349_v30  ;;  %v7395_v30 = vld [vmem:[%s8162_s22 + $0x13c0] ss:$16 sps:$4 sm:$0xff]   ;;  %v7400_v31 = vld [vmem:[%s8162_s22 + $0x11e4] ss:$16 sps:$4 sm:$0xff]   ;;  %v8615_v46 = vld [vmem:[%s8157_s18 + $0x58] sm:$0xff] }
 0x131   : > { %v7403_v32 = vld [vmem:[%s8162_s22 + $0x13e4] ss:$16 sps:$4 sm:$0xff]   ;;  %v7408_v47 = vld [vmem:[%s8162_s22 + $0x1400] ss:$16 sps:$4 sm:$0xff]  }
 0x132   : > { %5286 = vmatpush1.bf16.msra.mxu0 %v7344_v33  ;;  %v7398_v33 = vld [vmem:[%s8162_s22 + $0x11e0] ss:$16 sps:$4 sm:$0xff]   ;;  %v7410_v36 = vld [vmem:[%s8162_s22 + $0x1404] ss:$16 sps:$4 sm:$0xff]  }
 0x133   : > { %5327 = vmatpush1.bf16.msra.mxu1 %v7347_v34  ;;  %5287 = vmatprep.subr.bf16.mxu0 %v7352_v50  ;;  %v7401_v34 = vld [vmem:[%s8162_s22 + $0x13e0] ss:$16 sps:$4 sm:$0xff]   ;;  %v7413_v43 = vld [vmem:[%s8162_s22 + $0x1604] ss:$16 sps:$4 sm:$0xff]   ;;  %v8621_v50 = vcombine.low %v8518_v59, %v8518_v59  ;;  %v8635_v59 = vcombine.high %v8615_v46, %v8615_v46 }
 0x134   : > { %5328 = vmatprep.subr.bf16.mxu1 %v7355_v51  ;;  %v8612_v45 = vld [vmem:[%s8157_s18 + $0x50] sm:$0xff]  ;;  %v8625_v51 = vcombine.low %v8529_v62, %v8529_v62 }
 0x135   : > { %v7411_v49 = vld [vmem:[%s8162_s22 + $0x1600] ss:$16 sps:$4 sm:$0xff]  }
 0x136   : > { %5288 = vmatpush1.bf16.msra.mxu0 %v7350_v53  ;;  %v7416_v53 = vld [vmem:[%s8162_s22 + $0x1424] ss:$16 sps:$4 sm:$0xff]   ;;  %v7414_v62 = vld [vmem:[%s8162_s22 + $0x1420] ss:$16 sps:$4 sm:$0xff]  }
 0x137   : > { %5329 = vmatpush1.bf16.msra.mxu1 %v7353_v54  ;;  %5289 = vmatprep.subr.bf16.mxu0 %v7358_v55  ;;  %v7419_v54 = vld [vmem:[%s8162_s22 + $0x1624] ss:$16 sps:$4 sm:$0xff]   ;;  %v8631_v55 = vcombine.high %v8612_v45, %v8612_v45 }
 0x138   : > { %5330 = vmatprep.subr.bf16.mxu1 %v7361_v56  ;;  %v7417_v56 = vld [vmem:[%s8162_s22 + $0x1620] ss:$16 sps:$4 sm:$0xff]  }
 0x13a   : > { %5290 = vmatpush1.bf16.msra.mxu0 %v7356_v57  ;;  %v7422_v57 = vld [vmem:[%s8162_s22 + $0x1444] ss:$16 sps:$4 sm:$0xff]  }
 0x13b   : > { %5331 = vmatpush1.bf16.msra.mxu1 %v7359_v58  ;;  %5291 = vmatprep.subr.bf16.mxu0 %v7364_v63  ;;  %v7425_v58 = vld [vmem:[%s8162_s22 + $0x1644] ss:$16 sps:$4 sm:$0xff]   ;;  %v7420_v63 = vld [vmem:[%s8162_s22 + $0x1440] ss:$16 sps:$4 sm:$0xff]  }
 0x13c   : > { %5332 = vmatprep.subr.bf16.mxu1 %v7367_v0  ;;  %v7423_v0 = vld [vmem:[%s8162_s22 + $0x1640] ss:$16 sps:$4 sm:$0xff]  }
 0x13e   : > { %5292 = vmatpush1.bf16.msra.mxu0 %v7362_v1  ;;  %v7428_v1 = vld [vmem:[%s8162_s22 + $0x1464] ss:$16 sps:$4 sm:$0xff]  }
 0x13f   : > { %5333 = vmatpush1.bf16.msra.mxu1 %v7365_v2  ;;  %5293 = vmatprep.subr.bf16.mxu0 %v7370_v3  ;;  %v7431_v2 = vld [vmem:[%s8162_s22 + $0x1664] ss:$16 sps:$4 sm:$0xff]   ;;  %v7426_v3 = vld [vmem:[%s8162_s22 + $0x1460] ss:$16 sps:$4 sm:$0xff]  }
 0x140   : > { %5334 = vmatprep.subr.bf16.mxu1 %v7373_v4  ;;  %v7429_v4 = vld [vmem:[%s8162_s22 + $0x1660] ss:$16 sps:$4 sm:$0xff]  }
 0x142   : > { %5294 = vmatpush1.bf16.msra.mxu0 %v7368_v5  ;;  %v7434_v5 = vld [vmem:[%s8162_s22 + $0x1484] ss:$16 sps:$4 sm:$0xff]  }
 0x143   : > { %5335 = vmatpush1.bf16.msra.mxu1 %v7371_v6  ;;  %5295 = vmatprep.subr.bf16.mxu0 %v7376_v9  ;;  %v7437_v6 = vld [vmem:[%s8162_s22 + $0x1684] ss:$16 sps:$4 sm:$0xff]   ;;  %v7432_v9 = vld [vmem:[%s8162_s22 + $0x1480] ss:$16 sps:$4 sm:$0xff]  }
 0x144   : > { %5336 = vmatprep.subr.bf16.mxu1 %v7379_v10  ;;  %v7435_v10 = vld [vmem:[%s8162_s22 + $0x1680] ss:$16 sps:$4 sm:$0xff]  }
 0x146   : > { %5296 = vmatpush1.bf16.msra.mxu0 %v7374_v11  ;;  %v7440_v11 = vld [vmem:[%s8162_s22 + $0x14a4] ss:$16 sps:$4 sm:$0xff]  }
 0x147   : > { %5337 = vmatpush1.bf16.msra.mxu1 %v7377_v12  ;;  %5297 = vmatprep.subr.bf16.mxu0 %v7382_v13  ;;  %v7443_v12 = vld [vmem:[%s8162_s22 + $0x16a4] ss:$16 sps:$4 sm:$0xff]   ;;  %v7438_v13 = vld [vmem:[%s8162_s22 + $0x14a0] ss:$16 sps:$4 sm:$0xff]  }
 0x148   : > { %5338 = vmatprep.subr.bf16.mxu1 %v7385_v14  ;;  %v7441_v14 = vld [vmem:[%s8162_s22 + $0x16a0] ss:$16 sps:$4 sm:$0xff]  }
 0x14a   : > { %5298 = vmatpush1.bf16.msra.mxu0 %v7380_v15  ;;  %v7446_v15 = vld [vmem:[%s8162_s22 + $0x14c4] ss:$16 sps:$4 sm:$0xff]  }
 0x14b   : > { %5339 = vmatpush1.bf16.msra.mxu1 %v7383_v16  ;;  %5299 = vmatprep.subr.bf16.mxu0 %v7388_v19  ;;  %v7449_v16 = vld [vmem:[%s8162_s22 + $0x16c4] ss:$16 sps:$4 sm:$0xff]  }
 0x14c   : > { %5340 = vmatprep.subr.bf16.mxu1 %v7391_v20 }
 0x14e   : > { %5300 = vmatpush1.bf16.msra.mxu0 %v7386_v21  ;;  %v7444_v21 = vld [vmem:[%s8162_s22 + $0x14c0] ss:$16 sps:$4 sm:$0xff]  }
 0x14f   : > { %5341 = vmatpush1.bf16.msra.mxu1 %v7389_v22  ;;  %5301 = vmatprep.subr.bf16.mxu0 %v7394_v27  ;;  %v7447_v22 = vld [vmem:[%s8162_s22 + $0x16c0] ss:$16 sps:$4 sm:$0xff]  }
 0x150   : > { %5342 = vmatprep.subr.bf16.mxu1 %v7397_v28 }
 0x152   : > { %5302 = vmatpush1.bf16.msra.mxu0 %v7392_v29 }
 0x153   : > { %5343 = vmatpush1.bf16.msra.mxu1 %v7395_v30  ;;  %5303 = vmatprep.subr.bf16.mxu0 %v7400_v31 }
 0x154   : > { %5344 = vmatprep.subr.bf16.mxu1 %v7403_v32 }
 0x156   : > { %5304 = vmatpush1.bf16.msra.mxu0 %v7398_v33 }
 0x157   : > { %5345 = vmatpush1.bf16.msra.mxu1 %v7401_v34  ;;  %5355 = vmatprep.subr.bf16.mxu0 %v7410_v36 }
 0x158   : > { %5396 = vmatprep.subr.bf16.mxu1 %v7413_v43  ;;  %v7455_v43 = vld [vmem:[%s8162_s22 + $0x16e4] ss:$16 sps:$4 sm:$0xff]  }
 0x159   : > { %5306 = vmatmul.mubr.bf16.vlgmr.msra.gmra.mrb[16].mxu0 %v8621_v50 }
 0x15a   : > { %5347 = vmatmul.mubr.bf16.vlgmr.msra.gmra.mrb[16].mxu1 %v8625_v51  ;;  %5356 = vmatpush1.bf16.msra.mxu0 %v7408_v47 }
 0x15b   : > { %5397 = vmatpush1.bf16.msra.mxu1 %v7411_v49  ;;  %5357 = vmatprep.subr.bf16.mxu0 %v7416_v53  ;;  %v7453_v49 = vld [vmem:[%s8162_s22 + $0x16e0] ss:$16 sps:$4 sm:$0xff]   ;;  %v7458_v53 = vld [vmem:[%s8162_s22 + $0x1504] ss:$16 sps:$4 sm:$0xff]  }
 0x15c   : > { %5398 = vmatprep.subr.bf16.mxu1 %v7419_v54  ;;  %5387 = vmatprep.mubr.bf16.mxu0 %v8631_v55  ;;  %v7461_v54 = vld [vmem:[%s8162_s22 + $0x1704] ss:$16 sps:$4 sm:$0xff]  }
 0x15d   : > { %5428 = vmatprep.mubr.bf16.mxu1 %v8635_v59 }
 0x15e   : > { %5358 = vmatpush1.bf16.msra.mxu0 %v7414_v62  ;;  %v7456_v62 = vld [vmem:[%s8162_s22 + $0x1500] ss:$16 sps:$4 sm:$0xff]  }
 0x15f   : > { %5399 = vmatpush1.bf16.msra.mxu1 %v7417_v56  ;;  %5359 = vmatprep.subr.bf16.mxu0 %v7422_v57  ;;  %v7459_v56 = vld [vmem:[%s8162_s22 + $0x1700] ss:$16 sps:$4 sm:$0xff]   ;;  %v7464_v57 = vld [vmem:[%s8162_s22 + $0x1524] ss:$16 sps:$4 sm:$0xff]  }
 0x160   : > { %5400 = vmatprep.subr.bf16.mxu1 %v7425_v58  ;;  %v7467_v58 = vld [vmem:[%s8162_s22 + $0x1724] ss:$16 sps:$4 sm:$0xff]  }
 0x162   : > { %5360 = vmatpush1.bf16.msra.mxu0 %v7420_v63  ;;  %v7462_v63 = vld [vmem:[%s8162_s22 + $0x1520] ss:$16 sps:$4 sm:$0xff]  }
 0x163   : > { %5401 = vmatpush1.bf16.msra.mxu1 %v7423_v0  ;;  %5361 = vmatprep.subr.bf16.mxu0 %v7428_v1  ;;  %v7465_v0 = vld [vmem:[%s8162_s22 + $0x1720] ss:$16 sps:$4 sm:$0xff]   ;;  %v7470_v1 = vld [vmem:[%s8162_s22 + $0x1544] ss:$16 sps:$4 sm:$0xff]  }
 0x164   : > { %5402 = vmatprep.subr.bf16.mxu1 %v7431_v2  ;;  %v7473_v2 = vld [vmem:[%s8162_s22 + $0x1744] ss:$16 sps:$4 sm:$0xff]  }
 0x166   : > { %5362 = vmatpush1.bf16.msra.mxu0 %v7426_v3  ;;  %v7468_v3 = vld [vmem:[%s8162_s22 + $0x1540] ss:$16 sps:$4 sm:$0xff]  }
 0x167   : > { %5403 = vmatpush1.bf16.msra.mxu1 %v7429_v4  ;;  %5363 = vmatprep.subr.bf16.mxu0 %v7434_v5  ;;  %v7471_v4 = vld [vmem:[%s8162_s22 + $0x1740] ss:$16 sps:$4 sm:$0xff]   ;;  %v7476_v5 = vld [vmem:[%s8162_s22 + $0x1564] ss:$16 sps:$4 sm:$0xff]  }
 0x168   : > { %5404 = vmatprep.subr.bf16.mxu1 %v7437_v6  ;;  %v7479_v6 = vld [vmem:[%s8162_s22 + $0x1764] ss:$16 sps:$4 sm:$0xff]  }
 0x16a   : > { %5364 = vmatpush1.bf16.msra.mxu0 %v7432_v9  ;;  %v7474_v9 = vld [vmem:[%s8162_s22 + $0x1560] ss:$16 sps:$4 sm:$0xff]  }
 0x16b   : > { %5405 = vmatpush1.bf16.msra.mxu1 %v7435_v10  ;;  %5365 = vmatprep.subr.bf16.mxu0 %v7440_v11  ;;  %v7477_v10 = vld [vmem:[%s8162_s22 + $0x1760] ss:$16 sps:$4 sm:$0xff]   ;;  %v7482_v11 = vld [vmem:[%s8162_s22 + $0x1584] ss:$16 sps:$4 sm:$0xff]  }
 0x16c   : > { %5406 = vmatprep.subr.bf16.mxu1 %v7443_v12  ;;  %v5061_v19 = vpop.f32.mrb[4].mxu0  ;;  %v7485_v12 = vld [vmem:[%s8162_s22 + $0x1784] ss:$16 sps:$4 sm:$0xff]  }
 0x16d   : > { %v5102_v20 = vpop.f32.mrb[4].mxu1  ;;  %v5062_v27 = vadd.f32 %v5061_v19, %v8569_v35  ;;  %v5063_v28 = vpop.f32.mrb[5].mxu0  ;;  %v7452_v35 = vld [vmem:[%s8162_s22 + $0x14e4] ss:$16 sps:$4 sm:$0xff]   ;;  %v7486_v19 = vld [vmem:[%s8162_s22 + $0x15a0] ss:$16 sps:$4 sm:$0xff]  }
 0x16e   : > { %v5104_v29 = vpop.f32.mrb[5].mxu1  ;;  %v5064_v30 = vadd.f32 %v5063_v28, %v8571_v44  ;;  %v5065_v31 = vpop.f32.mrb[6].mxu0  ;;  %5366 = vmatpush1.bf16.msra.mxu0 %v7438_v13  ;;  %v7450_v44 = vld [vmem:[%s8162_s22 + $0x14e0] ss:$16 sps:$4 sm:$0xff]  }
 0x16f   : > { %v5106_v32 = vpop.f32.mrb[6].mxu1  ;;  %5407 = vmatpush1.bf16.msra.mxu1 %v7441_v14  ;;  %v8665_v33 = vadd.f32 %v5102_v20, %v5062_v27  ;;  %v5066_v34 = vpop.f32.mrb[7].mxu0  ;;  %5367 = vmatprep.subr.bf16.mxu0 %v7446_v15  ;;  %v7480_v13 = vld [vmem:[%s8162_s22 + $0x1580] ss:$16 sps:$4 sm:$0xff]   ;;  %v7488_v15 = vld [vmem:[%s8162_s22 + $0x15a4] ss:$16 sps:$4 sm:$0xff]  }
 0x170   : > { %v5107_v36 = vpop.f32.mrb[7].mxu1  ;;  %5408 = vmatprep.subr.bf16.mxu1 %v7449_v16  ;;  %v8669_v47 = vadd.f32 %v5104_v29, %v5064_v30  ;;  %v7483_v14 = vld [vmem:[%s8162_s22 + $0x1780] ss:$16 sps:$4 sm:$0xff]   ;;  %v7491_v16 = vld [vmem:[%s8162_s22 + $0x17a4] ss:$16 sps:$4 sm:$0xff]  }
 0x171   : > { %v7489_v20 = vld [vmem:[%s8162_s22 + $0x17a0] ss:$16 sps:$4 sm:$0xff]   ;;  %v7500_v29 = vld [vmem:[%s8162_s22 + $0x15e4] ss:$16 sps:$4 sm:$0xff]   ;;  %v7510_v34 = vld [vmem:[%s8162_s22 + $0xc] ss:$16 sps:$4 sm:$0xff]  }
 0x172   : > { %5368 = vmatpush1.bf16.msra.mxu0 %v7444_v21  ;;  %v7494_v21 = vld [vmem:[%s8162_s22 + $0x15c4] ss:$16 sps:$4 sm:$0xff]   ;;  %v7492_v27 = vld [vmem:[%s8162_s22 + $0x15c0] ss:$16 sps:$4 sm:$0xff]   ;;  %v7513_v36 = vld [vmem:[%s8162_s22 + $0x20c] ss:$16 sps:$4 sm:$0xff]  }
 0x173   : > { %5409 = vmatpush1.bf16.msra.mxu1 %v7447_v22  ;;  %5369 = vmatprep.subr.bf16.mxu0 %v7452_v35  ;;  %v7497_v22 = vld [vmem:[%s8162_s22 + $0x17c4] ss:$16 sps:$4 sm:$0xff]   ;;  %v7495_v28 = vld [vmem:[%s8162_s22 + $0x17c0] ss:$16 sps:$4 sm:$0xff]   ;;  %v7508_v35 = vld [vmem:[%s8162_s22 + $0x8] ss:$16 sps:$4 sm:$0xff]  }
 0x174   : > { %5410 = vmatprep.subr.bf16.mxu1 %v7455_v43  ;;  %v7503_v30 = vld [vmem:[%s8162_s22 + $0x17e4] ss:$16 sps:$4 sm:$0xff]   ;;  %v7498_v31 = vld [vmem:[%s8162_s22 + $0x15e0] ss:$16 sps:$4 sm:$0xff]   ;;  %v7511_v43 = vld [vmem:[%s8162_s22 + $0x208] ss:$16 sps:$4 sm:$0xff]  }
 0x175   : > { %v7501_v32 = vld [vmem:[%s8162_s22 + $0x17e0] ss:$16 sps:$4 sm:$0xff]  }
 0x176   : > { %5370 = vmatpush1.bf16.msra.mxu0 %v7450_v44  ;;  %v8711_v44 = vcombine.low %v8612_v45, %v8612_v45  ;;  %v7514_v45 = vld [vmem:[%s8162_s22 + $0x28] ss:$16 sps:$4 sm:$0xff]  }
 0x177   : > { %5411 = vmatpush1.bf16.msra.mxu1 %v7453_v49  ;;  %5371 = vmatprep.subr.bf16.mxu0 %v7458_v53  ;;  %v8715_v49 = vcombine.low %v8615_v46, %v8615_v46  ;;  %v7516_v53 = vld [vmem:[%s8162_s22 + $0x2c] ss:$16 sps:$4 sm:$0xff]   ;;  %v7517_v46 = vld [vmem:[%s8162_s22 + $0x228] ss:$16 sps:$4 sm:$0xff]  }
 0x178   : > { %5412 = vmatprep.subr.bf16.mxu1 %v7461_v54  ;;  %v7519_v54 = vld [vmem:[%s8162_s22 + $0x22c] ss:$16 sps:$4 sm:$0xff]  }
 0x17a   : > { %5372 = vmatpush1.bf16.msra.mxu0 %v7456_v62  ;;  %v7522_v62 = vld [vmem:[%s8162_s22 + $0x4c] ss:$16 sps:$4 sm:$0xff]  }
 0x17b   : > { %5413 = vmatpush1.bf16.msra.mxu1 %v7459_v56  ;;  %5373 = vmatprep.subr.bf16.mxu0 %v7464_v57  ;;  %v7525_v56 = vld [vmem:[%s8162_s22 + $0x24c] ss:$16 sps:$4 sm:$0xff]   ;;  %v7520_v57 = vld [vmem:[%s8162_s22 + $0x48] ss:$16 sps:$4 sm:$0xff]  }
 0x17c   : > { %5414 = vmatprep.subr.bf16.mxu1 %v7467_v58  ;;  %v7523_v58 = vld [vmem:[%s8162_s22 + $0x248] ss:$16 sps:$4 sm:$0xff]  }
 0x17e   : > { %5374 = vmatpush1.bf16.msra.mxu0 %v7462_v63  ;;  %v7528_v63 = vld [vmem:[%s8162_s22 + $0x6c] ss:$16 sps:$4 sm:$0xff]  }
 0x17f   : > { %5415 = vmatpush1.bf16.msra.mxu1 %v7465_v0  ;;  %5375 = vmatprep.subr.bf16.mxu0 %v7470_v1  ;;  %v7531_v0 = vld [vmem:[%s8162_s22 + $0x26c] ss:$16 sps:$4 sm:$0xff]   ;;  %v7529_v1 = vld [vmem:[%s8162_s22 + $0x268] ss:$16 sps:$4 sm:$0xff]  }
 0x180   : > { %5416 = vmatprep.subr.bf16.mxu1 %v7473_v2  ;;  %v7537_v2 = vld [vmem:[%s8162_s22 + $0x28c] ss:$16 sps:$4 sm:$0xff]  }
 0x182   : > { %5376 = vmatpush1.bf16.msra.mxu0 %v7468_v3  ;;  %v7532_v3 = vld [vmem:[%s8162_s22 + $0x88] ss:$16 sps:$4 sm:$0xff]  }
 0x183   : > { %5417 = vmatpush1.bf16.msra.mxu1 %v7471_v4  ;;  %5377 = vmatprep.subr.bf16.mxu0 %v7476_v5  ;;  %v7535_v4 = vld [vmem:[%s8162_s22 + $0x288] ss:$16 sps:$4 sm:$0xff]   ;;  %v7540_v5 = vld [vmem:[%s8162_s22 + $0xac] ss:$16 sps:$4 sm:$0xff]  }
 0x184   : > { %5418 = vmatprep.subr.bf16.mxu1 %v7479_v6  ;;  %v7543_v6 = vld [vmem:[%s8162_s22 + $0x2ac] ss:$16 sps:$4 sm:$0xff]  }
 0x186   : > { %5378 = vmatpush1.bf16.msra.mxu0 %v7474_v9  ;;  %v7538_v9 = vld [vmem:[%s8162_s22 + $0xa8] ss:$16 sps:$4 sm:$0xff]  }
 0x187   : > { %5419 = vmatpush1.bf16.msra.mxu1 %v7477_v10  ;;  %5379 = vmatprep.subr.bf16.mxu0 %v7482_v11  ;;  %v7541_v10 = vld [vmem:[%s8162_s22 + $0x2a8] ss:$16 sps:$4 sm:$0xff]   ;;  %v7546_v11 = vld [vmem:[%s8162_s22 + $0xcc] ss:$16 sps:$4 sm:$0xff]  }
 0x188   : > { %5420 = vmatprep.subr.bf16.mxu1 %v7485_v12  ;;  %v7549_v12 = vld [vmem:[%s8162_s22 + $0x2cc] ss:$16 sps:$4 sm:$0xff]  }
 0x18a   : > { %5380 = vmatpush1.bf16.msra.mxu0 %v7480_v13 }
 0x18b   : > { %5421 = vmatpush1.bf16.msra.mxu1 %v7483_v14  ;;  %5381 = vmatprep.subr.bf16.mxu0 %v7488_v15  ;;  %v7544_v15 = vld [vmem:[%s8162_s22 + $0xc8] ss:$16 sps:$4 sm:$0xff]  }
 0x18c   : > { %5422 = vmatprep.subr.bf16.mxu1 %v7491_v16  ;;  %v7547_v16 = vld [vmem:[%s8162_s22 + $0x2c8] ss:$16 sps:$4 sm:$0xff]  }
 0x18e   : > { %5382 = vmatpush1.bf16.msra.mxu0 %v7486_v19 }
 0x18f   : > { %5423 = vmatpush1.bf16.msra.mxu1 %v7489_v20  ;;  %5383 = vmatprep.subr.bf16.mxu0 %v7494_v21 }
 0x190   : > { %5424 = vmatprep.subr.bf16.mxu1 %v7497_v22 }
 0x192   : > { %5384 = vmatpush1.bf16.msra.mxu0 %v7492_v27 }
 0x193   : > { %5425 = vmatpush1.bf16.msra.mxu1 %v7495_v28  ;;  %5385 = vmatprep.subr.bf16.mxu0 %v7500_v29 }
 0x194   : > { %5426 = vmatprep.subr.bf16.mxu1 %v7503_v30 }
 0x196   : > { %5386 = vmatpush1.bf16.msra.mxu0 %v7498_v31 }
 0x197   : > { %5427 = vmatpush1.bf16.msra.mxu1 %v7501_v32  ;;  %5437 = vmatprep.subr.bf16.mxu0 %v7510_v34  ;;  %v7555_v32 = vld [vmem:[%s8162_s22 + $0x2ec] ss:$16 sps:$4 sm:$0xff]  }
 0x198   : > { %5478 = vmatprep.subr.bf16.mxu1 %v7513_v36  ;;  %v7553_v36 = vld [vmem:[%s8162_s22 + $0x2e8] ss:$16 sps:$4 sm:$0xff]  }
 0x199   : > { %5388 = vmatmul.mubr.bf16.vlgmr.msra.gmra.mrb[20].mxu0 %v8711_v44 }
 0x19a   : > { %5429 = vmatmul.mubr.bf16.vlgmr.msra.gmra.mrb[20].mxu1 %v8715_v49  ;;  %5438 = vmatpush1.bf16.msra.mxu0 %v7508_v35  ;;  %v7558_v35 = vld [vmem:[%s8162_s22 + $0x10c] ss:$16 sps:$4 sm:$0xff]  }
 0x19b   : > { %5479 = vmatpush1.bf16.msra.mxu1 %v7511_v43  ;;  %5439 = vmatprep.subr.bf16.mxu0 %v7516_v53  ;;  %v7561_v43 = vld [vmem:[%s8162_s22 + $0x30c] ss:$16 sps:$4 sm:$0xff]   ;;  %v7556_v53 = vld [vmem:[%s8162_s22 + $0x108] ss:$16 sps:$4 sm:$0xff]  }
 0x19c   : > { %5480 = vmatprep.subr.bf16.mxu1 %v7519_v54  ;;  %5469 = vmatprep.mubr.bf16.mxu0 %v8224_v48  ;;  %v7526_v48 = vld [vmem:[%s8162_s22 + $0x68] ss:$16 sps:$4 sm:$0xff]  }
 0x19d   : > { %5510 = vmatprep.mubr.bf16.mxu1 %v8229_v52  ;;  %v7534_v52 = vld [vmem:[%s8162_s22 + $0x8c] ss:$16 sps:$4 sm:$0xff]   ;;  %v7559_v54 = vld [vmem:[%s8162_s22 + $0x308] ss:$16 sps:$4 sm:$0xff]  }
 0x19e   : > { %5440 = vmatpush1.bf16.msra.mxu0 %v7514_v45  ;;  %v7564_v45 = vld [vmem:[%s8162_s22 + $0x12c] ss:$16 sps:$4 sm:$0xff]  }
 0x19f   : > { %5481 = vmatpush1.bf16.msra.mxu1 %v7517_v46  ;;  %5441 = vmatprep.subr.bf16.mxu0 %v7522_v62  ;;  %v7567_v46 = vld [vmem:[%s8162_s22 + $0x32c] ss:$16 sps:$4 sm:$0xff]   ;;  %v7562_v62 = vld [vmem:[%s8162_s22 + $0x128] ss:$16 sps:$4 sm:$0xff]  }
 0x1a0   : > { %5482 = vmatprep.subr.bf16.mxu1 %v7525_v56  ;;  %v7565_v56 = vld [vmem:[%s8162_s22 + $0x328] ss:$16 sps:$4 sm:$0xff]  }
 0x1a2   : > { %5442 = vmatpush1.bf16.msra.mxu0 %v7520_v57  ;;  %v7570_v57 = vld [vmem:[%s8162_s22 + $0x14c] ss:$16 sps:$4 sm:$0xff]  }
 0x1a3   : > { %5483 = vmatpush1.bf16.msra.mxu1 %v7523_v58  ;;  %5443 = vmatprep.subr.bf16.mxu0 %v7528_v63  ;;  %v7573_v58 = vld [vmem:[%s8162_s22 + $0x34c] ss:$16 sps:$4 sm:$0xff]   ;;  %v7568_v63 = vld [vmem:[%s8162_s22 + $0x148] ss:$16 sps:$4 sm:$0xff]  }
 0x1a4   : > { %5484 = vmatprep.subr.bf16.mxu1 %v7531_v0  ;;  %v7571_v0 = vld [vmem:[%s8162_s22 + $0x348] ss:$16 sps:$4 sm:$0xff]  }
 0x1a6   : > { %5444 = vmatpush1.bf16.msra.mxu0 %v7526_v48  ;;  %v7576_v48 = vld [vmem:[%s8162_s22 + $0x16c] ss:$16 sps:$4 sm:$0xff]  }
 0x1a7   : > { %5485 = vmatpush1.bf16.msra.mxu1 %v7529_v1  ;;  %5445 = vmatprep.subr.bf16.mxu0 %v7534_v52  ;;  %v7579_v1 = vld [vmem:[%s8162_s22 + $0x36c] ss:$16 sps:$4 sm:$0xff]   ;;  %v7574_v52 = vld [vmem:[%s8162_s22 + $0x168] ss:$16 sps:$4 sm:$0xff]  }
 0x1a8   : > { %5486 = vmatprep.subr.bf16.mxu1 %v7537_v2  ;;  %v7577_v2 = vld [vmem:[%s8162_s22 + $0x368] ss:$16 sps:$4 sm:$0xff]  }
 0x1aa   : > { %5446 = vmatpush1.bf16.msra.mxu0 %v7532_v3  ;;  %v7582_v3 = vld [vmem:[%s8162_s22 + $0x18c] ss:$16 sps:$4 sm:$0xff]  }
 0x1ab   : > { %5487 = vmatpush1.bf16.msra.mxu1 %v7535_v4  ;;  %5447 = vmatprep.subr.bf16.mxu0 %v7540_v5  ;;  %v7585_v4 = vld [vmem:[%s8162_s22 + $0x38c] ss:$16 sps:$4 sm:$0xff]   ;;  %v7580_v5 = vld [vmem:[%s8162_s22 + $0x188] ss:$16 sps:$4 sm:$0xff]  }
 0x1ac   : > { %5488 = vmatprep.subr.bf16.mxu1 %v7543_v6  ;;  %v5143_v13 = vpop.f32.mrb[8].mxu0  ;;  %v7583_v6 = vld [vmem:[%s8162_s22 + $0x388] ss:$16 sps:$4 sm:$0xff]  }
 0x1ad   : > { %v5184_v14 = vpop.f32.mrb[8].mxu1  ;;  %v5144_v19 = vadd.f32 %v5143_v13, %v8665_v33  ;;  %v5145_v20 = vpop.f32.mrb[9].mxu0  ;;  %v7552_v33 = vld [vmem:[%s8162_s22 + $0xec] ss:$16 sps:$4 sm:$0xff]  }
 0x1ae   : > { %v5186_v21 = vpop.f32.mrb[9].mxu1  ;;  %v5146_v22 = vadd.f32 %v5145_v20, %v8669_v47  ;;  %v5147_v27 = vpop.f32.mrb[10].mxu0  ;;  %5448 = vmatpush1.bf16.msra.mxu0 %v7538_v9  ;;  %v7550_v47 = vld [vmem:[%s8162_s22 + $0xe8] ss:$16 sps:$4 sm:$0xff]   ;;  %v7588_v9 = vld [vmem:[%s8162_s22 + $0x1ac] ss:$16 sps:$4 sm:$0xff]  }
 0x1af   : > { %v5188_v28 = vpop.f32.mrb[10].mxu1  ;;  %5489 = vmatpush1.bf16.msra.mxu1 %v7541_v10  ;;  %v8747_v29 = vadd.f32 %v5184_v14, %v5144_v19  ;;  %v5148_v30 = vpop.f32.mrb[11].mxu0  ;;  %5449 = vmatprep.subr.bf16.mxu0 %v7546_v11  ;;  %v7591_v10 = vld [vmem:[%s8162_s22 + $0x3ac] ss:$16 sps:$4 sm:$0xff]   ;;  %v7586_v11 = vld [vmem:[%s8162_s22 + $0x1a8] ss:$16 sps:$4 sm:$0xff]  }
 0x1b0   : > { %v5189_v31 = vpop.f32.mrb[11].mxu1  ;;  %5490 = vmatprep.subr.bf16.mxu1 %v7549_v12  ;;  %v8751_v34 = vadd.f32 %v5186_v21, %v5146_v22  ;;  %v7589_v12 = vld [vmem:[%s8162_s22 + $0x3a8] ss:$16 sps:$4 sm:$0xff]   ;;  %v7594_v13 = vld [vmem:[%s8162_s22 + $0x1cc] ss:$16 sps:$4 sm:$0xff]  }
 0x1b1   : > { %v7597_v14 = vld [vmem:[%s8162_s22 + $0x3cc] ss:$16 sps:$4 sm:$0xff]   ;;  %v7598_v21 = vld [vmem:[%s8162_s22 + $0x1e8] ss:$16 sps:$4 sm:$0xff]  }
 0x1b2   : > { %5450 = vmatpush1.bf16.msra.mxu0 %v7544_v15  ;;  %v7592_v15 = vld [vmem:[%s8162_s22 + $0x1c8] ss:$16 sps:$4 sm:$0xff]   ;;  %v7600_v19 = vld [vmem:[%s8162_s22 + $0x1ec] ss:$16 sps:$4 sm:$0xff]  }
 0x1b3   : > { %5491 = vmatpush1.bf16.msra.mxu1 %v7547_v16  ;;  %5451 = vmatprep.subr.bf16.mxu0 %v7552_v33  ;;  %v7595_v16 = vld [vmem:[%s8162_s22 + $0x3c8] ss:$16 sps:$4 sm:$0xff]   ;;  %v7603_v20 = vld [vmem:[%s8162_s22 + $0x3ec] ss:$16 sps:$4 sm:$0xff]  }
 0x1b4   : > { %5492 = vmatprep.subr.bf16.mxu1 %v7555_v32  ;;  %v7601_v22 = vld [vmem:[%s8162_s22 + $0x3e8] ss:$16 sps:$4 sm:$0xff]   ;;  %v7606_v27 = vld [vmem:[%s8162_s22 + $0x40c] ss:$16 sps:$4 sm:$0xff]  }
 0x1b5   : > { %v7609_v28 = vld [vmem:[%s8162_s22 + $0x60c] ss:$16 sps:$4 sm:$0xff]   ;;  %v7604_v30 = vld [vmem:[%s8162_s22 + $0x408] ss:$16 sps:$4 sm:$0xff]  }
 0x1b6   : > { %5452 = vmatpush1.bf16.msra.mxu0 %v7550_v47  ;;  %v7607_v31 = vld [vmem:[%s8162_s22 + $0x608] ss:$16 sps:$4 sm:$0xff]   ;;  %v7612_v33 = vld [vmem:[%s8162_s22 + $0x42c] ss:$16 sps:$4 sm:$0xff]  }
 0x1b7   : > { %5493 = vmatpush1.bf16.msra.mxu1 %v7553_v36  ;;  %5453 = vmatprep.subr.bf16.mxu0 %v7558_v35  ;;  %v7615_v32 = vld [vmem:[%s8162_s22 + $0x62c] ss:$16 sps:$4 sm:$0xff]   ;;  %v7610_v47 = vld [vmem:[%s8162_s22 + $0x428] ss:$16 sps:$4 sm:$0xff]  }
 0x1b8   : > { %5494 = vmatprep.subr.bf16.mxu1 %v7561_v43  ;;  %v7613_v36 = vld [vmem:[%s8162_s22 + $0x628] ss:$16 sps:$4 sm:$0xff]   ;;  %v7618_v35 = vld [vmem:[%s8162_s22 + $0x44c] ss:$16 sps:$4 sm:$0xff]  }
 0x1b9   : > { %v7621_v43 = vld [vmem:[%s8162_s22 + $0x64c] ss:$16 sps:$4 sm:$0xff]  }
 0x1ba   : > { %5454 = vmatpush1.bf16.msra.mxu0 %v7556_v53  ;;  %v7624_v53 = vld [vmem:[%s8162_s22 + $0x46c] ss:$16 sps:$4 sm:$0xff]  }
 0x1bb   : > { %5495 = vmatpush1.bf16.msra.mxu1 %v7559_v54  ;;  %5455 = vmatprep.subr.bf16.mxu0 %v7564_v45  ;;  %v7627_v54 = vld [vmem:[%s8162_s22 + $0x66c] ss:$16 sps:$4 sm:$0xff]   ;;  %v7622_v45 = vld [vmem:[%s8162_s22 + $0x468] ss:$16 sps:$4 sm:$0xff]  }
 0x1bc   : > { %5496 = vmatprep.subr.bf16.mxu1 %v7567_v46  ;;  %v7633_v46 = vld [vmem:[%s8162_s22 + $0x68c] ss:$16 sps:$4 sm:$0xff]  }
 0x1be   : > { %5456 = vmatpush1.bf16.msra.mxu0 %v7562_v62  ;;  %v7628_v62 = vld [vmem:[%s8162_s22 + $0x488] ss:$16 sps:$4 sm:$0xff]  }
 0x1bf   : > { %5497 = vmatpush1.bf16.msra.mxu1 %v7565_v56  ;;  %5457 = vmatprep.subr.bf16.mxu0 %v7570_v57  ;;  %v7631_v56 = vld [vmem:[%s8162_s22 + $0x688] ss:$16 sps:$4 sm:$0xff]   ;;  %v7636_v57 = vld [vmem:[%s8162_s22 + $0x4ac] ss:$16 sps:$4 sm:$0xff]  }
 0x1c0   : > { %5498 = vmatprep.subr.bf16.mxu1 %v7573_v58  ;;  %v7639_v58 = vld [vmem:[%s8162_s22 + $0x6ac] ss:$16 sps:$4 sm:$0xff]  }
 0x1c2   : > { %5458 = vmatpush1.bf16.msra.mxu0 %v7568_v63  ;;  %v7634_v63 = vld [vmem:[%s8162_s22 + $0x4a8] ss:$16 sps:$4 sm:$0xff]  }
 0x1c3   : > { %5499 = vmatpush1.bf16.msra.mxu1 %v7571_v0  ;;  %5459 = vmatprep.subr.bf16.mxu0 %v7576_v48  ;;  %v7637_v0 = vld [vmem:[%s8162_s22 + $0x6a8] ss:$16 sps:$4 sm:$0xff]   ;;  %v7642_v48 = vld [vmem:[%s8162_s22 + $0x4cc] ss:$16 sps:$4 sm:$0xff]  }
 0x1c4   : > { %5500 = vmatprep.subr.bf16.mxu1 %v7579_v1  ;;  %v7645_v1 = vld [vmem:[%s8162_s22 + $0x6cc] ss:$16 sps:$4 sm:$0xff]  }
 0x1c6   : > { %5460 = vmatpush1.bf16.msra.mxu0 %v7574_v52 }
 0x1c7   : > { %5501 = vmatpush1.bf16.msra.mxu1 %v7577_v2  ;;  %5461 = vmatprep.subr.bf16.mxu0 %v7582_v3 }
 0x1c8   : > { %5502 = vmatprep.subr.bf16.mxu1 %v7585_v4 }
 0x1ca   : > { %5462 = vmatpush1.bf16.msra.mxu0 %v7580_v5 }
 0x1cb   : > { %5503 = vmatpush1.bf16.msra.mxu1 %v7583_v6  ;;  %5463 = vmatprep.subr.bf16.mxu0 %v7588_v9 }
 0x1cc   : > { %5504 = vmatprep.subr.bf16.mxu1 %v7591_v10 }
 0x1ce   : > { %5464 = vmatpush1.bf16.msra.mxu0 %v7586_v11  ;;  %v7640_v11 = vld [vmem:[%s8162_s22 + $0x4c8] ss:$16 sps:$4 sm:$0xff]  }
 0x1cf   : > { %5505 = vmatpush1.bf16.msra.mxu1 %v7589_v12  ;;  %5465 = vmatprep.subr.bf16.mxu0 %v7594_v13  ;;  %v7643_v12 = vld [vmem:[%s8162_s22 + $0x6c8] ss:$16 sps:$4 sm:$0xff]  }
 0x1d0   : > { %5506 = vmatprep.subr.bf16.mxu1 %v7597_v14 }
 0x1d2   : > { %5466 = vmatpush1.bf16.msra.mxu0 %v7592_v15 }
 0x1d3   : > { %5507 = vmatpush1.bf16.msra.mxu1 %v7595_v16  ;;  %5467 = vmatprep.subr.bf16.mxu0 %v7600_v19  ;;  %v7646_v19 = vld [vmem:[%s8162_s22 + $0x4e8] ss:$16 sps:$4 sm:$0xff]  }
 0x1d4   : > { %5508 = vmatprep.subr.bf16.mxu1 %v7603_v20  ;;  %v7649_v20 = vld [vmem:[%s8162_s22 + $0x6e8] ss:$16 sps:$4 sm:$0xff]  }
 0x1d6   : > { %5468 = vmatpush1.bf16.msra.mxu0 %v7598_v21  ;;  %v7654_v21 = vld [vmem:[%s8162_s22 + $0x50c] ss:$16 sps:$4 sm:$0xff]  }
 0x1d7   : > { %5509 = vmatpush1.bf16.msra.mxu1 %v7601_v22  ;;  %5519 = vmatprep.subr.bf16.mxu0 %v7606_v27  ;;  %v7657_v22 = vld [vmem:[%s8162_s22 + $0x70c] ss:$16 sps:$4 sm:$0xff]   ;;  %v7652_v27 = vld [vmem:[%s8162_s22 + $0x508] ss:$16 sps:$4 sm:$0xff]  }
 0x1d8   : > { %5560 = vmatprep.subr.bf16.mxu1 %v7609_v28  ;;  %v7655_v28 = vld [vmem:[%s8162_s22 + $0x708] ss:$16 sps:$4 sm:$0xff]  }
 0x1d9   : > { %5470 = vmatmul.mubr.bf16.vlgmr.msra.gmra.mrb[24].mxu0 %v8251_v7  ;;  %v7616_v7 = vld [vmem:[%s8162_s22 + $0x448] ss:$16 sps:$4 sm:$0xff]  }
 0x1da   : > { %5511 = vmatmul.mubr.bf16.vlgmr.msra.gmra.mrb[24].mxu1 %v8253_v8  ;;  %5520 = vmatpush1.bf16.msra.mxu0 %v7604_v30  ;;  %v7619_v8 = vld [vmem:[%s8162_s22 + $0x648] ss:$16 sps:$4 sm:$0xff]   ;;  %v7660_v30 = vld [vmem:[%s8162_s22 + $0x52c] ss:$16 sps:$4 sm:$0xff]  }
 0x1db   : > { %5561 = vmatpush1.bf16.msra.mxu1 %v7607_v31  ;;  %5521 = vmatprep.subr.bf16.mxu0 %v7612_v33  ;;  %v7663_v31 = vld [vmem:[%s8162_s22 + $0x72c] ss:$16 sps:$4 sm:$0xff]   ;;  %v7658_v33 = vld [vmem:[%s8162_s22 + $0x528] ss:$16 sps:$4 sm:$0xff]  }
 0x1dc   : > { %5562 = vmatprep.subr.bf16.mxu1 %v7615_v32  ;;  %5551 = vmatprep.mubr.bf16.mxu0 %v8291_v37  ;;  %v7625_v37 = vld [vmem:[%s8162_s22 + $0x668] ss:$16 sps:$4 sm:$0xff]  }
 0x1dd   : > { %5592 = vmatprep.mubr.bf16.mxu1 %v8295_v38  ;;  %v7630_v38 = vld [vmem:[%s8162_s22 + $0x48c] ss:$16 sps:$4 sm:$0xff]   ;;  %v7661_v32 = vld [vmem:[%s8162_s22 + $0x728] ss:$16 sps:$4 sm:$0xff]  }
 0x1de   : > { %5522 = vmatpush1.bf16.msra.mxu0 %v7610_v47  ;;  %v7666_v47 = vld [vmem:[%s8162_s22 + $0x54c] ss:$16 sps:$4 sm:$0xff]  }
 0x1df   : > { %5563 = vmatpush1.bf16.msra.mxu1 %v7613_v36  ;;  %5523 = vmatprep.subr.bf16.mxu0 %v7618_v35  ;;  %v7669_v36 = vld [vmem:[%s8162_s22 + $0x74c] ss:$16 sps:$4 sm:$0xff]   ;;  %v7664_v35 = vld [vmem:[%s8162_s22 + $0x548] ss:$16 sps:$4 sm:$0xff]  }
 0x1e0   : > { %5564 = vmatprep.subr.bf16.mxu1 %v7621_v43  ;;  %v7667_v43 = vld [vmem:[%s8162_s22 + $0x748] ss:$16 sps:$4 sm:$0xff]  }
 0x1e2   : > { %5524 = vmatpush1.bf16.msra.mxu0 %v7616_v7  ;;  %v7672_v7 = vld [vmem:[%s8162_s22 + $0x56c] ss:$16 sps:$4 sm:$0xff]  }
 0x1e3   : > { %5565 = vmatpush1.bf16.msra.mxu1 %v7619_v8  ;;  %5525 = vmatprep.subr.bf16.mxu0 %v7624_v53  ;;  %v7675_v8 = vld [vmem:[%s8162_s22 + $0x76c] ss:$16 sps:$4 sm:$0xff]   ;;  %v7670_v53 = vld [vmem:[%s8162_s22 + $0x568] ss:$16 sps:$4 sm:$0xff]  }
 0x1e4   : > { %5566 = vmatprep.subr.bf16.mxu1 %v7627_v54  ;;  %v7673_v54 = vld [vmem:[%s8162_s22 + $0x768] ss:$16 sps:$4 sm:$0xff]  }
 0x1e6   : > { %5526 = vmatpush1.bf16.msra.mxu0 %v7622_v45  ;;  %v7678_v45 = vld [vmem:[%s8162_s22 + $0x58c] ss:$16 sps:$4 sm:$0xff]  }
 0x1e7   : > { %5567 = vmatpush1.bf16.msra.mxu1 %v7625_v37  ;;  %5527 = vmatprep.subr.bf16.mxu0 %v7630_v38  ;;  %v7681_v37 = vld [vmem:[%s8162_s22 + $0x78c] ss:$16 sps:$4 sm:$0xff]   ;;  %v7676_v38 = vld [vmem:[%s8162_s22 + $0x588] ss:$16 sps:$4 sm:$0xff]  }
 0x1e8   : > { %5568 = vmatprep.subr.bf16.mxu1 %v7633_v46  ;;  %v7679_v46 = vld [vmem:[%s8162_s22 + $0x788] ss:$16 sps:$4 sm:$0xff]  }
 0x1ea   : > { %5528 = vmatpush1.bf16.msra.mxu0 %v7628_v62  ;;  %v7684_v62 = vld [vmem:[%s8162_s22 + $0x5ac] ss:$16 sps:$4 sm:$0xff]  }
 0x1eb   : > { %5569 = vmatpush1.bf16.msra.mxu1 %v7631_v56  ;;  %5529 = vmatprep.subr.bf16.mxu0 %v7636_v57  ;;  %v7687_v56 = vld [vmem:[%s8162_s22 + $0x7ac] ss:$16 sps:$4 sm:$0xff]   ;;  %v7682_v57 = vld [vmem:[%s8162_s22 + $0x5a8] ss:$16 sps:$4 sm:$0xff]  }
 0x1ec   : > { %5570 = vmatprep.subr.bf16.mxu1 %v7639_v58  ;;  %v5225_v52 = vpop.f32.mrb[12].mxu0  ;;  %v7685_v58 = vld [vmem:[%s8162_s22 + $0x7a8] ss:$16 sps:$4 sm:$0xff]  }
 0x1ed   : > { %v5266_v2 = vpop.f32.mrb[12].mxu1  ;;  %v5226_v3 = vadd.f32 %v5225_v52, %v8747_v29  ;;  %v5227_v4 = vpop.f32.mrb[13].mxu0  ;;  %v7648_v29 = vld [vmem:[%s8162_s22 + $0x4ec] ss:$16 sps:$4 sm:$0xff]  }
 0x1ee   : > { %v5268_v5 = vpop.f32.mrb[13].mxu1  ;;  %v5228_v6 = vadd.f32 %v5227_v4, %v8751_v34  ;;  %v5229_v9 = vpop.f32.mrb[14].mxu0  ;;  %5530 = vmatpush1.bf16.msra.mxu0 %v7634_v63  ;;  %v7651_v34 = vld [vmem:[%s8162_s22 + $0x6ec] ss:$16 sps:$4 sm:$0xff]   ;;  %v7697_v4 = vld [vmem:[%s8162_s22 + $0x7e8] ss:$16 sps:$4 sm:$0xff]  }
 0x1ef   : > { %v5270_v10 = vpop.f32.mrb[14].mxu1  ;;  %5571 = vmatpush1.bf16.msra.mxu1 %v7637_v0  ;;  %v8821_v13 = vadd.f32 %v5266_v2, %v5226_v3  ;;  %v5230_v14 = vpop.f32.mrb[15].mxu0  ;;  %5531 = vmatprep.subr.bf16.mxu0 %v7642_v48  ;;  %v7690_v63 = vld [vmem:[%s8162_s22 + $0x5cc] ss:$16 sps:$4 sm:$0xff]   ;;  %v7688_v48 = vld [vmem:[%s8162_s22 + $0x5c8] ss:$16 sps:$4 sm:$0xff]  }
 0x1f0   : > { %v5271_v15 = vpop.f32.mrb[15].mxu1  ;;  %5572 = vmatprep.subr.bf16.mxu1 %v7645_v1  ;;  %v8825_v16 = vadd.f32 %v5268_v5, %v5228_v6  ;;  %v7693_v0 = vld [vmem:[%s8162_s22 + $0x7cc] ss:$16 sps:$4 sm:$0xff]   ;;  %v7691_v1 = vld [vmem:[%s8162_s22 + $0x7c8] ss:$16 sps:$4 sm:$0xff]  }
 0x1f1   : > { %v7696_v52 = vld [vmem:[%s8162_s22 + $0x5ec] ss:$16 sps:$4 sm:$0xff]   ;;  %v7694_v3 = vld [vmem:[%s8162_s22 + $0x5e8] ss:$16 sps:$4 sm:$0xff]  }
 0x1f2   : > { %5532 = vmatpush1.bf16.msra.mxu0 %v7640_v11  ;;  %v7699_v2 = vld [vmem:[%s8162_s22 + $0x7ec] ss:$16 sps:$4 sm:$0xff]   ;;  %v7700_v9 = vld [vmem:[%s8162_s22 + $0x808] ss:$16 sps:$4 sm:$0xff]  }
 0x1f3   : > { %5573 = vmatpush1.bf16.msra.mxu1 %v7643_v12  ;;  %5533 = vmatprep.subr.bf16.mxu0 %v7648_v29  ;;  %v7702_v5 = vld [vmem:[%s8162_s22 + $0x80c] ss:$16 sps:$4 sm:$0xff]   ;;  %v7703_v10 = vld [vmem:[%s8162_s22 + $0xa08] ss:$16 sps:$4 sm:$0xff]  }
 0x1f4   : > { %5574 = vmatprep.subr.bf16.mxu1 %v7651_v34  ;;  %v7705_v6 = vld [vmem:[%s8162_s22 + $0xa0c] ss:$16 sps:$4 sm:$0xff]   ;;  %v7706_v14 = vld [vmem:[%s8162_s22 + $0x828] ss:$16 sps:$4 sm:$0xff]  }
 0x1f5   : > { %v7708_v11 = vld [vmem:[%s8162_s22 + $0x82c] ss:$16 sps:$4 sm:$0xff]   ;;  %v7709_v15 = vld [vmem:[%s8162_s22 + $0xa28] ss:$16 sps:$4 sm:$0xff]  }
 0x1f6   : > { %5534 = vmatpush1.bf16.msra.mxu0 %v7646_v19  ;;  %v7711_v12 = vld [vmem:[%s8162_s22 + $0xa2c] ss:$16 sps:$4 sm:$0xff]  }
 0x1f7   : > { %5575 = vmatpush1.bf16.msra.mxu1 %v7649_v20  ;;  %5535 = vmatprep.subr.bf16.mxu0 %v7654_v21  ;;  %v7714_v29 = vld [vmem:[%s8162_s22 + $0x84c] ss:$16 sps:$4 sm:$0xff]   ;;  %v7718_v21 = vld [vmem:[%s8162_s22 + $0x868] ss:$16 sps:$4 sm:$0xff]  }
 0x1f8   : > { %5576 = vmatprep.subr.bf16.mxu1 %v7657_v22  ;;  %v7717_v34 = vld [vmem:[%s8162_s22 + $0xa4c] ss:$16 sps:$4 sm:$0xff]  }
 0x1f9   : > { %v7720_v19 = vld [vmem:[%s8162_s22 + $0x86c] ss:$16 sps:$4 sm:$0xff]  }
 0x1fa   : > { %5536 = vmatpush1.bf16.msra.mxu0 %v7652_v27  ;;  %v7723_v20 = vld [vmem:[%s8162_s22 + $0xa6c] ss:$16 sps:$4 sm:$0xff]   ;;  %v7724_v27 = vld [vmem:[%s8162_s22 + $0x888] ss:$16 sps:$4 sm:$0xff]  }
 0x1fb   : > { %5577 = vmatpush1.bf16.msra.mxu1 %v7655_v28  ;;  %5537 = vmatprep.subr.bf16.mxu0 %v7660_v30  ;;  %v7729_v22 = vld [vmem:[%s8162_s22 + $0xa8c] ss:$16 sps:$4 sm:$0xff]   ;;  %v7727_v28 = vld [vmem:[%s8162_s22 + $0xa88] ss:$16 sps:$4 sm:$0xff]  }
 0x1fc   : > { %5578 = vmatprep.subr.bf16.mxu1 %v7663_v31  ;;  %v7732_v30 = vld [vmem:[%s8162_s22 + $0x8ac] ss:$16 sps:$4 sm:$0xff]  }
 0x1fd   : > { %v7735_v31 = vld [vmem:[%s8162_s22 + $0xaac] ss:$16 sps:$4 sm:$0xff]  }
 0x1fe   : > { %5538 = vmatpush1.bf16.msra.mxu0 %v7658_v33  ;;  %v7730_v33 = vld [vmem:[%s8162_s22 + $0x8a8] ss:$16 sps:$4 sm:$0xff]  }
 0x1ff   : > { %5579 = vmatpush1.bf16.msra.mxu1 %v7661_v32  ;;  %5539 = vmatprep.subr.bf16.mxu0 %v7666_v47  ;;  %v7733_v32 = vld [vmem:[%s8162_s22 + $0xaa8] ss:$16 sps:$4 sm:$0xff]   ;;  %v7738_v47 = vld [vmem:[%s8162_s22 + $0x8cc] ss:$16 sps:$4 sm:$0xff]  }
 0x200   : > { %5580 = vmatprep.subr.bf16.mxu1 %v7669_v36  ;;  %v7741_v36 = vld [vmem:[%s8162_s22 + $0xacc] ss:$16 sps:$4 sm:$0xff]  }
 0x202   : > { %5540 = vmatpush1.bf16.msra.mxu0 %v7664_v35 }
 0x203   : > { %5581 = vmatpush1.bf16.msra.mxu1 %v7667_v43  ;;  %5541 = vmatprep.subr.bf16.mxu0 %v7672_v7 }
 0x204   : > { %5582 = vmatprep.subr.bf16.mxu1 %v7675_v8 }
 0x206   : > { %5542 = vmatpush1.bf16.msra.mxu0 %v7670_v53 }
 0x207   : > { %5583 = vmatpush1.bf16.msra.mxu1 %v7673_v54  ;;  %5543 = vmatprep.subr.bf16.mxu0 %v7678_v45 }
 0x208   : > { %5584 = vmatprep.subr.bf16.mxu1 %v7681_v37 }
 0x20a   : > { %5544 = vmatpush1.bf16.msra.mxu0 %v7676_v38  ;;  %v7736_v38 = vld [vmem:[%s8162_s22 + $0x8c8] ss:$16 sps:$4 sm:$0xff]  }
 0x20b   : > { %5585 = vmatpush1.bf16.msra.mxu1 %v7679_v46  ;;  %5545 = vmatprep.subr.bf16.mxu0 %v7684_v62  ;;  %v7739_v46 = vld [vmem:[%s8162_s22 + $0xac8] ss:$16 sps:$4 sm:$0xff]  }
 0x20c   : > { %5586 = vmatprep.subr.bf16.mxu1 %v7687_v56 }
 0x20e   : > { %5546 = vmatpush1.bf16.msra.mxu0 %v7682_v57 }
 0x20f   : > { %5587 = vmatpush1.bf16.msra.mxu1 %v7685_v58  ;;  %5547 = vmatprep.subr.bf16.mxu0 %v7690_v63  ;;  %v7742_v63 = vld [vmem:[%s8162_s22 + $0x8e8] ss:$16 sps:$4 sm:$0xff]  }
 0x210   : > { %5588 = vmatprep.subr.bf16.mxu1 %v7693_v0  ;;  %v7745_v0 = vld [vmem:[%s8162_s22 + $0xae8] ss:$16 sps:$4 sm:$0xff]  }
 0x212   : > { %5548 = vmatpush1.bf16.msra.mxu0 %v7688_v48  ;;  %v7750_v48 = vld [vmem:[%s8162_s22 + $0x90c] ss:$16 sps:$4 sm:$0xff]  }
 0x213   : > { %5589 = vmatpush1.bf16.msra.mxu1 %v7691_v1  ;;  %5549 = vmatprep.subr.bf16.mxu0 %v7696_v52  ;;  %v7753_v1 = vld [vmem:[%s8162_s22 + $0xb0c] ss:$16 sps:$4 sm:$0xff]   ;;  %v7748_v52 = vld [vmem:[%s8162_s22 + $0x908] ss:$16 sps:$4 sm:$0xff]  }
 0x214   : > { %5590 = vmatprep.subr.bf16.mxu1 %v7699_v2  ;;  %v7751_v2 = vld [vmem:[%s8162_s22 + $0xb08] ss:$16 sps:$4 sm:$0xff]  }
 0x216   : > { %5550 = vmatpush1.bf16.msra.mxu0 %v7694_v3  ;;  %v7756_v3 = vld [vmem:[%s8162_s22 + $0x92c] ss:$16 sps:$4 sm:$0xff]  }
 0x217   : > { %5591 = vmatpush1.bf16.msra.mxu1 %v7697_v4  ;;  %5601 = vmatprep.subr.bf16.mxu0 %v7702_v5  ;;  %v7759_v4 = vld [vmem:[%s8162_s22 + $0xb2c] ss:$16 sps:$4 sm:$0xff]   ;;  %v7754_v5 = vld [vmem:[%s8162_s22 + $0x928] ss:$16 sps:$4 sm:$0xff]  }
 0x218   : > { %5642 = vmatprep.subr.bf16.mxu1 %v7705_v6  ;;  %v7757_v6 = vld [vmem:[%s8162_s22 + $0xb28] ss:$16 sps:$4 sm:$0xff]  }
 0x219   : > { %5552 = vmatmul.mubr.bf16.vlgmr.msra.gmra.mrb[28].mxu0 %v8339_v17  ;;  %v7712_v17 = vld [vmem:[%s8162_s22 + $0x848] ss:$16 sps:$4 sm:$0xff]  }
 0x21a   : > { %5593 = vmatmul.mubr.bf16.vlgmr.msra.gmra.mrb[28].mxu1 %v8343_v18  ;;  %5602 = vmatpush1.bf16.msra.mxu0 %v7700_v9  ;;  %v7715_v18 = vld [vmem:[%s8162_s22 + $0xa48] ss:$16 sps:$4 sm:$0xff]   ;;  %v7762_v9 = vld [vmem:[%s8162_s22 + $0x94c] ss:$16 sps:$4 sm:$0xff]  }
 0x21b   : > { %5643 = vmatpush1.bf16.msra.mxu1 %v7703_v10  ;;  %5603 = vmatprep.subr.bf16.mxu0 %v7708_v11  ;;  %v7765_v10 = vld [vmem:[%s8162_s22 + $0xb4c] ss:$16 sps:$4 sm:$0xff]   ;;  %v7760_v11 = vld [vmem:[%s8162_s22 + $0x948] ss:$16 sps:$4 sm:$0xff]  }
 0x21c   : > { %5644 = vmatprep.subr.bf16.mxu1 %v7711_v12  ;;  %5633 = vmatprep.mubr.bf16.mxu0 %v8357_v25  ;;  %v7721_v25 = vld [vmem:[%s8162_s22 + $0xa68] ss:$16 sps:$4 sm:$0xff]  }
 0x21d   : > { %5674 = vmatprep.mubr.bf16.mxu1 %v8361_v26  ;;  %v7726_v26 = vld [vmem:[%s8162_s22 + $0x88c] ss:$16 sps:$4 sm:$0xff]   ;;  %v7763_v12 = vld [vmem:[%s8162_s22 + $0xb48] ss:$16 sps:$4 sm:$0xff]  }
 0x21e   : > { %5604 = vmatpush1.bf16.msra.mxu0 %v7706_v14  ;;  %v7768_v14 = vld [vmem:[%s8162_s22 + $0x96c] ss:$16 sps:$4 sm:$0xff]  }
 0x21f   : > { %5645 = vmatpush1.bf16.msra.mxu1 %v7709_v15  ;;  %5605 = vmatprep.subr.bf16.mxu0 %v7714_v29  ;;  %v7771_v15 = vld [vmem:[%s8162_s22 + $0xb6c] ss:$16 sps:$4 sm:$0xff]   ;;  %v7766_v29 = vld [vmem:[%s8162_s22 + $0x968] ss:$16 sps:$4 sm:$0xff]  }
 0x220   : > { %5646 = vmatprep.subr.bf16.mxu1 %v7717_v34  ;;  %v7769_v34 = vld [vmem:[%s8162_s22 + $0xb68] ss:$16 sps:$4 sm:$0xff]  }
 0x222   : > { %5606 = vmatpush1.bf16.msra.mxu0 %v7712_v17  ;;  %v7774_v17 = vld [vmem:[%s8162_s22 + $0x98c] ss:$16 sps:$4 sm:$0xff]  }
 0x223   : > { %5647 = vmatpush1.bf16.msra.mxu1 %v7715_v18  ;;  %5607 = vmatprep.subr.bf16.mxu0 %v7720_v19  ;;  %v7777_v18 = vld [vmem:[%s8162_s22 + $0xb8c] ss:$16 sps:$4 sm:$0xff]   ;;  %v7772_v19 = vld [vmem:[%s8162_s22 + $0x988] ss:$16 sps:$4 sm:$0xff]  }
 0x224   : > { %5648 = vmatprep.subr.bf16.mxu1 %v7723_v20  ;;  %v7775_v20 = vld [vmem:[%s8162_s22 + $0xb88] ss:$16 sps:$4 sm:$0xff]  }
 0x226   : > { %5608 = vmatpush1.bf16.msra.mxu0 %v7718_v21  ;;  %v7780_v21 = vld [vmem:[%s8162_s22 + $0x9ac] ss:$16 sps:$4 sm:$0xff]  }
 0x227   : > { %5649 = vmatpush1.bf16.msra.mxu1 %v7721_v25  ;;  %5609 = vmatprep.subr.bf16.mxu0 %v7726_v26  ;;  %v7783_v25 = vld [vmem:[%s8162_s22 + $0xbac] ss:$16 sps:$4 sm:$0xff]   ;;  %v7778_v26 = vld [vmem:[%s8162_s22 + $0x9a8] ss:$16 sps:$4 sm:$0xff]  }
 0x228   : > { %5650 = vmatprep.subr.bf16.mxu1 %v7729_v22  ;;  %v7781_v22 = vld [vmem:[%s8162_s22 + $0xba8] ss:$16 sps:$4 sm:$0xff]  }
 0x22a   : > { %5610 = vmatpush1.bf16.msra.mxu0 %v7724_v27  ;;  %v7786_v27 = vld [vmem:[%s8162_s22 + $0x9cc] ss:$16 sps:$4 sm:$0xff]  }
 0x22b   : > { %5651 = vmatpush1.bf16.msra.mxu1 %v7727_v28  ;;  %5611 = vmatprep.subr.bf16.mxu0 %v7732_v30  ;;  %v7789_v28 = vld [vmem:[%s8162_s22 + $0xbcc] ss:$16 sps:$4 sm:$0xff]   ;;  %v7784_v30 = vld [vmem:[%s8162_s22 + $0x9c8] ss:$16 sps:$4 sm:$0xff]  }
 0x22c   : > { %5652 = vmatprep.subr.bf16.mxu1 %v7735_v31  ;;  %v5307_v35 = vpop.f32.mrb[16].mxu0  ;;  %v7787_v31 = vld [vmem:[%s8162_s22 + $0xbc8] ss:$16 sps:$4 sm:$0xff]  }
 0x22d   : > { %v5348_v43 = vpop.f32.mrb[16].mxu1  ;;  %v5308_v7 = vadd.f32 %v5307_v35, %v8821_v13  ;;  %v5309_v8 = vpop.f32.mrb[17].mxu0  ;;  %v7744_v13 = vld [vmem:[%s8162_s22 + $0x8ec] ss:$16 sps:$4 sm:$0xff]  }
 0x22e   : > { %v5350_v53 = vpop.f32.mrb[17].mxu1  ;;  %v5310_v54 = vadd.f32 %v5309_v8, %v8825_v16  ;;  %v5311_v45 = vpop.f32.mrb[18].mxu0  ;;  %5612 = vmatpush1.bf16.msra.mxu0 %v7730_v33  ;;  %v7747_v16 = vld [vmem:[%s8162_s22 + $0xaec] ss:$16 sps:$4 sm:$0xff]   ;;  %v7799_v8 = vld [vmem:[%s8162_s22 + $0xe08] ss:$16 sps:$4 sm:$0xff]  }
 0x22f   : > { %v5352_v37 = vpop.f32.mrb[18].mxu1  ;;  %5653 = vmatpush1.bf16.msra.mxu1 %v7733_v32  ;;  %v8895_v62 = vadd.f32 %v5348_v43, %v5308_v7  ;;  %v5312_v56 = vpop.f32.mrb[19].mxu0  ;;  %5613 = vmatprep.subr.bf16.mxu0 %v7738_v47  ;;  %v7792_v33 = vld [vmem:[%s8162_s22 + $0x9ec] ss:$16 sps:$4 sm:$0xff]   ;;  %v7790_v47 = vld [vmem:[%s8162_s22 + $0x9e8] ss:$16 sps:$4 sm:$0xff]  }
 0x230   : > { %v5353_v57 = vpop.f32.mrb[19].mxu1  ;;  %5654 = vmatprep.subr.bf16.mxu1 %v7741_v36  ;;  %v8899_v58 = vadd.f32 %v5350_v53, %v5310_v54  ;;  %v7795_v32 = vld [vmem:[%s8162_s22 + $0xbec] ss:$16 sps:$4 sm:$0xff]   ;;  %v7793_v36 = vld [vmem:[%s8162_s22 + $0xbe8] ss:$16 sps:$4 sm:$0xff]  }
 0x231   : > { %v7798_v35 = vld [vmem:[%s8162_s22 + $0xc0c] ss:$16 sps:$4 sm:$0xff]   ;;  %v7796_v7 = vld [vmem:[%s8162_s22 + $0xc08] ss:$16 sps:$4 sm:$0xff]  }
 0x232   : > { %5614 = vmatpush1.bf16.msra.mxu0 %v7736_v38  ;;  %v7801_v43 = vld [vmem:[%s8162_s22 + $0xe0c] ss:$16 sps:$4 sm:$0xff]   ;;  %v7802_v45 = vld [vmem:[%s8162_s22 + $0xc28] ss:$16 sps:$4 sm:$0xff]  }
 0x233   : > { %5655 = vmatpush1.bf16.msra.mxu1 %v7739_v46  ;;  %5615 = vmatprep.subr.bf16.mxu0 %v7744_v13  ;;  %v7804_v53 = vld [vmem:[%s8162_s22 + $0xc2c] ss:$16 sps:$4 sm:$0xff]   ;;  %v7805_v37 = vld [vmem:[%s8162_s22 + $0xe28] ss:$16 sps:$4 sm:$0xff]  }
 0x234   : > { %5656 = vmatprep.subr.bf16.mxu1 %v7747_v16  ;;  %v7807_v54 = vld [vmem:[%s8162_s22 + $0xe2c] ss:$16 sps:$4 sm:$0xff]   ;;  %v7814_v13 = vld [vmem:[%s8162_s22 + $0xc68] ss:$16 sps:$4 sm:$0xff]  }
 0x235   : > { %v7810_v38 = vld [vmem:[%s8162_s22 + $0xc4c] ss:$16 sps:$4 sm:$0xff]  }
 0x236   : > { %5616 = vmatpush1.bf16.msra.mxu0 %v7742_v63  ;;  %v7813_v46 = vld [vmem:[%s8162_s22 + $0xe4c] ss:$16 sps:$4 sm:$0xff]   ;;  %v7820_v63 = vld [vmem:[%s8162_s22 + $0xc88] ss:$16 sps:$4 sm:$0xff]  }
 0x237   : > { %5657 = vmatpush1.bf16.msra.mxu1 %v7745_v0  ;;  %5617 = vmatprep.subr.bf16.mxu0 %v7750_v48  ;;  %v7816_v56 = vld [vmem:[%s8162_s22 + $0xc6c] ss:$16 sps:$4 sm:$0xff]   ;;  %v7823_v0 = vld [vmem:[%s8162_s22 + $0xe88] ss:$16 sps:$4 sm:$0xff]  }
 0x238   : > { %5658 = vmatprep.subr.bf16.mxu1 %v7753_v1  ;;  %v7819_v57 = vld [vmem:[%s8162_s22 + $0xe6c] ss:$16 sps:$4 sm:$0xff]  }
 0x239   : > { %v7825_v16 = vld [vmem:[%s8162_s22 + $0xe8c] ss:$16 sps:$4 sm:$0xff]  }
 0x23a   : > { %5618 = vmatpush1.bf16.msra.mxu0 %v7748_v52  ;;  %v7828_v48 = vld [vmem:[%s8162_s22 + $0xcac] ss:$16 sps:$4 sm:$0xff]   ;;  %v7826_v52 = vld [vmem:[%s8162_s22 + $0xca8] ss:$16 sps:$4 sm:$0xff]  }
 0x23b   : > { %5659 = vmatpush1.bf16.msra.mxu1 %v7751_v2  ;;  %5619 = vmatprep.subr.bf16.mxu0 %v7756_v3  ;;  %v7831_v1 = vld [vmem:[%s8162_s22 + $0xeac] ss:$16 sps:$4 sm:$0xff]   ;;  %v7829_v2 = vld [vmem:[%s8162_s22 + $0xea8] ss:$16 sps:$4 sm:$0xff]  }
 0x23c   : > { %5660 = vmatprep.subr.bf16.mxu1 %v7759_v4  ;;  %v7834_v3 = vld [vmem:[%s8162_s22 + $0xccc] ss:$16 sps:$4 sm:$0xff]  }
 0x23d   : > { %v7837_v4 = vld [vmem:[%s8162_s22 + $0xecc] ss:$16 sps:$4 sm:$0xff]  }
 0x23e   : > { %5620 = vmatpush1.bf16.msra.mxu0 %v7754_v5 }
 0x23f   : > { %5661 = vmatpush1.bf16.msra.mxu1 %v7757_v6  ;;  %5621 = vmatprep.subr.bf16.mxu0 %v7762_v9 }
 0x240   : > { %5662 = vmatprep.subr.bf16.mxu1 %v7765_v10 }
 0x242   : > { %5622 = vmatpush1.bf16.msra.mxu0 %v7760_v11 }
 0x243   : > { %5663 = vmatpush1.bf16.msra.mxu1 %v7763_v12  ;;  %5623 = vmatprep.subr.bf16.mxu0 %v7768_v14  ;;  %v7832_v12 = vld [vmem:[%s8162_s22 + $0xcc8] ss:$16 sps:$4 sm:$0xff]   ;;  %v237_v14 = vld [vmem:[%s9215_s2] sm:$0xff] }
 0x244   : > { %5664 = vmatprep.subr.bf16.mxu1 %v7771_v15 }
 0x246   : > { %5624 = vmatpush1.bf16.msra.mxu0 %v7766_v29  ;;  %v238_v29 = vld [vmem:[%s9215_s2 + $0x8] sm:$0xff] }
 0x247   : > { %5665 = vmatpush1.bf16.msra.mxu1 %v7769_v34  ;;  %5625 = vmatprep.subr.bf16.mxu0 %v7774_v17 }
 0x248   : > { %5666 = vmatprep.subr.bf16.mxu1 %v7777_v18 }
 0x24a   : > { %5626 = vmatpush1.bf16.msra.mxu0 %v7772_v19 }
 0x24b   : > { %5667 = vmatpush1.bf16.msra.mxu1 %v7775_v20  ;;  %5627 = vmatprep.subr.bf16.mxu0 %v7780_v21  ;;  %v7840_v21 = vld [vmem:[%s8162_s22 + $0xcec] ss:$16 sps:$4 sm:$0xff]  }
 0x24c   : > { %5668 = vmatprep.subr.bf16.mxu1 %v7783_v25 }
 0x24e   : > { %5628 = vmatpush1.bf16.msra.mxu0 %v7778_v26 }
 0x24f   : > { %5669 = vmatpush1.bf16.msra.mxu1 %v7781_v22  ;;  %5629 = vmatprep.subr.bf16.mxu0 %v7786_v27  ;;  %v7838_v27 = vld [vmem:[%s8162_s22 + $0xce8] ss:$16 sps:$4 sm:$0xff]  }
 0x250   : > { %5670 = vmatprep.subr.bf16.mxu1 %v7789_v28  ;;  %v7841_v28 = vld [vmem:[%s8162_s22 + $0xee8] ss:$16 sps:$4 sm:$0xff]  }
 0x252   : > { %5630 = vmatpush1.bf16.msra.mxu0 %v7784_v30  ;;  %v7846_v30 = vld [vmem:[%s8162_s22 + $0xd0c] ss:$16 sps:$4 sm:$0xff]  }
 0x253   : > { %5671 = vmatpush1.bf16.msra.mxu1 %v7787_v31  ;;  %5631 = vmatprep.subr.bf16.mxu0 %v7792_v33  ;;  %v7849_v31 = vld [vmem:[%s8162_s22 + $0xf0c] ss:$16 sps:$4 sm:$0xff]   ;;  %v7844_v33 = vld [vmem:[%s8162_s22 + $0xd08] ss:$16 sps:$4 sm:$0xff]  }
 0x254   : > { %5672 = vmatprep.subr.bf16.mxu1 %v7795_v32  ;;  %v7847_v32 = vld [vmem:[%s8162_s22 + $0xf08] ss:$16 sps:$4 sm:$0xff]  }
 0x256   : > { %5632 = vmatpush1.bf16.msra.mxu0 %v7790_v47  ;;  %v7852_v47 = vld [vmem:[%s8162_s22 + $0xd2c] ss:$16 sps:$4 sm:$0xff]  }
 0x257   : > { %5673 = vmatpush1.bf16.msra.mxu1 %v7793_v36  ;;  %5683 = vmatprep.subr.bf16.mxu0 %v7798_v35  ;;  %v7855_v36 = vld [vmem:[%s8162_s22 + $0xf2c] ss:$16 sps:$4 sm:$0xff]   ;;  %v7850_v35 = vld [vmem:[%s8162_s22 + $0xd28] ss:$16 sps:$4 sm:$0xff]  }
 0x258   : > { %5724 = vmatprep.subr.bf16.mxu1 %v7801_v43  ;;  %v7853_v43 = vld [vmem:[%s8162_s22 + $0xf28] ss:$16 sps:$4 sm:$0xff]  }
 0x259   : > { %5634 = vmatmul.mubr.bf16.vlgmr.msra.gmra.mrb[32].mxu0 %v8431_v39  ;;  %v7808_v39 = vld [vmem:[%s8162_s22 + $0xc48] ss:$16 sps:$4 sm:$0xff]  }
 0x25a   : > { %5675 = vmatmul.mubr.bf16.vlgmr.msra.gmra.mrb[32].mxu1 %v8435_v40  ;;  %5684 = vmatpush1.bf16.msra.mxu0 %v7796_v7  ;;  %v7811_v40 = vld [vmem:[%s8162_s22 + $0xe48] ss:$16 sps:$4 sm:$0xff]   ;;  %v7858_v7 = vld [vmem:[%s8162_s22 + $0xd4c] ss:$16 sps:$4 sm:$0xff]  }
 0x25b   : > { %5725 = vmatpush1.bf16.msra.mxu1 %v7799_v8  ;;  %5685 = vmatprep.subr.bf16.mxu0 %v7804_v53  ;;  %v7861_v8 = vld [vmem:[%s8162_s22 + $0xf4c] ss:$16 sps:$4 sm:$0xff]   ;;  %v7856_v53 = vld [vmem:[%s8162_s22 + $0xd48] ss:$16 sps:$4 sm:$0xff]  }
 0x25c   : > { %5726 = vmatprep.subr.bf16.mxu1 %v7807_v54  ;;  %5715 = vmatprep.mubr.bf16.mxu0 %v8447_v23  ;;  %v7817_v23 = vld [vmem:[%s8162_s22 + $0xe68] ss:$16 sps:$4 sm:$0xff]  }
 0x25d   : > { %5756 = vmatprep.mubr.bf16.mxu1 %v8451_v24  ;;  %v7822_v24 = vld [vmem:[%s8162_s22 + $0xc8c] ss:$16 sps:$4 sm:$0xff]   ;;  %v7859_v54 = vld [vmem:[%s8162_s22 + $0xf48] ss:$16 sps:$4 sm:$0xff]  }
 0x25e   : > { %5686 = vmatpush1.bf16.msra.mxu0 %v7802_v45  ;;  %v7864_v45 = vld [vmem:[%s8162_s22 + $0xd6c] ss:$16 sps:$4 sm:$0xff]  }
 0x25f   : > { %5727 = vmatpush1.bf16.msra.mxu1 %v7805_v37  ;;  %5687 = vmatprep.subr.bf16.mxu0 %v7810_v38  ;;  %v7867_v37 = vld [vmem:[%s8162_s22 + $0xf6c] ss:$16 sps:$4 sm:$0xff]   ;;  %v7862_v38 = vld [vmem:[%s8162_s22 + $0xd68] ss:$16 sps:$4 sm:$0xff]  }
 0x260   : > { %5728 = vmatprep.subr.bf16.mxu1 %v7813_v46  ;;  %v7865_v46 = vld [vmem:[%s8162_s22 + $0xf68] ss:$16 sps:$4 sm:$0xff]  }
 0x262   : > { %5688 = vmatpush1.bf16.msra.mxu0 %v7808_v39  ;;  %v7870_v39 = vld [vmem:[%s8162_s22 + $0xd8c] ss:$16 sps:$4 sm:$0xff]  }
 0x263   : > { %5729 = vmatpush1.bf16.msra.mxu1 %v7811_v40  ;;  %5689 = vmatprep.subr.bf16.mxu0 %v7816_v56  ;;  %v7873_v40 = vld [vmem:[%s8162_s22 + $0xf8c] ss:$16 sps:$4 sm:$0xff]   ;;  %v7868_v56 = vld [vmem:[%s8162_s22 + $0xd88] ss:$16 sps:$4 sm:$0xff]  }
 0x264   : > { %5730 = vmatprep.subr.bf16.mxu1 %v7819_v57  ;;  %v7871_v57 = vld [vmem:[%s8162_s22 + $0xf88] ss:$16 sps:$4 sm:$0xff]  }
 0x266   : > { %5690 = vmatpush1.bf16.msra.mxu0 %v7814_v13  ;;  %v7876_v13 = vld [vmem:[%s8162_s22 + $0xdac] ss:$16 sps:$4 sm:$0xff]  }
 0x267   : > { %5731 = vmatpush1.bf16.msra.mxu1 %v7817_v23  ;;  %5691 = vmatprep.subr.bf16.mxu0 %v7822_v24  ;;  %v7879_v23 = vld [vmem:[%s8162_s22 + $0xfac] ss:$16 sps:$4 sm:$0xff]   ;;  %v7874_v24 = vld [vmem:[%s8162_s22 + $0xda8] ss:$16 sps:$4 sm:$0xff]  }
 0x268   : > { %5732 = vmatprep.subr.bf16.mxu1 %v7825_v16  ;;  %v7877_v16 = vld [vmem:[%s8162_s22 + $0xfa8] ss:$16 sps:$4 sm:$0xff]  }
 0x26a   : > { %5692 = vmatpush1.bf16.msra.mxu0 %v7820_v63  ;;  %v7882_v63 = vld [vmem:[%s8162_s22 + $0xdcc] ss:$16 sps:$4 sm:$0xff]  }
 0x26b   : > { %5733 = vmatpush1.bf16.msra.mxu1 %v7823_v0  ;;  %5693 = vmatprep.subr.bf16.mxu0 %v7828_v48  ;;  %v7885_v0 = vld [vmem:[%s8162_s22 + $0xfcc] ss:$16 sps:$4 sm:$0xff]   ;;  %v7880_v48 = vld [vmem:[%s8162_s22 + $0xdc8] ss:$16 sps:$4 sm:$0xff]  }
 0x26c   : > { %5734 = vmatprep.subr.bf16.mxu1 %v7831_v1  ;;  %v5389_v5 = vpop.f32.mrb[20].mxu0  ;;  %v7883_v1 = vld [vmem:[%s8162_s22 + $0xfc8] ss:$16 sps:$4 sm:$0xff]  }
 0x26d   : > { %v5430_v6 = vpop.f32.mrb[20].mxu1  ;;  %v5390_v9 = vadd.f32 %v5389_v5, %v8895_v62  ;;  %v5391_v10 = vpop.f32.mrb[21].mxu0  ;;  %v7835_v62 = vld [vmem:[%s8162_s22 + $0xec8] ss:$16 sps:$4 sm:$0xff]   ;;  %v7894_v5 = vld [vmem:[%s8162_s22 + $0x100c] ss:$16 sps:$4 sm:$0xff]  }
 0x26e   : > { %v5432_v11 = vpop.f32.mrb[21].mxu1  ;;  %v5392_v15 = vadd.f32 %v5391_v10, %v8899_v58  ;;  %v5393_v34 = vpop.f32.mrb[22].mxu0  ;;  %5694 = vmatpush1.bf16.msra.mxu0 %v7826_v52  ;;  %v7843_v58 = vld [vmem:[%s8162_s22 + $0xeec] ss:$16 sps:$4 sm:$0xff]   ;;  %v7895_v10 = vld [vmem:[%s8162_s22 + $0x1208] ss:$16 sps:$4 sm:$0xff]  }
 0x26f   : > { %v5434_v17 = vpop.f32.mrb[22].mxu1  ;;  %5735 = vmatpush1.bf16.msra.mxu1 %v7829_v2  ;;  %v5431_v18 = vadd.f32 %v5430_v6, %v5390_v9  ;;  %v5394_v19 = vpop.f32.mrb[23].mxu0  ;;  %5695 = vmatprep.subr.bf16.mxu0 %v7834_v3  ;;  %v7888_v52 = vld [vmem:[%s8162_s22 + $0xdec] ss:$16 sps:$4 sm:$0xff]   ;;  %v7886_v3 = vld [vmem:[%s8162_s22 + $0xde8] ss:$16 sps:$4 sm:$0xff]  }
 0x270   : > { %v5435_v20 = vpop.f32.mrb[23].mxu1  ;;  %5736 = vmatprep.subr.bf16.mxu1 %v7837_v4  ;;  %v5433_v25 = vadd.f32 %v5432_v11, %v5392_v15  ;;  %v7891_v2 = vld [vmem:[%s8162_s22 + $0xfec] ss:$16 sps:$4 sm:$0xff]   ;;  %v7889_v4 = vld [vmem:[%s8162_s22 + $0xfe8] ss:$16 sps:$4 sm:$0xff]  }
 0x271   : > { %v5929_v26 = vadd.f32 %v5431_v18, %v237_v14  ;;  %v7897_v6 = vld [vmem:[%s8162_s22 + $0x120c] ss:$16 sps:$4 sm:$0xff]   ;;  %v7892_v9 = vld [vmem:[%s8162_s22 + $0x1008] ss:$16 sps:$4 sm:$0xff]  }
 0x272   : > { %v5930_v22 = vadd.f32 %v5433_v25, %v238_v29  ;;  %5696 = vmatpush1.bf16.msra.mxu0 %v7832_v12  ;;  %v7900_v11 = vld [vmem:[%s8162_s22 + $0x102c] ss:$16 sps:$4 sm:$0xff]   ;;  %v7898_v14 = vld [vmem:[%s8162_s22 + $0x1028] ss:$16 sps:$4 sm:$0xff]  }
 0x273   : > { %5737 = vmatpush1.bf16.msra.mxu1 %v7835_v62  ;;  %5933 = vst [vmem:[%s9215_s2] sm:$0xff] %v5929_v26  ;;  %5697 = vmatprep.subr.bf16.mxu0 %v7840_v21  ;;  %v7903_v12 = vld [vmem:[%s8162_s22 + $0x122c] ss:$16 sps:$4 sm:$0xff]   ;;  %v7901_v15 = vld [vmem:[%s8162_s22 + $0x1228] ss:$16 sps:$4 sm:$0xff]  }
 0x274   : > { %5738 = vmatprep.subr.bf16.mxu1 %v7843_v58  ;;  %5934 = vst [vmem:[%s9215_s2 + $0x8] sm:$0xff] %v5930_v22  ;;  %v7906_v29 = vld [vmem:[%s8162_s22 + $0x104c] ss:$16 sps:$4 sm:$0xff]   ;;  %v7910_v18 = vld [vmem:[%s8162_s22 + $0x1068] ss:$16 sps:$4 sm:$0xff]  }
 0x275   : > { %v7909_v34 = vld [vmem:[%s8162_s22 + $0x124c] ss:$16 sps:$4 sm:$0xff]   ;;  %v7916_v20 = vld [vmem:[%s8162_s22 + $0x1088] ss:$16 sps:$4 sm:$0xff]  }
 0x276   : > { %5698 = vmatpush1.bf16.msra.mxu0 %v7838_v27  ;;  %v7912_v17 = vld [vmem:[%s8162_s22 + $0x106c] ss:$16 sps:$4 sm:$0xff]   ;;  %v7919_v21 = vld [vmem:[%s8162_s22 + $0x1288] ss:$16 sps:$4 sm:$0xff]  }
 0x277   : > { %5739 = vmatpush1.bf16.msra.mxu1 %v7841_v28  ;;  %5699 = vmatprep.subr.bf16.mxu0 %v7846_v30  ;;  %v7915_v62 = vld [vmem:[%s8162_s22 + $0x126c] ss:$16 sps:$4 sm:$0xff]   ;;  %v7922_v26 = vld [vmem:[%s8162_s22 + $0x10a8] ss:$16 sps:$4 sm:$0xff]  }
 0x278   : > { %5740 = vmatprep.subr.bf16.mxu1 %v7849_v31  ;;  %v7921_v19 = vld [vmem:[%s8162_s22 + $0x128c] ss:$16 sps:$4 sm:$0xff]   ;;  %v7925_v22 = vld [vmem:[%s8162_s22 + $0x12a8] ss:$16 sps:$4 sm:$0xff]  }
 0x279   : > { %v7924_v58 = vld [vmem:[%s8162_s22 + $0x10ac] ss:$16 sps:$4 sm:$0xff]  }
 0x27a   : > { %5700 = vmatpush1.bf16.msra.mxu0 %v7844_v33  ;;  %v7927_v25 = vld [vmem:[%s8162_s22 + $0x12ac] ss:$16 sps:$4 sm:$0xff]  }
 0x27b   : > { %5741 = vmatpush1.bf16.msra.mxu1 %v7847_v32  ;;  %5701 = vmatprep.subr.bf16.mxu0 %v7852_v47  ;;  %v7930_v27 = vld [vmem:[%s8162_s22 + $0x10cc] ss:$16 sps:$4 sm:$0xff]  }
 0x27c   : > { %5742 = vmatprep.subr.bf16.mxu1 %v7855_v36  ;;  %v7933_v28 = vld [vmem:[%s8162_s22 + $0x12cc] ss:$16 sps:$4 sm:$0xff]  }
 0x27e   : > { %5702 = vmatpush1.bf16.msra.mxu0 %v7850_v35 }
 0x27f   : > { %5743 = vmatpush1.bf16.msra.mxu1 %v7853_v43  ;;  %5703 = vmatprep.subr.bf16.mxu0 %v7858_v7  ;;  %v7928_v7 = vld [vmem:[%s8162_s22 + $0x10c8] ss:$16 sps:$4 sm:$0xff]  }
 0x280   : > { %5744 = vmatprep.subr.bf16.mxu1 %v7861_v8  ;;  %v7931_v8 = vld [vmem:[%s8162_s22 + $0x12c8] ss:$16 sps:$4 sm:$0xff]  }
 0x282   : > { %5704 = vmatpush1.bf16.msra.mxu0 %v7856_v53 }
 0x283   : > { %5745 = vmatpush1.bf16.msra.mxu1 %v7859_v54  ;;  %5705 = vmatprep.subr.bf16.mxu0 %v7864_v45  ;;  %v7936_v45 = vld [vmem:[%s8162_s22 + $0x10ec] ss:$16 sps:$4 sm:$0xff]  }
 0x284   : > { %5746 = vmatprep.subr.bf16.mxu1 %v7867_v37  ;;  %v7939_v37 = vld [vmem:[%s8162_s22 + $0x12ec] ss:$16 sps:$4 sm:$0xff]  }
 0x286   : > { %5706 = vmatpush1.bf16.msra.mxu0 %v7862_v38  ;;  %v7934_v38 = vld [vmem:[%s8162_s22 + $0x10e8] ss:$16 sps:$4 sm:$0xff]  }
 0x287   : > { %5747 = vmatpush1.bf16.msra.mxu1 %v7865_v46  ;;  %5707 = vmatprep.subr.bf16.mxu0 %v7870_v39  ;;  %v7937_v46 = vld [vmem:[%s8162_s22 + $0x12e8] ss:$16 sps:$4 sm:$0xff]   ;;  %v7942_v39 = vld [vmem:[%s8162_s22 + $0x110c] ss:$16 sps:$4 sm:$0xff]  }
 0x288   : > { %5748 = vmatprep.subr.bf16.mxu1 %v7873_v40  ;;  %v7945_v40 = vld [vmem:[%s8162_s22 + $0x130c] ss:$16 sps:$4 sm:$0xff]  }
 0x28a   : > { %5708 = vmatpush1.bf16.msra.mxu0 %v7868_v56  ;;  %v7940_v56 = vld [vmem:[%s8162_s22 + $0x1108] ss:$16 sps:$4 sm:$0xff]  }
 0x28b   : > { %5749 = vmatpush1.bf16.msra.mxu1 %v7871_v57  ;;  %5709 = vmatprep.subr.bf16.mxu0 %v7876_v13  ;;  %v7943_v57 = vld [vmem:[%s8162_s22 + $0x1308] ss:$16 sps:$4 sm:$0xff]   ;;  %v7948_v13 = vld [vmem:[%s8162_s22 + $0x112c] ss:$16 sps:$4 sm:$0xff]  }
 0x28c   : > { %5750 = vmatprep.subr.bf16.mxu1 %v7879_v23  ;;  %v7951_v23 = vld [vmem:[%s8162_s22 + $0x132c] ss:$16 sps:$4 sm:$0xff]  }
 0x28e   : > { %5710 = vmatpush1.bf16.msra.mxu0 %v7874_v24  ;;  %v7946_v24 = vld [vmem:[%s8162_s22 + $0x1128] ss:$16 sps:$4 sm:$0xff]  }
 0x28f   : > { %5751 = vmatpush1.bf16.msra.mxu1 %v7877_v16  ;;  %5711 = vmatprep.subr.bf16.mxu0 %v7882_v63  ;;  %v7949_v16 = vld [vmem:[%s8162_s22 + $0x1328] ss:$16 sps:$4 sm:$0xff]   ;;  %v7954_v63 = vld [vmem:[%s8162_s22 + $0x114c] ss:$16 sps:$4 sm:$0xff]  }
 0x290   : > { %5752 = vmatprep.subr.bf16.mxu1 %v7885_v0  ;;  %v7957_v0 = vld [vmem:[%s8162_s22 + $0x134c] ss:$16 sps:$4 sm:$0xff]  }
 0x292   : > { %5712 = vmatpush1.bf16.msra.mxu0 %v7880_v48  ;;  %v7952_v48 = vld [vmem:[%s8162_s22 + $0x1148] ss:$16 sps:$4 sm:$0xff]  }
 0x293   : > { %5753 = vmatpush1.bf16.msra.mxu1 %v7883_v1  ;;  %5713 = vmatprep.subr.bf16.mxu0 %v7888_v52  ;;  %v7955_v1 = vld [vmem:[%s8162_s22 + $0x1348] ss:$16 sps:$4 sm:$0xff]   ;;  %v7960_v52 = vld [vmem:[%s8162_s22 + $0x116c] ss:$16 sps:$4 sm:$0xff]  }
 0x294   : > { %5754 = vmatprep.subr.bf16.mxu1 %v7891_v2  ;;  %v7963_v2 = vld [vmem:[%s8162_s22 + $0x136c] ss:$16 sps:$4 sm:$0xff]  }
 0x296   : > { %5714 = vmatpush1.bf16.msra.mxu0 %v7886_v3  ;;  %v7958_v3 = vld [vmem:[%s8162_s22 + $0x1168] ss:$16 sps:$4 sm:$0xff]  }
 0x297   : > { %5755 = vmatpush1.bf16.msra.mxu1 %v7889_v4  ;;  %5765 = vmatprep.subr.bf16.mxu0 %v7894_v5  ;;  %v7961_v4 = vld [vmem:[%s8162_s22 + $0x1368] ss:$16 sps:$4 sm:$0xff]   ;;  %v7966_v5 = vld [vmem:[%s8162_s22 + $0x118c] ss:$16 sps:$4 sm:$0xff]  }
 0x298   : > { %5806 = vmatprep.subr.bf16.mxu1 %v7897_v6  ;;  %v7969_v6 = vld [vmem:[%s8162_s22 + $0x138c] ss:$16 sps:$4 sm:$0xff]  }
 0x299   : > { %5716 = vmatmul.mubr.bf16.vlgmr.msra.gmra.mrb[36].mxu0 %v8522_v60  ;;  %v7904_v60 = vld [vmem:[%s8162_s22 + $0x1048] ss:$16 sps:$4 sm:$0xff]  }
 0x29a   : > { %5757 = vmatmul.mubr.bf16.vlgmr.msra.gmra.mrb[36].mxu1 %v8526_v61  ;;  %5766 = vmatpush1.bf16.msra.mxu0 %v7892_v9  ;;  %v7907_v61 = vld [vmem:[%s8162_s22 + $0x1248] ss:$16 sps:$4 sm:$0xff]  }
 0x29b   : > { %5807 = vmatpush1.bf16.msra.mxu1 %v7895_v10  ;;  %5767 = vmatprep.subr.bf16.mxu0 %v7900_v11  ;;  %v7964_v9 = vld [vmem:[%s8162_s22 + $0x1188] ss:$16 sps:$4 sm:$0xff]   ;;  %v7972_v11 = vld [vmem:[%s8162_s22 + $0x11ac] ss:$16 sps:$4 sm:$0xff]  }
 0x29c   : > { %5808 = vmatprep.subr.bf16.mxu1 %v7903_v12  ;;  %5797 = vmatprep.mubr.bf16.mxu0 %v8537_v41  ;;  %v7913_v41 = vld [vmem:[%s8162_s22 + $0x1268] ss:$16 sps:$4 sm:$0xff]   ;;  %v7975_v12 = vld [vmem:[%s8162_s22 + $0x13ac] ss:$16 sps:$4 sm:$0xff]  }
 0x29d   : > { %5838 = vmatprep.mubr.bf16.mxu1 %v8541_v42  ;;  %v7918_v42 = vld [vmem:[%s8162_s22 + $0x108c] ss:$16 sps:$4 sm:$0xff]   ;;  %v7967_v10 = vld [vmem:[%s8162_s22 + $0x1388] ss:$16 sps:$4 sm:$0xff]  }
 0x29e   : > { %5768 = vmatpush1.bf16.msra.mxu0 %v7898_v14  ;;  %v7970_v14 = vld [vmem:[%s8162_s22 + $0x11a8] ss:$16 sps:$4 sm:$0xff]  }
 0x29f   : > { %5809 = vmatpush1.bf16.msra.mxu1 %v7901_v15  ;;  %5769 = vmatprep.subr.bf16.mxu0 %v7906_v29  ;;  %v7973_v15 = vld [vmem:[%s8162_s22 + $0x13a8] ss:$16 sps:$4 sm:$0xff]   ;;  %v7978_v29 = vld [vmem:[%s8162_s22 + $0x11cc] ss:$16 sps:$4 sm:$0xff]  }
 0x2a0   : > { %5810 = vmatprep.subr.bf16.mxu1 %v7909_v34  ;;  %v7981_v34 = vld [vmem:[%s8162_s22 + $0x13cc] ss:$16 sps:$4 sm:$0xff]  }
 0x2a2   : > { %5770 = vmatpush1.bf16.msra.mxu0 %v7904_v60  ;;  %v7976_v60 = vld [vmem:[%s8162_s22 + $0x11c8] ss:$16 sps:$4 sm:$0xff]  }
 0x2a3   : > { %5811 = vmatpush1.bf16.msra.mxu1 %v7907_v61  ;;  %5771 = vmatprep.subr.bf16.mxu0 %v7912_v17  ;;  %v7979_v61 = vld [vmem:[%s8162_s22 + $0x13c8] ss:$16 sps:$4 sm:$0xff]   ;;  %v7984_v17 = vld [vmem:[%s8162_s22 + $0x11ec] ss:$16 sps:$4 sm:$0xff]  }
 0x2a4   : > { %5812 = vmatprep.subr.bf16.mxu1 %v7915_v62  ;;  %v7987_v62 = vld [vmem:[%s8162_s22 + $0x13ec] ss:$16 sps:$4 sm:$0xff]  }
 0x2a6   : > { %5772 = vmatpush1.bf16.msra.mxu0 %v7910_v18  ;;  %v7982_v18 = vld [vmem:[%s8162_s22 + $0x11e8] ss:$16 sps:$4 sm:$0xff]  }
 0x2a7   : > { %5813 = vmatpush1.bf16.msra.mxu1 %v7913_v41  ;;  %5773 = vmatprep.subr.bf16.mxu0 %v7918_v42  ;;  %v7985_v41 = vld [vmem:[%s8162_s22 + $0x13e8] ss:$16 sps:$4 sm:$0xff]   ;;  %v7990_v42 = vld [vmem:[%s8162_s22 + $0x140c] ss:$16 sps:$4 sm:$0xff]  }
 0x2a8   : > { %5814 = vmatprep.subr.bf16.mxu1 %v7921_v19  ;;  %v7993_v19 = vld [vmem:[%s8162_s22 + $0x160c] ss:$16 sps:$4 sm:$0xff]  }
 0x2aa   : > { %5774 = vmatpush1.bf16.msra.mxu0 %v7916_v20  ;;  %v7988_v20 = vld [vmem:[%s8162_s22 + $0x1408] ss:$16 sps:$4 sm:$0xff]  }
 0x2ab   : > { %5815 = vmatpush1.bf16.msra.mxu1 %v7919_v21  ;;  %5775 = vmatprep.subr.bf16.mxu0 %v7924_v58  ;;  %v7991_v21 = vld [vmem:[%s8162_s22 + $0x1608] ss:$16 sps:$4 sm:$0xff]   ;;  %v7996_v58 = vld [vmem:[%s8162_s22 + $0x142c] ss:$16 sps:$4 sm:$0xff]  }
 0x2ac   : > { %5816 = vmatprep.subr.bf16.mxu1 %v7927_v25  ;;  %v5471_v30 = vpop.f32.mrb[24].mxu0  ;;  %v7999_v25 = vld [vmem:[%s8162_s22 + $0x162c] ss:$16 sps:$4 sm:$0xff]  }
 0x2ad   : > { %v5512_v31 = vpop.f32.mrb[24].mxu1  ;;  %v5473_v32 = vpop.f32.mrb[25].mxu0 }
 0x2ae   : > { %v9047_v33 = vadd.f32 %v5512_v31, %v5471_v30  ;;  %v5514_v47 = vpop.f32.mrb[25].mxu1  ;;  %v5475_v35 = vpop.f32.mrb[26].mxu0  ;;  %5776 = vmatpush1.bf16.msra.mxu0 %v7922_v26  ;;  %v7994_v26 = vld [vmem:[%s8162_s22 + $0x1428] ss:$16 sps:$4 sm:$0xff]   ;;  %v8008_v30 = vld [vmem:[%s8162_s22 + $0x146c] ss:$16 sps:$4 sm:$0xff]  }
 0x2af   : > { %v9049_v36 = vadd.f32 %v5514_v47, %v5473_v32  ;;  %v5516_v43 = vpop.f32.mrb[26].mxu1  ;;  %5817 = vmatpush1.bf16.msra.mxu1 %v7925_v22  ;;  %v5476_v53 = vpop.f32.mrb[27].mxu0  ;;  %5777 = vmatprep.subr.bf16.mxu0 %v7930_v27  ;;  %v7997_v22 = vld [vmem:[%s8162_s22 + $0x1628] ss:$16 sps:$4 sm:$0xff]   ;;  %v8002_v27 = vld [vmem:[%s8162_s22 + $0x144c] ss:$16 sps:$4 sm:$0xff]  }
 0x2b0   : > { %v5517_v54 = vpop.f32.mrb[27].mxu1  ;;  %5818 = vmatprep.subr.bf16.mxu1 %v7933_v28  ;;  %v8005_v28 = vld [vmem:[%s8162_s22 + $0x164c] ss:$16 sps:$4 sm:$0xff]   ;;  %v8006_v32 = vld [vmem:[%s8162_s22 + $0x1468] ss:$16 sps:$4 sm:$0xff]  }
 0x2b1   : > { %v8011_v31 = vld [vmem:[%s8162_s22 + $0x166c] ss:$16 sps:$4 sm:$0xff]   ;;  %v8012_v35 = vld [vmem:[%s8162_s22 + $0x1488] ss:$16 sps:$4 sm:$0xff]  }
 0x2b2   : > { %5778 = vmatpush1.bf16.msra.mxu0 %v7928_v7  ;;  %v8017_v47 = vld [vmem:[%s8162_s22 + $0x168c] ss:$16 sps:$4 sm:$0xff]   ;;  %v8015_v43 = vld [vmem:[%s8162_s22 + $0x1688] ss:$16 sps:$4 sm:$0xff]  }
 0x2b3   : > { %5819 = vmatpush1.bf16.msra.mxu1 %v7931_v8  ;;  %5779 = vmatprep.subr.bf16.mxu0 %v7936_v45  ;;  %v8020_v7 = vld [vmem:[%s8162_s22 + $0x14ac] ss:$16 sps:$4 sm:$0xff]   ;;  %v8018_v53 = vld [vmem:[%s8162_s22 + $0x14a8] ss:$16 sps:$4 sm:$0xff]  }
 0x2b4   : > { %5820 = vmatprep.subr.bf16.mxu1 %v7939_v37  ;;  %v8023_v8 = vld [vmem:[%s8162_s22 + $0x16ac] ss:$16 sps:$4 sm:$0xff]   ;;  %v8021_v54 = vld [vmem:[%s8162_s22 + $0x16a8] ss:$16 sps:$4 sm:$0xff]  }
 0x2b5   : > { %v8026_v45 = vld [vmem:[%s8162_s22 + $0x14cc] ss:$16 sps:$4 sm:$0xff]  }
 0x2b6   : > { %5780 = vmatpush1.bf16.msra.mxu0 %v7934_v38  ;;  %v8029_v37 = vld [vmem:[%s8162_s22 + $0x16cc] ss:$16 sps:$4 sm:$0xff]  }
 0x2b7   : > { %5821 = vmatpush1.bf16.msra.mxu1 %v7937_v46  ;;  %5781 = vmatprep.subr.bf16.mxu0 %v7942_v39 }
 0x2b8   : > { %5822 = vmatprep.subr.bf16.mxu1 %v7945_v40 }
 0x2ba   : > { %5782 = vmatpush1.bf16.msra.mxu0 %v7940_v56 }
 0x2bb   : > { %5823 = vmatpush1.bf16.msra.mxu1 %v7943_v57  ;;  %5783 = vmatprep.subr.bf16.mxu0 %v7948_v13 }
 0x2bc   : > { %5824 = vmatprep.subr.bf16.mxu1 %v7951_v23 }
 0x2be   : > { %5784 = vmatpush1.bf16.msra.mxu0 %v7946_v24  ;;  %v8024_v24 = vld [vmem:[%s8162_s22 + $0x14c8] ss:$16 sps:$4 sm:$0xff]  }
 0x2bf   : > { %5825 = vmatpush1.bf16.msra.mxu1 %v7949_v16  ;;  %5785 = vmatprep.subr.bf16.mxu0 %v7954_v63  ;;  %v8027_v16 = vld [vmem:[%s8162_s22 + $0x16c8] ss:$16 sps:$4 sm:$0xff]  }
 0x2c0   : > { %5826 = vmatprep.subr.bf16.mxu1 %v7957_v0 }
 0x2c2   : > { %5786 = vmatpush1.bf16.msra.mxu0 %v7952_v48 }
 0x2c3   : > { %5827 = vmatpush1.bf16.msra.mxu1 %v7955_v1  ;;  %5787 = vmatprep.subr.bf16.mxu0 %v7960_v52  ;;  %v8030_v52 = vld [vmem:[%s8162_s22 + $0x14e8] ss:$16 sps:$4 sm:$0xff]  }
 0x2c4   : > { %5828 = vmatprep.subr.bf16.mxu1 %v7963_v2  ;;  %v8033_v2 = vld [vmem:[%s8162_s22 + $0x16e8] ss:$16 sps:$4 sm:$0xff]  }
 0x2c6   : > { %5788 = vmatpush1.bf16.msra.mxu0 %v7958_v3  ;;  %v8038_v3 = vld [vmem:[%s8162_s22 + $0x150c] ss:$16 sps:$4 sm:$0xff]  }
 0x2c7   : > { %5829 = vmatpush1.bf16.msra.mxu1 %v7961_v4  ;;  %5789 = vmatprep.subr.bf16.mxu0 %v7966_v5  ;;  %v8041_v4 = vld [vmem:[%s8162_s22 + $0x170c] ss:$16 sps:$4 sm:$0xff]   ;;  %v8036_v5 = vld [vmem:[%s8162_s22 + $0x1508] ss:$16 sps:$4 sm:$0xff]  }
 0x2c8   : > { %5830 = vmatprep.subr.bf16.mxu1 %v7969_v6  ;;  %v8039_v6 = vld [vmem:[%s8162_s22 + $0x1708] ss:$16 sps:$4 sm:$0xff]  }
 0x2ca   : > { %5790 = vmatpush1.bf16.msra.mxu0 %v7964_v9  ;;  %v8044_v9 = vld [vmem:[%s8162_s22 + $0x152c] ss:$16 sps:$4 sm:$0xff]  }
 0x2cb   : > { %5831 = vmatpush1.bf16.msra.mxu1 %v7967_v10  ;;  %5791 = vmatprep.subr.bf16.mxu0 %v7972_v11  ;;  %v8047_v10 = vld [vmem:[%s8162_s22 + $0x172c] ss:$16 sps:$4 sm:$0xff]   ;;  %v8042_v11 = vld [vmem:[%s8162_s22 + $0x1528] ss:$16 sps:$4 sm:$0xff]  }
 0x2cc   : > { %5832 = vmatprep.subr.bf16.mxu1 %v7975_v12  ;;  %v8045_v12 = vld [vmem:[%s8162_s22 + $0x1728] ss:$16 sps:$4 sm:$0xff]  }
 0x2ce   : > { %5792 = vmatpush1.bf16.msra.mxu0 %v7970_v14  ;;  %v8050_v14 = vld [vmem:[%s8162_s22 + $0x154c] ss:$16 sps:$4 sm:$0xff]  }
 0x2cf   : > { %5833 = vmatpush1.bf16.msra.mxu1 %v7973_v15  ;;  %5793 = vmatprep.subr.bf16.mxu0 %v7978_v29  ;;  %v8053_v15 = vld [vmem:[%s8162_s22 + $0x174c] ss:$16 sps:$4 sm:$0xff]   ;;  %v8048_v29 = vld [vmem:[%s8162_s22 + $0x1548] ss:$16 sps:$4 sm:$0xff]  }
 0x2d0   : > { %5834 = vmatprep.subr.bf16.mxu1 %v7981_v34  ;;  %v8051_v34 = vld [vmem:[%s8162_s22 + $0x1748] ss:$16 sps:$4 sm:$0xff]  }
 0x2d2   : > { %5794 = vmatpush1.bf16.msra.mxu0 %v7976_v60  ;;  %v8056_v60 = vld [vmem:[%s8162_s22 + $0x156c] ss:$16 sps:$4 sm:$0xff]  }
 0x2d3   : > { %5835 = vmatpush1.bf16.msra.mxu1 %v7979_v61  ;;  %5795 = vmatprep.subr.bf16.mxu0 %v7984_v17  ;;  %v8059_v61 = vld [vmem:[%s8162_s22 + $0x176c] ss:$16 sps:$4 sm:$0xff]   ;;  %v8054_v17 = vld [vmem:[%s8162_s22 + $0x1568] ss:$16 sps:$4 sm:$0xff]  }
 0x2d4   : > { %5836 = vmatprep.subr.bf16.mxu1 %v7987_v62  ;;  %v8057_v62 = vld [vmem:[%s8162_s22 + $0x1768] ss:$16 sps:$4 sm:$0xff]  }
 0x2d6   : > { %5796 = vmatpush1.bf16.msra.mxu0 %v7982_v18  ;;  %v8062_v18 = vld [vmem:[%s8162_s22 + $0x158c] ss:$16 sps:$4 sm:$0xff]  }
 0x2d7   : > { %5837 = vmatpush1.bf16.msra.mxu1 %v7985_v41  ;;  %5847 = vmatprep.subr.bf16.mxu0 %v7990_v42  ;;  %v8065_v41 = vld [vmem:[%s8162_s22 + $0x178c] ss:$16 sps:$4 sm:$0xff]   ;;  %v8060_v42 = vld [vmem:[%s8162_s22 + $0x1588] ss:$16 sps:$4 sm:$0xff]  }
 0x2d8   : > { %5888 = vmatprep.subr.bf16.mxu1 %v7993_v19  ;;  %v8063_v19 = vld [vmem:[%s8162_s22 + $0x1788] ss:$16 sps:$4 sm:$0xff]  }
 0x2d9   : > { %5798 = vmatmul.mubr.bf16.vlgmr.msra.gmra.mrb[40].mxu0 %v8621_v50  ;;  %v8000_v50 = vld [vmem:[%s8162_s22 + $0x1448] ss:$16 sps:$4 sm:$0xff]  }
 0x2da   : > { %5839 = vmatmul.mubr.bf16.vlgmr.msra.gmra.mrb[40].mxu1 %v8625_v51  ;;  %5848 = vmatpush1.bf16.msra.mxu0 %v7988_v20  ;;  %v8003_v51 = vld [vmem:[%s8162_s22 + $0x1648] ss:$16 sps:$4 sm:$0xff]   ;;  %v8068_v20 = vld [vmem:[%s8162_s22 + $0x15ac] ss:$16 sps:$4 sm:$0xff]  }
 0x2db   : > { %5889 = vmatpush1.bf16.msra.mxu1 %v7991_v21  ;;  %5849 = vmatprep.subr.bf16.mxu0 %v7996_v58  ;;  %v8071_v21 = vld [vmem:[%s8162_s22 + $0x17ac] ss:$16 sps:$4 sm:$0xff]   ;;  %v8066_v58 = vld [vmem:[%s8162_s22 + $0x15a8] ss:$16 sps:$4 sm:$0xff]  }
 0x2dc   : > { %5890 = vmatprep.subr.bf16.mxu1 %v7999_v25  ;;  %5879 = vmatprep.mubr.bf16.mxu0 %v8631_v55  ;;  %v8009_v55 = vld [vmem:[%s8162_s22 + $0x1668] ss:$16 sps:$4 sm:$0xff]  }
 0x2dd   : > { %5920 = vmatprep.mubr.bf16.mxu1 %v8635_v59  ;;  %v8014_v59 = vld [vmem:[%s8162_s22 + $0x148c] ss:$16 sps:$4 sm:$0xff]   ;;  %v8069_v25 = vld [vmem:[%s8162_s22 + $0x17a8] ss:$16 sps:$4 sm:$0xff]  }
 0x2de   : > { %5850 = vmatpush1.bf16.msra.mxu0 %v7994_v26  ;;  %v8074_v26 = vld [vmem:[%s8162_s22 + $0x15cc] ss:$16 sps:$4 sm:$0xff]  }
 0x2df   : > { %5891 = vmatpush1.bf16.msra.mxu1 %v7997_v22  ;;  %5851 = vmatprep.subr.bf16.mxu0 %v8002_v27  ;;  %v8077_v22 = vld [vmem:[%s8162_s22 + $0x17cc] ss:$16 sps:$4 sm:$0xff]   ;;  %v8072_v27 = vld [vmem:[%s8162_s22 + $0x15c8] ss:$16 sps:$4 sm:$0xff]  }
 0x2e0   : > { %5892 = vmatprep.subr.bf16.mxu1 %v8005_v28  ;;  %v8075_v28 = vld [vmem:[%s8162_s22 + $0x17c8] ss:$16 sps:$4 sm:$0xff]  }
 0x2e2   : > { %5852 = vmatpush1.bf16.msra.mxu0 %v8000_v50  ;;  %v8080_v50 = vld [vmem:[%s8162_s22 + $0x15ec] ss:$16 sps:$4 sm:$0xff]  }
 0x2e3   : > { %5893 = vmatpush1.bf16.msra.mxu1 %v8003_v51  ;;  %5853 = vmatprep.subr.bf16.mxu0 %v8008_v30  ;;  %v8083_v51 = vld [vmem:[%s8162_s22 + $0x17ec] ss:$16 sps:$4 sm:$0xff]   ;;  %v8078_v30 = vld [vmem:[%s8162_s22 + $0x15e8] ss:$16 sps:$4 sm:$0xff]  }
 0x2e4   : > { %5894 = vmatprep.subr.bf16.mxu1 %v8011_v31  ;;  %v8081_v31 = vld [vmem:[%s8162_s22 + $0x17e8] ss:$16 sps:$4 sm:$0xff]  }
 0x2e6   : > { %5854 = vmatpush1.bf16.msra.mxu0 %v8006_v32 }
 0x2e7   : > { %5895 = vmatpush1.bf16.msra.mxu1 %v8009_v55  ;;  %5855 = vmatprep.subr.bf16.mxu0 %v8014_v59 }
 0x2e8   : > { %5896 = vmatprep.subr.bf16.mxu1 %v8017_v47 }
 0x2ea   : > { %5856 = vmatpush1.bf16.msra.mxu0 %v8012_v35 }
 0x2eb   : > { %5897 = vmatpush1.bf16.msra.mxu1 %v8015_v43  ;;  %5857 = vmatprep.subr.bf16.mxu0 %v8020_v7 }
 0x2ec   : > { %5898 = vmatprep.subr.bf16.mxu1 %v8023_v8  ;;  %v5553_v38 = vpop.f32.mrb[28].mxu0 }
 0x2ed   : > { %v5594_v46 = vpop.f32.mrb[28].mxu1  ;;  %v5554_v39 = vadd.f32 %v5553_v38, %v9047_v33  ;;  %v5555_v40 = vpop.f32.mrb[29].mxu0  ;;  %v8032_v33 = vld [vmem:[%s8162_s22 + $0x14ec] ss:$16 sps:$4 sm:$0xff]  }
 0x2ee   : > { %v5596_v56 = vpop.f32.mrb[29].mxu1  ;;  %v5556_v57 = vadd.f32 %v5555_v40, %v9049_v36  ;;  %v5557_v13 = vpop.f32.mrb[30].mxu0  ;;  %5858 = vmatpush1.bf16.msra.mxu0 %v8018_v53  ;;  %v8035_v36 = vld [vmem:[%s8162_s22 + $0x16ec] ss:$16 sps:$4 sm:$0xff]  }
 0x2ef   : > { %v5598_v23 = vpop.f32.mrb[30].mxu1  ;;  %5899 = vmatpush1.bf16.msra.mxu1 %v8021_v54  ;;  %v9123_v63 = vadd.f32 %v5594_v46, %v5554_v39  ;;  %v5558_v0 = vpop.f32.mrb[31].mxu0  ;;  %5859 = vmatprep.subr.bf16.mxu0 %v8026_v45 }
 0x2f0   : > { %v5599_v48 = vpop.f32.mrb[31].mxu1  ;;  %5900 = vmatprep.subr.bf16.mxu1 %v8029_v37  ;;  %v9127_v1 = vadd.f32 %v5596_v56, %v5556_v57 }
 0x2f2   : > { %5860 = vmatpush1.bf16.msra.mxu0 %v8024_v24 }
 0x2f3   : > { %5901 = vmatpush1.bf16.msra.mxu1 %v8027_v16  ;;  %5861 = vmatprep.subr.bf16.mxu0 %v8032_v33 }
 0x2f4   : > { %5902 = vmatprep.subr.bf16.mxu1 %v8035_v36 }
 0x2f6   : > { %5862 = vmatpush1.bf16.msra.mxu0 %v8030_v52 }
 0x2f7   : > { %5903 = vmatpush1.bf16.msra.mxu1 %v8033_v2  ;;  %5863 = vmatprep.subr.bf16.mxu0 %v8038_v3 }
 0x2f8   : > { %5904 = vmatprep.subr.bf16.mxu1 %v8041_v4 }
 0x2fa   : > { %5864 = vmatpush1.bf16.msra.mxu0 %v8036_v5 }
 0x2fb   : > { %5905 = vmatpush1.bf16.msra.mxu1 %v8039_v6  ;;  %5865 = vmatprep.subr.bf16.mxu0 %v8044_v9 }
 0x2fc   : > { %5906 = vmatprep.subr.bf16.mxu1 %v8047_v10 }
 0x2fe   : > { %5866 = vmatpush1.bf16.msra.mxu0 %v8042_v11 }
 0x2ff   : > { %5907 = vmatpush1.bf16.msra.mxu1 %v8045_v12  ;;  %5867 = vmatprep.subr.bf16.mxu0 %v8050_v14 }
 0x300   : > { %5908 = vmatprep.subr.bf16.mxu1 %v8053_v15  ;;  %v239_v15 = vld [vmem:[%s9215_s2 + $0x10] sm:$0xff] }
 0x302   : > { %5868 = vmatpush1.bf16.msra.mxu0 %v8048_v29 }
 0x303   : > { %5909 = vmatpush1.bf16.msra.mxu1 %v8051_v34  ;;  %5869 = vmatprep.subr.bf16.mxu0 %v8056_v60 }
 0x304   : > { %5910 = vmatprep.subr.bf16.mxu1 %v8059_v61 }
 0x306   : > { %5870 = vmatpush1.bf16.msra.mxu0 %v8054_v17  ;;  %v240_v17 = vld [vmem:[%s9215_s2 + $0x18] sm:$0xff] }
 0x307   : > { %5911 = vmatpush1.bf16.msra.mxu1 %v8057_v62  ;;  %5871 = vmatprep.subr.bf16.mxu0 %v8062_v18 }
 0x308   : > { %5912 = vmatprep.subr.bf16.mxu1 %v8065_v41 }
 0x30a   : > { %5872 = vmatpush1.bf16.msra.mxu0 %v8060_v42 }
 0x30b   : > { %5913 = vmatpush1.bf16.msra.mxu1 %v8063_v19  ;;  %5873 = vmatprep.subr.bf16.mxu0 %v8068_v20  ;;  %v5941_v20 = vld [vmem:[%s9215_s2] sm:$0xff] (!%p6877_p7) }
 0x30c   : > { %5914 = vmatprep.subr.bf16.mxu1 %v8071_v21  ;;  %v5942_v21 = vld [vmem:[%s9215_s2 + $0x8] sm:$0xff] (!%p6877_p7) }
 0x30e   : > { %5874 = vmatpush1.bf16.msra.mxu0 %v8066_v58 }
 0x30f   : > { %5915 = vmatpush1.bf16.msra.mxu1 %v8069_v25  ;;  %5875 = vmatprep.subr.bf16.mxu0 %v8074_v26  ;;  %v5949_v25 = vmul.f32 (!%p6877_p7), 0.70710677, %v5941_v20  ;;  %v5950_v26 = vmul.f32 (!%p6877_p7), 0.70710677, %v5942_v21 }
 0x310   : > { %5916 = vmatprep.subr.bf16.mxu1 %v8077_v22 }
 0x311   : > { %8084 = verf.f32 (!%p6877_p7), %v5949_v25 }
 0x312   : > { %5876 = vmatpush1.bf16.msra.mxu0 %v8072_v27  ;;  %8086 = verf.f32 (!%p6877_p7), %v5950_v26 }
 0x313   : > { %5917 = vmatpush1.bf16.msra.mxu1 %v8075_v28  ;;  %5877 = vmatprep.subr.bf16.mxu0 %v8080_v50  ;;  %v5945_v50 = vmul.f32 (!%p6877_p7), 0.5, %v5941_v20 }
 0x314   : > { %5918 = vmatprep.subr.bf16.mxu1 %v8083_v51 }
 0x316   : > { %5878 = vmatpush1.bf16.msra.mxu0 %v8078_v30  ;;  %v5946_v30 = vmul.f32 (!%p6877_p7), 0.5, %v5942_v21 }
 0x317   : > { %5919 = vmatpush1.bf16.msra.mxu1 %v8081_v31 }
 0x319   : > { %5880 = vmatmul.mubr.bf16.vlgmr.msra.gmra.mrb[44].mxu0 %v8711_v44 }
 0x31a   : > { %5921 = vmatmul.mubr.bf16.vlgmr.msra.gmra.mrb[44].mxu1 %v8715_v49 }
 0x31b   : > { %v8085_v51 = vpop.eup (!%p6877_p7), %8084 }
 0x31c   : > { %v8087_v31 = vpop.eup (!%p6877_p7), %8086 }
 0x32c   : > { %v5635_v32 = vpop.f32.mrb[32].mxu0 }
 0x32d   : > { %v5676_v55 = vpop.f32.mrb[32].mxu1  ;;  %v5636_v59 = vadd.f32 %v5635_v32, %v9123_v63  ;;  %v5637_v47 = vpop.f32.mrb[33].mxu0  ;;  %v5957_v32 = vadd.f32 (!%p6877_p7), 1.0, %v8085_v51 }
 0x32e   : > { %v5678_v35 = vpop.f32.mrb[33].mxu1  ;;  %v5638_v43 = vadd.f32 %v5637_v47, %v9127_v1  ;;  %v5639_v7 = vpop.f32.mrb[34].mxu0  ;;  %v5958_v47 = vadd.f32 (!%p6877_p7), 1.0, %v8087_v31 }
 0x32f   : > { %v5680_v8 = vpop.f32.mrb[34].mxu1  ;;  %v5677_v53 = vadd.f32 %v5676_v55, %v5636_v59  ;;  %v5640_v54 = vpop.f32.mrb[35].mxu0  ;;  %v5961_v7 = vmul.f32 (!%p6877_p7), %v5957_v32, %v5945_v50 }
 0x330   : > { %v5681_v45 = vpop.f32.mrb[35].mxu1  ;;  %v5679_v37 = vadd.f32 %v5678_v35, %v5638_v43 }
 0x331   : > { %5965 = vst [vmem:[%s9215_s2] sm:$0xff] (!%p6877_p7), %v5961_v7 }
 0x36c   : > { %v5717_v38 = vpop.f32.mrb[36].mxu0 }
 0x36d   : > { %v5758_v46 = vpop.f32.mrb[36].mxu1  ;;  %v5718_v39 = vadd.f32 %v5717_v38, %v5677_v53  ;;  %v5719_v44 = vpop.f32.mrb[37].mxu0  ;;  %v5962_v53 = vmul.f32 (!%p6877_p7), %v5958_v47, %v5946_v30 }
 0x36e   : > { %v5760_v40 = vpop.f32.mrb[37].mxu1  ;;  %v5720_v49 = vadd.f32 %v5719_v44, %v5679_v37  ;;  %v5721_v56 = vpop.f32.mrb[38].mxu0 }
 0x36f   : > { %v5762_v57 = vpop.f32.mrb[38].mxu1  ;;  %v5759_v13 = vadd.f32 %v5758_v46, %v5718_v39  ;;  %v5722_v23 = vpop.f32.mrb[39].mxu0  ;;  %5966 = vst [vmem:[%s9215_s2 + $0x8] sm:$0xff] (!%p6877_p7), %v5962_v53 }
 0x370   : > { %v5763_v24 = vpop.f32.mrb[39].mxu1  ;;  %v5761_v16 = vadd.f32 %v5760_v40, %v5720_v49 }
 0x3ac   : > { %v5799_v63 = vpop.f32.mrb[40].mxu0 }
 0x3ad   : > { %v5840_v0 = vpop.f32.mrb[40].mxu1  ;;  %v5800_v48 = vadd.f32 %v5799_v63, %v5759_v13  ;;  %v5801_v33 = vpop.f32.mrb[41].mxu0 }
 0x3ae   : > { %v5842_v36 = vpop.f32.mrb[41].mxu1  ;;  %v5802_v1 = vadd.f32 %v5801_v33, %v5761_v16  ;;  %v5803_v52 = vpop.f32.mrb[42].mxu0 }
 0x3af   : > { %v5844_v2 = vpop.f32.mrb[42].mxu1  ;;  %v5841_v3 = vadd.f32 %v5840_v0, %v5800_v48  ;;  %v5804_v4 = vpop.f32.mrb[43].mxu0 }
 0x3b0   : > { %v5845_v5 = vpop.f32.mrb[43].mxu1  ;;  %v5843_v6 = vadd.f32 %v5842_v36, %v5802_v1 }
 0x3ec   : > { %v5881_v9 = vpop.f32.mrb[44].mxu0 }
 0x3ed   : > { %v5922_v10 = vpop.f32.mrb[44].mxu1  ;;  %v5882_v11 = vadd.f32 %v5881_v9, %v5841_v3  ;;  %v5883_v12 = vpop.f32.mrb[45].mxu0 }
 0x3ee   : > { %v5924_v14 = vpop.f32.mrb[45].mxu1  ;;  %v5884_v29 = vadd.f32 %v5883_v12, %v5843_v6  ;;  %v5885_v34 = vpop.f32.mrb[46].mxu0  ;;  %5940 = sbr.rel (%p6877_p7) target bundleno = 1038 (0x40e), region = 36 }
 0x3ef   : > { %v5926_v60 = vpop.f32.mrb[46].mxu1  ;;  %v5923_v61 = vadd.f32 %v5922_v10, %v5882_v11  ;;  %v5886_v62 = vpop.f32.mrb[47].mxu0 }
 0x3f0   : > { %v5927_v18 = vpop.f32.mrb[47].mxu1  ;;  %v5925_v41 = vadd.f32 %v5924_v14, %v5884_v29 }
 0x3f1   : > { %v5931_v42 = vadd.f32 %v5923_v61, %v239_v15 }
 0x3f2   : > { %v5932_v19 = vadd.f32 %v5925_v41, %v240_v17 }
 0x3f3   : > { %5935 = vst [vmem:[%s9215_s2 + $0x10] sm:$0xff] %v5931_v42 }
 0x3f4   : > { %5936 = vst [vmem:[%s9215_s2 + $0x18] sm:$0xff] %v5932_v19 }
 0x3fa   : > { %v5943_v58 = vld [vmem:[%s9215_s2 + $0x10] sm:$0xff] }
 0x3fb   : > { %v5951_v22 = vmul.f32 0.70710677, %v5943_v58  ;;  %v5944_v27 = vld [vmem:[%s9215_s2 + $0x18] sm:$0xff]  ;;  %v5947_v55 = vmul.f32 0.5, %v5943_v58 }
 0x3fc   : > { %v5952_v28 = vmul.f32 0.70710677, %v5944_v27  ;;  %v5948_v35 = vmul.f32 0.5, %v5944_v27 }
 0x3fd   : > { %8088 = verf.f32 %v5951_v22 }
 0x3fe   : > { %8090 = verf.f32 %v5952_v28 }
 0x407   : > { %v8089_v59 = vpop.eup %8088 }
 0x408   : > { %v8091_v43 = vpop.eup %8090  ;;  %v5959_v8 = vadd.f32 1.0, %v8089_v59 }
 0x409   : > { %v5960_v54 = vadd.f32 1.0, %v8091_v43 }
 0x40a   : > { %v5963_v45 = vmul.f32 %v5959_v8, %v5947_v55 }
 0x40b   : > { %v5964_v37 = vmul.f32 %v5960_v54, %v5948_v35 }
 0x40c   : > { %5967 = vst [vmem:[%s9215_s2 + $0x10] sm:$0xff] %v5963_v45 }
 0x40d   : > { %5968 = vst [vmem:[%s9215_s2 + $0x18] sm:$0xff] %v5964_v37 }
 0x40e PF: > { %s12_s11 = sadd.s32 1, %s8114_s11   ;;  %s9216_s9 = smov %s8110_s10 }
 0x40f   : > { %p9_p8 = scmp.ge.s32.totalorder %s12_s11, 12   ;;  %s9217_s10 = smov %s9219_s12 }
 0x411   :  { %11 = sbr.rel (!%p9_p8) target bundleno = 2 (0x2), region = 69 }

</bundles_post_ra>
